<compile_context>
chip_gen: v7x
topology: tpu7x:2x2x1
jax: 0.10.0
libtpu: 0.0.40
codegen_flags: <defaults>
</compile_context>

<pallas_src>
import jax
import jax.numpy as jnp
from jax.experimental import pallas as pl
from jax.experimental.pallas import tpu as pltpu

STREAM_FEATS = 531               # per-stream logical output features
FUSED_FEATS = 2 * STREAM_FEATS   # 1062 (fusion Linear in/out features)

# Lane-dense padded dims used inside the kernel.
P_STREAM = 640                   # 5 * 128
P_FUSED = 1280                   # 10 * 128

TM_MAX = 128                     # max batch tile
TK_MAX = 2048                    # max reduction (d_in) tile
_K_ALIGN = 512                   # K padding granularity for small d_in


def _round_up(x, m):
    return (x + m - 1) // m * m


def _pad_k(d_in):
    """Padded d_in used for weight storage / kernel tiling."""
    if d_in <= TK_MAX:
        return _round_up(d_in, _K_ALIGN)
    return _round_up(d_in, TK_MAX)


def _pick_tm(batch):
    return min(TM_MAX, _round_up(max(batch, 1), 8))


# ---------------------------------------------------------------------------
# Kernel variant A: whole reduction fits in one K tile (n_k == 1).
# No accumulators, no pl.when; weights are grid-resident (constant index map).
# ---------------------------------------------------------------------------
def _two_stream_kernel_single(x1_ref, x2_ref,
                              w1_ref, b1_ref,
                              w2_ref, b2_ref,
                              wf1_ref, wf2_ref, bf_ref,
                              f1_ref, f2_ref, fuse_ref):
    x1 = x1_ref[...].astype(jnp.bfloat16)
    x2 = x2_ref[...].astype(jnp.bfloat16)
    f1 = jnp.dot(x1, w1_ref[...], preferred_element_type=jnp.float32) + b1_ref[...]
    f2 = jnp.dot(x2, w2_ref[...], preferred_element_type=jnp.float32) + b2_ref[...]
    f1_ref[...] = f1.astype(f1_ref.dtype)
    f2_ref[...] = f2.astype(f2_ref.dtype)
    # Fusion Linear(1062->1062) with the concat folded into a split matmul:
    #   concat([f1, f2], 1) @ Wf == f1 @ Wf[:531] + f2 @ Wf[531:]
    fuse = (jnp.dot(f1.astype(wf1_ref.dtype), wf1_ref[...],
                    preferred_element_type=jnp.float32)
            + jnp.dot(f2.astype(wf2_ref.dtype), wf2_ref[...],
                      preferred_element_type=jnp.float32)
            + bf_ref[...])
    fuse_ref[...] = fuse.astype(fuse_ref.dtype)


# ---------------------------------------------------------------------------
# Kernel variant B: large d_in -> grid over (batch tiles, K tiles) with an f32
# VMEM accumulator and pl.when init/finalize.
# ---------------------------------------------------------------------------
def _two_stream_kernel_acc(x1_ref, x2_ref,
                           w1_ref, b1_ref,
                           w2_ref, b2_ref,
                           wf1_ref, wf2_ref, bf_ref,
                           f1_ref, f2_ref, fuse_ref,
                           acc1_ref, acc2_ref):
    k = pl.program_id(1)

    @pl.when(k == 0)
    def _():
        acc1_ref[...] = jnp.zeros_like(acc1_ref)
        acc2_ref[...] = jnp.zeros_like(acc2_ref)

    x1 = x1_ref[...].astype(jnp.bfloat16)
    x2 = x2_ref[...].astype(jnp.bfloat16)
    acc1_ref[...] += jnp.dot(x1, w1_ref[...], preferred_element_type=jnp.float32)
    acc2_ref[...] += jnp.dot(x2, w2_ref[...], preferred_element_type=jnp.float32)

    @pl.when(k == pl.num_programs(1) - 1)
    def _():
        f1 = acc1_ref[...] + b1_ref[...]
        f2 = acc2_ref[...] + b2_ref[...]
        f1_ref[...] = f1.astype(f1_ref.dtype)
        f2_ref[...] = f2.astype(f2_ref.dtype)
        fuse = (jnp.dot(f1.astype(wf1_ref.dtype), wf1_ref[...],
                        preferred_element_type=jnp.float32)
                + jnp.dot(f2.astype(wf2_ref.dtype), wf2_ref[...],
                          preferred_element_type=jnp.float32)
                + bf_ref[...])
        fuse_ref[...] = fuse.astype(fuse_ref.dtype)


def two_stream_net(blurred_img, detailed_img, params):
    """Full forward pass in one pipelined Pallas kernel.

    blurred_img, detailed_img: (B, C, H, W) float32 (NCHW).
    params: padded / pre-split bf16 weights from init_params (biases f32).
    Returns (f1, f2, fusion) with logical shapes (B,531), (B,531), (B,1062).
    """
    B = blurred_img.shape[0]
    d_in = blurred_img.shape[1] * blurred_img.shape[2] * blurred_img.shape[3]
    d_in_p = params["w1"].shape[0]          # weights stored K-padded

    TM = _pick_tm(B)
    Bp = _round_up(B, TM)
    TK = min(d_in_p, TK_MAX)
    n_b = Bp // TM
    n_k = d_in_p // TK

    # Flatten only; keep the producer dtype (f32) — the bf16 cast happens
    # in-kernel on the VPU, saving a separate XLA cast pass over HBM.
    x1 = blurred_img.reshape(B, d_in)
    x2 = detailed_img.reshape(B, d_in)
    if (Bp, d_in_p) != (B, d_in):
        x1 = jnp.pad(x1, ((0, Bp - B), (0, d_in_p - d_in)))
        x2 = jnp.pad(x2, ((0, Bp - B), (0, d_in_p - d_in)))

    flops = 4 * Bp * d_in_p * P_STREAM + 4 * Bp * P_STREAM * P_FUSED
    stream_w_fetches = 1 if n_k == 1 else n_b   # resident when K axis collapses
    bytes_accessed = (
        2 * Bp * d_in_p * 4                                   # f32 inputs
        + stream_w_fetches * 2 * d_in_p * P_STREAM * 2        # bf16 stream weights
        + 2 * P_STREAM * P_FUSED * 2                          # bf16 fusion weights
        + (2 * P_STREAM + P_FUSED) * 4                        # f32 biases
        + (2 * Bp * P_STREAM + Bp * P_FUSED) * 4)             # f32 outputs

    out_shapes = (
        jax.ShapeDtypeStruct((Bp, P_STREAM), jnp.float32),
        jax.ShapeDtypeStruct((Bp, P_STREAM), jnp.float32),
        jax.ShapeDtypeStruct((Bp, P_FUSED), jnp.float32),
    )
    compiler_params = pltpu.CompilerParams(
        dimension_semantics=("parallel",) if n_k == 1 else ("parallel", "arbitrary"),
        vmem_limit_bytes=48 << 20)
    cost = pl.CostEstimate(flops=flops, transcendentals=0,
                           bytes_accessed=bytes_accessed)

    if n_k == 1:
        f1_p, f2_p, fuse_p = pl.pallas_call(
            _two_stream_kernel_single,
            out_shape=out_shapes,
            grid=(n_b,),
            in_specs=[
                pl.BlockSpec((TM, TK), lambda b: (b, 0)),               # x1 (f32)
                pl.BlockSpec((TM, TK), lambda b: (b, 0)),               # x2 (f32)
                pl.BlockSpec((TK, P_STREAM), lambda b: (0, 0)),         # w1
                pl.BlockSpec((1, P_STREAM), lambda b: (0, 0)),          # b1
                pl.BlockSpec((TK, P_STREAM), lambda b: (0, 0)),         # w2
                pl.BlockSpec((1, P_STREAM), lambda b: (0, 0)),          # b2
                pl.BlockSpec((P_STREAM, P_FUSED), lambda b: (0, 0)),    # wf1
                pl.BlockSpec((P_STREAM, P_FUSED), lambda b: (0, 0)),    # wf2
                pl.BlockSpec((1, P_FUSED), lambda b: (0, 0)),           # bf
            ],
            out_specs=(
                pl.BlockSpec((TM, P_STREAM), lambda b: (b, 0)),
                pl.BlockSpec((TM, P_STREAM), lambda b: (b, 0)),
                pl.BlockSpec((TM, P_FUSED), lambda b: (b, 0)),
            ),
            compiler_params=compiler_params,
            cost_estimate=cost,
        )(x1, x2,
          params["w1"], params["b1"],
          params["w2"], params["b2"],
          params["wf1"], params["wf2"], params["bf"])
    else:
        f1_p, f2_p, fuse_p = pl.pallas_call(
            _two_stream_kernel_acc,
            out_shape=out_shapes,
            grid=(n_b, n_k),
            in_specs=[
                pl.BlockSpec((TM, TK), lambda b, k: (b, k)),              # x1 (f32)
                pl.BlockSpec((TM, TK), lambda b, k: (b, k)),              # x2 (f32)
                pl.BlockSpec((TK, P_STREAM), lambda b, k: (k, 0)),        # w1
                pl.BlockSpec((1, P_STREAM), lambda b, k: (0, 0)),         # b1
                pl.BlockSpec((TK, P_STREAM), lambda b, k: (k, 0)),        # w2
                pl.BlockSpec((1, P_STREAM), lambda b, k: (0, 0)),         # b2
                pl.BlockSpec((P_STREAM, P_FUSED), lambda b, k: (0, 0)),   # wf1
                pl.BlockSpec((P_STREAM, P_FUSED), lambda b, k: (0, 0)),   # wf2
                pl.BlockSpec((1, P_FUSED), lambda b, k: (0, 0)),          # bf
            ],
            out_specs=(
                pl.BlockSpec((TM, P_STREAM), lambda b, k: (b, 0)),
                pl.BlockSpec((TM, P_STREAM), lambda b, k: (b, 0)),
                pl.BlockSpec((TM, P_FUSED), lambda b, k: (b, 0)),
            ),
            scratch_shapes=[pltpu.VMEM((TM, P_STREAM), jnp.float32),
                            pltpu.VMEM((TM, P_STREAM), jnp.float32)],
            compiler_params=compiler_params,
            cost_estimate=cost,
        )(x1, x2,
          params["w1"], params["b1"],
          params["w2"], params["b2"],
          params["wf1"], params["wf2"], params["bf"])

    # Slice the lane-dense padded outputs back to the logical shapes.
    f1 = f1_p[:B, :STREAM_FEATS]
    f2 = f2_p[:B, :STREAM_FEATS]
    fusion = fuse_p[:B, :FUSED_FEATS]
    return f1, f2, fusion


def init_params(key, d_in):
    """Deterministic PyTorch-Linear-like init; stored pre-split, zero-padded,
    and cast to bf16 (biases kept f32)."""
    ks = jax.random.split(key, 6)
    d_in_p = _pad_k(d_in)

    def linear_init(kw, kb, fan_in, fan_out):
        bound = 1.0 / jnp.sqrt(jnp.float32(fan_in))
        w = jax.random.uniform(kw, (fan_in, fan_out), jnp.float32, -bound, bound)
        b = jax.random.uniform(kb, (1, fan_out), jnp.float32, -bound, bound)
        return w, b

    w1, b1 = linear_init(ks[0], ks[1], d_in, STREAM_FEATS)        # stream1 head
    w2, b2 = linear_init(ks[2], ks[3], d_in, STREAM_FEATS)        # stream2 head
    wf, bf = linear_init(ks[4], ks[5], FUSED_FEATS, FUSED_FEATS)  # fusion

    def pad2(a, rows, cols):
        return jnp.pad(a, ((0, rows - a.shape[0]), (0, cols - a.shape[1])))

    return {
        "w1": pad2(w1, d_in_p, P_STREAM).astype(jnp.bfloat16),
        "b1": pad2(b1, 1, P_STREAM),
        "w2": pad2(w2, d_in_p, P_STREAM).astype(jnp.bfloat16),
        "b2": pad2(b2, 1, P_STREAM),
        # Fusion weight pre-split at the concat boundary (row 531) at init time.
        "wf1": pad2(wf[:STREAM_FEATS, :], P_STREAM, P_FUSED).astype(jnp.bfloat16),
        "wf2": pad2(wf[STREAM_FEATS:, :], P_STREAM, P_FUSED).astype(jnp.bfloat16),
        "bf": pad2(bf, 1, P_FUSED),
    }


def reference_forward(blurred_img, detailed_img, params):
    """Pure-JAX reference mirroring the PyTorch forward (same bf16 weights,
    same in-pipeline bf16 quantization of activations)."""
    B = blurred_img.shape[0]
    d_in = blurred_img.shape[1] * blurred_img.shape[2] * blurred_img.shape[3]
    x1 = blurred_img.reshape(B, d_in).astype(jnp.bfloat16)
    x2 = detailed_img.reshape(B, d_in).astype(jnp.bfloat16)
    w1 = params["w1"][:d_in, :STREAM_FEATS]
    w2 = params["w2"][:d_in, :STREAM_FEATS]
    f1 = jnp.dot(x1, w1, preferred_element_type=jnp.float32) \
        + params["b1"][:, :STREAM_FEATS]
    f2 = jnp.dot(x2, w2, preferred_element_type=jnp.float32) \
        + params["b2"][:, :STREAM_FEATS]
    x = jnp.concatenate([f1, f2], axis=1).astype(jnp.bfloat16)
    wf = jnp.concatenate([params["wf1"][:STREAM_FEATS, :FUSED_FEATS],
                          params["wf2"][:STREAM_FEATS, :FUSED_FEATS]], axis=0)
    fusion = jnp.dot(x, wf, preferred_element_type=jnp.float32) \
        + params["bf"][:, :FUSED_FEATS]
    return f1, f2, fusion


if __name__ == "__main__":
    key = jax.random.PRNGKey(0)
    k_in1, k_in2, k_param = jax.random.split(key, 3)

    # Small NCHW inputs: batch=2, channels=4, spatial=16x16 -> d_in = 1024.
    B, C, H, W = 2, 4, 16, 16
    blurred = jax.random.normal(k_in1, (B, C, H, W), jnp.float32)
    detailed = jax.random.normal(k_in2, (B, C, H, W), jnp.float32)

    params = init_params(k_param, C * H * W)

    # TODO(synk): FirstStream/SecondStream are injected (unspecified) modules in
    # the PyTorch code; flatten+Linear(d_in->531) feature extractors stand in.
    f1, f2, fusion = jax.jit(two_stream_net)(blurred, detailed, params)
    jax.block_until_ready((f1, f2, fusion))

    # Cross-check against the pure-JAX reference (same bf16 weights).
    r1, r2, rf = reference_forward(blurred, detailed, params)
    assert f1.shape == (B, STREAM_FEATS)
    assert f2.shape == (B, STREAM_FEATS)
    assert fusion.shape == (B, FUSED_FEATS)
    assert jnp.allclose(f1, r1, atol=5e-3, rtol=5e-3)
    assert jnp.allclose(f2, r2, atol=5e-3, rtol=5e-3)
    assert jnp.allclose(fusion, rf, atol=5e-3, rtol=5e-3)

    print("KERNEL_OK")
</pallas_src>

<mosaic_0001>
module attributes {stable_mosaic.version = 11 : i64} {
  func.func @_two_stream_kernel_single(%arg0: i32, %arg1: memref<8x1024xf32, #tpu.memory_space<vmem>>, %arg2: memref<8x1024xf32, #tpu.memory_space<vmem>>, %arg3: memref<1024x640xbf16, #tpu.memory_space<vmem>>, %arg4: memref<1x640xf32, #tpu.memory_space<vmem>>, %arg5: memref<1024x640xbf16, #tpu.memory_space<vmem>>, %arg6: memref<1x640xf32, #tpu.memory_space<vmem>>, %arg7: memref<640x1280xbf16, #tpu.memory_space<vmem>>, %arg8: memref<640x1280xbf16, #tpu.memory_space<vmem>>, %arg9: memref<1x1280xf32, #tpu.memory_space<vmem>>, %arg10: memref<8x640xf32, #tpu.memory_space<vmem>>, %arg11: memref<8x640xf32, #tpu.memory_space<vmem>>, %arg12: memref<8x1280xf32, #tpu.memory_space<vmem>>) attributes {dimension_semantics = [#tpu.dimension_semantics<parallel>], iteration_bounds = array<i64: 1>, scalar_prefetch = 0 : i64, scratch_operands = 0 : i64, tpu.core_type = #tpu.core_type<tc>, window_params = [{transform_indices = @transform_0, window_bounds = array<i64: 8, 1024>}, {transform_indices = @transform_1, window_bounds = array<i64: 8, 1024>}, {pipeline_mode = #tpu.pipeline_mode<synchronous>, transform_indices = @transform_2, window_bounds = array<i64: 1024, 640>}, {pipeline_mode = #tpu.pipeline_mode<synchronous>, transform_indices = @transform_3, window_bounds = array<i64: 1, 640>}, {pipeline_mode = #tpu.pipeline_mode<synchronous>, transform_indices = @transform_4, window_bounds = array<i64: 1024, 640>}, {pipeline_mode = #tpu.pipeline_mode<synchronous>, transform_indices = @transform_5, window_bounds = array<i64: 1, 640>}, {pipeline_mode = #tpu.pipeline_mode<synchronous>, transform_indices = @transform_6, window_bounds = array<i64: 640, 1280>}, {pipeline_mode = #tpu.pipeline_mode<synchronous>, transform_indices = @transform_7, window_bounds = array<i64: 640, 1280>}, {pipeline_mode = #tpu.pipeline_mode<synchronous>, transform_indices = @transform_8, window_bounds = array<i64: 1, 1280>}, {transform_indices = @transform_9, window_bounds = array<i64: 8, 640>}, {transform_indices = @transform_10, window_bounds = array<i64: 8, 640>}, {transform_indices = @transform_11, window_bounds = array<i64: 8, 1280>}]} {
    %c0 = arith.constant 0 : index
    %c0_0 = arith.constant 0 : index
    %0 = vector.load %arg1[%c0, %c0_0] : memref<8x1024xf32, #tpu.memory_space<vmem>>, vector<8x1024xf32>
    %1 = arith.truncf %0 : vector<8x1024xf32> to vector<8x1024xbf16>
    %c0_1 = arith.constant 0 : index
    %c0_2 = arith.constant 0 : index
    %2 = vector.load %arg2[%c0_1, %c0_2] : memref<8x1024xf32, #tpu.memory_space<vmem>>, vector<8x1024xf32>
    %3 = arith.truncf %2 : vector<8x1024xf32> to vector<8x1024xbf16>
    %c0_3 = arith.constant 0 : index
    %c0_4 = arith.constant 0 : index
    %4 = vector.load %arg3[%c0_3, %c0_4] : memref<1024x640xbf16, #tpu.memory_space<vmem>>, vector<1024x640xbf16>
    %cst = arith.constant dense<0.000000e+00> : vector<8x640xf32>
    %5 = tpu.matmul %1, %4, %cst {dimension_numbers = #tpu.dot_dimension_numbers<[1], [0], [0], [1], [0, 0, 1, 1], [], []>} : vector<8x1024xbf16>, vector<1024x640xbf16>, vector<8x640xf32> -> vector<8x640xf32>
    %c0_5 = arith.constant 0 : index
    %c0_6 = arith.constant 0 : index
    %6 = vector.load %arg4[%c0_5, %c0_6] : memref<1x640xf32, #tpu.memory_space<vmem>>, vector<1x640xf32>
    %7 = vector.broadcast %6 : vector<1x640xf32> to vector<8x640xf32>
    %8 = arith.addf %5, %7 : vector<8x640xf32>
    %c0_7 = arith.constant 0 : index
    %c0_8 = arith.constant 0 : index
    %9 = vector.load %arg5[%c0_7, %c0_8] : memref<1024x640xbf16, #tpu.memory_space<vmem>>, vector<1024x640xbf16>
    %cst_9 = arith.constant dense<0.000000e+00> : vector<8x640xf32>
    %10 = tpu.matmul %3, %9, %cst_9 {dimension_numbers = #tpu.dot_dimension_numbers<[1], [0], [0], [1], [0, 0, 1, 1], [], []>} : vector<8x1024xbf16>, vector<1024x640xbf16>, vector<8x640xf32> -> vector<8x640xf32>
    %c0_10 = arith.constant 0 : index
    %c0_11 = arith.constant 0 : index
    %11 = vector.load %arg6[%c0_10, %c0_11] : memref<1x640xf32, #tpu.memory_space<vmem>>, vector<1x640xf32>
    %12 = vector.broadcast %11 : vector<1x640xf32> to vector<8x640xf32>
    %13 = arith.addf %10, %12 : vector<8x640xf32>
    %c0_12 = arith.constant 0 : index
    %c0_13 = arith.constant 0 : index
    %14 = vector.load %arg10[%c0_12, %c0_13] : memref<8x640xf32, #tpu.memory_space<vmem>>, vector<8x640xf32>
    tpu.vector_store %arg10[%c0_12, %c0_13], %8 {strides = array<i32>} : memref<8x640xf32, #tpu.memory_space<vmem>>, vector<8x640xf32>,
    %c0_14 = arith.constant 0 : index
    %c0_15 = arith.constant 0 : index
    %15 = vector.load %arg11[%c0_14, %c0_15] : memref<8x640xf32, #tpu.memory_space<vmem>>, vector<8x640xf32>
    tpu.vector_store %arg11[%c0_14, %c0_15], %13 {strides = array<i32>} : memref<8x640xf32, #tpu.memory_space<vmem>>, vector<8x640xf32>,
    %16 = arith.truncf %8 : vector<8x640xf32> to vector<8x640xbf16>
    %c0_16 = arith.constant 0 : index
    %c0_17 = arith.constant 0 : index
    %17 = vector.load %arg7[%c0_16, %c0_17] : memref<640x1280xbf16, #tpu.memory_space<vmem>>, vector<640x1280xbf16>
    %cst_18 = arith.constant dense<0.000000e+00> : vector<8x1280xf32>
    %18 = tpu.matmul %16, %17, %cst_18 {dimension_numbers = #tpu.dot_dimension_numbers<[1], [0], [0], [1], [0, 0, 1, 1], [], []>} : vector<8x640xbf16>, vector<640x1280xbf16>, vector<8x1280xf32> -> vector<8x1280xf32>
    %19 = arith.truncf %13 : vector<8x640xf32> to vector<8x640xbf16>
    %c0_19 = arith.constant 0 : index
    %c0_20 = arith.constant 0 : index
    %20 = vector.load %arg8[%c0_19, %c0_20] : memref<640x1280xbf16, #tpu.memory_space<vmem>>, vector<640x1280xbf16>
    %cst_21 = arith.constant dense<0.000000e+00> : vector<8x1280xf32>
    %21 = tpu.matmul %19, %20, %cst_21 {dimension_numbers = #tpu.dot_dimension_numbers<[1], [0], [0], [1], [0, 0, 1, 1], [], []>} : vector<8x640xbf16>, vector<640x1280xbf16>, vector<8x1280xf32> -> vector<8x1280xf32>
    %22 = arith.addf %18, %21 : vector<8x1280xf32>
    %c0_22 = arith.constant 0 : index
    %c0_23 = arith.constant 0 : index
    %23 = vector.load %arg9[%c0_22, %c0_23] : memref<1x1280xf32, #tpu.memory_space<vmem>>, vector<1x1280xf32>
    %24 = vector.broadcast %23 : vector<1x1280xf32> to vector<8x1280xf32>
    %25 = arith.addf %22, %24 : vector<8x1280xf32>
    %c0_24 = arith.constant 0 : index
    %c0_25 = arith.constant 0 : index
    %26 = vector.load %arg12[%c0_24, %c0_25] : memref<8x1280xf32, #tpu.memory_space<vmem>>, vector<8x1280xf32>
    tpu.vector_store %arg12[%c0_24, %c0_25], %25 {strides = array<i32>} : memref<8x1280xf32, #tpu.memory_space<vmem>>, vector<8x1280xf32>,
    return
  }
  func.func @transform_0(%arg0: i32) -> (i32, i32) {
    %c0_i32 = arith.constant 0 : i32
    %c0_i32_0 = arith.constant 0 : i32
    return %arg0, %c0_i32 : i32, i32
  }
  func.func @transform_1(%arg0: i32) -> (i32, i32) {
    %c0_i32 = arith.constant 0 : i32
    %c0_i32_0 = arith.constant 0 : i32
    return %arg0, %c0_i32 : i32, i32
  }
  func.func @transform_2(%arg0: i32) -> (i32, i32) {
    %c0_i32 = arith.constant 0 : i32
    %c0_i32_0 = arith.constant 0 : i32
    %c0_i32_1 = arith.constant 0 : i32
    return %c0_i32, %c0_i32_0 : i32, i32
  }
  func.func @transform_3(%arg0: i32) -> (i32, i32) {
    %c0_i32 = arith.constant 0 : i32
    %c0_i32_0 = arith.constant 0 : i32
    %c0_i32_1 = arith.constant 0 : i32
    return %c0_i32, %c0_i32_0 : i32, i32
  }
  func.func @transform_4(%arg0: i32) -> (i32, i32) {
    %c0_i32 = arith.constant 0 : i32
    %c0_i32_0 = arith.constant 0 : i32
    %c0_i32_1 = arith.constant 0 : i32
    return %c0_i32, %c0_i32_0 : i32, i32
  }
  func.func @transform_5(%arg0: i32) -> (i32, i32) {
    %c0_i32 = arith.constant 0 : i32
    %c0_i32_0 = arith.constant 0 : i32
    %c0_i32_1 = arith.constant 0 : i32
    return %c0_i32, %c0_i32_0 : i32, i32
  }
  func.func @transform_6(%arg0: i32) -> (i32, i32) {
    %c0_i32 = arith.constant 0 : i32
    %c0_i32_0 = arith.constant 0 : i32
    %c0_i32_1 = arith.constant 0 : i32
    return %c0_i32, %c0_i32_0 : i32, i32
  }
  func.func @transform_7(%arg0: i32) -> (i32, i32) {
    %c0_i32 = arith.constant 0 : i32
    %c0_i32_0 = arith.constant 0 : i32
    %c0_i32_1 = arith.constant 0 : i32
    return %c0_i32, %c0_i32_0 : i32, i32
  }
  func.func @transform_8(%arg0: i32) -> (i32, i32) {
    %c0_i32 = arith.constant 0 : i32
    %c0_i32_0 = arith.constant 0 : i32
    %c0_i32_1 = arith.constant 0 : i32
    return %c0_i32, %c0_i32_0 : i32, i32
  }
  func.func @transform_9(%arg0: i32) -> (i32, i32) {
    %c0_i32 = arith.constant 0 : i32
    %c0_i32_0 = arith.constant 0 : i32
    return %arg0, %c0_i32 : i32, i32
  }
  func.func @transform_10(%arg0: i32) -> (i32, i32) {
    %c0_i32 = arith.constant 0 : i32
    %c0_i32_0 = arith.constant 0 : i32
    return %arg0, %c0_i32 : i32, i32
  }
  func.func @transform_11(%arg0: i32) -> (i32, i32) {
    %c0_i32 = arith.constant 0 : i32
    %c0_i32_0 = arith.constant 0 : i32
    return %arg0, %c0_i32 : i32, i32
  }
}

</mosaic_0001>

<bundles_post_ra>
// kernel: two_stream_net.1
= control target key start
LH: loop header
LB: loop body
LE: loop exit
PB: predicated region body
PF: predicated region fallthrough
CT: control target
= control target key end

     0   :  { %17 = vsyncpa [#allocation3], 0  ;;  %s15995_s0 = inlined_call_operand.vmem [shape: f32[8,1024], index: 0, kind: input, shape index: {}]   ;;  %s15996_s1 = inlined_call_operand.vmem [shape: f32[8,1024], index: 1, kind: input, shape index: {}]   ;;  %s15997_s2 = inlined_call_operand.hbm [shape: bf16[1024,640], index: 2, kind: input, shape index: {}]   ;;  %s15998_s3 = inlined_call_operand.hbm [shape: f32[1,640], index: 3, kind: input, shape index: {}]   ;;  %s15999_s4 = inlined_call_operand.hbm [shape: bf16[1024,640], index: 4, kind: input, shape index: {}]   ;;  %s16000_s5 = inlined_call_operand.hbm [shape: f32[1,640], index: 5, kind: input, shape index: {}]   ;;  %s16001_s6 = inlined_call_operand.hbm [shape: bf16[640,1280], index: 6, kind: input, shape index: {}]   ;;  %s16002_s7 = inlined_call_operand.hbm [shape: bf16[640,1280], index: 7, kind: input, shape index: {}]   ;;  %s16003_s8 = inlined_call_operand.hbm [shape: f32[1,1280], index: 8, kind: input, shape index: {}]   ;;  %s16004_s9 = inlined_call_operand.vmem [shape: f32[8,640], index: 9, kind: output, shape index: {0}]   ;;  %s16005_s10 = inlined_call_operand.vmem [shape: f32[8,640], index: 10, kind: output, shape index: {1}]   ;;  %s16006_s11 = inlined_call_operand.vmem [shape: f32[8,1280], index: 11, kind: output, shape index: {2}]  }
   0x1   :  { %18 = vsyncpa [#allocation5], 0 }
   0x2   :  { %19 = vsyncpa [#allocation8], 0 }
   0x3   :  { %20 = vsyncpa [#allocation11], 0  ;;  %s15370_s17 = smov [#allocation4]   ;;  %s15371_s19 = smov [#allocation7]  }
   0x4   :  { %s43_s18 = sshll.u32 %s15370_s17, 4  ;;  %s65_s20 = sshll.u32 %s15371_s19, 4  ;;  %s44_s18 = int_to_ptr.vmem [resolvable:$true] %s43_s18  ;;  %s66_s20 = int_to_ptr.vmem [resolvable:$true] %s65_s20 }
   0x5   :  { %s15208_s23 = scalar_lea.hbm %s15998_s3, 80 }
   0x6   :  { %p15209_p0 = scmp.ne.s32.totalorder %s15998_s3, %s15208_s23  ;;  %p15212_p1 = scmp.lt.u32.totalorder %s15208_s23, %s15998_s3 }
   0x8   :  { %p15214_p2 = pnand %p15212_p1, %p15209_p0 }
   0xa   :  { %15217 = shalt.err (!%p15214_p2)
}
   0xb   :  { %s15218_s28 = scalar_lea.vmem %s44_s18, 80  ;;  %s15222_s29 = scalar_lea.vmem %s44_s18, 96 }
   0xc   :  { %p15219_p3 = scmp.ne.s32.totalorder %s44_s18, %s15218_s28  ;;  %p15223_p4 = scmp.lt.s32.totalorder %s44_s18, %s44_s18 }
   0xd   :  { %p15224_p5 = scmp.lt.s32.totalorder %s15222_s29, %s15218_s28 }
   0xf   :  { %p15225_p6 = por %p15224_p5, %p15223_p4 }
  0x11   :  { %p15226_p7 = pnand %p15225_p6, %p15219_p3 }
  0x13   :  { %15229 = shalt.err (!%p15226_p7)
}
  0x14   :  { %46 = dma.hbm_to_vmem [thread:$0]  %s15998_s3, 80, %s44_s18, [#allocation5]  }
  0x15   :  { %s15230_s15 = scalar_lea.hbm %s16000_s5, 80 }
  0x16   :  { %p15231_p8 = scmp.ne.s32.totalorder %s16000_s5, %s15230_s15  ;;  %p15234_p9 = scmp.lt.u32.totalorder %s15230_s15, %s16000_s5 }
  0x18   :  { %p15236_p10 = pnand %p15234_p9, %p15231_p8 }
  0x1a   :  { %15239 = shalt.err (!%p15236_p10)
}
  0x1b   :  { %s15240_s22 = scalar_lea.vmem %s66_s20, 80  ;;  %s15244_s23 = scalar_lea.vmem %s66_s20, 96 }
  0x1c   :  { %p15241_p11 = scmp.ne.s32.totalorder %s66_s20, %s15240_s22  ;;  %p15245_p12 = scmp.lt.s32.totalorder %s66_s20, %s66_s20 }
  0x1d   :  { %p15246_p13 = scmp.lt.s32.totalorder %s15244_s23, %s15240_s22 }
  0x1f   :  { %p15247_p0 = por %p15246_p13, %p15245_p12 }
  0x21   :  { %p15248_p1 = pnand %p15247_p0, %p15241_p11 }
  0x23   :  { %15251 = shalt.err (!%p15248_p1)
}
  0x24   :  { %68 = dma.hbm_to_vmem [thread:$0]  %s16000_s5, 80, %s66_s20, [#allocation8]  }
  0x25   :  { %s15372_s24 = smov [#allocation10]   ;;  %s15373_s26 = smov [#allocation2]  }
  0x26   :  { %s86_s25 = sshll.u32 %s15372_s24, 4  ;;  %s30_s27 = sshll.u32 %s15373_s26, 4  ;;  %s87_s25 = int_to_ptr.vmem [resolvable:$true] %s86_s25  ;;  %s15466_s27 = int_to_ptr.vmem [resolvable:$true] %s30_s27 }
  0x27   :  { %s15252_s30 = scalar_lea.hbm %s16002_s7, 51200 }
  0x28   :  { %p15253_p2 = scmp.ne.s32.totalorder %s16002_s7, %s15252_s30  ;;  %p15256_p3 = scmp.lt.u32.totalorder %s15252_s30, %s16002_s7 }
  0x2a   :  { %p15258_p4 = pnand %p15256_p3, %p15253_p2 }
  0x2c   :  { %15261 = shalt.err (!%p15258_p4)
}
  0x2d   :  { %s15262_s5 = scalar_lea.vmem %s87_s25, 51200  ;;  %p15267_p6 = scmp.lt.s32.totalorder %s87_s25, %s87_s25 }
  0x2e   :  { %p15263_p5 = scmp.ne.s32.totalorder %s87_s25, %s15262_s5  ;;  %p15268_p7 = scmp.lt.s32.totalorder %s15262_s5, %s15262_s5 }
  0x30   :  { %p15269_p8 = por %p15268_p7, %p15267_p6 }
  0x32   :  { %p15270_p9 = pnand %p15269_p8, %p15263_p5 }
  0x34   :  { %15273 = shalt.err (!%p15270_p9)
}
  0x35   :  { %s15374_s20 = smov 640   ;;  %s15375_s16 = smov 40  }
  0x36   :  { %92 = dma.hbm_to_vmem [thread:$0]  %s16002_s7, 51200, %s87_s25, [#allocation11], %s15374_s20, %s15374_s20, %s15375_s16  }
  0x37   :  { %s15274_s23 = scalar_lea.hbm %s15997_s2, 40960 }
  0x38   :  { %p15275_p10 = scmp.ne.s32.totalorder %s15997_s2, %s15274_s23  ;;  %p15278_p11 = scmp.lt.u32.totalorder %s15274_s23, %s15997_s2 }
  0x3a   :  { %p15280_p12 = pnand %p15278_p11, %p15275_p10 }
  0x3c   :  { %15283 = shalt.err (!%p15280_p12)
}
  0x3d   :  { %s15284_s28 = scalar_lea.vmem %s15466_s27, 40960  ;;  %p15289_p0 = scmp.lt.s32.totalorder %s15466_s27, %s15466_s27 }
  0x3e   :  { %p15285_p13 = scmp.ne.s32.totalorder %s15466_s27, %s15284_s28  ;;  %p15290_p1 = scmp.lt.s32.totalorder %s15284_s28, %s15284_s28 }
  0x40   :  { %p15291_p2 = por %p15290_p1, %p15289_p0 }
  0x42   :  { %p15292_p3 = pnand %p15291_p2, %p15285_p13 }
  0x44   :  { %15295 = shalt.err (!%p15292_p3)
}
  0x45   :  { %s15376_s7 = smov 320   ;;  %s15377_s25 = smov 20  }
  0x46   :  { %36 = dma.hbm_to_vmem [thread:$0]  %s15997_s2, 40960, %s15466_s27, [#allocation3], %s15376_s7, %s15376_s7, %s15377_s25  }
  0x47   :  { %s15378_s12 = smov [#allocation6]   ;;  %s15379_s14 = smov [#allocation9]  }
  0x48   :  { %s52_s13 = sshll.u32 %s15378_s12, 4  ;;  %s74_s15 = sshll.u32 %s15379_s14, 4  ;;  %s53_s13 = int_to_ptr.vmem [resolvable:$true] %s52_s13  ;;  %s15500_s15 = int_to_ptr.vmem [resolvable:$true] %s74_s15 }
  0x49   :  { %s15296_s19 = scalar_lea.hbm %s15999_s4, 40960 }
  0x4a   :  { %p15297_p4 = scmp.ne.s32.totalorder %s15999_s4, %s15296_s19  ;;  %p15300_p5 = scmp.lt.u32.totalorder %s15296_s19, %s15999_s4 }
  0x4c   :  { %p15302_p6 = pnand %p15300_p5, %p15297_p4 }
  0x4e   :  { %15305 = shalt.err (!%p15302_p6)
}
  0x4f   :  { %s15306_s2 = scalar_lea.vmem %s53_s13, 40960  ;;  %p15311_p8 = scmp.lt.s32.totalorder %s53_s13, %s53_s13 }
  0x50   :  { %p15307_p7 = scmp.ne.s32.totalorder %s53_s13, %s15306_s2  ;;  %p15312_p9 = scmp.lt.s32.totalorder %s15306_s2, %s15306_s2 }
  0x52   :  { %p15313_p10 = por %p15312_p9, %p15311_p8 }
  0x54   :  { %p15314_p11 = pnand %p15313_p10, %p15307_p7 }
  0x56   :  { %15317 = shalt.err (!%p15314_p11)
}
  0x57   :  { %58 = dma.hbm_to_vmem [thread:$0]  %s15999_s4, 40960, %s53_s13, [#allocation5], %s15376_s7, %s15376_s7, %s15377_s25  }
  0x58   :  { %s15318_s28 = scalar_lea.hbm %s16001_s6, 51200 }
  0x59   :  { %p15319_p12 = scmp.ne.s32.totalorder %s16001_s6, %s15318_s28  ;;  %p15322_p13 = scmp.lt.u32.totalorder %s15318_s28, %s16001_s6 }
  0x5b   :  { %p15324_p0 = pnand %p15322_p13, %p15319_p12 }
  0x5d   :  { %15327 = shalt.err (!%p15324_p0)
}
  0x5e   :  { %s15328_s5 = scalar_lea.vmem %s15500_s15, 51200  ;;  %p15333_p2 = scmp.lt.s32.totalorder %s15500_s15, %s15500_s15 }
  0x5f   :  { %p15329_p1 = scmp.ne.s32.totalorder %s15500_s15, %s15328_s5  ;;  %p15334_p3 = scmp.lt.s32.totalorder %s15328_s5, %s15328_s5 }
  0x61   :  { %p15335_p4 = por %p15334_p3, %p15333_p2 }
  0x63   :  { %p15336_p5 = pnand %p15335_p4, %p15329_p1 }
  0x65   :  { %15339 = shalt.err (!%p15336_p5)
}
  0x66   :  { %80 = dma.hbm_to_vmem [thread:$0]  %s16001_s6, 51200, %s15500_s15, [#allocation8], %s15374_s20, %s15374_s20, %s15375_s16  }
  0x67   :  { %s15380_s25 = smov [#allocation12]   ;;  %s15340_s21 = scalar_lea.hbm %s16003_s8, 160 }
  0x68   :  { %s99_s13 = sshll.u32 %s15380_s25, 4  ;;  %p15341_p6 = scmp.ne.s32.totalorder %s16003_s8, %s15340_s21  ;;  %s100_s13 = int_to_ptr.vmem [resolvable:$true] %s99_s13 }
  0x69   :  { %p15344_p7 = scmp.lt.u32.totalorder %s15340_s21, %s16003_s8 }
  0x6b   :  { %p15346_p8 = pnand %p15344_p7, %p15341_p6 }
  0x6d   :  { %15349 = shalt.err (!%p15346_p8)
}
  0x6e   :  { %s15350_s27 = scalar_lea.vmem %s100_s13, 160  ;;  %p15355_p10 = scmp.lt.s32.totalorder %s100_s13, %s100_s13 }
  0x6f   :  { %p15351_p9 = scmp.ne.s32.totalorder %s100_s13, %s15350_s27  ;;  %p15356_p11 = scmp.lt.s32.totalorder %s15350_s27, %s15350_s27 }
  0x71   :  { %p15357_p12 = por %p15356_p11, %p15355_p10 }
  0x73   :  { %p15358_p13 = pnand %p15357_p12, %p15351_p9 }
  0x75   :  { %15361 = shalt.err (!%p15358_p13)
}
  0x76   :  { %102 = dma.hbm_to_vmem [thread:$0]  %s16003_s8, 160, %s100_s13, [#allocation11]  }
  0x77   :  { %15362 = dma.done.wait [#allocation3], 40960  }
  0x78   :  { %15363 = vsyncadd [#allocation3], 4294926336 }
  0x79   :  { %15364 = dma.done.wait [#allocation5], 41040  }
  0x7a   :  { %15365 = vsyncadd [#allocation5], 4294926256 }
  0x7b   :  { %15366 = dma.done.wait [#allocation8], 51280  }
  0x7c   :  { %15367 = vsyncadd [#allocation8], 4294916016 }
  0x7d   :  { %15368 = dma.done.wait [#allocation11], 51360  }
  0x7e   :  { %15369 = vsyncadd [#allocation11], 4294915936  ;;  %v13107_v0 = vld [vmem:[#allocation2 + $0x4] ss:$20 sps:$4 sm:$0xff]   ;;  %v13109_v1 = vld [vmem:[#allocation2 + $0xc] ss:$20 sps:$4 sm:$0xff]  }
  0x7f   :  { %2232 = vmatprep.subr.bf16.mxu0 %v13107_v0  ;;  %v13111_v2 = vld [vmem:[#allocation2] ss:$20 sps:$4 sm:$0xff]   ;;  %v13112_v3 = vld [vmem:[#allocation2 + $0x8] ss:$20 sps:$4 sm:$0xff]   ;;  %2396 = vmatprep.subr.bf16.mxu1 %v13109_v1  ;;  %v13118_v7 = vld [vmem:[#allocation2 + $0x30] ss:$20 sps:$4 sm:$0xff]  }
  0x80   :  { %v13113_v4 = vld [vmem:[#allocation2 + $0x2c] ss:$20 sps:$4 sm:$0xff]   ;;  %2233 = vmatpush1.bf16.msra.mxu0 %v13111_v2  ;;  %2397 = vmatpush1.bf16.msra.mxu1 %v13112_v3  ;;  %v13115_v5 = vld [vmem:[#allocation2 + $0x34] ss:$20 sps:$4 sm:$0xff]   ;;  %v13121_v9 = vld [vmem:[#allocation2 + $0x5c] ss:$20 sps:$4 sm:$0xff]  }
  0x81   :  { %v13117_v6 = vld [vmem:[#allocation2 + $0x28] ss:$20 sps:$4 sm:$0xff]   ;;  %2234 = vmatprep.subr.bf16.mxu0 %v13113_v4  ;;  %2398 = vmatprep.subr.bf16.mxu1 %v13115_v5  ;;  %v13123_v10 = vld [vmem:[#allocation2 + $0x50] ss:$20 sps:$4 sm:$0xff]   ;;  %v13124_v11 = vld [vmem:[#allocation2 + $0x58] ss:$20 sps:$4 sm:$0xff]  }
  0x82   :  { %v13119_v8 = vld [vmem:[#allocation2 + $0x54] ss:$20 sps:$4 sm:$0xff]   ;;  %v13125_v12 = vld [vmem:[#allocation2 + $0x7c] ss:$20 sps:$4 sm:$0xff]   ;;  %v13127_v13 = vld [vmem:[#allocation2 + $0x84] ss:$20 sps:$4 sm:$0xff]  }
  0x83   :  { %v13129_v14 = vld [vmem:[#allocation2 + $0x78] ss:$20 sps:$4 sm:$0xff]   ;;  %v13130_v15 = vld [vmem:[#allocation2 + $0x80] ss:$20 sps:$4 sm:$0xff]   ;;  %v13136_v19 = vld [vmem:[#allocation2 + $0xa8] ss:$20 sps:$4 sm:$0xff]  }
  0x84   :  { %2235 = vmatpush1.bf16.msra.mxu0 %v13117_v6  ;;  %2399 = vmatpush1.bf16.msra.mxu1 %v13118_v7  ;;  %v13131_v16 = vld [vmem:[#allocation2 + $0xa4] ss:$20 sps:$4 sm:$0xff]   ;;  %v13133_v17 = vld [vmem:[#allocation2 + $0xac] ss:$20 sps:$4 sm:$0xff]   ;;  %v13139_v21 = vld [vmem:[#allocation2 + $0xd4] ss:$20 sps:$4 sm:$0xff]  }
  0x85   :  { %2236 = vmatprep.subr.bf16.mxu0 %v13119_v8  ;;  %2400 = vmatprep.subr.bf16.mxu1 %v13121_v9  ;;  %v13135_v18 = vld [vmem:[#allocation2 + $0xa0] ss:$20 sps:$4 sm:$0xff]   ;;  %v13141_v22 = vld [vmem:[#allocation2 + $0xc8] ss:$20 sps:$4 sm:$0xff]   ;;  %v13142_v23 = vld [vmem:[#allocation2 + $0xd0] ss:$20 sps:$4 sm:$0xff]  }
  0x86   :  { %v13137_v20 = vld [vmem:[#allocation2 + $0xcc] ss:$20 sps:$4 sm:$0xff]   ;;  %v13143_v24 = vld [vmem:[#allocation2 + $0xf4] ss:$20 sps:$4 sm:$0xff]   ;;  %v13145_v25 = vld [vmem:[#allocation2 + $0xfc] ss:$20 sps:$4 sm:$0xff]  }
  0x87   :  { %v13147_v26 = vld [vmem:[#allocation2 + $0xf0] ss:$20 sps:$4 sm:$0xff]   ;;  %v13148_v27 = vld [vmem:[#allocation2 + $0xf8] ss:$20 sps:$4 sm:$0xff]   ;;  %v13154_v31 = vld [vmem:[#allocation2 + $0x120] ss:$20 sps:$4 sm:$0xff]  }
  0x88   :  { %2237 = vmatpush1.bf16.msra.mxu0 %v13123_v10  ;;  %2401 = vmatpush1.bf16.msra.mxu1 %v13124_v11  ;;  %v13149_v28 = vld [vmem:[#allocation2 + $0x11c] ss:$20 sps:$4 sm:$0xff]   ;;  %v13151_v29 = vld [vmem:[#allocation2 + $0x124] ss:$20 sps:$4 sm:$0xff]   ;;  %v13157_v33 = vld [vmem:[#allocation2 + $0x14c] ss:$20 sps:$4 sm:$0xff]  }
  0x89   :  { %2238 = vmatprep.subr.bf16.mxu0 %v13125_v12  ;;  %2402 = vmatprep.subr.bf16.mxu1 %v13127_v13  ;;  %v13153_v30 = vld [vmem:[#allocation2 + $0x118] ss:$20 sps:$4 sm:$0xff]   ;;  %v13159_v34 = vld [vmem:[#allocation2 + $0x140] ss:$20 sps:$4 sm:$0xff]   ;;  %v13160_v35 = vld [vmem:[#allocation2 + $0x148] ss:$20 sps:$4 sm:$0xff]  }
  0x8a   :  { %v13155_v32 = vld [vmem:[#allocation2 + $0x144] ss:$20 sps:$4 sm:$0xff]   ;;  %v13161_v36 = vld [vmem:[#allocation2 + $0x16c] ss:$20 sps:$4 sm:$0xff]   ;;  %v13163_v37 = vld [vmem:[#allocation2 + $0x174] ss:$20 sps:$4 sm:$0xff]  }
  0x8b   :  { %v13165_v38 = vld [vmem:[#allocation2 + $0x168] ss:$20 sps:$4 sm:$0xff]   ;;  %v13166_v39 = vld [vmem:[#allocation2 + $0x170] ss:$20 sps:$4 sm:$0xff]   ;;  %v13172_v43 = vld [vmem:[#allocation2 + $0x198] ss:$20 sps:$4 sm:$0xff]  }
  0x8c   :  { %2239 = vmatpush1.bf16.msra.mxu0 %v13129_v14  ;;  %2403 = vmatpush1.bf16.msra.mxu1 %v13130_v15  ;;  %v13167_v40 = vld [vmem:[#allocation2 + $0x194] ss:$20 sps:$4 sm:$0xff]   ;;  %v13169_v41 = vld [vmem:[#allocation2 + $0x19c] ss:$20 sps:$4 sm:$0xff]   ;;  %v13175_v45 = vld [vmem:[#allocation2 + $0x1c4] ss:$20 sps:$4 sm:$0xff]  }
  0x8d   :  { %2240 = vmatprep.subr.bf16.mxu0 %v13131_v16  ;;  %2404 = vmatprep.subr.bf16.mxu1 %v13133_v17  ;;  %v13171_v42 = vld [vmem:[#allocation2 + $0x190] ss:$20 sps:$4 sm:$0xff]   ;;  %v126_v46 = vld [vmem:[%s15995_s0 + $0x8] sm:$0xff]  ;;  %v13178_v49 = vld [vmem:[#allocation2 + $0x1c0] ss:$20 sps:$4 sm:$0xff]  }
  0x8e   :  { %v13173_v44 = vld [vmem:[#allocation2 + $0x1bc] ss:$20 sps:$4 sm:$0xff]   ;;  %v13177_v47 = vld [vmem:[#allocation2 + $0x1b8] ss:$20 sps:$4 sm:$0xff]   ;;  %v15549_v48 = vpack.c.bf16 %v126_v46, %v126_v46  ;;  %v13183_v52 = vld [vmem:[#allocation2 + $0x1e0] ss:$20 sps:$4 sm:$0xff]  }
  0x8f   :  { %v13179_v50 = vld [vmem:[#allocation2 + $0x1e4] ss:$20 sps:$4 sm:$0xff]   ;;  %v13181_v51 = vld [vmem:[#allocation2 + $0x1ec] ss:$20 sps:$4 sm:$0xff]   ;;  %v13184_v53 = vld [vmem:[#allocation2 + $0x1e8] ss:$20 sps:$4 sm:$0xff]  }
  0x90   :  { %2241 = vmatpush1.bf16.msra.mxu0 %v13135_v18  ;;  %2405 = vmatpush1.bf16.msra.mxu1 %v13136_v19  ;;  %v13185_v54 = vld [vmem:[#allocation2 + $0x20c] ss:$20 sps:$4 sm:$0xff]   ;;  %v13187_v55 = vld [vmem:[#allocation2 + $0x214] ss:$20 sps:$4 sm:$0xff]   ;;  %v13190_v57 = vld [vmem:[#allocation2 + $0x210] ss:$20 sps:$4 sm:$0xff]  }
  0x91   :  { %2242 = vmatprep.subr.bf16.mxu0 %v13137_v20  ;;  %2406 = vmatprep.subr.bf16.mxu1 %v13139_v21  ;;  %v13189_v56 = vld [vmem:[#allocation2 + $0x208] ss:$20 sps:$4 sm:$0xff]   ;;  %v13195_v60 = vld [vmem:[#allocation2 + $0x230] ss:$20 sps:$4 sm:$0xff]   ;;  %v13196_v61 = vld [vmem:[#allocation2 + $0x238] ss:$20 sps:$4 sm:$0xff]  }
  0x92   :  { %2264 = vmatprep.mubr.bf16.mxu0 %v15549_v48  ;;  %2428 = vmatprep.mubr.bf16.mxu1 %v15549_v48  ;;  %v13191_v58 = vld [vmem:[#allocation2 + $0x234] ss:$20 sps:$4 sm:$0xff]   ;;  %v13193_v59 = vld [vmem:[#allocation2 + $0x23c] ss:$20 sps:$4 sm:$0xff]   ;;  %v13199_v63 = vld [vmem:[#allocation2 + $0x264] ss:$20 sps:$4 sm:$0xff]  }
  0x93   :  { %v13197_v62 = vld [vmem:[#allocation2 + $0x25c] ss:$20 sps:$4 sm:$0xff]   ;;  %v13201_v0 = vld [vmem:[#allocation2 + $0x258] ss:$20 sps:$4 sm:$0xff]   ;;  %v13202_v1 = vld [vmem:[#allocation2 + $0x260] ss:$20 sps:$4 sm:$0xff]  }
  0x94   :  { %2243 = vmatpush1.bf16.msra.mxu0 %v13141_v22  ;;  %2407 = vmatpush1.bf16.msra.mxu1 %v13142_v23  ;;  %v125_v2 = vld [vmem:[%s15995_s0] sm:$0xff]  ;;  %v13206_v7 = vld [vmem:[#allocation2 + $0x288] ss:$20 sps:$4 sm:$0xff]   ;;  %v13218_v15 = vld [vmem:[#allocation2 + $0x2d8] ss:$20 sps:$4 sm:$0xff]  }
  0x95   :  { %2244 = vmatprep.subr.bf16.mxu0 %v13143_v24  ;;  %2408 = vmatprep.subr.bf16.mxu1 %v13145_v25  ;;  %v13205_v3 = vld [vmem:[#allocation2 + $0x284] ss:$20 sps:$4 sm:$0xff]   ;;  %v13208_v4 = vld [vmem:[#allocation2 + $0x28c] ss:$20 sps:$4 sm:$0xff]   ;;  %v15556_v5 = vpack.c.bf16 %v125_v2, %v125_v2  ;;  %v13214_v9 = vld [vmem:[#allocation2 + $0x2b4] ss:$20 sps:$4 sm:$0xff]  }
  0x96   :  { %v13203_v6 = vld [vmem:[#allocation2 + $0x280] ss:$20 sps:$4 sm:$0xff]   ;;  %v13209_v10 = vld [vmem:[#allocation2 + $0x2a8] ss:$20 sps:$4 sm:$0xff]   ;;  %v13212_v11 = vld [vmem:[#allocation2 + $0x2b0] ss:$20 sps:$4 sm:$0xff]  }
  0x97   :  { %v13211_v8 = vld [vmem:[#allocation2 + $0x2ac] ss:$20 sps:$4 sm:$0xff]   ;;  %v13217_v12 = vld [vmem:[#allocation2 + $0x2d4] ss:$20 sps:$4 sm:$0xff]   ;;  %v13220_v13 = vld [vmem:[#allocation2 + $0x2dc] ss:$20 sps:$4 sm:$0xff]  }
  0x98   :  { %2245 = vmatpush1.bf16.msra.mxu0 %v13147_v26  ;;  %2409 = vmatpush1.bf16.msra.mxu1 %v13148_v27  ;;  %v13215_v14 = vld [vmem:[#allocation2 + $0x2d0] ss:$20 sps:$4 sm:$0xff]   ;;  %v13221_v18 = vld [vmem:[#allocation2 + $0x2f8] ss:$20 sps:$4 sm:$0xff]   ;;  %v13224_v19 = vld [vmem:[#allocation2 + $0x300] ss:$20 sps:$4 sm:$0xff]  }
  0x99   :  { %2246 = vmatprep.subr.bf16.mxu0 %v13149_v28  ;;  %2410 = vmatprep.subr.bf16.mxu1 %v13151_v29  ;;  %v13223_v16 = vld [vmem:[#allocation2 + $0x2fc] ss:$20 sps:$4 sm:$0xff]   ;;  %v13226_v17 = vld [vmem:[#allocation2 + $0x304] ss:$20 sps:$4 sm:$0xff]   ;;  %v13232_v21 = vld [vmem:[#allocation2 + $0x32c] ss:$20 sps:$4 sm:$0xff]  }
  0x9a   :  { %v13229_v20 = vld [vmem:[#allocation2 + $0x324] ss:$20 sps:$4 sm:$0xff]   ;;  %v13227_v22 = vld [vmem:[#allocation2 + $0x320] ss:$20 sps:$4 sm:$0xff]   ;;  %v13230_v23 = vld [vmem:[#allocation2 + $0x328] ss:$20 sps:$4 sm:$0xff]  }
  0x9b   :  { %v13235_v24 = vld [vmem:[#allocation2 + $0x34c] ss:$20 sps:$4 sm:$0xff]   ;;  %v13238_v25 = vld [vmem:[#allocation2 + $0x354] ss:$20 sps:$4 sm:$0xff]   ;;  %v13236_v27 = vld [vmem:[#allocation2 + $0x350] ss:$20 sps:$4 sm:$0xff]  }
  0x9c   :  { %2247 = vmatpush1.bf16.msra.mxu0 %v13153_v30  ;;  %2411 = vmatpush1.bf16.msra.mxu1 %v13154_v31  ;;  %v13233_v26 = vld [vmem:[#allocation2 + $0x348] ss:$20 sps:$4 sm:$0xff]   ;;  %v13239_v31 = vld [vmem:[#allocation2 + $0x370] ss:$20 sps:$4 sm:$0xff]   ;;  %v13290_v2 = vld [vmem:[#allocation2 + $0x4b8] ss:$20 sps:$4 sm:$0xff]  }
  0x9d   :  { %2248 = vmatprep.subr.bf16.mxu0 %v13155_v32  ;;  %2412 = vmatprep.subr.bf16.mxu1 %v13157_v33  ;;  %v13241_v28 = vld [vmem:[#allocation2 + $0x374] ss:$20 sps:$4 sm:$0xff]   ;;  %v13244_v29 = vld [vmem:[#allocation2 + $0x37c] ss:$20 sps:$4 sm:$0xff]   ;;  %v13242_v33 = vld [vmem:[#allocation2 + $0x378] ss:$20 sps:$4 sm:$0xff]  }
  0x9e   :  { %v128_v30 = vld [vmem:[%s15995_s0 + $0x18] sm:$0xff]  ;;  %v13265_v46 = vld [vmem:[#allocation2 + $0x414] ss:$20 sps:$4 sm:$0xff]  }
  0x9f   :  { %v15563_v32 = vpack.c.bf16 %v128_v30, %v128_v30  ;;  %v13323_v30 = vld [vmem:[#allocation2 + $0x5a0] ss:$20 sps:$4 sm:$0xff]  }
  0xa0   :  { %2249 = vmatpush1.bf16.msra.mxu0 %v13159_v34  ;;  %2413 = vmatpush1.bf16.msra.mxu1 %v13160_v35  ;;  %v13247_v34 = vld [vmem:[#allocation2 + $0x39c] ss:$20 sps:$4 sm:$0xff]   ;;  %v13250_v35 = vld [vmem:[#allocation2 + $0x3a4] ss:$20 sps:$4 sm:$0xff]  }
  0xa1   :  { %2250 = vmatprep.subr.bf16.mxu0 %v13161_v36  ;;  %2414 = vmatprep.subr.bf16.mxu1 %v13163_v37  ;;  %v13245_v36 = vld [vmem:[#allocation2 + $0x398] ss:$20 sps:$4 sm:$0xff]   ;;  %v13248_v37 = vld [vmem:[#allocation2 + $0x3a0] ss:$20 sps:$4 sm:$0xff]  }
  0xa4   :  { %2251 = vmatpush1.bf16.msra.mxu0 %v13165_v38  ;;  %2415 = vmatpush1.bf16.msra.mxu1 %v13166_v39  ;;  %v13253_v38 = vld [vmem:[#allocation2 + $0x3c4] ss:$20 sps:$4 sm:$0xff]   ;;  %v13256_v39 = vld [vmem:[#allocation2 + $0x3cc] ss:$20 sps:$4 sm:$0xff]  }
  0xa5   :  { %2252 = vmatprep.subr.bf16.mxu0 %v13167_v40  ;;  %2416 = vmatprep.subr.bf16.mxu1 %v13169_v41  ;;  %v13251_v40 = vld [vmem:[#allocation2 + $0x3c0] ss:$20 sps:$4 sm:$0xff]   ;;  %v13254_v41 = vld [vmem:[#allocation2 + $0x3c8] ss:$20 sps:$4 sm:$0xff]  }
  0xa8   :  { %2253 = vmatpush1.bf16.msra.mxu0 %v13171_v42  ;;  %2417 = vmatpush1.bf16.msra.mxu1 %v13172_v43  ;;  %v13259_v42 = vld [vmem:[#allocation2 + $0x3ec] ss:$20 sps:$4 sm:$0xff]   ;;  %v13262_v43 = vld [vmem:[#allocation2 + $0x3f4] ss:$20 sps:$4 sm:$0xff]  }
  0xa9   :  { %2254 = vmatprep.subr.bf16.mxu0 %v13173_v44  ;;  %2418 = vmatprep.subr.bf16.mxu1 %v13175_v45  ;;  %v13257_v44 = vld [vmem:[#allocation2 + $0x3e8] ss:$20 sps:$4 sm:$0xff]   ;;  %v13260_v45 = vld [vmem:[#allocation2 + $0x3f0] ss:$20 sps:$4 sm:$0xff]  }
  0xac   :  { %2255 = vmatpush1.bf16.msra.mxu0 %v13177_v47  ;;  %2419 = vmatpush1.bf16.msra.mxu1 %v13178_v49  ;;  %v13268_v47 = vld [vmem:[#allocation2 + $0x41c] ss:$20 sps:$4 sm:$0xff]  }
  0xad   :  { %2256 = vmatprep.subr.bf16.mxu0 %v13179_v50  ;;  %2420 = vmatprep.subr.bf16.mxu1 %v13181_v51  ;;  %v13263_v49 = vld [vmem:[#allocation2 + $0x410] ss:$20 sps:$4 sm:$0xff]   ;;  %v13266_v50 = vld [vmem:[#allocation2 + $0x418] ss:$20 sps:$4 sm:$0xff]  }
  0xae   :  { %v13271_v51 = vld [vmem:[#allocation2 + $0x43c] ss:$20 sps:$4 sm:$0xff]  }
  0xb0   :  { %2257 = vmatpush1.bf16.msra.mxu0 %v13183_v52  ;;  %2421 = vmatpush1.bf16.msra.mxu1 %v13184_v53  ;;  %v13274_v52 = vld [vmem:[#allocation2 + $0x444] ss:$20 sps:$4 sm:$0xff]  }
  0xb1   :  { %2258 = vmatprep.subr.bf16.mxu0 %v13185_v54  ;;  %2422 = vmatprep.subr.bf16.mxu1 %v13187_v55  ;;  %v13269_v53 = vld [vmem:[#allocation2 + $0x438] ss:$20 sps:$4 sm:$0xff]   ;;  %v13272_v54 = vld [vmem:[#allocation2 + $0x440] ss:$20 sps:$4 sm:$0xff]  }
  0xb2   :  { %v13277_v55 = vld [vmem:[#allocation2 + $0x464] ss:$20 sps:$4 sm:$0xff]  }
  0xb4   :  { %2259 = vmatpush1.bf16.msra.mxu0 %v13189_v56  ;;  %2423 = vmatpush1.bf16.msra.mxu1 %v13190_v57  ;;  %v13280_v56 = vld [vmem:[#allocation2 + $0x46c] ss:$20 sps:$4 sm:$0xff]  }
  0xb5   :  { %2260 = vmatprep.subr.bf16.mxu0 %v13191_v58  ;;  %2424 = vmatprep.subr.bf16.mxu1 %v13193_v59  ;;  %v13275_v57 = vld [vmem:[#allocation2 + $0x460] ss:$20 sps:$4 sm:$0xff]   ;;  %v13278_v58 = vld [vmem:[#allocation2 + $0x468] ss:$20 sps:$4 sm:$0xff]  }
  0xb6   :  { %v13283_v59 = vld [vmem:[#allocation2 + $0x48c] ss:$20 sps:$4 sm:$0xff]  }
  0xb8   :  { %2261 = vmatpush1.bf16.msra.mxu0 %v13195_v60  ;;  %2425 = vmatpush1.bf16.msra.mxu1 %v13196_v61  ;;  %v13286_v60 = vld [vmem:[#allocation2 + $0x494] ss:$20 sps:$4 sm:$0xff]  }
  0xb9   :  { %2262 = vmatprep.subr.bf16.mxu0 %v13197_v62  ;;  %2426 = vmatprep.subr.bf16.mxu1 %v13199_v63  ;;  %v13281_v61 = vld [vmem:[#allocation2 + $0x488] ss:$20 sps:$4 sm:$0xff]   ;;  %v13284_v62 = vld [vmem:[#allocation2 + $0x490] ss:$20 sps:$4 sm:$0xff]  }
  0xba   :  { %v13289_v63 = vld [vmem:[#allocation2 + $0x4b4] ss:$20 sps:$4 sm:$0xff]  }
  0xbc   :  { %2263 = vmatpush1.bf16.msra.mxu0 %v13201_v0  ;;  %2427 = vmatpush1.bf16.msra.mxu1 %v13202_v1  ;;  %v13292_v0 = vld [vmem:[#allocation2 + $0x4bc] ss:$20 sps:$4 sm:$0xff]  }
  0xbd   :  { %2273 = vmatprep.subr.bf16.mxu0 %v13205_v3  ;;  %2437 = vmatprep.subr.bf16.mxu1 %v13208_v4  ;;  %v13287_v1 = vld [vmem:[#allocation2 + $0x4b0] ss:$20 sps:$4 sm:$0xff]  }
  0xbe   :  { %v13295_v3 = vld [vmem:[#allocation2 + $0x4dc] ss:$20 sps:$4 sm:$0xff]   ;;  %v13298_v4 = vld [vmem:[#allocation2 + $0x4e4] ss:$20 sps:$4 sm:$0xff]  }
  0xbf   :  { %2265 = vmatmul.mubr.bf16.vlgmr.msra.gmra.mrb[0].mxu0 %v15556_v5  ;;  %2429 = vmatmul.mubr.bf16.vlgmr.msra.gmra.mrb[0].mxu1 %v15556_v5 }
  0xc0   :  { %2274 = vmatpush1.bf16.msra.mxu0 %v13203_v6  ;;  %2438 = vmatpush1.bf16.msra.mxu1 %v13206_v7  ;;  %v13293_v6 = vld [vmem:[#allocation2 + $0x4d8] ss:$20 sps:$4 sm:$0xff]   ;;  %v13296_v7 = vld [vmem:[#allocation2 + $0x4e0] ss:$20 sps:$4 sm:$0xff]  }
  0xc1   :  { %2275 = vmatprep.subr.bf16.mxu0 %v13211_v8  ;;  %2439 = vmatprep.subr.bf16.mxu1 %v13214_v9  ;;  %v13301_v8 = vld [vmem:[#allocation2 + $0x504] ss:$20 sps:$4 sm:$0xff]   ;;  %v127_v9 = vld [vmem:[%s15995_s0 + $0x10] sm:$0xff] }
  0xc2   :  { %2305 = vmatprep.mubr.bf16.mxu0 %v15563_v32  ;;  %2469 = vmatprep.mubr.bf16.mxu1 %v15563_v32 }
  0xc4   :  { %2276 = vmatpush1.bf16.msra.mxu0 %v13209_v10  ;;  %2440 = vmatpush1.bf16.msra.mxu1 %v13212_v11  ;;  %v13304_v10 = vld [vmem:[#allocation2 + $0x50c] ss:$20 sps:$4 sm:$0xff]  }
  0xc5   :  { %2277 = vmatprep.subr.bf16.mxu0 %v13217_v12  ;;  %2441 = vmatprep.subr.bf16.mxu1 %v13220_v13  ;;  %v13299_v11 = vld [vmem:[#allocation2 + $0x500] ss:$20 sps:$4 sm:$0xff]   ;;  %v13302_v12 = vld [vmem:[#allocation2 + $0x508] ss:$20 sps:$4 sm:$0xff]   ;;  %v15570_v13 = vpack.c.bf16 %v127_v9, %v127_v9  ;;  %v13383_v9 = vld [vmem:[#allocation2 + $0x730] ss:$20 sps:$4 sm:$0xff]  }
  0xc8   :  { %2278 = vmatpush1.bf16.msra.mxu0 %v13215_v14  ;;  %2442 = vmatpush1.bf16.msra.mxu1 %v13218_v15  ;;  %v13307_v14 = vld [vmem:[#allocation2 + $0x52c] ss:$20 sps:$4 sm:$0xff]   ;;  %v13310_v15 = vld [vmem:[#allocation2 + $0x534] ss:$20 sps:$4 sm:$0xff]  }
  0xc9   :  { %2279 = vmatprep.subr.bf16.mxu0 %v13223_v16  ;;  %2443 = vmatprep.subr.bf16.mxu1 %v13226_v17  ;;  %v130_v16 = vld [vmem:[%s15995_s0 + $0x28] sm:$0xff] }
  0xca   :  { %v15575_v17 = vpack.c.bf16 %v130_v16, %v130_v16  ;;  %v13397_v16 = vld [vmem:[#allocation2 + $0x784] ss:$20 sps:$4 sm:$0xff]  }
  0xcc   :  { %2280 = vmatpush1.bf16.msra.mxu0 %v13221_v18  ;;  %2444 = vmatpush1.bf16.msra.mxu1 %v13224_v19  ;;  %v13305_v18 = vld [vmem:[#allocation2 + $0x528] ss:$20 sps:$4 sm:$0xff]   ;;  %v13308_v19 = vld [vmem:[#allocation2 + $0x530] ss:$20 sps:$4 sm:$0xff]  }
  0xcd   :  { %2281 = vmatprep.subr.bf16.mxu0 %v13229_v20  ;;  %2445 = vmatprep.subr.bf16.mxu1 %v13232_v21  ;;  %v13313_v20 = vld [vmem:[#allocation2 + $0x554] ss:$20 sps:$4 sm:$0xff]   ;;  %v13316_v21 = vld [vmem:[#allocation2 + $0x55c] ss:$20 sps:$4 sm:$0xff]  }
  0xd0   :  { %2282 = vmatpush1.bf16.msra.mxu0 %v13227_v22  ;;  %2446 = vmatpush1.bf16.msra.mxu1 %v13230_v23  ;;  %v13311_v22 = vld [vmem:[#allocation2 + $0x550] ss:$20 sps:$4 sm:$0xff]   ;;  %v13314_v23 = vld [vmem:[#allocation2 + $0x558] ss:$20 sps:$4 sm:$0xff]  }
  0xd1   :  { %2283 = vmatprep.subr.bf16.mxu0 %v13235_v24  ;;  %2447 = vmatprep.subr.bf16.mxu1 %v13238_v25  ;;  %v13319_v24 = vld [vmem:[#allocation2 + $0x57c] ss:$20 sps:$4 sm:$0xff]   ;;  %v13322_v25 = vld [vmem:[#allocation2 + $0x584] ss:$20 sps:$4 sm:$0xff]  }
  0xd4   :  { %2284 = vmatpush1.bf16.msra.mxu0 %v13233_v26  ;;  %2448 = vmatpush1.bf16.msra.mxu1 %v13236_v27  ;;  %v13317_v26 = vld [vmem:[#allocation2 + $0x578] ss:$20 sps:$4 sm:$0xff]   ;;  %v13320_v27 = vld [vmem:[#allocation2 + $0x580] ss:$20 sps:$4 sm:$0xff]  }
  0xd5   :  { %2285 = vmatprep.subr.bf16.mxu0 %v13241_v28  ;;  %2449 = vmatprep.subr.bf16.mxu1 %v13244_v29  ;;  %v13325_v28 = vld [vmem:[#allocation2 + $0x5a4] ss:$20 sps:$4 sm:$0xff]   ;;  %v13328_v29 = vld [vmem:[#allocation2 + $0x5ac] ss:$20 sps:$4 sm:$0xff]  }
  0xd8   :  { %2286 = vmatpush1.bf16.msra.mxu0 %v13239_v31  ;;  %2450 = vmatpush1.bf16.msra.mxu1 %v13242_v33  ;;  %v13326_v31 = vld [vmem:[#allocation2 + $0x5a8] ss:$20 sps:$4 sm:$0xff]   ;;  %v13331_v33 = vld [vmem:[#allocation2 + $0x5cc] ss:$20 sps:$4 sm:$0xff]  }
  0xd9   :  { %2287 = vmatprep.subr.bf16.mxu0 %v13247_v34  ;;  %2451 = vmatprep.subr.bf16.mxu1 %v13250_v35  ;;  %v13334_v34 = vld [vmem:[#allocation2 + $0x5d4] ss:$20 sps:$4 sm:$0xff]  }
  0xda   :  { %v13329_v35 = vld [vmem:[#allocation2 + $0x5c8] ss:$20 sps:$4 sm:$0xff]  }
  0xdc   :  { %2288 = vmatpush1.bf16.msra.mxu0 %v13245_v36  ;;  %2452 = vmatpush1.bf16.msra.mxu1 %v13248_v37  ;;  %v13332_v36 = vld [vmem:[#allocation2 + $0x5d0] ss:$20 sps:$4 sm:$0xff]   ;;  %v13337_v37 = vld [vmem:[#allocation2 + $0x5f4] ss:$20 sps:$4 sm:$0xff]  }
  0xdd   :  { %2289 = vmatprep.subr.bf16.mxu0 %v13253_v38  ;;  %2453 = vmatprep.subr.bf16.mxu1 %v13256_v39  ;;  %v13340_v38 = vld [vmem:[#allocation2 + $0x5fc] ss:$20 sps:$4 sm:$0xff]  }
  0xde   :  { %v13335_v39 = vld [vmem:[#allocation2 + $0x5f0] ss:$20 sps:$4 sm:$0xff]  }
  0xe0   :  { %2290 = vmatpush1.bf16.msra.mxu0 %v13251_v40  ;;  %2454 = vmatpush1.bf16.msra.mxu1 %v13254_v41  ;;  %v13338_v40 = vld [vmem:[#allocation2 + $0x5f8] ss:$20 sps:$4 sm:$0xff]   ;;  %v13343_v41 = vld [vmem:[#allocation2 + $0x61c] ss:$20 sps:$4 sm:$0xff]  }
  0xe1   :  { %2291 = vmatprep.subr.bf16.mxu0 %v13259_v42  ;;  %2455 = vmatprep.subr.bf16.mxu1 %v13262_v43  ;;  %v13346_v42 = vld [vmem:[#allocation2 + $0x624] ss:$20 sps:$4 sm:$0xff]  }
  0xe2   :  { %v13341_v43 = vld [vmem:[#allocation2 + $0x618] ss:$20 sps:$4 sm:$0xff]  }
  0xe4   :  { %2292 = vmatpush1.bf16.msra.mxu0 %v13257_v44  ;;  %2456 = vmatpush1.bf16.msra.mxu1 %v13260_v45  ;;  %v13344_v44 = vld [vmem:[#allocation2 + $0x620] ss:$20 sps:$4 sm:$0xff]   ;;  %v13349_v45 = vld [vmem:[#allocation2 + $0x644] ss:$20 sps:$4 sm:$0xff]  }
  0xe5   :  { %2293 = vmatprep.subr.bf16.mxu0 %v13265_v46  ;;  %2457 = vmatprep.subr.bf16.mxu1 %v13268_v47  ;;  %v13352_v46 = vld [vmem:[#allocation2 + $0x64c] ss:$20 sps:$4 sm:$0xff]  }
  0xe6   :  { %v13347_v47 = vld [vmem:[#allocation2 + $0x640] ss:$20 sps:$4 sm:$0xff]  }
  0xe8   :  { %2294 = vmatpush1.bf16.msra.mxu0 %v13263_v49  ;;  %2458 = vmatpush1.bf16.msra.mxu1 %v13266_v50  ;;  %v13350_v49 = vld [vmem:[#allocation2 + $0x648] ss:$20 sps:$4 sm:$0xff]   ;;  %v13355_v50 = vld [vmem:[#allocation2 + $0x66c] ss:$20 sps:$4 sm:$0xff]  }
  0xe9   :  { %2295 = vmatprep.subr.bf16.mxu0 %v13271_v51  ;;  %2459 = vmatprep.subr.bf16.mxu1 %v13274_v52  ;;  %v13358_v51 = vld [vmem:[#allocation2 + $0x674] ss:$20 sps:$4 sm:$0xff]  }
  0xea   :  { %v13353_v52 = vld [vmem:[#allocation2 + $0x668] ss:$20 sps:$4 sm:$0xff]  }
  0xec   :  { %2296 = vmatpush1.bf16.msra.mxu0 %v13269_v53  ;;  %2460 = vmatpush1.bf16.msra.mxu1 %v13272_v54  ;;  %v13356_v53 = vld [vmem:[#allocation2 + $0x670] ss:$20 sps:$4 sm:$0xff]   ;;  %v13361_v54 = vld [vmem:[#allocation2 + $0x694] ss:$20 sps:$4 sm:$0xff]  }
  0xed   :  { %2297 = vmatprep.subr.bf16.mxu0 %v13277_v55  ;;  %2461 = vmatprep.subr.bf16.mxu1 %v13280_v56  ;;  %v13364_v55 = vld [vmem:[#allocation2 + $0x69c] ss:$20 sps:$4 sm:$0xff]  }
  0xee   :  { %v13359_v56 = vld [vmem:[#allocation2 + $0x690] ss:$20 sps:$4 sm:$0xff]  }
  0xf0   :  { %2298 = vmatpush1.bf16.msra.mxu0 %v13275_v57  ;;  %2462 = vmatpush1.bf16.msra.mxu1 %v13278_v58  ;;  %v13362_v57 = vld [vmem:[#allocation2 + $0x698] ss:$20 sps:$4 sm:$0xff]   ;;  %v13367_v58 = vld [vmem:[#allocation2 + $0x6bc] ss:$20 sps:$4 sm:$0xff]  }
  0xf1   :  { %2299 = vmatprep.subr.bf16.mxu0 %v13283_v59  ;;  %2463 = vmatprep.subr.bf16.mxu1 %v13286_v60  ;;  %v13370_v59 = vld [vmem:[#allocation2 + $0x6c4] ss:$20 sps:$4 sm:$0xff]  }
  0xf2   :  { %v13365_v60 = vld [vmem:[#allocation2 + $0x6b8] ss:$20 sps:$4 sm:$0xff]  }
  0xf4   :  { %2300 = vmatpush1.bf16.msra.mxu0 %v13281_v61  ;;  %2464 = vmatpush1.bf16.msra.mxu1 %v13284_v62  ;;  %v13368_v61 = vld [vmem:[#allocation2 + $0x6c0] ss:$20 sps:$4 sm:$0xff]   ;;  %v13373_v62 = vld [vmem:[#allocation2 + $0x6e4] ss:$20 sps:$4 sm:$0xff]  }
  0xf5   :  { %2301 = vmatprep.subr.bf16.mxu0 %v13289_v63  ;;  %2465 = vmatprep.subr.bf16.mxu1 %v13292_v0  ;;  %v13376_v63 = vld [vmem:[#allocation2 + $0x6ec] ss:$20 sps:$4 sm:$0xff]  }
  0xf6   :  { %v13371_v0 = vld [vmem:[#allocation2 + $0x6e0] ss:$20 sps:$4 sm:$0xff]  }
  0xf8   :  { %2302 = vmatpush1.bf16.msra.mxu0 %v13287_v1  ;;  %2466 = vmatpush1.bf16.msra.mxu1 %v13290_v2  ;;  %v13374_v1 = vld [vmem:[#allocation2 + $0x6e8] ss:$20 sps:$4 sm:$0xff]   ;;  %v13379_v2 = vld [vmem:[#allocation2 + $0x70c] ss:$20 sps:$4 sm:$0xff]  }
  0xf9   :  { %2303 = vmatprep.subr.bf16.mxu0 %v13295_v3  ;;  %2467 = vmatprep.subr.bf16.mxu1 %v13298_v4  ;;  %v13382_v3 = vld [vmem:[#allocation2 + $0x714] ss:$20 sps:$4 sm:$0xff]  }
  0xfa   :  { %v13377_v4 = vld [vmem:[#allocation2 + $0x708] ss:$20 sps:$4 sm:$0xff]  }
  0xfc   :  { %2304 = vmatpush1.bf16.msra.mxu0 %v13293_v6  ;;  %2468 = vmatpush1.bf16.msra.mxu1 %v13296_v7  ;;  %v13380_v6 = vld [vmem:[#allocation2 + $0x710] ss:$20 sps:$4 sm:$0xff]   ;;  %v13385_v7 = vld [vmem:[#allocation2 + $0x734] ss:$20 sps:$4 sm:$0xff]  }
  0xfd   :  { %2314 = vmatprep.subr.bf16.mxu0 %v13301_v8  ;;  %2478 = vmatprep.subr.bf16.mxu1 %v13304_v10  ;;  %v13388_v8 = vld [vmem:[#allocation2 + $0x73c] ss:$20 sps:$4 sm:$0xff]   ;;  %v13386_v10 = vld [vmem:[#allocation2 + $0x738] ss:$20 sps:$4 sm:$0xff]  }
  0xff   :  { %2306 = vmatmul.mubr.bf16.vlgmr.msra.gmra.mrb[0].mxu0 %v15570_v13  ;;  %2470 = vmatmul.mubr.bf16.vlgmr.msra.gmra.mrb[0].mxu1 %v15570_v13 }
 0x100   :  { %2315 = vmatpush1.bf16.msra.mxu0 %v13299_v11  ;;  %2479 = vmatpush1.bf16.msra.mxu1 %v13302_v12  ;;  %v13391_v11 = vld [vmem:[#allocation2 + $0x75c] ss:$20 sps:$4 sm:$0xff]   ;;  %v13394_v12 = vld [vmem:[#allocation2 + $0x764] ss:$20 sps:$4 sm:$0xff]  }
 0x101   :  { %2316 = vmatprep.subr.bf16.mxu0 %v13307_v14  ;;  %2480 = vmatprep.subr.bf16.mxu1 %v13310_v15  ;;  %v13389_v14 = vld [vmem:[#allocation2 + $0x758] ss:$20 sps:$4 sm:$0xff]   ;;  %v13392_v15 = vld [vmem:[#allocation2 + $0x760] ss:$20 sps:$4 sm:$0xff]  }
 0x102   :  { %2346 = vmatprep.mubr.bf16.mxu0 %v15575_v17  ;;  %2510 = vmatprep.mubr.bf16.mxu1 %v15575_v17 }
 0x104   :  { %2317 = vmatpush1.bf16.msra.mxu0 %v13305_v18  ;;  %2481 = vmatpush1.bf16.msra.mxu1 %v13308_v19  ;;  %v129_v18 = vld [vmem:[%s15995_s0 + $0x20] sm:$0xff] }
 0x105   :  { %2318 = vmatprep.subr.bf16.mxu0 %v13313_v20  ;;  %2482 = vmatprep.subr.bf16.mxu1 %v13316_v21  ;;  %v13400_v19 = vld [vmem:[#allocation2 + $0x78c] ss:$20 sps:$4 sm:$0xff]   ;;  %v13398_v21 = vld [vmem:[#allocation2 + $0x788] ss:$20 sps:$4 sm:$0xff]  }
 0x106   :  { %v13395_v20 = vld [vmem:[#allocation2 + $0x780] ss:$20 sps:$4 sm:$0xff]  }
 0x108   :  { %2319 = vmatpush1.bf16.msra.mxu0 %v13311_v22  ;;  %2483 = vmatpush1.bf16.msra.mxu1 %v13314_v23  ;;  %v15584_v22 = vpack.c.bf16 %v129_v18, %v129_v18  ;;  %v132_v23 = vld [vmem:[%s15995_s0 + $0x38] sm:$0xff]  ;;  %v13481_v18 = vld [vmem:[#allocation2 + $0x9b4] ss:$20 sps:$4 sm:$0xff]  }
 0x109   :  { %2320 = vmatprep.subr.bf16.mxu0 %v13319_v24  ;;  %2484 = vmatprep.subr.bf16.mxu1 %v13322_v25  ;;  %v13403_v24 = vld [vmem:[#allocation2 + $0x7ac] ss:$20 sps:$4 sm:$0xff]   ;;  %v13406_v25 = vld [vmem:[#allocation2 + $0x7b4] ss:$20 sps:$4 sm:$0xff]  }
 0x10c   :  { %2321 = vmatpush1.bf16.msra.mxu0 %v13317_v26  ;;  %2485 = vmatpush1.bf16.msra.mxu1 %v13320_v27  ;;  %v13401_v26 = vld [vmem:[#allocation2 + $0x7a8] ss:$20 sps:$4 sm:$0xff]   ;;  %v15589_v27 = vpack.c.bf16 %v132_v23, %v132_v23 }
 0x10d   :  { %2322 = vmatprep.subr.bf16.mxu0 %v13325_v28  ;;  %2486 = vmatprep.subr.bf16.mxu1 %v13328_v29  ;;  %v13404_v28 = vld [vmem:[#allocation2 + $0x7b0] ss:$20 sps:$4 sm:$0xff]   ;;  %v13409_v29 = vld [vmem:[#allocation2 + $0x7d4] ss:$20 sps:$4 sm:$0xff]  }
 0x10e   :  { %v13487_v23 = vld [vmem:[#allocation2 + $0x9dc] ss:$20 sps:$4 sm:$0xff]  }
 0x110   :  { %2323 = vmatpush1.bf16.msra.mxu0 %v13323_v30  ;;  %2487 = vmatpush1.bf16.msra.mxu1 %v13326_v31  ;;  %v13412_v30 = vld [vmem:[#allocation2 + $0x7dc] ss:$20 sps:$4 sm:$0xff]  }
 0x111   :  { %2324 = vmatprep.subr.bf16.mxu0 %v13331_v33  ;;  %2488 = vmatprep.subr.bf16.mxu1 %v13334_v34  ;;  %v13407_v31 = vld [vmem:[#allocation2 + $0x7d0] ss:$20 sps:$4 sm:$0xff]   ;;  %v13410_v33 = vld [vmem:[#allocation2 + $0x7d8] ss:$20 sps:$4 sm:$0xff]  }
 0x112   :  { %v13415_v34 = vld [vmem:[#allocation2 + $0x7fc] ss:$20 sps:$4 sm:$0xff]  }
 0x114   :  { %2325 = vmatpush1.bf16.msra.mxu0 %v13329_v35  ;;  %2489 = vmatpush1.bf16.msra.mxu1 %v13332_v36  ;;  %v13418_v35 = vld [vmem:[#allocation2 + $0x804] ss:$20 sps:$4 sm:$0xff]  }
 0x115   :  { %2326 = vmatprep.subr.bf16.mxu0 %v13337_v37  ;;  %2490 = vmatprep.subr.bf16.mxu1 %v13340_v38  ;;  %v13413_v36 = vld [vmem:[#allocation2 + $0x7f8] ss:$20 sps:$4 sm:$0xff]   ;;  %v13416_v37 = vld [vmem:[#allocation2 + $0x800] ss:$20 sps:$4 sm:$0xff]  }
 0x116   :  { %v13421_v38 = vld [vmem:[#allocation2 + $0x824] ss:$20 sps:$4 sm:$0xff]  }
 0x118   :  { %2327 = vmatpush1.bf16.msra.mxu0 %v13335_v39  ;;  %2491 = vmatpush1.bf16.msra.mxu1 %v13338_v40  ;;  %v13424_v39 = vld [vmem:[#allocation2 + $0x82c] ss:$20 sps:$4 sm:$0xff]  }
 0x119   :  { %2328 = vmatprep.subr.bf16.mxu0 %v13343_v41  ;;  %2492 = vmatprep.subr.bf16.mxu1 %v13346_v42  ;;  %v13419_v40 = vld [vmem:[#allocation2 + $0x820] ss:$20 sps:$4 sm:$0xff]   ;;  %v13422_v41 = vld [vmem:[#allocation2 + $0x828] ss:$20 sps:$4 sm:$0xff]  }
 0x11a   :  { %v13427_v42 = vld [vmem:[#allocation2 + $0x84c] ss:$20 sps:$4 sm:$0xff]  }
 0x11c   :  { %2329 = vmatpush1.bf16.msra.mxu0 %v13341_v43  ;;  %2493 = vmatpush1.bf16.msra.mxu1 %v13344_v44  ;;  %v13430_v43 = vld [vmem:[#allocation2 + $0x854] ss:$20 sps:$4 sm:$0xff]  }
 0x11d   :  { %2330 = vmatprep.subr.bf16.mxu0 %v13349_v45  ;;  %2494 = vmatprep.subr.bf16.mxu1 %v13352_v46  ;;  %v13425_v44 = vld [vmem:[#allocation2 + $0x848] ss:$20 sps:$4 sm:$0xff]   ;;  %v13428_v45 = vld [vmem:[#allocation2 + $0x850] ss:$20 sps:$4 sm:$0xff]  }
 0x11e   :  { %v13433_v46 = vld [vmem:[#allocation2 + $0x874] ss:$20 sps:$4 sm:$0xff]  }
 0x120   :  { %2331 = vmatpush1.bf16.msra.mxu0 %v13347_v47  ;;  %2495 = vmatpush1.bf16.msra.mxu1 %v13350_v49  ;;  %v13436_v47 = vld [vmem:[#allocation2 + $0x87c] ss:$20 sps:$4 sm:$0xff]  }
 0x121   :  { %2332 = vmatprep.subr.bf16.mxu0 %v13355_v50  ;;  %2496 = vmatprep.subr.bf16.mxu1 %v13358_v51  ;;  %v13431_v49 = vld [vmem:[#allocation2 + $0x870] ss:$20 sps:$4 sm:$0xff]   ;;  %v13434_v50 = vld [vmem:[#allocation2 + $0x878] ss:$20 sps:$4 sm:$0xff]  }
 0x122   :  { %v13439_v51 = vld [vmem:[#allocation2 + $0x89c] ss:$20 sps:$4 sm:$0xff]  }
 0x124   :  { %2333 = vmatpush1.bf16.msra.mxu0 %v13353_v52  ;;  %2497 = vmatpush1.bf16.msra.mxu1 %v13356_v53  ;;  %v13442_v52 = vld [vmem:[#allocation2 + $0x8a4] ss:$20 sps:$4 sm:$0xff]  }
 0x125   :  { %2334 = vmatprep.subr.bf16.mxu0 %v13361_v54  ;;  %2498 = vmatprep.subr.bf16.mxu1 %v13364_v55  ;;  %v13437_v53 = vld [vmem:[#allocation2 + $0x898] ss:$20 sps:$4 sm:$0xff]   ;;  %v13440_v54 = vld [vmem:[#allocation2 + $0x8a0] ss:$20 sps:$4 sm:$0xff]  }
 0x126   :  { %v13445_v55 = vld [vmem:[#allocation2 + $0x8c4] ss:$20 sps:$4 sm:$0xff]  }
 0x128   :  { %2335 = vmatpush1.bf16.msra.mxu0 %v13359_v56  ;;  %2499 = vmatpush1.bf16.msra.mxu1 %v13362_v57  ;;  %v13448_v56 = vld [vmem:[#allocation2 + $0x8cc] ss:$20 sps:$4 sm:$0xff]  }
 0x129   :  { %2336 = vmatprep.subr.bf16.mxu0 %v13367_v58  ;;  %2500 = vmatprep.subr.bf16.mxu1 %v13370_v59  ;;  %v13443_v57 = vld [vmem:[#allocation2 + $0x8c0] ss:$20 sps:$4 sm:$0xff]   ;;  %v13446_v58 = vld [vmem:[#allocation2 + $0x8c8] ss:$20 sps:$4 sm:$0xff]  }
 0x12a   :  { %v13451_v59 = vld [vmem:[#allocation2 + $0x8ec] ss:$20 sps:$4 sm:$0xff]  }
 0x12c   :  { %2337 = vmatpush1.bf16.msra.mxu0 %v13365_v60  ;;  %2501 = vmatpush1.bf16.msra.mxu1 %v13368_v61  ;;  %v13454_v60 = vld [vmem:[#allocation2 + $0x8f4] ss:$20 sps:$4 sm:$0xff]  }
 0x12d   :  { %2338 = vmatprep.subr.bf16.mxu0 %v13373_v62  ;;  %2502 = vmatprep.subr.bf16.mxu1 %v13376_v63  ;;  %v13449_v61 = vld [vmem:[#allocation2 + $0x8e8] ss:$20 sps:$4 sm:$0xff]   ;;  %v13452_v62 = vld [vmem:[#allocation2 + $0x8f0] ss:$20 sps:$4 sm:$0xff]  }
 0x12e   :  { %v13457_v63 = vld [vmem:[#allocation2 + $0x914] ss:$20 sps:$4 sm:$0xff]  }
 0x130   :  { %2339 = vmatpush1.bf16.msra.mxu0 %v13371_v0  ;;  %2503 = vmatpush1.bf16.msra.mxu1 %v13374_v1  ;;  %v13460_v0 = vld [vmem:[#allocation2 + $0x91c] ss:$20 sps:$4 sm:$0xff]  }
 0x131   :  { %2340 = vmatprep.subr.bf16.mxu0 %v13379_v2  ;;  %2504 = vmatprep.subr.bf16.mxu1 %v13382_v3  ;;  %v13455_v1 = vld [vmem:[#allocation2 + $0x910] ss:$20 sps:$4 sm:$0xff]   ;;  %v13458_v2 = vld [vmem:[#allocation2 + $0x918] ss:$20 sps:$4 sm:$0xff]  }
 0x132   :  { %v13463_v3 = vld [vmem:[#allocation2 + $0x93c] ss:$20 sps:$4 sm:$0xff]  }
 0x134   :  { %2341 = vmatpush1.bf16.msra.mxu0 %v13377_v4  ;;  %2505 = vmatpush1.bf16.msra.mxu1 %v13380_v6  ;;  %v13466_v4 = vld [vmem:[#allocation2 + $0x944] ss:$20 sps:$4 sm:$0xff]  }
 0x135   :  { %2342 = vmatprep.subr.bf16.mxu0 %v13385_v7  ;;  %2506 = vmatprep.subr.bf16.mxu1 %v13388_v8  ;;  %v13461_v6 = vld [vmem:[#allocation2 + $0x938] ss:$20 sps:$4 sm:$0xff]   ;;  %v13464_v7 = vld [vmem:[#allocation2 + $0x940] ss:$20 sps:$4 sm:$0xff]  }
 0x136   :  { %v13469_v8 = vld [vmem:[#allocation2 + $0x964] ss:$20 sps:$4 sm:$0xff]  }
 0x138   :  { %2343 = vmatpush1.bf16.msra.mxu0 %v13383_v9  ;;  %2507 = vmatpush1.bf16.msra.mxu1 %v13386_v10  ;;  %v13472_v9 = vld [vmem:[#allocation2 + $0x96c] ss:$20 sps:$4 sm:$0xff]  }
 0x139   :  { %2344 = vmatprep.subr.bf16.mxu0 %v13391_v11  ;;  %2508 = vmatprep.subr.bf16.mxu1 %v13394_v12  ;;  %v13467_v10 = vld [vmem:[#allocation2 + $0x960] ss:$20 sps:$4 sm:$0xff]   ;;  %v13470_v11 = vld [vmem:[#allocation2 + $0x968] ss:$20 sps:$4 sm:$0xff]  }
 0x13a   :  { %v13475_v12 = vld [vmem:[#allocation2 + $0x98c] ss:$20 sps:$4 sm:$0xff]  }
 0x13c   :  { %2345 = vmatpush1.bf16.msra.mxu0 %v13389_v14  ;;  %2509 = vmatpush1.bf16.msra.mxu1 %v13392_v15  ;;  %v13478_v14 = vld [vmem:[#allocation2 + $0x994] ss:$20 sps:$4 sm:$0xff]  }
 0x13d   :  { %2355 = vmatprep.subr.bf16.mxu0 %v13397_v16  ;;  %2519 = vmatprep.subr.bf16.mxu1 %v13400_v19  ;;  %v13473_v15 = vld [vmem:[#allocation2 + $0x988] ss:$20 sps:$4 sm:$0xff]   ;;  %v13476_v16 = vld [vmem:[#allocation2 + $0x990] ss:$20 sps:$4 sm:$0xff]  }
 0x13e   :  { %v13484_v19 = vld [vmem:[#allocation2 + $0x9bc] ss:$20 sps:$4 sm:$0xff]  }
 0x13f   :  { %2347 = vmatmul.mubr.bf16.vlgmr.msra.gmra.mrb[0].mxu0 %v15584_v22  ;;  %2511 = vmatmul.mubr.bf16.vlgmr.msra.gmra.mrb[0].mxu1 %v15584_v22 }
 0x140   :  { %2356 = vmatpush1.bf16.msra.mxu0 %v13395_v20  ;;  %2520 = vmatpush1.bf16.msra.mxu1 %v13398_v21  ;;  %v13479_v20 = vld [vmem:[#allocation2 + $0x9b0] ss:$20 sps:$4 sm:$0xff]   ;;  %v13482_v21 = vld [vmem:[#allocation2 + $0x9b8] ss:$20 sps:$4 sm:$0xff]  }
 0x141   :  { %2357 = vmatprep.subr.bf16.mxu0 %v13403_v24  ;;  %2521 = vmatprep.subr.bf16.mxu1 %v13406_v25  ;;  %v13490_v24 = vld [vmem:[#allocation2 + $0x9e4] ss:$20 sps:$4 sm:$0xff]  }
 0x142   :  { %2387 = vmatprep.mubr.bf16.mxu0 %v15589_v27  ;;  %2551 = vmatprep.mubr.bf16.mxu1 %v15589_v27  ;;  %v13485_v25 = vld [vmem:[#allocation2 + $0x9d8] ss:$20 sps:$4 sm:$0xff]  }
 0x144   :  { %2358 = vmatpush1.bf16.msra.mxu0 %v13401_v26  ;;  %2522 = vmatpush1.bf16.msra.mxu1 %v13404_v28  ;;  %v13488_v26 = vld [vmem:[#allocation2 + $0x9e0] ss:$20 sps:$4 sm:$0xff]  }
 0x145   :  { %2359 = vmatprep.subr.bf16.mxu0 %v13409_v29  ;;  %2523 = vmatprep.subr.bf16.mxu1 %v13412_v30  ;;  %v131_v28 = vld [vmem:[%s15995_s0 + $0x30] sm:$0xff] }
 0x146   :  { %v13491_v29 = vld [vmem:[#allocation2 + $0x150] ss:$20 sps:$4 sm:$0xff]  }
 0x147   :  { %v13492_v30 = vld [vmem:[#allocation2 + $0x3d0] ss:$20 sps:$4 sm:$0xff]  }
 0x148   :  { %2360 = vmatpush1.bf16.msra.mxu0 %v13407_v31  ;;  %2524 = vmatpush1.bf16.msra.mxu1 %v13410_v33  ;;  %v15598_v31 = vpack.c.bf16 %v131_v28, %v131_v28  ;;  %v13493_v33 = vld [vmem:[#allocation2 + $0x10] ss:$20 sps:$4 sm:$0xff]   ;;  %v13552_v28 = vld [vmem:[#allocation2 + $0x9e8] ss:$20 sps:$4 sm:$0xff]  }
 0x149   :  { %2361 = vmatprep.subr.bf16.mxu0 %v13415_v34  ;;  %2525 = vmatprep.subr.bf16.mxu1 %v13418_v35  ;;  %v13494_v34 = vld [vmem:[#allocation2 + $0x290] ss:$20 sps:$4 sm:$0xff]   ;;  %v13495_v35 = vld [vmem:[#allocation2 + $0x178] ss:$20 sps:$4 sm:$0xff]  }
 0x14c   :  { %2362 = vmatpush1.bf16.msra.mxu0 %v13413_v36  ;;  %2526 = vmatpush1.bf16.msra.mxu1 %v13416_v37  ;;  %v13496_v36 = vld [vmem:[#allocation2 + $0x3f8] ss:$20 sps:$4 sm:$0xff]  }
 0x14d   :  { %2363 = vmatprep.subr.bf16.mxu0 %v13421_v38  ;;  %2527 = vmatprep.subr.bf16.mxu1 %v13424_v39  ;;  %v13497_v37 = vld [vmem:[#allocation2 + $0x38] ss:$20 sps:$4 sm:$0xff]   ;;  %v13499_v39 = vld [vmem:[#allocation2 + $0x1a0] ss:$20 sps:$4 sm:$0xff]  }
 0x14e   :  { %v13498_v38 = vld [vmem:[#allocation2 + $0x2b8] ss:$20 sps:$4 sm:$0xff]  }
 0x150   :  { %2364 = vmatpush1.bf16.msra.mxu0 %v13419_v40  ;;  %2528 = vmatpush1.bf16.msra.mxu1 %v13422_v41  ;;  %v13500_v40 = vld [vmem:[#allocation2 + $0x420] ss:$20 sps:$4 sm:$0xff]  }
 0x151   :  { %2365 = vmatprep.subr.bf16.mxu0 %v13427_v42  ;;  %2529 = vmatprep.subr.bf16.mxu1 %v13430_v43  ;;  %v13501_v41 = vld [vmem:[#allocation2 + $0x60] ss:$20 sps:$4 sm:$0xff]   ;;  %v13503_v43 = vld [vmem:[#allocation2 + $0x1c8] ss:$20 sps:$4 sm:$0xff]  }
 0x152   :  { %v13502_v42 = vld [vmem:[#allocation2 + $0x2e0] ss:$20 sps:$4 sm:$0xff]  }
 0x154   :  { %2366 = vmatpush1.bf16.msra.mxu0 %v13425_v44  ;;  %2530 = vmatpush1.bf16.msra.mxu1 %v13428_v45  ;;  %v13504_v44 = vld [vmem:[#allocation2 + $0x448] ss:$20 sps:$4 sm:$0xff]  }
 0x155   :  { %2367 = vmatprep.subr.bf16.mxu0 %v13433_v46  ;;  %2531 = vmatprep.subr.bf16.mxu1 %v13436_v47  ;;  %v13505_v45 = vld [vmem:[#allocation2 + $0x88] ss:$20 sps:$4 sm:$0xff]   ;;  %v13507_v47 = vld [vmem:[#allocation2 + $0x1f0] ss:$20 sps:$4 sm:$0xff]  }
 0x156   :  { %v13506_v46 = vld [vmem:[#allocation2 + $0x308] ss:$20 sps:$4 sm:$0xff]  }
 0x158   :  { %2368 = vmatpush1.bf16.msra.mxu0 %v13431_v49  ;;  %2532 = vmatpush1.bf16.msra.mxu1 %v13434_v50  ;;  %v13508_v49 = vld [vmem:[#allocation2 + $0x470] ss:$20 sps:$4 sm:$0xff]  }
 0x159   :  { %2369 = vmatprep.subr.bf16.mxu0 %v13439_v51  ;;  %2533 = vmatprep.subr.bf16.mxu1 %v13442_v52  ;;  %v13509_v50 = vld [vmem:[#allocation2 + $0xb0] ss:$20 sps:$4 sm:$0xff]   ;;  %v13512_v51 = vld [vmem:[#allocation2 + $0x498] ss:$20 sps:$4 sm:$0xff]  }
 0x15a   :  { %v13513_v52 = vld [vmem:[#allocation2 + $0xd8] ss:$20 sps:$4 sm:$0xff]  }
 0x15c   :  { %2370 = vmatpush1.bf16.msra.mxu0 %v13437_v53  ;;  %2534 = vmatpush1.bf16.msra.mxu1 %v13440_v54  ;;  %v13514_v53 = vld [vmem:[#allocation2 + $0x358] ss:$20 sps:$4 sm:$0xff]   ;;  %v13515_v54 = vld [vmem:[#allocation2 + $0x240] ss:$20 sps:$4 sm:$0xff]  }
 0x15d   :  { %2371 = vmatprep.subr.bf16.mxu0 %v13445_v55  ;;  %2535 = vmatprep.subr.bf16.mxu1 %v13448_v56  ;;  %v13516_v55 = vld [vmem:[#allocation2 + $0x4c0] ss:$20 sps:$4 sm:$0xff]  }
 0x15e   :  { %v13517_v56 = vld [vmem:[#allocation2 + $0x100] ss:$20 sps:$4 sm:$0xff]  }
 0x160   :  { %2372 = vmatpush1.bf16.msra.mxu0 %v13443_v57  ;;  %2536 = vmatpush1.bf16.msra.mxu1 %v13446_v58  ;;  %v13518_v57 = vld [vmem:[#allocation2 + $0x380] ss:$20 sps:$4 sm:$0xff]   ;;  %v13519_v58 = vld [vmem:[#allocation2 + $0x268] ss:$20 sps:$4 sm:$0xff]  }
 0x161   :  { %2373 = vmatprep.subr.bf16.mxu0 %v13451_v59  ;;  %2537 = vmatprep.subr.bf16.mxu1 %v13454_v60  ;;  %v13520_v59 = vld [vmem:[#allocation2 + $0x4e8] ss:$20 sps:$4 sm:$0xff]  }
 0x162   :  { %v13521_v60 = vld [vmem:[#allocation2 + $0x128] ss:$20 sps:$4 sm:$0xff]  }
 0x164   :  { %2374 = vmatpush1.bf16.msra.mxu0 %v13449_v61  ;;  %2538 = vmatpush1.bf16.msra.mxu1 %v13452_v62  ;;  %v13522_v61 = vld [vmem:[#allocation2 + $0x3a8] ss:$20 sps:$4 sm:$0xff]   ;;  %v13523_v62 = vld [vmem:[#allocation2 + $0x650] ss:$20 sps:$4 sm:$0xff]  }
 0x165   :  { %2375 = vmatprep.subr.bf16.mxu0 %v13457_v63  ;;  %2539 = vmatprep.subr.bf16.mxu1 %v13460_v0  ;;  %v13524_v63 = vld [vmem:[#allocation2 + $0x8d0] ss:$20 sps:$4 sm:$0xff]  }
 0x166   :  { %v13525_v0 = vld [vmem:[#allocation2 + $0x510] ss:$20 sps:$4 sm:$0xff]  }
 0x168   :  { %2376 = vmatpush1.bf16.msra.mxu0 %v13455_v1  ;;  %2540 = vmatpush1.bf16.msra.mxu1 %v13458_v2  ;;  %v13526_v1 = vld [vmem:[#allocation2 + $0x790] ss:$20 sps:$4 sm:$0xff]   ;;  %v13527_v2 = vld [vmem:[#allocation2 + $0x678] ss:$20 sps:$4 sm:$0xff]  }
 0x169   :  { %2377 = vmatprep.subr.bf16.mxu0 %v13463_v3  ;;  %2541 = vmatprep.subr.bf16.mxu1 %v13466_v4  ;;  %v13528_v3 = vld [vmem:[#allocation2 + $0x8f8] ss:$20 sps:$4 sm:$0xff]  }
 0x16a   :  { %v13529_v4 = vld [vmem:[#allocation2 + $0x538] ss:$20 sps:$4 sm:$0xff]  }
 0x16c   :  { %2378 = vmatpush1.bf16.msra.mxu0 %v13461_v6  ;;  %2542 = vmatpush1.bf16.msra.mxu1 %v13464_v7  ;;  %v13530_v6 = vld [vmem:[#allocation2 + $0x7b8] ss:$20 sps:$4 sm:$0xff]   ;;  %v13531_v7 = vld [vmem:[#allocation2 + $0x6a0] ss:$20 sps:$4 sm:$0xff]  }
 0x16d   :  { %2379 = vmatprep.subr.bf16.mxu0 %v13469_v8  ;;  %2543 = vmatprep.subr.bf16.mxu1 %v13472_v9  ;;  %v13532_v8 = vld [vmem:[#allocation2 + $0x920] ss:$20 sps:$4 sm:$0xff]  }
 0x16e   :  { %v13533_v9 = vld [vmem:[#allocation2 + $0x560] ss:$20 sps:$4 sm:$0xff]  }
 0x170   :  { %2380 = vmatpush1.bf16.msra.mxu0 %v13467_v10  ;;  %2544 = vmatpush1.bf16.msra.mxu1 %v13470_v11  ;;  %v13534_v10 = vld [vmem:[#allocation2 + $0x7e0] ss:$20 sps:$4 sm:$0xff]   ;;  %v13537_v11 = vld [vmem:[#allocation2 + $0x588] ss:$20 sps:$4 sm:$0xff]  }
 0x171   :  { %2381 = vmatprep.subr.bf16.mxu0 %v13475_v12  ;;  %2545 = vmatprep.subr.bf16.mxu1 %v13478_v14  ;;  %v13538_v12 = vld [vmem:[#allocation2 + $0x808] ss:$20 sps:$4 sm:$0xff]   ;;  %v13539_v14 = vld [vmem:[#allocation2 + $0x6f0] ss:$20 sps:$4 sm:$0xff]  }
 0x174   :  { %2382 = vmatpush1.bf16.msra.mxu0 %v13473_v15  ;;  %2546 = vmatpush1.bf16.msra.mxu1 %v13476_v16  ;;  %v13540_v15 = vld [vmem:[#allocation2 + $0x970] ss:$20 sps:$4 sm:$0xff]   ;;  %v13543_v16 = vld [vmem:[#allocation2 + $0x718] ss:$20 sps:$4 sm:$0xff]  }
 0x175   :  { %2383 = vmatprep.subr.bf16.mxu0 %v13481_v18  ;;  %2547 = vmatprep.subr.bf16.mxu1 %v13484_v19  ;;  %v13544_v18 = vld [vmem:[#allocation2 + $0x998] ss:$20 sps:$4 sm:$0xff]  }
 0x176   :  { %v13545_v19 = vld [vmem:[#allocation2 + $0x5d8] ss:$20 sps:$4 sm:$0xff]  }
 0x178   :  { %2384 = vmatpush1.bf16.msra.mxu0 %v13479_v20  ;;  %2548 = vmatpush1.bf16.msra.mxu1 %v13482_v21  ;;  %v13546_v20 = vld [vmem:[#allocation2 + $0x858] ss:$20 sps:$4 sm:$0xff]   ;;  %v13547_v21 = vld [vmem:[#allocation2 + $0x740] ss:$20 sps:$4 sm:$0xff]  }
 0x179   :  { %2385 = vmatprep.subr.bf16.mxu0 %v13487_v23  ;;  %2549 = vmatprep.subr.bf16.mxu1 %v13490_v24  ;;  %v13548_v23 = vld [vmem:[#allocation2 + $0x9c0] ss:$20 sps:$4 sm:$0xff]  }
 0x17a   :  { %v13549_v24 = vld [vmem:[#allocation2 + $0x600] ss:$20 sps:$4 sm:$0xff]  }
 0x17c   :  { %2386 = vmatpush1.bf16.msra.mxu0 %v13485_v25  ;;  %2550 = vmatpush1.bf16.msra.mxu1 %v13488_v26  ;;  %v13550_v25 = vld [vmem:[#allocation2 + $0x880] ss:$20 sps:$4 sm:$0xff]   ;;  %v13551_v26 = vld [vmem:[#allocation2 + $0x768] ss:$20 sps:$4 sm:$0xff]  }
 0x17d   :  { %12863 = vmatprep.subr.bf16.mxu0 %v13491_v29  ;;  %12885 = vmatprep.subr.bf16.mxu1 %v13492_v30  ;;  %v13553_v29 = vld [vmem:[#allocation2 + $0x628] ss:$20 sps:$4 sm:$0xff]  }
 0x17e   :  { %v13554_v30 = vld [vmem:[#allocation2 + $0x8a8] ss:$20 sps:$4 sm:$0xff]  }
 0x17f   :  { %2388 = vmatmul.mubr.bf16.vlgmr.msra.gmra.mrb[0].mxu0 %v15598_v31  ;;  %2552 = vmatmul.mubr.bf16.vlgmr.msra.gmra.mrb[0].mxu1 %v15598_v31 }
 0x180   :  { %12864 = vmatpush3.bf16.msra.mxu0 %v13493_v33  ;;  %12886 = vmatpush3.bf16.msra.mxu1 %v13494_v34  ;;  %v13557_v33 = vld [vmem:[#allocation6 + $0x4] ss:$20 sps:$4 sm:$0xff]   ;;  %v13560_v34 = vld [vmem:[#allocation6 + $0xc] ss:$20 sps:$4 sm:$0xff]  }
 0x181   :  { %12865 = vmatprep.subr.bf16.mxu0 %v13495_v35  ;;  %12887 = vmatprep.subr.bf16.mxu1 %v13496_v36  ;;  %v142_v35 = vld [vmem:[%s15996_s1 + $0x8] sm:$0xff] }
 0x182   :  { %2592 = vmatprep.mubr.bf16.mxu0 %v15549_v48  ;;  %2632 = vmatprep.mubr.bf16.mxu1 %v15563_v32  ;;  %v13510_v48 = vld [vmem:[#allocation2 + $0x330] ss:$20 sps:$4 sm:$0xff]   ;;  %v13511_v32 = vld [vmem:[#allocation2 + $0x218] ss:$20 sps:$4 sm:$0xff]  }
 0x183   :  { %v13555_v36 = vld [vmem:[#allocation6] ss:$20 sps:$4 sm:$0xff]  }
 0x184   :  { %12866 = vmatpush3.bf16.msra.mxu0 %v13497_v37  ;;  %12888 = vmatpush3.bf16.msra.mxu1 %v13498_v38  ;;  %v13558_v37 = vld [vmem:[#allocation6 + $0x8] ss:$20 sps:$4 sm:$0xff]   ;;  %v13563_v38 = vld [vmem:[#allocation6 + $0x2c] ss:$20 sps:$4 sm:$0xff]  }
 0x185   :  { %12867 = vmatprep.subr.bf16.mxu0 %v13499_v39  ;;  %12889 = vmatprep.subr.bf16.mxu1 %v13500_v40  ;;  %v13566_v39 = vld [vmem:[#allocation6 + $0x34] ss:$20 sps:$4 sm:$0xff]   ;;  %v15611_v40 = vpack.c.bf16 %v142_v35, %v142_v35  ;;  %v13653_v35 = vld [vmem:[#allocation6 + $0x284] ss:$20 sps:$4 sm:$0xff]  }
 0x188   :  { %12868 = vmatpush3.bf16.msra.mxu0 %v13501_v41  ;;  %12890 = vmatpush3.bf16.msra.mxu1 %v13502_v42  ;;  %v13561_v41 = vld [vmem:[#allocation6 + $0x28] ss:$20 sps:$4 sm:$0xff]   ;;  %v13564_v42 = vld [vmem:[#allocation6 + $0x30] ss:$20 sps:$4 sm:$0xff]  }
 0x189   :  { %12869 = vmatprep.subr.bf16.mxu0 %v13503_v43  ;;  %12891 = vmatprep.subr.bf16.mxu1 %v13504_v44  ;;  %v13569_v43 = vld [vmem:[#allocation6 + $0x54] ss:$20 sps:$4 sm:$0xff]   ;;  %v13572_v44 = vld [vmem:[#allocation6 + $0x5c] ss:$20 sps:$4 sm:$0xff]  }
 0x18c   :  { %12870 = vmatpush3.bf16.msra.mxu0 %v13505_v45  ;;  %12892 = vmatpush3.bf16.msra.mxu1 %v13506_v46  ;;  %v13567_v45 = vld [vmem:[#allocation6 + $0x50] ss:$20 sps:$4 sm:$0xff]   ;;  %v13570_v46 = vld [vmem:[#allocation6 + $0x58] ss:$20 sps:$4 sm:$0xff]  }
 0x18d   :  { %12871 = vmatprep.subr.bf16.mxu0 %v13507_v47  ;;  %12893 = vmatprep.subr.bf16.mxu1 %v13508_v49  ;;  %v13575_v47 = vld [vmem:[#allocation6 + $0x7c] ss:$20 sps:$4 sm:$0xff]   ;;  %v13576_v49 = vld [vmem:[#allocation6 + $0x80] ss:$20 sps:$4 sm:$0xff]  }
 0x190   :  { %12872 = vmatpush3.bf16.msra.mxu0 %v13509_v50  ;;  %12894 = vmatpush3.bf16.msra.mxu1 %v13510_v48  ;;  %v13581_v50 = vld [vmem:[#allocation6 + $0xa4] ss:$20 sps:$4 sm:$0xff]   ;;  %v13584_v48 = vld [vmem:[#allocation6 + $0xac] ss:$20 sps:$4 sm:$0xff]  }
 0x191   :  { %12873 = vmatprep.subr.bf16.mxu0 %v13511_v32  ;;  %12895 = vmatprep.subr.bf16.mxu1 %v13512_v51  ;;  %v13579_v32 = vld [vmem:[#allocation6 + $0xa0] ss:$20 sps:$4 sm:$0xff]   ;;  %v13582_v51 = vld [vmem:[#allocation6 + $0xa8] ss:$20 sps:$4 sm:$0xff]  }
 0x194   :  { %12874 = vmatpush3.bf16.msra.mxu0 %v13513_v52  ;;  %12896 = vmatpush3.bf16.msra.mxu1 %v13514_v53  ;;  %v13587_v52 = vld [vmem:[#allocation6 + $0xcc] ss:$20 sps:$4 sm:$0xff]   ;;  %v13590_v53 = vld [vmem:[#allocation6 + $0xd4] ss:$20 sps:$4 sm:$0xff]  }
 0x195   :  { %12875 = vmatprep.subr.bf16.mxu0 %v13515_v54  ;;  %12897 = vmatprep.subr.bf16.mxu1 %v13516_v55  ;;  %v13585_v54 = vld [vmem:[#allocation6 + $0xc8] ss:$20 sps:$4 sm:$0xff]   ;;  %v13588_v55 = vld [vmem:[#allocation6 + $0xd0] ss:$20 sps:$4 sm:$0xff]  }
 0x198   :  { %12876 = vmatpush3.bf16.msra.mxu0 %v13517_v56  ;;  %12898 = vmatpush3.bf16.msra.mxu1 %v13518_v57  ;;  %v13593_v56 = vld [vmem:[#allocation6 + $0xf4] ss:$20 sps:$4 sm:$0xff]   ;;  %v13596_v57 = vld [vmem:[#allocation6 + $0xfc] ss:$20 sps:$4 sm:$0xff]  }
 0x199   :  { %12877 = vmatprep.subr.bf16.mxu0 %v13519_v58  ;;  %12899 = vmatprep.subr.bf16.mxu1 %v13520_v59  ;;  %v13591_v58 = vld [vmem:[#allocation6 + $0xf0] ss:$20 sps:$4 sm:$0xff]   ;;  %v13594_v59 = vld [vmem:[#allocation6 + $0xf8] ss:$20 sps:$4 sm:$0xff]  }
 0x19c   :  { %12878 = vmatpush3.bf16.msra.mxu0 %v13521_v60  ;;  %12900 = vmatpush3.bf16.msra.mxu1 %v13522_v61  ;;  %v13599_v60 = vld [vmem:[#allocation6 + $0x11c] ss:$20 sps:$4 sm:$0xff]   ;;  %v13602_v61 = vld [vmem:[#allocation6 + $0x124] ss:$20 sps:$4 sm:$0xff]  }
 0x19d   :  { %12907 = vmatprep.subr.bf16.mxu0 %v13523_v62  ;;  %12929 = vmatprep.subr.bf16.mxu1 %v13524_v63  ;;  %v13597_v62 = vld [vmem:[#allocation6 + $0x118] ss:$20 sps:$4 sm:$0xff]   ;;  %v13600_v63 = vld [vmem:[#allocation6 + $0x120] ss:$20 sps:$4 sm:$0xff]  }
 0x19f   :  { %2593 = vmatmul.mubr.bf16.vlgmr.msra.gmra.mrb[4].mxu0 %v15556_v5  ;;  %2633 = vmatmul.mubr.bf16.vlgmr.msra.gmra.mrb[4].mxu1 %v15570_v13  ;;  %v13535_v5 = vld [vmem:[#allocation2 + $0x6c8] ss:$20 sps:$4 sm:$0xff]  }
 0x1a0   :  { %12908 = vmatpush3.bf16.msra.mxu0 %v13525_v0  ;;  %12930 = vmatpush3.bf16.msra.mxu1 %v13526_v1  ;;  %v13536_v13 = vld [vmem:[#allocation2 + $0x948] ss:$20 sps:$4 sm:$0xff]  }
 0x1a1   :  { %12909 = vmatprep.subr.bf16.mxu0 %v13527_v2  ;;  %12931 = vmatprep.subr.bf16.mxu1 %v13528_v3  ;;  %v13605_v0 = vld [vmem:[#allocation6 + $0x144] ss:$20 sps:$4 sm:$0xff]   ;;  %v13608_v1 = vld [vmem:[#allocation6 + $0x14c] ss:$20 sps:$4 sm:$0xff]   ;;  %v13606_v3 = vld [vmem:[#allocation6 + $0x148] ss:$20 sps:$4 sm:$0xff]  }
 0x1a2   :  { %2672 = vmatprep.mubr.bf16.mxu0 %v15575_v17  ;;  %2712 = vmatprep.mubr.bf16.mxu1 %v15589_v27  ;;  %v13541_v17 = vld [vmem:[#allocation2 + $0x5b0] ss:$20 sps:$4 sm:$0xff]  }
 0x1a3   :  { %v13542_v27 = vld [vmem:[#allocation2 + $0x830] ss:$20 sps:$4 sm:$0xff]  }
 0x1a4   :  { %12910 = vmatpush3.bf16.msra.mxu0 %v13529_v4  ;;  %12932 = vmatpush3.bf16.msra.mxu1 %v13530_v6  ;;  %v13603_v2 = vld [vmem:[#allocation6 + $0x140] ss:$20 sps:$4 sm:$0xff]  }
 0x1a5   :  { %12911 = vmatprep.subr.bf16.mxu0 %v13531_v7  ;;  %12933 = vmatprep.subr.bf16.mxu1 %v13532_v8  ;;  %v13611_v4 = vld [vmem:[#allocation6 + $0x16c] ss:$20 sps:$4 sm:$0xff]   ;;  %v13614_v6 = vld [vmem:[#allocation6 + $0x174] ss:$20 sps:$4 sm:$0xff]   ;;  %v13612_v8 = vld [vmem:[#allocation6 + $0x170] ss:$20 sps:$4 sm:$0xff]  }
 0x1a6   :  { %v13609_v7 = vld [vmem:[#allocation6 + $0x168] ss:$20 sps:$4 sm:$0xff]  }
 0x1a8   :  { %12912 = vmatpush3.bf16.msra.mxu0 %v13533_v9  ;;  %12934 = vmatpush3.bf16.msra.mxu1 %v13534_v10  ;;  %v13617_v9 = vld [vmem:[#allocation6 + $0x194] ss:$20 sps:$4 sm:$0xff]   ;;  %v13620_v10 = vld [vmem:[#allocation6 + $0x19c] ss:$20 sps:$4 sm:$0xff]  }
 0x1a9   :  { %12913 = vmatprep.subr.bf16.mxu0 %v13535_v5  ;;  %12935 = vmatprep.subr.bf16.mxu1 %v13536_v13  ;;  %v13615_v5 = vld [vmem:[#allocation6 + $0x190] ss:$20 sps:$4 sm:$0xff]   ;;  %v13618_v13 = vld [vmem:[#allocation6 + $0x198] ss:$20 sps:$4 sm:$0xff]  }
 0x1ac   :  { %12914 = vmatpush3.bf16.msra.mxu0 %v13537_v11  ;;  %12936 = vmatpush3.bf16.msra.mxu1 %v13538_v12  ;;  %v13623_v11 = vld [vmem:[#allocation6 + $0x1bc] ss:$20 sps:$4 sm:$0xff]   ;;  %v13626_v12 = vld [vmem:[#allocation6 + $0x1c4] ss:$20 sps:$4 sm:$0xff]  }
 0x1ad   :  { %12915 = vmatprep.subr.bf16.mxu0 %v13539_v14  ;;  %12937 = vmatprep.subr.bf16.mxu1 %v13540_v15  ;;  %v13621_v14 = vld [vmem:[#allocation6 + $0x1b8] ss:$20 sps:$4 sm:$0xff]   ;;  %v13624_v15 = vld [vmem:[#allocation6 + $0x1c0] ss:$20 sps:$4 sm:$0xff]  }
 0x1b0   :  { %12916 = vmatpush3.bf16.msra.mxu0 %v13541_v17  ;;  %12938 = vmatpush3.bf16.msra.mxu1 %v13542_v27  ;;  %v13629_v17 = vld [vmem:[#allocation6 + $0x1e4] ss:$20 sps:$4 sm:$0xff]   ;;  %v13632_v27 = vld [vmem:[#allocation6 + $0x1ec] ss:$20 sps:$4 sm:$0xff]  }
 0x1b1   :  { %12917 = vmatprep.subr.bf16.mxu0 %v13543_v16  ;;  %12939 = vmatprep.subr.bf16.mxu1 %v13544_v18  ;;  %v13627_v16 = vld [vmem:[#allocation6 + $0x1e0] ss:$20 sps:$4 sm:$0xff]   ;;  %v13630_v18 = vld [vmem:[#allocation6 + $0x1e8] ss:$20 sps:$4 sm:$0xff]  }
 0x1b4   :  { %12918 = vmatpush3.bf16.msra.mxu0 %v13545_v19  ;;  %12940 = vmatpush3.bf16.msra.mxu1 %v13546_v20  ;;  %v13635_v19 = vld [vmem:[#allocation6 + $0x20c] ss:$20 sps:$4 sm:$0xff]   ;;  %v13638_v20 = vld [vmem:[#allocation6 + $0x214] ss:$20 sps:$4 sm:$0xff]  }
 0x1b5   :  { %12919 = vmatprep.subr.bf16.mxu0 %v13547_v21  ;;  %12941 = vmatprep.subr.bf16.mxu1 %v13548_v23  ;;  %v13633_v21 = vld [vmem:[#allocation6 + $0x208] ss:$20 sps:$4 sm:$0xff]   ;;  %v13636_v23 = vld [vmem:[#allocation6 + $0x210] ss:$20 sps:$4 sm:$0xff]  }
 0x1b8   :  { %12920 = vmatpush3.bf16.msra.mxu0 %v13549_v24  ;;  %12942 = vmatpush3.bf16.msra.mxu1 %v13550_v25  ;;  %v13641_v24 = vld [vmem:[#allocation6 + $0x234] ss:$20 sps:$4 sm:$0xff]   ;;  %v13644_v25 = vld [vmem:[#allocation6 + $0x23c] ss:$20 sps:$4 sm:$0xff]  }
 0x1b9   :  { %12921 = vmatprep.subr.bf16.mxu0 %v13551_v26  ;;  %12943 = vmatprep.subr.bf16.mxu1 %v13552_v28  ;;  %v13639_v26 = vld [vmem:[#allocation6 + $0x230] ss:$20 sps:$4 sm:$0xff]   ;;  %v13642_v28 = vld [vmem:[#allocation6 + $0x238] ss:$20 sps:$4 sm:$0xff]  }
 0x1bc   :  { %12922 = vmatpush3.bf16.msra.mxu0 %v13553_v29  ;;  %12944 = vmatpush3.bf16.msra.mxu1 %v13554_v30  ;;  %v13647_v29 = vld [vmem:[#allocation6 + $0x25c] ss:$20 sps:$4 sm:$0xff]   ;;  %v13650_v30 = vld [vmem:[#allocation6 + $0x264] ss:$20 sps:$4 sm:$0xff]  }
 0x1bd   :  { %4795 = vmatprep.subr.bf16.mxu0 %v13557_v33  ;;  %4959 = vmatprep.subr.bf16.mxu1 %v13560_v34  ;;  %v13645_v33 = vld [vmem:[#allocation6 + $0x258] ss:$20 sps:$4 sm:$0xff]   ;;  %v13648_v34 = vld [vmem:[#allocation6 + $0x260] ss:$20 sps:$4 sm:$0xff]  }
 0x1bf   :  { %2673 = vmatmul.mubr.bf16.vlgmr.msra.gmra.mrb[8].mxu0 %v15584_v22  ;;  %2713 = vmatmul.mubr.bf16.vlgmr.msra.gmra.mrb[8].mxu1 %v15598_v31  ;;  %v13578_v22 = vld [vmem:[#allocation6 + $0x84] ss:$20 sps:$4 sm:$0xff]  }
 0x1c0   :  { %4796 = vmatpush1.bf16.msra.mxu0 %v13555_v36  ;;  %4960 = vmatpush1.bf16.msra.mxu1 %v13558_v37  ;;  %v13573_v31 = vld [vmem:[#allocation6 + $0x78] ss:$20 sps:$4 sm:$0xff]  }
 0x1c1   :  { %4797 = vmatprep.subr.bf16.mxu0 %v13563_v38  ;;  %4961 = vmatprep.subr.bf16.mxu1 %v13566_v39  ;;  %v141_v36 = vld [vmem:[%s15996_s1] sm:$0xff]  ;;  %v144_v38 = vld [vmem:[%s15996_s1 + $0x18] sm:$0xff] }
 0x1c2   :  { %4827 = vmatprep.mubr.bf16.mxu0 %v15611_v40  ;;  %4991 = vmatprep.mubr.bf16.mxu1 %v15611_v40  ;;  %v13656_v37 = vld [vmem:[#allocation6 + $0x28c] ss:$20 sps:$4 sm:$0xff]   ;;  %v15623_v39 = vpack.c.bf16 %v141_v36, %v141_v36  ;;  %v13743_v36 = vld [vmem:[#allocation6 + $0x4dc] ss:$20 sps:$4 sm:$0xff]  }
 0x1c4   :  { %4798 = vmatpush1.bf16.msra.mxu0 %v13561_v41  ;;  %4962 = vmatpush1.bf16.msra.mxu1 %v13564_v42  ;;  %v13651_v41 = vld [vmem:[#allocation6 + $0x280] ss:$20 sps:$4 sm:$0xff]   ;;  %v13654_v42 = vld [vmem:[#allocation6 + $0x288] ss:$20 sps:$4 sm:$0xff]  }
 0x1c5   :  { %4799 = vmatprep.subr.bf16.mxu0 %v13569_v43  ;;  %4963 = vmatprep.subr.bf16.mxu1 %v13572_v44  ;;  %v13659_v43 = vld [vmem:[#allocation6 + $0x2ac] ss:$20 sps:$4 sm:$0xff]   ;;  %v13662_v44 = vld [vmem:[#allocation6 + $0x2b4] ss:$20 sps:$4 sm:$0xff]  }
 0x1c8   :  { %4800 = vmatpush1.bf16.msra.mxu0 %v13567_v45  ;;  %4964 = vmatpush1.bf16.msra.mxu1 %v13570_v46  ;;  %v15625_v45 = vpack.c.bf16 %v144_v38, %v144_v38  ;;  %v13657_v46 = vld [vmem:[#allocation6 + $0x2a8] ss:$20 sps:$4 sm:$0xff]   ;;  %v13741_v38 = vld [vmem:[#allocation6 + $0x4d8] ss:$20 sps:$4 sm:$0xff]  }
 0x1c9   :  { %4801 = vmatprep.subr.bf16.mxu0 %v13575_v47  ;;  %4965 = vmatprep.subr.bf16.mxu1 %v13578_v22  ;;  %v13660_v47 = vld [vmem:[#allocation6 + $0x2b0] ss:$20 sps:$4 sm:$0xff]   ;;  %v13665_v22 = vld [vmem:[#allocation6 + $0x2d4] ss:$20 sps:$4 sm:$0xff]  }
 0x1cc   :  { %4802 = vmatpush1.bf16.msra.mxu0 %v13573_v31  ;;  %4966 = vmatpush1.bf16.msra.mxu1 %v13576_v49  ;;  %v13668_v31 = vld [vmem:[#allocation6 + $0x2dc] ss:$20 sps:$4 sm:$0xff]  }
 0x1cd   :  { %4803 = vmatprep.subr.bf16.mxu0 %v13581_v50  ;;  %4967 = vmatprep.subr.bf16.mxu1 %v13584_v48  ;;  %v13663_v49 = vld [vmem:[#allocation6 + $0x2d0] ss:$20 sps:$4 sm:$0xff]   ;;  %v13666_v50 = vld [vmem:[#allocation6 + $0x2d8] ss:$20 sps:$4 sm:$0xff]  }
 0x1ce   :  { %v13671_v48 = vld [vmem:[#allocation6 + $0x2fc] ss:$20 sps:$4 sm:$0xff]  }
 0x1d0   :  { %4804 = vmatpush1.bf16.msra.mxu0 %v13579_v32  ;;  %4968 = vmatpush1.bf16.msra.mxu1 %v13582_v51  ;;  %v13674_v32 = vld [vmem:[#allocation6 + $0x304] ss:$20 sps:$4 sm:$0xff]  }
 0x1d1   :  { %4805 = vmatprep.subr.bf16.mxu0 %v13587_v52  ;;  %4969 = vmatprep.subr.bf16.mxu1 %v13590_v53  ;;  %v13669_v51 = vld [vmem:[#allocation6 + $0x2f8] ss:$20 sps:$4 sm:$0xff]   ;;  %v13672_v52 = vld [vmem:[#allocation6 + $0x300] ss:$20 sps:$4 sm:$0xff]  }
 0x1d2   :  { %v13677_v53 = vld [vmem:[#allocation6 + $0x324] ss:$20 sps:$4 sm:$0xff]  }
 0x1d4   :  { %4806 = vmatpush1.bf16.msra.mxu0 %v13585_v54  ;;  %4970 = vmatpush1.bf16.msra.mxu1 %v13588_v55  ;;  %v13680_v54 = vld [vmem:[#allocation6 + $0x32c] ss:$20 sps:$4 sm:$0xff]  }
 0x1d5   :  { %4807 = vmatprep.subr.bf16.mxu0 %v13593_v56  ;;  %4971 = vmatprep.subr.bf16.mxu1 %v13596_v57  ;;  %v13675_v55 = vld [vmem:[#allocation6 + $0x320] ss:$20 sps:$4 sm:$0xff]   ;;  %v13678_v56 = vld [vmem:[#allocation6 + $0x328] ss:$20 sps:$4 sm:$0xff]  }
 0x1d6   :  { %v13683_v57 = vld [vmem:[#allocation6 + $0x34c] ss:$20 sps:$4 sm:$0xff]  }
 0x1d8   :  { %4808 = vmatpush1.bf16.msra.mxu0 %v13591_v58  ;;  %4972 = vmatpush1.bf16.msra.mxu1 %v13594_v59  ;;  %v13686_v58 = vld [vmem:[#allocation6 + $0x354] ss:$20 sps:$4 sm:$0xff]  }
 0x1d9   :  { %4809 = vmatprep.subr.bf16.mxu0 %v13599_v60  ;;  %4973 = vmatprep.subr.bf16.mxu1 %v13602_v61  ;;  %v13681_v59 = vld [vmem:[#allocation6 + $0x348] ss:$20 sps:$4 sm:$0xff]   ;;  %v13684_v60 = vld [vmem:[#allocation6 + $0x350] ss:$20 sps:$4 sm:$0xff]  }
 0x1da   :  { %v13689_v61 = vld [vmem:[#allocation6 + $0x374] ss:$20 sps:$4 sm:$0xff]  }
 0x1dc   :  { %4810 = vmatpush1.bf16.msra.mxu0 %v13597_v62  ;;  %4974 = vmatpush1.bf16.msra.mxu1 %v13600_v63  ;;  %v13692_v62 = vld [vmem:[#allocation6 + $0x37c] ss:$20 sps:$4 sm:$0xff]  }
 0x1dd   :  { %4811 = vmatprep.subr.bf16.mxu0 %v13605_v0  ;;  %4975 = vmatprep.subr.bf16.mxu1 %v13608_v1  ;;  %v13687_v63 = vld [vmem:[#allocation6 + $0x370] ss:$20 sps:$4 sm:$0xff]   ;;  %v13690_v0 = vld [vmem:[#allocation6 + $0x378] ss:$20 sps:$4 sm:$0xff]  }
 0x1de   :  { %v13695_v1 = vld [vmem:[#allocation6 + $0x39c] ss:$20 sps:$4 sm:$0xff]  }
 0x1e0   :  { %4812 = vmatpush1.bf16.msra.mxu0 %v13603_v2  ;;  %4976 = vmatpush1.bf16.msra.mxu1 %v13606_v3  ;;  %v13698_v2 = vld [vmem:[#allocation6 + $0x3a4] ss:$20 sps:$4 sm:$0xff]  }
 0x1e1   :  { %4813 = vmatprep.subr.bf16.mxu0 %v13611_v4  ;;  %4977 = vmatprep.subr.bf16.mxu1 %v13614_v6  ;;  %v13693_v3 = vld [vmem:[#allocation6 + $0x398] ss:$20 sps:$4 sm:$0xff]   ;;  %v13696_v4 = vld [vmem:[#allocation6 + $0x3a0] ss:$20 sps:$4 sm:$0xff]  }
 0x1e2   :  { %v13701_v6 = vld [vmem:[#allocation6 + $0x3c4] ss:$20 sps:$4 sm:$0xff]  }
 0x1e4   :  { %4814 = vmatpush1.bf16.msra.mxu0 %v13609_v7  ;;  %4978 = vmatpush1.bf16.msra.mxu1 %v13612_v8  ;;  %v13704_v7 = vld [vmem:[#allocation6 + $0x3cc] ss:$20 sps:$4 sm:$0xff]  }
 0x1e5   :  { %4815 = vmatprep.subr.bf16.mxu0 %v13617_v9  ;;  %4979 = vmatprep.subr.bf16.mxu1 %v13620_v10  ;;  %v13699_v8 = vld [vmem:[#allocation6 + $0x3c0] ss:$20 sps:$4 sm:$0xff]   ;;  %v13702_v9 = vld [vmem:[#allocation6 + $0x3c8] ss:$20 sps:$4 sm:$0xff]  }
 0x1e6   :  { %v13707_v10 = vld [vmem:[#allocation6 + $0x3ec] ss:$20 sps:$4 sm:$0xff]  }
 0x1e8   :  { %4816 = vmatpush1.bf16.msra.mxu0 %v13615_v5  ;;  %4980 = vmatpush1.bf16.msra.mxu1 %v13618_v13  ;;  %v13710_v5 = vld [vmem:[#allocation6 + $0x3f4] ss:$20 sps:$4 sm:$0xff]  }
 0x1e9   :  { %4817 = vmatprep.subr.bf16.mxu0 %v13623_v11  ;;  %4981 = vmatprep.subr.bf16.mxu1 %v13626_v12  ;;  %v13705_v13 = vld [vmem:[#allocation6 + $0x3e8] ss:$20 sps:$4 sm:$0xff]   ;;  %v13708_v11 = vld [vmem:[#allocation6 + $0x3f0] ss:$20 sps:$4 sm:$0xff]  }
 0x1ea   :  { %v13713_v12 = vld [vmem:[#allocation6 + $0x414] ss:$20 sps:$4 sm:$0xff]  }
 0x1ec   :  { %4818 = vmatpush1.bf16.msra.mxu0 %v13621_v14  ;;  %4982 = vmatpush1.bf16.msra.mxu1 %v13624_v15  ;;  %v13716_v14 = vld [vmem:[#allocation6 + $0x41c] ss:$20 sps:$4 sm:$0xff]  }
 0x1ed   :  { %4819 = vmatprep.subr.bf16.mxu0 %v13629_v17  ;;  %4983 = vmatprep.subr.bf16.mxu1 %v13632_v27  ;;  %v13711_v15 = vld [vmem:[#allocation6 + $0x410] ss:$20 sps:$4 sm:$0xff]   ;;  %v13714_v17 = vld [vmem:[#allocation6 + $0x418] ss:$20 sps:$4 sm:$0xff]  }
 0x1ee   :  { %v13719_v27 = vld [vmem:[#allocation6 + $0x43c] ss:$20 sps:$4 sm:$0xff]  }
 0x1f0   :  { %4820 = vmatpush1.bf16.msra.mxu0 %v13627_v16  ;;  %4984 = vmatpush1.bf16.msra.mxu1 %v13630_v18  ;;  %v13722_v16 = vld [vmem:[#allocation6 + $0x444] ss:$20 sps:$4 sm:$0xff]  }
 0x1f1   :  { %4821 = vmatprep.subr.bf16.mxu0 %v13635_v19  ;;  %4985 = vmatprep.subr.bf16.mxu1 %v13638_v20  ;;  %v13717_v18 = vld [vmem:[#allocation6 + $0x438] ss:$20 sps:$4 sm:$0xff]   ;;  %v13720_v19 = vld [vmem:[#allocation6 + $0x440] ss:$20 sps:$4 sm:$0xff]  }
 0x1f2   :  { %v13725_v20 = vld [vmem:[#allocation6 + $0x464] ss:$20 sps:$4 sm:$0xff]  }
 0x1f4   :  { %4822 = vmatpush1.bf16.msra.mxu0 %v13633_v21  ;;  %4986 = vmatpush1.bf16.msra.mxu1 %v13636_v23  ;;  %v13728_v21 = vld [vmem:[#allocation6 + $0x46c] ss:$20 sps:$4 sm:$0xff]  }
 0x1f5   :  { %4823 = vmatprep.subr.bf16.mxu0 %v13641_v24  ;;  %4987 = vmatprep.subr.bf16.mxu1 %v13644_v25  ;;  %v13723_v23 = vld [vmem:[#allocation6 + $0x460] ss:$20 sps:$4 sm:$0xff]   ;;  %v13726_v24 = vld [vmem:[#allocation6 + $0x468] ss:$20 sps:$4 sm:$0xff]  }
 0x1f6   :  { %v13731_v25 = vld [vmem:[#allocation6 + $0x48c] ss:$20 sps:$4 sm:$0xff]  }
 0x1f8   :  { %4824 = vmatpush1.bf16.msra.mxu0 %v13639_v26  ;;  %4988 = vmatpush1.bf16.msra.mxu1 %v13642_v28  ;;  %v13734_v26 = vld [vmem:[#allocation6 + $0x494] ss:$20 sps:$4 sm:$0xff]  }
 0x1f9   :  { %4825 = vmatprep.subr.bf16.mxu0 %v13647_v29  ;;  %4989 = vmatprep.subr.bf16.mxu1 %v13650_v30  ;;  %v13729_v28 = vld [vmem:[#allocation6 + $0x488] ss:$20 sps:$4 sm:$0xff]   ;;  %v13732_v29 = vld [vmem:[#allocation6 + $0x490] ss:$20 sps:$4 sm:$0xff]  }
 0x1fa   :  { %v13737_v30 = vld [vmem:[#allocation6 + $0x4b4] ss:$20 sps:$4 sm:$0xff]  }
 0x1fc   :  { %4826 = vmatpush1.bf16.msra.mxu0 %v13645_v33  ;;  %4990 = vmatpush1.bf16.msra.mxu1 %v13648_v34  ;;  %v13740_v33 = vld [vmem:[#allocation6 + $0x4bc] ss:$20 sps:$4 sm:$0xff]  }
 0x1fd   :  { %4836 = vmatprep.subr.bf16.mxu0 %v13653_v35  ;;  %5000 = vmatprep.subr.bf16.mxu1 %v13656_v37  ;;  %v13735_v34 = vld [vmem:[#allocation6 + $0x4b0] ss:$20 sps:$4 sm:$0xff]   ;;  %v13738_v35 = vld [vmem:[#allocation6 + $0x4b8] ss:$20 sps:$4 sm:$0xff]  }
 0x1fe   :  { %v13746_v37 = vld [vmem:[#allocation6 + $0x4e4] ss:$20 sps:$4 sm:$0xff]  }
 0x1ff   :  { %4828 = vmatmul.mubr.bf16.vlgmr.msra.gmra.mrb[12].mxu0 %v15623_v39  ;;  %4992 = vmatmul.mubr.bf16.vlgmr.msra.gmra.mrb[12].mxu1 %v15623_v39 }
 0x200   :  { %4837 = vmatpush1.bf16.msra.mxu0 %v13651_v41  ;;  %5001 = vmatpush1.bf16.msra.mxu1 %v13654_v42  ;;  %v13744_v41 = vld [vmem:[#allocation6 + $0x4e0] ss:$20 sps:$4 sm:$0xff]   ;;  %v143_v42 = vld [vmem:[%s15996_s1 + $0x10] sm:$0xff] }
 0x201   :  { %4838 = vmatprep.subr.bf16.mxu0 %v13659_v43  ;;  %5002 = vmatprep.subr.bf16.mxu1 %v13662_v44  ;;  %v13749_v43 = vld [vmem:[#allocation6 + $0x504] ss:$20 sps:$4 sm:$0xff]   ;;  %v13752_v44 = vld [vmem:[#allocation6 + $0x50c] ss:$20 sps:$4 sm:$0xff]  }
 0x202   :  { %4868 = vmatprep.mubr.bf16.mxu0 %v15625_v45  ;;  %5032 = vmatprep.mubr.bf16.mxu1 %v15625_v45 }
 0x204   :  { %4839 = vmatpush1.bf16.msra.mxu0 %v13657_v46  ;;  %5003 = vmatpush1.bf16.msra.mxu1 %v13660_v47  ;;  %v13747_v46 = vld [vmem:[#allocation6 + $0x500] ss:$20 sps:$4 sm:$0xff]   ;;  %v15634_v47 = vpack.c.bf16 %v143_v42, %v143_v42 }
 0x205   :  { %4840 = vmatprep.subr.bf16.mxu0 %v13665_v22  ;;  %5004 = vmatprep.subr.bf16.mxu1 %v13668_v31  ;;  %v146_v22 = vld [vmem:[%s15996_s1 + $0x28] sm:$0xff] }
 0x206   :  { %v13750_v31 = vld [vmem:[#allocation6 + $0x508] ss:$20 sps:$4 sm:$0xff]   ;;  %v13795_v42 = vld [vmem:[#allocation6 + $0x640] ss:$20 sps:$4 sm:$0xff]  }
 0x208   :  { %4841 = vmatpush1.bf16.msra.mxu0 %v13663_v49  ;;  %5005 = vmatpush1.bf16.msra.mxu1 %v13666_v50  ;;  %v13755_v49 = vld [vmem:[#allocation6 + $0x52c] ss:$20 sps:$4 sm:$0xff]   ;;  %v13758_v50 = vld [vmem:[#allocation6 + $0x534] ss:$20 sps:$4 sm:$0xff]  }
 0x209   :  { %4842 = vmatprep.subr.bf16.mxu0 %v13671_v48  ;;  %5006 = vmatprep.subr.bf16.mxu1 %v13674_v32  ;;  %v13753_v48 = vld [vmem:[#allocation6 + $0x528] ss:$20 sps:$4 sm:$0xff]   ;;  %v15639_v32 = vpack.c.bf16 %v146_v22, %v146_v22 }
 0x20a   :  { %v13801_v22 = vld [vmem:[#allocation6 + $0x668] ss:$20 sps:$4 sm:$0xff]  }
 0x20c   :  { %4843 = vmatpush1.bf16.msra.mxu0 %v13669_v51  ;;  %5007 = vmatpush1.bf16.msra.mxu1 %v13672_v52  ;;  %v13756_v51 = vld [vmem:[#allocation6 + $0x530] ss:$20 sps:$4 sm:$0xff]   ;;  %v13761_v52 = vld [vmem:[#allocation6 + $0x554] ss:$20 sps:$4 sm:$0xff]  }
 0x20d   :  { %4844 = vmatprep.subr.bf16.mxu0 %v13677_v53  ;;  %5008 = vmatprep.subr.bf16.mxu1 %v13680_v54  ;;  %v13764_v53 = vld [vmem:[#allocation6 + $0x55c] ss:$20 sps:$4 sm:$0xff]  }
 0x20e   :  { %v13759_v54 = vld [vmem:[#allocation6 + $0x550] ss:$20 sps:$4 sm:$0xff]  }
 0x210   :  { %4845 = vmatpush1.bf16.msra.mxu0 %v13675_v55  ;;  %5009 = vmatpush1.bf16.msra.mxu1 %v13678_v56  ;;  %v543_v55 = vlaneseq  ;;  %v13762_v56 = vld [vmem:[#allocation6 + $0x558] ss:$20 sps:$4 sm:$0xff]  }
 0x211   :  { %4846 = vmatprep.subr.bf16.mxu0 %v13683_v57  ;;  %5010 = vmatprep.subr.bf16.mxu1 %v13686_v58  ;;  %v13767_v57 = vld [vmem:[#allocation6 + $0x57c] ss:$20 sps:$4 sm:$0xff]   ;;  %v13770_v58 = vld [vmem:[#allocation6 + $0x584] ss:$20 sps:$4 sm:$0xff]  }
 0x214   :  { %4847 = vmatpush1.bf16.msra.mxu0 %v13681_v59  ;;  %5011 = vmatpush1.bf16.msra.mxu1 %v13684_v60  ;;  %v13765_v59 = vld [vmem:[#allocation6 + $0x578] ss:$20 sps:$4 sm:$0xff]   ;;  %v15645_v60 = vshrl.u32 %v543_v55, 7  ;;  %v13816_v55 = vld [vmem:[#allocation6 + $0x6c0] ss:$20 sps:$4 sm:$0xff]  }
 0x215   :  { %4848 = vmatprep.subr.bf16.mxu0 %v13689_v61  ;;  %5012 = vmatprep.subr.bf16.mxu1 %v13692_v62  ;;  %v13768_v61 = vld [vmem:[#allocation6 + $0x580] ss:$20 sps:$4 sm:$0xff]   ;;  %v13773_v62 = vld [vmem:[#allocation6 + $0x5a4] ss:$20 sps:$4 sm:$0xff]  }
 0x218   :  { %4849 = vmatpush1.bf16.msra.mxu0 %v13687_v63  ;;  %5013 = vmatpush1.bf16.msra.mxu1 %v13690_v0  ;;  %v13776_v63 = vld [vmem:[#allocation6 + $0x5ac] ss:$20 sps:$4 sm:$0xff]  }
 0x219   :  { %4850 = vmatprep.subr.bf16.mxu0 %v13695_v1  ;;  %5014 = vmatprep.subr.bf16.mxu1 %v13698_v2  ;;  %v13771_v0 = vld [vmem:[#allocation6 + $0x5a0] ss:$20 sps:$4 sm:$0xff]   ;;  %v13774_v1 = vld [vmem:[#allocation6 + $0x5a8] ss:$20 sps:$4 sm:$0xff]   ;;  %v15648_v2 = vsub.s32 0, %v15645_v60 }
 0x21c   :  { %4851 = vmatpush1.bf16.msra.mxu0 %v13693_v3  ;;  %5015 = vmatpush1.bf16.msra.mxu1 %v13696_v4  ;;  %v15651_v3 = vsub.s32 2, %v15645_v60  ;;  %v15653_v4 = vld [vmem:[#allocation4] sm:$0x1f] }
 0x21d   :  { %4852 = vmatprep.subr.bf16.mxu0 %v13701_v6  ;;  %5016 = vmatprep.subr.bf16.mxu1 %v13704_v7  ;;  %v15656_v6 = vsub.s32 1, %v15645_v60  ;;  %v15659_v7 = vsub.s32 3, %v15645_v60 }
 0x220   :  { %4853 = vmatpush1.bf16.msra.mxu0 %v13699_v8  ;;  %5017 = vmatpush1.bf16.msra.mxu1 %v13702_v9  ;;  %v13779_v8 = vld [vmem:[#allocation6 + $0x5cc] ss:$20 sps:$4 sm:$0xff]   ;;  %v13782_v9 = vld [vmem:[#allocation6 + $0x5d4] ss:$20 sps:$4 sm:$0xff]  }
 0x221   :  { %4854 = vmatprep.subr.bf16.mxu0 %v13707_v10  ;;  %5018 = vmatprep.subr.bf16.mxu1 %v13710_v5  ;;  %v13777_v10 = vld [vmem:[#allocation6 + $0x5c8] ss:$20 sps:$4 sm:$0xff]   ;;  %v546_v5 = vrot.slane %v15653_v4, %v15648_v2 }
 0x224   :  { %4855 = vmatpush1.bf16.msra.mxu0 %v13705_v13  ;;  %5019 = vmatpush1.bf16.msra.mxu1 %v13708_v11  ;;  %v554_v13 = vrot.slane %v15653_v4, %v15651_v3  ;;  %v550_v11 = vrot.slane %v15653_v4, %v15656_v6 }
 0x225   :  { %4856 = vmatprep.subr.bf16.mxu0 %v13713_v12  ;;  %5020 = vmatprep.subr.bf16.mxu1 %v13716_v14  ;;  %v558_v12 = vrot.slane %v15653_v4, %v15659_v7  ;;  %v13780_v14 = vld [vmem:[#allocation6 + $0x5d0] ss:$20 sps:$4 sm:$0xff]  }
 0x228   :  { %4857 = vmatpush1.bf16.msra.mxu0 %v13711_v15  ;;  %5021 = vmatpush1.bf16.msra.mxu1 %v13714_v17  ;;  %v13785_v15 = vld [vmem:[#allocation6 + $0x5f4] ss:$20 sps:$4 sm:$0xff]   ;;  %v13788_v17 = vld [vmem:[#allocation6 + $0x5fc] ss:$20 sps:$4 sm:$0xff]  }
 0x229   :  { %4858 = vmatprep.subr.bf16.mxu0 %v13719_v27  ;;  %5022 = vmatprep.subr.bf16.mxu1 %v13722_v16 }
 0x22c   :  { %4859 = vmatpush1.bf16.msra.mxu0 %v13717_v18  ;;  %5023 = vmatpush1.bf16.msra.mxu1 %v13720_v19  ;;  %v13783_v18 = vld [vmem:[#allocation6 + $0x5f0] ss:$20 sps:$4 sm:$0xff]  }
 0x22d   :  { %4860 = vmatprep.subr.bf16.mxu0 %v13725_v20  ;;  %5024 = vmatprep.subr.bf16.mxu1 %v13728_v21 }
 0x230   :  { %4861 = vmatpush1.bf16.msra.mxu0 %v13723_v23  ;;  %5025 = vmatpush1.bf16.msra.mxu1 %v13726_v24 }
 0x231   :  { %4862 = vmatprep.subr.bf16.mxu0 %v13731_v25  ;;  %5026 = vmatprep.subr.bf16.mxu1 %v13734_v26 }
 0x234   :  { %4863 = vmatpush1.bf16.msra.mxu0 %v13729_v28  ;;  %5027 = vmatpush1.bf16.msra.mxu1 %v13732_v29  ;;  %v13786_v29 = vld [vmem:[#allocation6 + $0x5f8] ss:$20 sps:$4 sm:$0xff]  }
 0x235   :  { %4864 = vmatprep.subr.bf16.mxu0 %v13737_v30  ;;  %5028 = vmatprep.subr.bf16.mxu1 %v13740_v33 }
 0x238   :  { %4865 = vmatpush1.bf16.msra.mxu0 %v13735_v34  ;;  %5029 = vmatpush1.bf16.msra.mxu1 %v13738_v35  ;;  %v13791_v34 = vld [vmem:[#allocation6 + $0x61c] ss:$20 sps:$4 sm:$0xff]   ;;  %v13794_v35 = vld [vmem:[#allocation6 + $0x624] ss:$20 sps:$4 sm:$0xff]  }
 0x239   :  { %4866 = vmatprep.subr.bf16.mxu0 %v13743_v36  ;;  %5030 = vmatprep.subr.bf16.mxu1 %v13746_v37  ;;  %v13789_v36 = vld [vmem:[#allocation6 + $0x618] ss:$20 sps:$4 sm:$0xff]   ;;  %v13792_v37 = vld [vmem:[#allocation6 + $0x620] ss:$20 sps:$4 sm:$0xff]  }
 0x23c   :  { %4867 = vmatpush1.bf16.msra.mxu0 %v13741_v38  ;;  %5031 = vmatpush1.bf16.msra.mxu1 %v13744_v41  ;;  %v13797_v38 = vld [vmem:[#allocation6 + $0x644] ss:$20 sps:$4 sm:$0xff]   ;;  %v13800_v41 = vld [vmem:[#allocation6 + $0x64c] ss:$20 sps:$4 sm:$0xff]  }
 0x23d   :  { %4877 = vmatprep.subr.bf16.mxu0 %v13749_v43  ;;  %5041 = vmatprep.subr.bf16.mxu1 %v13752_v44  ;;  %v13798_v43 = vld [vmem:[#allocation6 + $0x648] ss:$20 sps:$4 sm:$0xff]   ;;  %v13803_v44 = vld [vmem:[#allocation6 + $0x66c] ss:$20 sps:$4 sm:$0xff]  }
 0x23f   :  { %4869 = vmatmul.mubr.bf16.vlgmr.msra.gmra.mrb[12].mxu0 %v15634_v47  ;;  %5033 = vmatmul.mubr.bf16.vlgmr.msra.gmra.mrb[12].mxu1 %v15634_v47 }
 0x240   :  { %4878 = vmatpush1.bf16.msra.mxu0 %v13747_v46  ;;  %5042 = vmatpush1.bf16.msra.mxu1 %v13750_v31  ;;  %v13806_v46 = vld [vmem:[#allocation6 + $0x674] ss:$20 sps:$4 sm:$0xff]   ;;  %v13804_v31 = vld [vmem:[#allocation6 + $0x670] ss:$20 sps:$4 sm:$0xff]  }
 0x241   :  { %4879 = vmatprep.subr.bf16.mxu0 %v13755_v49  ;;  %5043 = vmatprep.subr.bf16.mxu1 %v13758_v50  ;;  %v13809_v49 = vld [vmem:[#allocation6 + $0x694] ss:$20 sps:$4 sm:$0xff]   ;;  %v13812_v50 = vld [vmem:[#allocation6 + $0x69c] ss:$20 sps:$4 sm:$0xff]  }
 0x242   :  { %4909 = vmatprep.mubr.bf16.mxu0 %v15639_v32  ;;  %5073 = vmatprep.mubr.bf16.mxu1 %v15639_v32 }
 0x244   :  { %4880 = vmatpush1.bf16.msra.mxu0 %v13753_v48  ;;  %5044 = vmatpush1.bf16.msra.mxu1 %v13756_v51  ;;  %v13807_v48 = vld [vmem:[#allocation6 + $0x690] ss:$20 sps:$4 sm:$0xff]   ;;  %v13810_v51 = vld [vmem:[#allocation6 + $0x698] ss:$20 sps:$4 sm:$0xff]  }
 0x245   :  { %4881 = vmatprep.subr.bf16.mxu0 %v13761_v52  ;;  %5045 = vmatprep.subr.bf16.mxu1 %v13764_v53  ;;  %v13815_v52 = vld [vmem:[#allocation6 + $0x6bc] ss:$20 sps:$4 sm:$0xff]   ;;  %v13818_v53 = vld [vmem:[#allocation6 + $0x6c4] ss:$20 sps:$4 sm:$0xff]  }
 0x248   :  { %4882 = vmatpush1.bf16.msra.mxu0 %v13759_v54  ;;  %5046 = vmatpush1.bf16.msra.mxu1 %v13762_v56  ;;  %v13813_v54 = vld [vmem:[#allocation6 + $0x6b8] ss:$20 sps:$4 sm:$0xff]  }
 0x249   :  { %4883 = vmatprep.subr.bf16.mxu0 %v13767_v57  ;;  %5047 = vmatprep.subr.bf16.mxu1 %v13770_v58  ;;  %v13821_v56 = vld [vmem:[#allocation6 + $0x6e4] ss:$20 sps:$4 sm:$0xff]   ;;  %v13824_v57 = vld [vmem:[#allocation6 + $0x6ec] ss:$20 sps:$4 sm:$0xff]  }
 0x24a   :  { %v13819_v58 = vld [vmem:[#allocation6 + $0x6e0] ss:$20 sps:$4 sm:$0xff]  }
 0x24c   :  { %4884 = vmatpush1.bf16.msra.mxu0 %v13765_v59  ;;  %5048 = vmatpush1.bf16.msra.mxu1 %v13768_v61  ;;  %v13822_v59 = vld [vmem:[#allocation6 + $0x6e8] ss:$20 sps:$4 sm:$0xff]   ;;  %v13827_v61 = vld [vmem:[#allocation6 + $0x70c] ss:$20 sps:$4 sm:$0xff]  }
 0x24d   :  { %4885 = vmatprep.subr.bf16.mxu0 %v13773_v62  ;;  %5049 = vmatprep.subr.bf16.mxu1 %v13776_v63  ;;  %v13830_v62 = vld [vmem:[#allocation6 + $0x714] ss:$20 sps:$4 sm:$0xff]   ;;  %v15682_v63 = vsub.s32 4, %v15645_v60 }
 0x250   :  { %4886 = vmatpush1.bf16.msra.mxu0 %v13771_v0  ;;  %5050 = vmatpush1.bf16.msra.mxu1 %v13774_v1  ;;  %v13825_v0 = vld [vmem:[#allocation6 + $0x708] ss:$20 sps:$4 sm:$0xff]   ;;  %v13828_v1 = vld [vmem:[#allocation6 + $0x710] ss:$20 sps:$4 sm:$0xff]  }
 0x251   :  { %4887 = vmatprep.subr.bf16.mxu0 %v13779_v8  ;;  %5051 = vmatprep.subr.bf16.mxu1 %v13782_v9  ;;  %v13833_v8 = vld [vmem:[#allocation6 + $0x734] ss:$20 sps:$4 sm:$0xff]   ;;  %v13836_v9 = vld [vmem:[#allocation6 + $0x73c] ss:$20 sps:$4 sm:$0xff]  }
 0x252   :  { %v2389_v27 = vpop.f32.mrb[0].mxu0  ;;  %v2553_v16 = vpop.f32.mrb[0].mxu1 }
 0x253   :  { %v13039_v19 = vadd.f32 %v2389_v27, %v546_v5  ;;  %v13041_v20 = vadd.f32 %v2553_v16, %v554_v13  ;;  %v2391_v21 = vpop.f32.mrb[1].mxu0  ;;  %v2555_v23 = vpop.f32.mrb[1].mxu1  ;;  %v562_v13 = vrot.slane %v15653_v4, %v15682_v63 }
 0x254   :  { %v13040_v24 = vadd.f32 %v2391_v21, %v550_v11  ;;  %v13042_v25 = vadd.f32 %v2555_v23, %v558_v12  ;;  %v2393_v26 = vpop.f32.mrb[2].mxu0  ;;  %v2557_v28 = vpop.f32.mrb[2].mxu1  ;;  %4888 = vmatpush1.bf16.msra.mxu0 %v13777_v10  ;;  %5052 = vmatpush1.bf16.msra.mxu1 %v13780_v14  ;;  %v13831_v11 = vld [vmem:[#allocation6 + $0x730] ss:$20 sps:$4 sm:$0xff]  }
 0x255   :  { %5283 = vst [vmem:[%s16004_s9] sm:$0xff] %v13039_v19  ;;  %5285 = vst [vmem:[%s16004_s9 + $0x10] sm:$0xff] %v13041_v20  ;;  %v2394_v30 = vpop.f32.mrb[3].mxu0  ;;  %v2558_v33 = vpop.f32.mrb[3].mxu1  ;;  %4889 = vmatprep.subr.bf16.mxu0 %v13785_v15  ;;  %5053 = vmatprep.subr.bf16.mxu1 %v13788_v17  ;;  %v13839_v21 = vld [vmem:[#allocation6 + $0x75c] ss:$20 sps:$4 sm:$0xff]  }
 0x256   :  { %5284 = vst [vmem:[%s16004_s9 + $0x8] sm:$0xff] %v13040_v24  ;;  %5286 = vst [vmem:[%s16004_s9 + $0x18] sm:$0xff] %v13042_v25  ;;  %v13842_v23 = vld [vmem:[#allocation6 + $0x764] ss:$20 sps:$4 sm:$0xff]   ;;  %v13840_v26 = vld [vmem:[#allocation6 + $0x760] ss:$20 sps:$4 sm:$0xff]  }
 0x257   :  { %v13837_v25 = vld [vmem:[#allocation6 + $0x758] ss:$20 sps:$4 sm:$0xff]   ;;  %v13843_v33 = vld [vmem:[#allocation6 + $0x780] ss:$20 sps:$4 sm:$0xff]  }
 0x258   :  { %4890 = vmatpush1.bf16.msra.mxu0 %v13783_v18  ;;  %5054 = vmatpush1.bf16.msra.mxu1 %v13786_v29  ;;  %v13834_v18 = vld [vmem:[#allocation6 + $0x738] ss:$20 sps:$4 sm:$0xff]  }
 0x259   :  { %4891 = vmatprep.subr.bf16.mxu0 %v13791_v34  ;;  %5055 = vmatprep.subr.bf16.mxu1 %v13794_v35  ;;  %v145_v28 = vld [vmem:[%s15996_s1 + $0x20] sm:$0xff]  ;;  %v148_v35 = vld [vmem:[%s15996_s1 + $0x38] sm:$0xff] }
 0x25a   :  { %v13845_v29 = vld [vmem:[#allocation6 + $0x784] ss:$20 sps:$4 sm:$0xff]   ;;  %v13848_v30 = vld [vmem:[#allocation6 + $0x78c] ss:$20 sps:$4 sm:$0xff]   ;;  %v13846_v34 = vld [vmem:[#allocation6 + $0x788] ss:$20 sps:$4 sm:$0xff]  }
 0x25c   :  { %4892 = vmatpush1.bf16.msra.mxu0 %v13789_v36  ;;  %5056 = vmatpush1.bf16.msra.mxu1 %v13792_v37  ;;  %v15694_v36 = vpack.c.bf16 %v145_v28, %v145_v28  ;;  %v13851_v37 = vld [vmem:[#allocation6 + $0x7ac] ss:$20 sps:$4 sm:$0xff]   ;;  %v13902_v28 = vld [vmem:[#allocation6 + $0x8f4] ss:$20 sps:$4 sm:$0xff]  }
 0x25d   :  { %4893 = vmatprep.subr.bf16.mxu0 %v13797_v38  ;;  %5057 = vmatprep.subr.bf16.mxu1 %v13800_v41  ;;  %v13854_v38 = vld [vmem:[#allocation6 + $0x7b4] ss:$20 sps:$4 sm:$0xff]   ;;  %v15696_v41 = vpack.c.bf16 %v148_v35, %v148_v35  ;;  %v13903_v35 = vld [vmem:[#allocation6 + $0x910] ss:$20 sps:$4 sm:$0xff]  }
 0x260   :  { %4894 = vmatpush1.bf16.msra.mxu0 %v13795_v42  ;;  %5058 = vmatpush1.bf16.msra.mxu1 %v13798_v43  ;;  %v13849_v42 = vld [vmem:[#allocation6 + $0x7a8] ss:$20 sps:$4 sm:$0xff]   ;;  %v13852_v43 = vld [vmem:[#allocation6 + $0x7b0] ss:$20 sps:$4 sm:$0xff]  }
 0x261   :  { %4895 = vmatprep.subr.bf16.mxu0 %v13803_v44  ;;  %5059 = vmatprep.subr.bf16.mxu1 %v13806_v46  ;;  %v13857_v44 = vld [vmem:[#allocation6 + $0x7d4] ss:$20 sps:$4 sm:$0xff]   ;;  %v13860_v46 = vld [vmem:[#allocation6 + $0x7dc] ss:$20 sps:$4 sm:$0xff]  }
 0x264   :  { %4896 = vmatpush1.bf16.msra.mxu0 %v13801_v22  ;;  %5060 = vmatpush1.bf16.msra.mxu1 %v13804_v31  ;;  %v13855_v22 = vld [vmem:[#allocation6 + $0x7d0] ss:$20 sps:$4 sm:$0xff]   ;;  %v13858_v31 = vld [vmem:[#allocation6 + $0x7d8] ss:$20 sps:$4 sm:$0xff]  }
 0x265   :  { %4897 = vmatprep.subr.bf16.mxu0 %v13809_v49  ;;  %5061 = vmatprep.subr.bf16.mxu1 %v13812_v50  ;;  %v13863_v49 = vld [vmem:[#allocation6 + $0x7fc] ss:$20 sps:$4 sm:$0xff]   ;;  %v13866_v50 = vld [vmem:[#allocation6 + $0x804] ss:$20 sps:$4 sm:$0xff]  }
 0x268   :  { %4898 = vmatpush1.bf16.msra.mxu0 %v13807_v48  ;;  %5062 = vmatpush1.bf16.msra.mxu1 %v13810_v51  ;;  %v13861_v48 = vld [vmem:[#allocation6 + $0x7f8] ss:$20 sps:$4 sm:$0xff]   ;;  %v13864_v51 = vld [vmem:[#allocation6 + $0x800] ss:$20 sps:$4 sm:$0xff]  }
 0x269   :  { %4899 = vmatprep.subr.bf16.mxu0 %v13815_v52  ;;  %5063 = vmatprep.subr.bf16.mxu1 %v13818_v53  ;;  %v13869_v52 = vld [vmem:[#allocation6 + $0x824] ss:$20 sps:$4 sm:$0xff]   ;;  %v13872_v53 = vld [vmem:[#allocation6 + $0x82c] ss:$20 sps:$4 sm:$0xff]  }
 0x26c   :  { %4900 = vmatpush1.bf16.msra.mxu0 %v13813_v54  ;;  %5064 = vmatpush1.bf16.msra.mxu1 %v13816_v55  ;;  %v13867_v54 = vld [vmem:[#allocation6 + $0x820] ss:$20 sps:$4 sm:$0xff]   ;;  %v13870_v55 = vld [vmem:[#allocation6 + $0x828] ss:$20 sps:$4 sm:$0xff]  }
 0x26d   :  { %4901 = vmatprep.subr.bf16.mxu0 %v13821_v56  ;;  %5065 = vmatprep.subr.bf16.mxu1 %v13824_v57  ;;  %v13875_v56 = vld [vmem:[#allocation6 + $0x84c] ss:$20 sps:$4 sm:$0xff]   ;;  %v13878_v57 = vld [vmem:[#allocation6 + $0x854] ss:$20 sps:$4 sm:$0xff]  }
 0x270   :  { %4902 = vmatpush1.bf16.msra.mxu0 %v13819_v58  ;;  %5066 = vmatpush1.bf16.msra.mxu1 %v13822_v59  ;;  %v13873_v58 = vld [vmem:[#allocation6 + $0x848] ss:$20 sps:$4 sm:$0xff]   ;;  %v13876_v59 = vld [vmem:[#allocation6 + $0x850] ss:$20 sps:$4 sm:$0xff]  }
 0x271   :  { %4903 = vmatprep.subr.bf16.mxu0 %v13827_v61  ;;  %5067 = vmatprep.subr.bf16.mxu1 %v13830_v62  ;;  %v13881_v61 = vld [vmem:[#allocation6 + $0x874] ss:$20 sps:$4 sm:$0xff]   ;;  %v13884_v62 = vld [vmem:[#allocation6 + $0x87c] ss:$20 sps:$4 sm:$0xff]  }
 0x272   :  { %v12879_v10 = vpop.f32.mrb[4].mxu0  ;;  %v12901_v5 = vpop.f32.mrb[4].mxu1 }
 0x273   :  { %v12880_v12 = vpop.f32.mrb[5].mxu0  ;;  %v12902_v14 = vpop.f32.mrb[5].mxu1 }
 0x274   :  { %v12881_v15 = vadd.f32 %v12880_v12, %v12879_v10  ;;  %v12903_v17 = vadd.f32 %v12902_v14, %v12901_v5  ;;  %v12882_v27 = vpop.f32.mrb[6].mxu0  ;;  %v12904_v16 = vpop.f32.mrb[6].mxu1  ;;  %4904 = vmatpush1.bf16.msra.mxu0 %v13825_v0  ;;  %5068 = vmatpush1.bf16.msra.mxu1 %v13828_v1  ;;  %v13879_v12 = vld [vmem:[#allocation6 + $0x870] ss:$20 sps:$4 sm:$0xff]   ;;  %v13882_v14 = vld [vmem:[#allocation6 + $0x878] ss:$20 sps:$4 sm:$0xff]  }
 0x275   :  { %v12883_v19 = vpop.f32.mrb[7].mxu0  ;;  %v12905_v20 = vpop.f32.mrb[7].mxu1  ;;  %4905 = vmatprep.subr.bf16.mxu0 %v13833_v8  ;;  %5069 = vmatprep.subr.bf16.mxu1 %v13836_v9  ;;  %v13887_v27 = vld [vmem:[#allocation6 + $0x89c] ss:$20 sps:$4 sm:$0xff]   ;;  %v13890_v16 = vld [vmem:[#allocation6 + $0x8a4] ss:$20 sps:$4 sm:$0xff]  }
 0x276   :  { %v2595_v24 = vadd.f32 %v12881_v15, %v562_v13  ;;  %v13885_v20 = vld [vmem:[#allocation6 + $0x898] ss:$20 sps:$4 sm:$0xff]  }
 0x278   :  { %v15686_v4 = vadd.f32 %v12903_v17, %v2595_v24  ;;  %4906 = vmatpush1.bf16.msra.mxu0 %v13831_v11  ;;  %5070 = vmatpush1.bf16.msra.mxu1 %v13834_v18  ;;  %v13896_v24 = vld [vmem:[#allocation6 + $0x8cc] ss:$20 sps:$4 sm:$0xff]  }
 0x279   :  { %4907 = vmatprep.subr.bf16.mxu0 %v13839_v21  ;;  %5071 = vmatprep.subr.bf16.mxu1 %v13842_v23  ;;  %v13888_v21 = vld [vmem:[#allocation6 + $0x8a0] ss:$20 sps:$4 sm:$0xff]   ;;  %v13893_v23 = vld [vmem:[#allocation6 + $0x8c4] ss:$20 sps:$4 sm:$0xff]  }
 0x27c   :  { %4908 = vmatpush1.bf16.msra.mxu0 %v13837_v25  ;;  %5072 = vmatpush1.bf16.msra.mxu1 %v13840_v26  ;;  %v13891_v25 = vld [vmem:[#allocation6 + $0x8c0] ss:$20 sps:$4 sm:$0xff]   ;;  %v13894_v26 = vld [vmem:[#allocation6 + $0x8c8] ss:$20 sps:$4 sm:$0xff]  }
 0x27d   :  { %4918 = vmatprep.subr.bf16.mxu0 %v13845_v29  ;;  %5082 = vmatprep.subr.bf16.mxu1 %v13848_v30  ;;  %v13897_v29 = vld [vmem:[#allocation6 + $0x8e8] ss:$20 sps:$4 sm:$0xff]   ;;  %v13900_v30 = vld [vmem:[#allocation6 + $0x8f0] ss:$20 sps:$4 sm:$0xff]  }
 0x27f   :  { %4910 = vmatmul.mubr.bf16.vlgmr.msra.gmra.mrb[12].mxu0 %v15694_v36  ;;  %5074 = vmatmul.mubr.bf16.vlgmr.msra.gmra.mrb[12].mxu1 %v15694_v36 }
 0x280   :  { %4919 = vmatpush1.bf16.msra.mxu0 %v13843_v33  ;;  %5083 = vmatpush1.bf16.msra.mxu1 %v13846_v34  ;;  %v13905_v33 = vld [vmem:[#allocation6 + $0x914] ss:$20 sps:$4 sm:$0xff]   ;;  %v13908_v34 = vld [vmem:[#allocation6 + $0x91c] ss:$20 sps:$4 sm:$0xff]  }
 0x281   :  { %4920 = vmatprep.subr.bf16.mxu0 %v13851_v37  ;;  %5084 = vmatprep.subr.bf16.mxu1 %v13854_v38  ;;  %v13906_v37 = vld [vmem:[#allocation6 + $0x918] ss:$20 sps:$4 sm:$0xff]   ;;  %v13911_v38 = vld [vmem:[#allocation6 + $0x93c] ss:$20 sps:$4 sm:$0xff]  }
 0x282   :  { %4950 = vmatprep.mubr.bf16.mxu0 %v15696_v41  ;;  %5114 = vmatprep.mubr.bf16.mxu1 %v15696_v41 }
 0x284   :  { %4921 = vmatpush1.bf16.msra.mxu0 %v13849_v42  ;;  %5085 = vmatpush1.bf16.msra.mxu1 %v13852_v43  ;;  %v13914_v42 = vld [vmem:[#allocation6 + $0x944] ss:$20 sps:$4 sm:$0xff]  }
 0x285   :  { %4922 = vmatprep.subr.bf16.mxu0 %v13857_v44  ;;  %5086 = vmatprep.subr.bf16.mxu1 %v13860_v46  ;;  %v13909_v43 = vld [vmem:[#allocation6 + $0x938] ss:$20 sps:$4 sm:$0xff]   ;;  %v13912_v44 = vld [vmem:[#allocation6 + $0x940] ss:$20 sps:$4 sm:$0xff]  }
 0x286   :  { %v13917_v46 = vld [vmem:[#allocation6 + $0x964] ss:$20 sps:$4 sm:$0xff]  }
 0x288   :  { %4923 = vmatpush1.bf16.msra.mxu0 %v13855_v22  ;;  %5087 = vmatpush1.bf16.msra.mxu1 %v13858_v31  ;;  %v13920_v22 = vld [vmem:[#allocation6 + $0x96c] ss:$20 sps:$4 sm:$0xff]  }
 0x289   :  { %4924 = vmatprep.subr.bf16.mxu0 %v13863_v49  ;;  %5088 = vmatprep.subr.bf16.mxu1 %v13866_v50  ;;  %v13915_v31 = vld [vmem:[#allocation6 + $0x960] ss:$20 sps:$4 sm:$0xff]   ;;  %v13918_v49 = vld [vmem:[#allocation6 + $0x968] ss:$20 sps:$4 sm:$0xff]  }
 0x28a   :  { %v13923_v50 = vld [vmem:[#allocation6 + $0x98c] ss:$20 sps:$4 sm:$0xff]  }
 0x28c   :  { %4925 = vmatpush1.bf16.msra.mxu0 %v13861_v48  ;;  %5089 = vmatpush1.bf16.msra.mxu1 %v13864_v51  ;;  %v13926_v48 = vld [vmem:[#allocation6 + $0x994] ss:$20 sps:$4 sm:$0xff]  }
 0x28d   :  { %4926 = vmatprep.subr.bf16.mxu0 %v13869_v52  ;;  %5090 = vmatprep.subr.bf16.mxu1 %v13872_v53  ;;  %v13921_v51 = vld [vmem:[#allocation6 + $0x988] ss:$20 sps:$4 sm:$0xff]   ;;  %v13924_v52 = vld [vmem:[#allocation6 + $0x990] ss:$20 sps:$4 sm:$0xff]  }
 0x28e   :  { %v13929_v53 = vld [vmem:[#allocation6 + $0x9b4] ss:$20 sps:$4 sm:$0xff]  }
 0x290   :  { %4927 = vmatpush1.bf16.msra.mxu0 %v13867_v54  ;;  %5091 = vmatpush1.bf16.msra.mxu1 %v13870_v55  ;;  %v13932_v54 = vld [vmem:[#allocation6 + $0x9bc] ss:$20 sps:$4 sm:$0xff]  }
 0x291   :  { %4928 = vmatprep.subr.bf16.mxu0 %v13875_v56  ;;  %5092 = vmatprep.subr.bf16.mxu1 %v13878_v57  ;;  %v13927_v55 = vld [vmem:[#allocation6 + $0x9b0] ss:$20 sps:$4 sm:$0xff]   ;;  %v13930_v56 = vld [vmem:[#allocation6 + $0x9b8] ss:$20 sps:$4 sm:$0xff]  }
 0x292   :  { %v12923_v0 = vpop.f32.mrb[8].mxu0  ;;  %v12945_v1 = vpop.f32.mrb[8].mxu1  ;;  %v13935_v57 = vld [vmem:[#allocation6 + $0x9dc] ss:$20 sps:$4 sm:$0xff]  }
 0x293   :  { %v12924_v8 = vpop.f32.mrb[9].mxu0  ;;  %v12946_v9 = vpop.f32.mrb[9].mxu1 }
 0x294   :  { %v12925_v10 = vadd.f32 %v12924_v8, %v12923_v0  ;;  %v12947_v5 = vadd.f32 %v12946_v9, %v12945_v1  ;;  %v12926_v13 = vpop.f32.mrb[10].mxu0  ;;  %v12948_v11 = vpop.f32.mrb[10].mxu1  ;;  %4929 = vmatpush1.bf16.msra.mxu0 %v13873_v58  ;;  %5093 = vmatpush1.bf16.msra.mxu1 %v13876_v59  ;;  %v13938_v58 = vld [vmem:[#allocation6 + $0x9e4] ss:$20 sps:$4 sm:$0xff]  }
 0x295   :  { %v12927_v15 = vpop.f32.mrb[11].mxu0  ;;  %v12949_v17 = vpop.f32.mrb[11].mxu1  ;;  %4930 = vmatprep.subr.bf16.mxu0 %v13881_v61  ;;  %5094 = vmatprep.subr.bf16.mxu1 %v13884_v62  ;;  %v13933_v59 = vld [vmem:[#allocation6 + $0x9d8] ss:$20 sps:$4 sm:$0xff]   ;;  %v13936_v61 = vld [vmem:[#allocation6 + $0x9e0] ss:$20 sps:$4 sm:$0xff]  }
 0x296   :  { %v2675_v18 = vadd.f32 %v12925_v10, %v15686_v4  ;;  %v13899_v4 = vld [vmem:[#allocation6 + $0x8ec] ss:$20 sps:$4 sm:$0xff]   ;;  %v13939_v0 = vld [vmem:[#allocation6 + $0x150] ss:$20 sps:$4 sm:$0xff]  }
 0x297   :  { %v147_v62 = vld [vmem:[%s15996_s1 + $0x30] sm:$0xff]  ;;  %v13948_v15 = vld [vmem:[#allocation6 + $0x420] ss:$20 sps:$4 sm:$0xff]  }
 0x298   :  { %v2715_v19 = vadd.f32 %v12947_v5, %v2675_v18  ;;  %4931 = vmatpush1.bf16.msra.mxu0 %v13879_v12  ;;  %5095 = vmatpush1.bf16.msra.mxu1 %v13882_v14  ;;  %v13940_v1 = vld [vmem:[#allocation6 + $0x3d0] ss:$20 sps:$4 sm:$0xff]   ;;  %v15709_v10 = vpack.c.bf16 %v147_v62, %v147_v62  ;;  %v13943_v5 = vld [vmem:[#allocation6 + $0x178] ss:$20 sps:$4 sm:$0xff]   ;;  %v13947_v14 = vld [vmem:[#allocation6 + $0x1a0] ss:$20 sps:$4 sm:$0xff]  }
 0x299   :  { %4932 = vmatprep.subr.bf16.mxu0 %v13887_v27  ;;  %5096 = vmatprep.subr.bf16.mxu1 %v13890_v16  ;;  %v13941_v8 = vld [vmem:[#allocation6 + $0x10] ss:$20 sps:$4 sm:$0xff]   ;;  %v13944_v13 = vld [vmem:[#allocation6 + $0x3f8] ss:$20 sps:$4 sm:$0xff]   ;;  %v13949_v17 = vld [vmem:[#allocation6 + $0x60] ss:$20 sps:$4 sm:$0xff]  }
 0x29a   :  { %5287 = vst [vmem:[%s16004_s9 + $0x20] sm:$0xff] %v2715_v19  ;;  %v13942_v9 = vld [vmem:[#allocation6 + $0x290] ss:$20 sps:$4 sm:$0xff]   ;;  %v13945_v11 = vld [vmem:[#allocation6 + $0x38] ss:$20 sps:$4 sm:$0xff]  }
 0x29b   :  { %v13946_v12 = vld [vmem:[#allocation6 + $0x2b8] ss:$20 sps:$4 sm:$0xff]   ;;  %v13950_v27 = vld [vmem:[#allocation6 + $0x2e0] ss:$20 sps:$4 sm:$0xff]   ;;  %v13951_v16 = vld [vmem:[#allocation6 + $0x1c8] ss:$20 sps:$4 sm:$0xff]  }
 0x29c   :  { %4933 = vmatpush1.bf16.msra.mxu0 %v13885_v20  ;;  %5097 = vmatpush1.bf16.msra.mxu1 %v13888_v21  ;;  %v13952_v18 = vld [vmem:[#allocation6 + $0x448] ss:$20 sps:$4 sm:$0xff]   ;;  %v13955_v21 = vld [vmem:[#allocation6 + $0x1f0] ss:$20 sps:$4 sm:$0xff]   ;;  %v13994_v62 = vld [vmem:[#allocation6 + $0x858] ss:$20 sps:$4 sm:$0xff]  }
 0x29d   :  { %4934 = vmatprep.subr.bf16.mxu0 %v13893_v23  ;;  %5098 = vmatprep.subr.bf16.mxu1 %v13896_v24  ;;  %v13953_v19 = vld [vmem:[#allocation6 + $0x88] ss:$20 sps:$4 sm:$0xff]   ;;  %v13956_v23 = vld [vmem:[#allocation6 + $0x470] ss:$20 sps:$4 sm:$0xff]  }
 0x29e   :  { %v13954_v20 = vld [vmem:[#allocation6 + $0x308] ss:$20 sps:$4 sm:$0xff]   ;;  %v13957_v24 = vld [vmem:[#allocation6 + $0xb0] ss:$20 sps:$4 sm:$0xff]  }
 0x2a0   :  { %4935 = vmatpush1.bf16.msra.mxu0 %v13891_v25  ;;  %5099 = vmatpush1.bf16.msra.mxu1 %v13894_v26  ;;  %v13958_v25 = vld [vmem:[#allocation6 + $0x330] ss:$20 sps:$4 sm:$0xff]   ;;  %v13959_v26 = vld [vmem:[#allocation6 + $0x218] ss:$20 sps:$4 sm:$0xff]  }
 0x2a1   :  { %4936 = vmatprep.subr.bf16.mxu0 %v13899_v4  ;;  %5100 = vmatprep.subr.bf16.mxu1 %v13902_v28  ;;  %v13962_v4 = vld [vmem:[#allocation6 + $0x358] ss:$20 sps:$4 sm:$0xff]   ;;  %v13963_v28 = vld [vmem:[#allocation6 + $0x240] ss:$20 sps:$4 sm:$0xff]  }
 0x2a4   :  { %4937 = vmatpush1.bf16.msra.mxu0 %v13897_v29  ;;  %5101 = vmatpush1.bf16.msra.mxu1 %v13900_v30  ;;  %v13964_v29 = vld [vmem:[#allocation6 + $0x4c0] ss:$20 sps:$4 sm:$0xff]  }
 0x2a5   :  { %4938 = vmatprep.subr.bf16.mxu0 %v13905_v33  ;;  %5102 = vmatprep.subr.bf16.mxu1 %v13908_v34  ;;  %v13965_v30 = vld [vmem:[#allocation6 + $0x100] ss:$20 sps:$4 sm:$0xff]   ;;  %v13967_v34 = vld [vmem:[#allocation6 + $0x268] ss:$20 sps:$4 sm:$0xff]  }
 0x2a6   :  { %v13966_v33 = vld [vmem:[#allocation6 + $0x380] ss:$20 sps:$4 sm:$0xff]  }
 0x2a8   :  { %4939 = vmatpush1.bf16.msra.mxu0 %v13903_v35  ;;  %5103 = vmatpush1.bf16.msra.mxu1 %v13906_v37  ;;  %v13968_v35 = vld [vmem:[#allocation6 + $0x4e8] ss:$20 sps:$4 sm:$0xff]  }
 0x2a9   :  { %4940 = vmatprep.subr.bf16.mxu0 %v13911_v38  ;;  %5104 = vmatprep.subr.bf16.mxu1 %v13914_v42  ;;  %v13969_v37 = vld [vmem:[#allocation6 + $0x128] ss:$20 sps:$4 sm:$0xff]   ;;  %v13971_v42 = vld [vmem:[#allocation6 + $0x650] ss:$20 sps:$4 sm:$0xff]  }
 0x2aa   :  { %v13970_v38 = vld [vmem:[#allocation6 + $0x3a8] ss:$20 sps:$4 sm:$0xff]  }
 0x2ac   :  { %4941 = vmatpush1.bf16.msra.mxu0 %v13909_v43  ;;  %5105 = vmatpush1.bf16.msra.mxu1 %v13912_v44  ;;  %v13972_v43 = vld [vmem:[#allocation6 + $0x8d0] ss:$20 sps:$4 sm:$0xff]  }
 0x2ad   :  { %4942 = vmatprep.subr.bf16.mxu0 %v13917_v46  ;;  %5106 = vmatprep.subr.bf16.mxu1 %v13920_v22  ;;  %v13973_v44 = vld [vmem:[#allocation6 + $0x510] ss:$20 sps:$4 sm:$0xff]   ;;  %v13975_v22 = vld [vmem:[#allocation6 + $0x678] ss:$20 sps:$4 sm:$0xff]  }
 0x2ae   :  { %v13974_v46 = vld [vmem:[#allocation6 + $0x790] ss:$20 sps:$4 sm:$0xff]  }
 0x2b0   :  { %4943 = vmatpush1.bf16.msra.mxu0 %v13915_v31  ;;  %5107 = vmatpush1.bf16.msra.mxu1 %v13918_v49  ;;  %v13976_v31 = vld [vmem:[#allocation6 + $0x8f8] ss:$20 sps:$4 sm:$0xff]  }
 0x2b1   :  { %4944 = vmatprep.subr.bf16.mxu0 %v13923_v50  ;;  %5108 = vmatprep.subr.bf16.mxu1 %v13926_v48  ;;  %v13977_v49 = vld [vmem:[#allocation6 + $0x538] ss:$20 sps:$4 sm:$0xff]   ;;  %v13979_v48 = vld [vmem:[#allocation6 + $0x6a0] ss:$20 sps:$4 sm:$0xff]  }
 0x2b2   :  { %v13978_v50 = vld [vmem:[#allocation6 + $0x7b8] ss:$20 sps:$4 sm:$0xff]  }
 0x2b4   :  { %4945 = vmatpush1.bf16.msra.mxu0 %v13921_v51  ;;  %5109 = vmatpush1.bf16.msra.mxu1 %v13924_v52  ;;  %v13980_v51 = vld [vmem:[#allocation6 + $0x920] ss:$20 sps:$4 sm:$0xff]  }
 0x2b5   :  { %4946 = vmatprep.subr.bf16.mxu0 %v13929_v53  ;;  %5110 = vmatprep.subr.bf16.mxu1 %v13932_v54  ;;  %v13981_v52 = vld [vmem:[#allocation6 + $0x560] ss:$20 sps:$4 sm:$0xff]   ;;  %v13983_v54 = vld [vmem:[#allocation6 + $0x6c8] ss:$20 sps:$4 sm:$0xff]  }
 0x2b6   :  { %v13982_v53 = vld [vmem:[#allocation6 + $0x7e0] ss:$20 sps:$4 sm:$0xff]  }
 0x2b8   :  { %4947 = vmatpush1.bf16.msra.mxu0 %v13927_v55  ;;  %5111 = vmatpush1.bf16.msra.mxu1 %v13930_v56  ;;  %v13984_v55 = vld [vmem:[#allocation6 + $0x948] ss:$20 sps:$4 sm:$0xff]   ;;  %v13987_v56 = vld [vmem:[#allocation6 + $0x6f0] ss:$20 sps:$4 sm:$0xff]  }
 0x2b9   :  { %4948 = vmatprep.subr.bf16.mxu0 %v13935_v57  ;;  %5112 = vmatprep.subr.bf16.mxu1 %v13938_v58  ;;  %v13988_v57 = vld [vmem:[#allocation6 + $0x970] ss:$20 sps:$4 sm:$0xff]  }
 0x2ba   :  { %v13989_v58 = vld [vmem:[#allocation6 + $0x5b0] ss:$20 sps:$4 sm:$0xff]  }
 0x2bc   :  { %4949 = vmatpush1.bf16.msra.mxu0 %v13933_v59  ;;  %5113 = vmatpush1.bf16.msra.mxu1 %v13936_v61  ;;  %v13990_v59 = vld [vmem:[#allocation6 + $0x830] ss:$20 sps:$4 sm:$0xff]   ;;  %v13991_v61 = vld [vmem:[#allocation6 + $0x718] ss:$20 sps:$4 sm:$0xff]  }
 0x2bd   :  { %12951 = vmatprep.subr.bf16.mxu0 %v13939_v0  ;;  %12973 = vmatprep.subr.bf16.mxu1 %v13940_v1  ;;  %v13995_v0 = vld [vmem:[#allocation6 + $0x740] ss:$20 sps:$4 sm:$0xff]  }
 0x2be   :  { %v13996_v1 = vld [vmem:[#allocation6 + $0x9c0] ss:$20 sps:$4 sm:$0xff]  }
 0x2bf   :  { %4951 = vmatmul.mubr.bf16.vlgmr.msra.gmra.mrb[12].mxu0 %v15709_v10  ;;  %5115 = vmatmul.mubr.bf16.vlgmr.msra.gmra.mrb[12].mxu1 %v15709_v10 }
 0x2c0   :  { %12952 = vmatpush3.bf16.msra.mxu0 %v13941_v8  ;;  %12974 = vmatpush3.bf16.msra.mxu1 %v13942_v9  ;;  %v13997_v8 = vld [vmem:[#allocation6 + $0x600] ss:$20 sps:$4 sm:$0xff]  }
 0x2c1   :  { %12953 = vmatprep.subr.bf16.mxu0 %v13943_v5  ;;  %12975 = vmatprep.subr.bf16.mxu1 %v13944_v13  ;;  %v13998_v9 = vld [vmem:[#allocation6 + $0x880] ss:$20 sps:$4 sm:$0xff]   ;;  %v13999_v5 = vld [vmem:[#allocation6 + $0x768] ss:$20 sps:$4 sm:$0xff]  }
 0x2c2   :  { %5155 = vmatprep.mubr.bf16.mxu0 %v15611_v40  ;;  %5195 = vmatprep.mubr.bf16.mxu1 %v15625_v45  ;;  %v13960_v40 = vld [vmem:[#allocation6 + $0x498] ss:$20 sps:$4 sm:$0xff]   ;;  %v14000_v13 = vld [vmem:[#allocation6 + $0x9e8] ss:$20 sps:$4 sm:$0xff]  }
 0x2c3   :  { %v13961_v45 = vld [vmem:[#allocation6 + $0xd8] ss:$20 sps:$4 sm:$0xff]  }
 0x2c4   :  { %12954 = vmatpush3.bf16.msra.mxu0 %v13945_v11  ;;  %12976 = vmatpush3.bf16.msra.mxu1 %v13946_v12  ;;  %v14001_v11 = vld [vmem:[#allocation6 + $0x628] ss:$20 sps:$4 sm:$0xff]  }
 0x2c5   :  { %12955 = vmatprep.subr.bf16.mxu0 %v13947_v14  ;;  %12977 = vmatprep.subr.bf16.mxu1 %v13948_v15  ;;  %v14002_v12 = vld [vmem:[#allocation6 + $0x8a8] ss:$20 sps:$4 sm:$0xff]  }
 0x2c6   :  { %v14005_v14 = vld [vmem:[#allocation10 + $0x504] ss:$40 sps:$4 sm:$0xff]  }
 0x2c7   :  { %v14008_v15 = vld [vmem:[#allocation10 + $0x4] ss:$40 sps:$4 sm:$0xff]  }
 0x2c8   :  { %12956 = vmatpush3.bf16.msra.mxu0 %v13949_v17  ;;  %12978 = vmatpush3.bf16.msra.mxu1 %v13950_v27  ;;  %v14003_v17 = vld [vmem:[#allocation10 + $0x500] ss:$40 sps:$4 sm:$0xff]  }
 0x2c9   :  { %12957 = vmatprep.subr.bf16.mxu0 %v13951_v16  ;;  %12979 = vmatprep.subr.bf16.mxu1 %v13952_v18  ;;  %v14006_v27 = vld [vmem:[#allocation10] ss:$40 sps:$4 sm:$0xff]   ;;  %v14011_v16 = vld [vmem:[#allocation10 + $0x554] ss:$40 sps:$4 sm:$0xff]  }
 0x2ca   :  { %v14014_v18 = vld [vmem:[#allocation10 + $0x54] ss:$40 sps:$4 sm:$0xff]  }
 0x2cc   :  { %12958 = vmatpush3.bf16.msra.mxu0 %v13953_v19  ;;  %12980 = vmatpush3.bf16.msra.mxu1 %v13954_v20  ;;  %v14009_v19 = vld [vmem:[#allocation10 + $0x550] ss:$40 sps:$4 sm:$0xff]  }
 0x2cd   :  { %12959 = vmatprep.subr.bf16.mxu0 %v13955_v21  ;;  %12981 = vmatprep.subr.bf16.mxu1 %v13956_v23  ;;  %v14012_v20 = vld [vmem:[#allocation10 + $0x50] ss:$40 sps:$4 sm:$0xff]   ;;  %v14017_v21 = vld [vmem:[#allocation10 + $0x5a4] ss:$40 sps:$4 sm:$0xff]  }
 0x2ce   :  { %v14020_v23 = vld [vmem:[#allocation10 + $0xa4] ss:$40 sps:$4 sm:$0xff]  }
 0x2d0   :  { %12960 = vmatpush3.bf16.msra.mxu0 %v13957_v24  ;;  %12982 = vmatpush3.bf16.msra.mxu1 %v13958_v25  ;;  %v14015_v24 = vld [vmem:[#allocation10 + $0x5a0] ss:$40 sps:$4 sm:$0xff]  }
 0x2d1   :  { %12961 = vmatprep.subr.bf16.mxu0 %v13959_v26  ;;  %12983 = vmatprep.subr.bf16.mxu1 %v13960_v40  ;;  %v14018_v25 = vld [vmem:[#allocation10 + $0xa0] ss:$40 sps:$4 sm:$0xff]   ;;  %v14023_v26 = vld [vmem:[#allocation10 + $0x5f4] ss:$40 sps:$4 sm:$0xff]  }
 0x2d2   :  { %v14026_v40 = vld [vmem:[#allocation10 + $0xf4] ss:$40 sps:$4 sm:$0xff]  }
 0x2d4   :  { %12962 = vmatpush3.bf16.msra.mxu0 %v13961_v45  ;;  %12984 = vmatpush3.bf16.msra.mxu1 %v13962_v4  ;;  %v14021_v45 = vld [vmem:[#allocation10 + $0x5f0] ss:$40 sps:$4 sm:$0xff]  }
 0x2d5   :  { %12963 = vmatprep.subr.bf16.mxu0 %v13963_v28  ;;  %12985 = vmatprep.subr.bf16.mxu1 %v13964_v29  ;;  %v14024_v4 = vld [vmem:[#allocation10 + $0xf0] ss:$40 sps:$4 sm:$0xff]   ;;  %v14029_v28 = vld [vmem:[#allocation10 + $0x644] ss:$40 sps:$4 sm:$0xff]   ;;  %v14030_v29 = vld [vmem:[#allocation10 + $0x140] ss:$40 sps:$4 sm:$0xff]  }
 0x2d8   :  { %12964 = vmatpush3.bf16.msra.mxu0 %v13965_v30  ;;  %12986 = vmatpush3.bf16.msra.mxu1 %v13966_v33  ;;  %v14035_v30 = vld [vmem:[#allocation10 + $0x694] ss:$40 sps:$4 sm:$0xff]  }
 0x2d9   :  { %12965 = vmatprep.subr.bf16.mxu0 %v13967_v34  ;;  %12987 = vmatprep.subr.bf16.mxu1 %v13968_v35  ;;  %v14038_v33 = vld [vmem:[#allocation10 + $0x194] ss:$40 sps:$4 sm:$0xff]   ;;  %v14033_v34 = vld [vmem:[#allocation10 + $0x690] ss:$40 sps:$4 sm:$0xff]  }
 0x2da   :  { %v14036_v35 = vld [vmem:[#allocation10 + $0x190] ss:$40 sps:$4 sm:$0xff]  }
 0x2dc   :  { %12966 = vmatpush3.bf16.msra.mxu0 %v13969_v37  ;;  %12988 = vmatpush3.bf16.msra.mxu1 %v13970_v38  ;;  %v14041_v37 = vld [vmem:[#allocation10 + $0x6e4] ss:$40 sps:$4 sm:$0xff]  }
 0x2dd   :  { %12995 = vmatprep.subr.bf16.mxu0 %v13971_v42  ;;  %13017 = vmatprep.subr.bf16.mxu1 %v13972_v43  ;;  %v14044_v38 = vld [vmem:[#allocation10 + $0x1e4] ss:$40 sps:$4 sm:$0xff]   ;;  %v14039_v42 = vld [vmem:[#allocation10 + $0x6e0] ss:$40 sps:$4 sm:$0xff]  }
 0x2de   :  { %v14042_v43 = vld [vmem:[#allocation10 + $0x1e0] ss:$40 sps:$4 sm:$0xff]  }
 0x2df   :  { %5156 = vmatmul.mubr.bf16.vlgmr.msra.gmra.mrb[16].mxu0 %v15623_v39  ;;  %5196 = vmatmul.mubr.bf16.vlgmr.msra.gmra.mrb[16].mxu1 %v15634_v47  ;;  %v13985_v39 = vld [vmem:[#allocation6 + $0x588] ss:$20 sps:$4 sm:$0xff]  }
 0x2e0   :  { %12996 = vmatpush3.bf16.msra.mxu0 %v13973_v44  ;;  %13018 = vmatpush3.bf16.msra.mxu1 %v13974_v46  ;;  %v13986_v47 = vld [vmem:[#allocation6 + $0x808] ss:$20 sps:$4 sm:$0xff]  }
 0x2e1   :  { %12997 = vmatprep.subr.bf16.mxu0 %v13975_v22  ;;  %13019 = vmatprep.subr.bf16.mxu1 %v13976_v31  ;;  %v14047_v44 = vld [vmem:[#allocation10 + $0x734] ss:$40 sps:$4 sm:$0xff]   ;;  %v14045_v22 = vld [vmem:[#allocation10 + $0x730] ss:$40 sps:$4 sm:$0xff]  }
 0x2e2   :  { %5235 = vmatprep.mubr.bf16.mxu0 %v15639_v32  ;;  %5275 = vmatprep.mubr.bf16.mxu1 %v15696_v41  ;;  %v13992_v32 = vld [vmem:[#allocation6 + $0x998] ss:$20 sps:$4 sm:$0xff]  }
 0x2e3   :  { %v13993_v41 = vld [vmem:[#allocation6 + $0x5d8] ss:$20 sps:$4 sm:$0xff]  }
 0x2e4   :  { %12998 = vmatpush3.bf16.msra.mxu0 %v13977_v49  ;;  %13020 = vmatpush3.bf16.msra.mxu1 %v13978_v50  ;;  %v14050_v46 = vld [vmem:[#allocation10 + $0x234] ss:$40 sps:$4 sm:$0xff]   ;;  %v14048_v31 = vld [vmem:[#allocation10 + $0x230] ss:$40 sps:$4 sm:$0xff]   ;;  %v14053_v49 = vld [vmem:[#allocation10 + $0x784] ss:$40 sps:$4 sm:$0xff]  }
 0x2e5   :  { %12999 = vmatprep.subr.bf16.mxu0 %v13979_v48  ;;  %13021 = vmatprep.subr.bf16.mxu1 %v13980_v51  ;;  %v14056_v50 = vld [vmem:[#allocation10 + $0x284] ss:$40 sps:$4 sm:$0xff]   ;;  %v14051_v48 = vld [vmem:[#allocation10 + $0x780] ss:$40 sps:$4 sm:$0xff]  }
 0x2e6   :  { %v14054_v51 = vld [vmem:[#allocation10 + $0x280] ss:$40 sps:$4 sm:$0xff]  }
 0x2e8   :  { %13000 = vmatpush3.bf16.msra.mxu0 %v13981_v52  ;;  %13022 = vmatpush3.bf16.msra.mxu1 %v13982_v53  ;;  %v14059_v52 = vld [vmem:[#allocation10 + $0x7d4] ss:$40 sps:$4 sm:$0xff]  }
 0x2e9   :  { %13001 = vmatprep.subr.bf16.mxu0 %v13983_v54  ;;  %13023 = vmatprep.subr.bf16.mxu1 %v13984_v55  ;;  %v14062_v53 = vld [vmem:[#allocation10 + $0x2d4] ss:$40 sps:$4 sm:$0xff]   ;;  %v14057_v54 = vld [vmem:[#allocation10 + $0x7d0] ss:$40 sps:$4 sm:$0xff]  }
 0x2ea   :  { %v14060_v55 = vld [vmem:[#allocation10 + $0x2d0] ss:$40 sps:$4 sm:$0xff]  }
 0x2ec   :  { %13002 = vmatpush3.bf16.msra.mxu0 %v13985_v39  ;;  %13024 = vmatpush3.bf16.msra.mxu1 %v13986_v47  ;;  %v14065_v39 = vld [vmem:[#allocation10 + $0x824] ss:$40 sps:$4 sm:$0xff]  }
 0x2ed   :  { %13003 = vmatprep.subr.bf16.mxu0 %v13987_v56  ;;  %13025 = vmatprep.subr.bf16.mxu1 %v13988_v57  ;;  %v14068_v47 = vld [vmem:[#allocation10 + $0x324] ss:$40 sps:$4 sm:$0xff]   ;;  %v14063_v56 = vld [vmem:[#allocation10 + $0x820] ss:$40 sps:$4 sm:$0xff]  }
 0x2ee   :  { %v14066_v57 = vld [vmem:[#allocation10 + $0x320] ss:$40 sps:$4 sm:$0xff]  }
 0x2f0   :  { %13004 = vmatpush3.bf16.msra.mxu0 %v13989_v58  ;;  %13026 = vmatpush3.bf16.msra.mxu1 %v13990_v59  ;;  %v14071_v58 = vld [vmem:[#allocation10 + $0x874] ss:$40 sps:$4 sm:$0xff]  }
 0x2f1   :  { %13005 = vmatprep.subr.bf16.mxu0 %v13991_v61  ;;  %13027 = vmatprep.subr.bf16.mxu1 %v13992_v32  ;;  %v14074_v59 = vld [vmem:[#allocation10 + $0x374] ss:$40 sps:$4 sm:$0xff]   ;;  %v14069_v61 = vld [vmem:[#allocation10 + $0x870] ss:$40 sps:$4 sm:$0xff]  }
 0x2f2   :  { %v14072_v32 = vld [vmem:[#allocation10 + $0x370] ss:$40 sps:$4 sm:$0xff]  }
 0x2f4   :  { %13006 = vmatpush3.bf16.msra.mxu0 %v13993_v41  ;;  %13028 = vmatpush3.bf16.msra.mxu1 %v13994_v62  ;;  %v14077_v41 = vld [vmem:[#allocation10 + $0x8c4] ss:$40 sps:$4 sm:$0xff]  }
 0x2f5   :  { %13007 = vmatprep.subr.bf16.mxu0 %v13995_v0  ;;  %13029 = vmatprep.subr.bf16.mxu1 %v13996_v1  ;;  %v14080_v62 = vld [vmem:[#allocation10 + $0x3c4] ss:$40 sps:$4 sm:$0xff]   ;;  %v14075_v0 = vld [vmem:[#allocation10 + $0x8c0] ss:$40 sps:$4 sm:$0xff]  }
 0x2f6   :  { %v14078_v1 = vld [vmem:[#allocation10 + $0x3c0] ss:$40 sps:$4 sm:$0xff]  }
 0x2f8   :  { %13008 = vmatpush3.bf16.msra.mxu0 %v13997_v8  ;;  %13030 = vmatpush3.bf16.msra.mxu1 %v13998_v9  ;;  %v14083_v8 = vld [vmem:[#allocation10 + $0x914] ss:$40 sps:$4 sm:$0xff]  }
 0x2f9   :  { %13009 = vmatprep.subr.bf16.mxu0 %v13999_v5  ;;  %13031 = vmatprep.subr.bf16.mxu1 %v14000_v13  ;;  %v14086_v9 = vld [vmem:[#allocation10 + $0x414] ss:$40 sps:$4 sm:$0xff]   ;;  %v14081_v5 = vld [vmem:[#allocation10 + $0x910] ss:$40 sps:$4 sm:$0xff]  }
 0x2fa   :  { %v14084_v13 = vld [vmem:[#allocation10 + $0x410] ss:$40 sps:$4 sm:$0xff]  }
 0x2fc   :  { %13010 = vmatpush3.bf16.msra.mxu0 %v14001_v11  ;;  %13032 = vmatpush3.bf16.msra.mxu1 %v14002_v12  ;;  %v14089_v11 = vld [vmem:[#allocation10 + $0x964] ss:$40 sps:$4 sm:$0xff]  }
 0x2fd   :  { %8144 = vmatprep.subr.bf16.mxu1 %v14005_v14  ;;  %8103 = vmatprep.subr.bf16.mxu0 %v14008_v15  ;;  %v14092_v12 = vld [vmem:[#allocation10 + $0x464] ss:$40 sps:$4 sm:$0xff]   ;;  %v14087_v14 = vld [vmem:[#allocation10 + $0x960] ss:$40 sps:$4 sm:$0xff]  }
 0x2fe   :  { %v14090_v15 = vld [vmem:[#allocation10 + $0x460] ss:$40 sps:$4 sm:$0xff]  }
 0x2ff   :  { %5236 = vmatmul.mubr.bf16.vlgmr.msra.gmra.mrb[20].mxu0 %v15694_v36  ;;  %5276 = vmatmul.mubr.bf16.vlgmr.msra.gmra.mrb[20].mxu1 %v15709_v10  ;;  %v14032_v36 = vld [vmem:[#allocation10 + $0x144] ss:$40 sps:$4 sm:$0xff]   ;;  %v14027_v10 = vld [vmem:[#allocation10 + $0x640] ss:$40 sps:$4 sm:$0xff]  }
 0x300   :  { %8145 = vmatpush1.bf16.msra.mxu1 %v14003_v17  ;;  %8104 = vmatpush1.bf16.msra.mxu0 %v14006_v27  ;;  %v14095_v17 = vld [vmem:[#allocation10 + $0x9b4] ss:$40 sps:$4 sm:$0xff]  }
 0x301   :  { %8146 = vmatprep.subr.bf16.mxu1 %v14011_v16  ;;  %8105 = vmatprep.subr.bf16.mxu0 %v14014_v18  ;;  %v14098_v27 = vld [vmem:[#allocation10 + $0x4b4] ss:$40 sps:$4 sm:$0xff]   ;;  %v14093_v16 = vld [vmem:[#allocation10 + $0x9b0] ss:$40 sps:$4 sm:$0xff]  }
 0x302   :  { %v14096_v18 = vld [vmem:[#allocation10 + $0x4b0] ss:$40 sps:$4 sm:$0xff]  }
 0x304   :  { %8147 = vmatpush1.bf16.msra.mxu1 %v14009_v19  ;;  %8106 = vmatpush1.bf16.msra.mxu0 %v14012_v20  ;;  %v14101_v19 = vld [vmem:[#allocation10 + $0xc] ss:$40 sps:$4 sm:$0xff]  }
 0x305   :  { %8148 = vmatprep.subr.bf16.mxu1 %v14017_v21  ;;  %8107 = vmatprep.subr.bf16.mxu0 %v14020_v23  ;;  %v14128_v20 = vld [vmem:[#allocation10 + $0xa04] ss:$40 sps:$4 sm:$0xff]   ;;  %v15721_v21 = vld [vmem:[#allocation7] sm:$0x1f] }
 0x306   :  { %v3109_v23 = vrot.slane %v15721_v21, %v15648_v2 }
 0x308   :  { %8149 = vmatpush1.bf16.msra.mxu1 %v14015_v24  ;;  %8108 = vmatpush1.bf16.msra.mxu0 %v14018_v25  ;;  %v3117_v24 = vrot.slane %v15721_v21, %v15651_v3  ;;  %v3113_v25 = vrot.slane %v15721_v21, %v15656_v6 }
 0x309   :  { %8150 = vmatprep.subr.bf16.mxu1 %v14023_v26  ;;  %8109 = vmatprep.subr.bf16.mxu0 %v14026_v40  ;;  %v3121_v26 = vrot.slane %v15721_v21, %v15659_v7 }
 0x30c   :  { %8151 = vmatpush1.bf16.msra.mxu1 %v14021_v45  ;;  %8110 = vmatpush1.bf16.msra.mxu0 %v14024_v4 }
 0x30d   :  { %8152 = vmatprep.subr.bf16.mxu1 %v14029_v28  ;;  %8111 = vmatprep.subr.bf16.mxu0 %v14032_v36 }
 0x310   :  { %8153 = vmatpush1.bf16.msra.mxu1 %v14027_v10  ;;  %8112 = vmatpush1.bf16.msra.mxu0 %v14030_v29 }
 0x311   :  { %8154 = vmatprep.subr.bf16.mxu1 %v14035_v30  ;;  %8113 = vmatprep.subr.bf16.mxu0 %v14038_v33 }
 0x314   :  { %8155 = vmatpush1.bf16.msra.mxu1 %v14033_v34  ;;  %8114 = vmatpush1.bf16.msra.mxu0 %v14036_v35 }
 0x315   :  { %8156 = vmatprep.subr.bf16.mxu1 %v14041_v37  ;;  %8115 = vmatprep.subr.bf16.mxu0 %v14044_v38 }
 0x318   :  { %8157 = vmatpush1.bf16.msra.mxu1 %v14039_v42  ;;  %8116 = vmatpush1.bf16.msra.mxu0 %v14042_v43  ;;  %v14099_v43 = vld [vmem:[#allocation10 + $0x8] ss:$40 sps:$4 sm:$0xff]  }
 0x319   :  { %8158 = vmatprep.subr.bf16.mxu1 %v14047_v44  ;;  %8117 = vmatprep.subr.bf16.mxu0 %v14050_v46  ;;  %v14104_v44 = vld [vmem:[#allocation10 + $0x5c] ss:$40 sps:$4 sm:$0xff]  }
 0x31c   :  { %8159 = vmatpush1.bf16.msra.mxu1 %v14045_v22  ;;  %8118 = vmatpush1.bf16.msra.mxu0 %v14048_v31  ;;  %v14126_v31 = vld [vmem:[#allocation10 + $0xa00] ss:$40 sps:$4 sm:$0xff]  }
 0x31d   :  { %8160 = vmatprep.subr.bf16.mxu1 %v14053_v49  ;;  %8119 = vmatprep.subr.bf16.mxu0 %v14056_v50  ;;  %v14134_v49 = vld [vmem:[#allocation10 + $0xa54] ss:$40 sps:$4 sm:$0xff]   ;;  %v14102_v50 = vld [vmem:[#allocation10 + $0x58] ss:$40 sps:$4 sm:$0xff]  }
 0x320   :  { %8161 = vmatpush1.bf16.msra.mxu1 %v14051_v48  ;;  %8120 = vmatpush1.bf16.msra.mxu0 %v14054_v51  ;;  %v14107_v48 = vld [vmem:[#allocation10 + $0xac] ss:$40 sps:$4 sm:$0xff]   ;;  %v14132_v51 = vld [vmem:[#allocation10 + $0xa50] ss:$40 sps:$4 sm:$0xff]  }
 0x321   :  { %8162 = vmatprep.subr.bf16.mxu1 %v14059_v52  ;;  %8121 = vmatprep.subr.bf16.mxu0 %v14062_v53  ;;  %v14140_v52 = vld [vmem:[#allocation10 + $0xaa4] ss:$40 sps:$4 sm:$0xff]   ;;  %v15381_v53 = vmov 0  }
 0x324   :  { %8163 = vmatpush1.bf16.msra.mxu1 %v14057_v54  ;;  %8122 = vmatpush1.bf16.msra.mxu0 %v14060_v55  ;;  %v14105_v54 = vld [vmem:[#allocation10 + $0xa8] ss:$40 sps:$4 sm:$0xff]   ;;  %v14110_v55 = vld [vmem:[#allocation10 + $0xfc] ss:$40 sps:$4 sm:$0xff]  }
 0x325   :  { %8164 = vmatprep.subr.bf16.mxu1 %v14065_v39  ;;  %8123 = vmatprep.subr.bf16.mxu0 %v14068_v47  ;;  %v14138_v39 = vld [vmem:[#allocation10 + $0xaa0] ss:$40 sps:$4 sm:$0xff]   ;;  %v14146_v47 = vld [vmem:[#allocation10 + $0xaf4] ss:$40 sps:$4 sm:$0xff]  }
 0x328   :  { %8165 = vmatpush1.bf16.msra.mxu1 %v14063_v56  ;;  %8124 = vmatpush1.bf16.msra.mxu0 %v14066_v57  ;;  %v14108_v56 = vld [vmem:[#allocation10 + $0xf8] ss:$40 sps:$4 sm:$0xff]   ;;  %v14113_v57 = vld [vmem:[#allocation10 + $0x14c] ss:$40 sps:$4 sm:$0xff]  }
 0x329   :  { %8166 = vmatprep.subr.bf16.mxu1 %v14071_v58  ;;  %8125 = vmatprep.subr.bf16.mxu0 %v14074_v59  ;;  %v14144_v58 = vld [vmem:[#allocation10 + $0xaf0] ss:$40 sps:$4 sm:$0xff]   ;;  %v14152_v59 = vld [vmem:[#allocation10 + $0xb44] ss:$40 sps:$4 sm:$0xff]  }
 0x32c   :  { %8167 = vmatpush1.bf16.msra.mxu1 %v14069_v61  ;;  %8126 = vmatpush1.bf16.msra.mxu0 %v14072_v32  ;;  %v14111_v61 = vld [vmem:[#allocation10 + $0x148] ss:$40 sps:$4 sm:$0xff]   ;;  %v14116_v32 = vld [vmem:[#allocation10 + $0x19c] ss:$40 sps:$4 sm:$0xff]  }
 0x32d   :  { %8168 = vmatprep.subr.bf16.mxu1 %v14077_v41  ;;  %8127 = vmatprep.subr.bf16.mxu0 %v14080_v62  ;;  %v14150_v41 = vld [vmem:[#allocation10 + $0xb40] ss:$40 sps:$4 sm:$0xff]   ;;  %v14158_v62 = vld [vmem:[#allocation10 + $0xb94] ss:$40 sps:$4 sm:$0xff]  }
 0x330   :  { %8169 = vmatpush1.bf16.msra.mxu1 %v14075_v0  ;;  %8128 = vmatpush1.bf16.msra.mxu0 %v14078_v1  ;;  %v14114_v0 = vld [vmem:[#allocation10 + $0x198] ss:$40 sps:$4 sm:$0xff]   ;;  %v14119_v1 = vld [vmem:[#allocation10 + $0x1ec] ss:$40 sps:$4 sm:$0xff]  }
 0x331   :  { %8170 = vmatprep.subr.bf16.mxu1 %v14083_v8  ;;  %8129 = vmatprep.subr.bf16.mxu0 %v14086_v9  ;;  %v14156_v8 = vld [vmem:[#allocation10 + $0xb90] ss:$40 sps:$4 sm:$0xff]   ;;  %v14164_v9 = vld [vmem:[#allocation10 + $0xbe4] ss:$40 sps:$4 sm:$0xff]  }
 0x334   :  { %8171 = vmatpush1.bf16.msra.mxu1 %v14081_v5  ;;  %8130 = vmatpush1.bf16.msra.mxu0 %v14084_v13  ;;  %v14117_v5 = vld [vmem:[#allocation10 + $0x1e8] ss:$40 sps:$4 sm:$0xff]   ;;  %v14122_v13 = vld [vmem:[#allocation10 + $0x23c] ss:$40 sps:$4 sm:$0xff]  }
 0x335   :  { %8172 = vmatprep.subr.bf16.mxu1 %v14089_v11  ;;  %8131 = vmatprep.subr.bf16.mxu0 %v14092_v12  ;;  %v14162_v11 = vld [vmem:[#allocation10 + $0xbe0] ss:$40 sps:$4 sm:$0xff]   ;;  %v14170_v12 = vld [vmem:[#allocation10 + $0xc34] ss:$40 sps:$4 sm:$0xff]  }
 0x338   :  { %8173 = vmatpush1.bf16.msra.mxu1 %v14087_v14  ;;  %8132 = vmatpush1.bf16.msra.mxu0 %v14090_v15 }
 0x339   :  { %8174 = vmatprep.subr.bf16.mxu1 %v14095_v17  ;;  %8133 = vmatprep.subr.bf16.mxu0 %v14098_v27  ;;  %v3125_v17 = vrot.slane %v15721_v21, %v15682_v63  ;;  %v14120_v27 = vld [vmem:[#allocation10 + $0x238] ss:$40 sps:$4 sm:$0xff]   ;;  %v14131_v21 = vld [vmem:[#allocation10 + $0x2dc] ss:$40 sps:$4 sm:$0xff]  }
 0x33c   :  { %8175 = vmatpush1.bf16.msra.mxu1 %v14093_v16  ;;  %8134 = vmatpush1.bf16.msra.mxu0 %v14096_v18 }
 0x33d   :  { %8226 = vmatprep.subr.bf16.mxu1 %v14101_v19  ;;  %8185 = vmatprep.subr.bf16.mxu0 %v14128_v20  ;;  %v14125_v19 = vld [vmem:[#allocation10 + $0x28c] ss:$40 sps:$4 sm:$0xff]   ;;  %v14168_v20 = vld [vmem:[#allocation10 + $0xc30] ss:$40 sps:$4 sm:$0xff]  }
 0x392   :  { %v4952_v40 = vpop.f32.mrb[12].mxu0  ;;  %v5116_v45 = vpop.f32.mrb[12].mxu1 }
 0x393   :  { %v13043_v4 = vadd.f32 %v4952_v40, %v3109_v23  ;;  %v13045_v28 = vadd.f32 %v5116_v45, %v3117_v24  ;;  %v4954_v36 = vpop.f32.mrb[13].mxu0  ;;  %v5118_v10 = vpop.f32.mrb[13].mxu1  ;;  %v14176_v40 = vld [vmem:[#allocation10 + $0x50c] ss:$40 sps:$4 sm:$0xff]  }
 0x394   :  { %v13044_v29 = vadd.f32 %v4954_v36, %v3113_v25  ;;  %v13046_v30 = vadd.f32 %v5118_v10, %v3121_v26  ;;  %v4956_v33 = vpop.f32.mrb[14].mxu0  ;;  %v5120_v34 = vpop.f32.mrb[14].mxu1  ;;  %v14123_v36 = vld [vmem:[#allocation10 + $0x288] ss:$40 sps:$4 sm:$0xff]  }
 0x395   :  { %5288 = vst [vmem:[%s16005_s10] sm:$0xff] %v13043_v4  ;;  %5290 = vst [vmem:[%s16005_s10 + $0x10] sm:$0xff] %v13045_v28  ;;  %v4957_v35 = vpop.f32.mrb[15].mxu0  ;;  %v5121_v37 = vpop.f32.mrb[15].mxu1  ;;  %v15747_v46 = vpack.c.bf16 %v13043_v4, %v13043_v4  ;;  %v15749_v22 = vpack.c.bf16 %v13045_v28, %v13045_v28  ;;  %v14135_v33 = vld [vmem:[#allocation10 + $0x328] ss:$40 sps:$4 sm:$0xff]  }
 0x396   :  { %5289 = vst [vmem:[%s16005_s10 + $0x8] sm:$0xff] %v13044_v29  ;;  %v15740_v38 = vpack.c.bf16 %v13044_v29, %v13044_v29  ;;  %5291 = vst [vmem:[%s16005_s10 + $0x18] sm:$0xff] %v13046_v30  ;;  %v15745_v42 = vpack.c.bf16 %v13046_v30, %v13046_v30  ;;  %v14129_v29 = vld [vmem:[#allocation10 + $0x2d8] ss:$40 sps:$4 sm:$0xff]   ;;  %v14137_v30 = vld [vmem:[#allocation10 + $0x32c] ss:$40 sps:$4 sm:$0xff]  }
 0x397   :  { %v14143_v34 = vld [vmem:[#allocation10 + $0x37c] ss:$40 sps:$4 sm:$0xff]   ;;  %v14141_v35 = vld [vmem:[#allocation10 + $0x378] ss:$40 sps:$4 sm:$0xff]   ;;  %v14149_v37 = vld [vmem:[#allocation10 + $0x3cc] ss:$40 sps:$4 sm:$0xff]  }
 0x398   :  { %8135 = vmatprep.mubr.bf16.mxu0 %v15740_v38  ;;  %8176 = vmatprep.mubr.bf16.mxu1 %v15745_v42 }
 0x399   :  { %8136 = vmatmul.mubr.bf16.vlgmr.msra.gmra.mrb[24].mxu0 %v15747_v46  ;;  %8177 = vmatmul.mubr.bf16.vlgmr.msra.gmra.mrb[24].mxu1 %v15749_v22 }
 0x39a   :  { %8227 = vmatpush1.bf16.msra.mxu1 %v14099_v43  ;;  %8258 = vmatprep.mubr.bf16.mxu1 %v15740_v38  ;;  %v14147_v43 = vld [vmem:[#allocation10 + $0x3c8] ss:$40 sps:$4 sm:$0xff]  }
 0x39b   :  { %8228 = vmatprep.subr.bf16.mxu1 %v14104_v44  ;;  %8186 = vmatpush1.bf16.msra.mxu0 %v14126_v31  ;;  %v14155_v44 = vld [vmem:[#allocation10 + $0x41c] ss:$40 sps:$4 sm:$0xff]   ;;  %v14153_v31 = vld [vmem:[#allocation10 + $0x418] ss:$40 sps:$4 sm:$0xff]  }
 0x39c   :  { %8187 = vmatprep.subr.bf16.mxu0 %v14134_v49  ;;  %8217 = vmatprep.mubr.bf16.mxu0 %v15381_v53  ;;  %v14161_v49 = vld [vmem:[#allocation10 + $0x46c] ss:$40 sps:$4 sm:$0xff]  }
 0x39e   :  { %8229 = vmatpush1.bf16.msra.mxu1 %v14102_v50  ;;  %v14159_v50 = vld [vmem:[#allocation10 + $0x468] ss:$40 sps:$4 sm:$0xff]  }
 0x39f   :  { %8230 = vmatprep.subr.bf16.mxu1 %v14107_v48  ;;  %8188 = vmatpush1.bf16.msra.mxu0 %v14132_v51  ;;  %v14167_v48 = vld [vmem:[#allocation10 + $0x4bc] ss:$40 sps:$4 sm:$0xff]  }
 0x3a0   :  { %8189 = vmatprep.subr.bf16.mxu0 %v14140_v52 }
 0x3a2   :  { %8231 = vmatpush1.bf16.msra.mxu1 %v14105_v54  ;;  %v14165_v54 = vld [vmem:[#allocation10 + $0x4b8] ss:$40 sps:$4 sm:$0xff]  }
 0x3a3   :  { %8232 = vmatprep.subr.bf16.mxu1 %v14110_v55  ;;  %8190 = vmatpush1.bf16.msra.mxu0 %v14138_v39 }
 0x3a4   :  { %8191 = vmatprep.subr.bf16.mxu0 %v14146_v47  ;;  %v14173_v47 = vld [vmem:[#allocation10 + $0xa0c] ss:$40 sps:$4 sm:$0xff]  }
 0x3a6   :  { %8233 = vmatpush1.bf16.msra.mxu1 %v14108_v56 }
 0x3a7   :  { %8234 = vmatprep.subr.bf16.mxu1 %v14113_v57  ;;  %8192 = vmatpush1.bf16.msra.mxu0 %v14144_v58 }
 0x3a8   :  { %8193 = vmatprep.subr.bf16.mxu0 %v14152_v59 }
 0x3aa   :  { %8235 = vmatpush1.bf16.msra.mxu1 %v14111_v61 }
 0x3ab   :  { %8236 = vmatprep.subr.bf16.mxu1 %v14116_v32  ;;  %8194 = vmatpush1.bf16.msra.mxu0 %v14150_v41 }
 0x3ac   :  { %8195 = vmatprep.subr.bf16.mxu0 %v14158_v62  ;;  %v14171_v62 = vld [vmem:[#allocation10 + $0xa08] ss:$40 sps:$4 sm:$0xff]  }
 0x3ae   :  { %8237 = vmatpush1.bf16.msra.mxu1 %v14114_v0  ;;  %v14179_v0 = vld [vmem:[#allocation10 + $0xa5c] ss:$40 sps:$4 sm:$0xff]  }
 0x3af   :  { %8238 = vmatprep.subr.bf16.mxu1 %v14119_v1  ;;  %8196 = vmatpush1.bf16.msra.mxu0 %v14156_v8  ;;  %v14174_v8 = vld [vmem:[#allocation10 + $0x508] ss:$40 sps:$4 sm:$0xff]  }
 0x3b0   :  { %8197 = vmatprep.subr.bf16.mxu0 %v14164_v9 }
 0x3b2   :  { %8239 = vmatpush1.bf16.msra.mxu1 %v14117_v5  ;;  %v12967_v14 = vpop.f32.mrb[16].mxu0  ;;  %v12989_v15 = vpop.f32.mrb[16].mxu1  ;;  %v14177_v5 = vld [vmem:[#allocation10 + $0xa58] ss:$40 sps:$4 sm:$0xff]  }
 0x3b3   :  { %v12968_v16 = vpop.f32.mrb[17].mxu0  ;;  %v12990_v18 = vpop.f32.mrb[17].mxu1  ;;  %8240 = vmatprep.subr.bf16.mxu1 %v14122_v13  ;;  %8198 = vmatpush1.bf16.msra.mxu0 %v14162_v11  ;;  %v14182_v13 = vld [vmem:[#allocation10 + $0x55c] ss:$40 sps:$4 sm:$0xff]   ;;  %v14185_v11 = vld [vmem:[#allocation10 + $0xaac] ss:$40 sps:$4 sm:$0xff]  }
 0x3b4   :  { %v12969_v23 = vadd.f32 %v12968_v16, %v12967_v14  ;;  %v12991_v24 = vadd.f32 %v12990_v18, %v12989_v15  ;;  %v12970_v25 = vpop.f32.mrb[18].mxu0  ;;  %v12992_v26 = vpop.f32.mrb[18].mxu1  ;;  %8199 = vmatprep.subr.bf16.mxu0 %v14170_v12  ;;  %v14180_v12 = vld [vmem:[#allocation10 + $0x558] ss:$40 sps:$4 sm:$0xff]   ;;  %v14183_v14 = vld [vmem:[#allocation10 + $0xaa8] ss:$40 sps:$4 sm:$0xff]  }
 0x3b5   :  { %v12971_v45 = vpop.f32.mrb[19].mxu0  ;;  %v12993_v4 = vpop.f32.mrb[19].mxu1  ;;  %v14188_v15 = vld [vmem:[#allocation10 + $0x5ac] ss:$40 sps:$4 sm:$0xff]   ;;  %v14189_v16 = vld [vmem:[#allocation10 + $0xaf8] ss:$40 sps:$4 sm:$0xff]  }
 0x3b6   :  { %v5158_v28 = vadd.f32 %v12969_v23, %v3125_v17  ;;  %8241 = vmatpush1.bf16.msra.mxu1 %v14120_v27  ;;  %v14191_v17 = vld [vmem:[#allocation10 + $0xafc] ss:$40 sps:$4 sm:$0xff]   ;;  %v14186_v27 = vld [vmem:[#allocation10 + $0x5a8] ss:$40 sps:$4 sm:$0xff]   ;;  %v14209_v4 = vld [vmem:[#allocation10 + $0xbec] ss:$40 sps:$4 sm:$0xff]  }
 0x3b7   :  { %8242 = vmatprep.subr.bf16.mxu1 %v14125_v19  ;;  %8200 = vmatpush1.bf16.msra.mxu0 %v14168_v20  ;;  %v14194_v18 = vld [vmem:[#allocation10 + $0x5fc] ss:$40 sps:$4 sm:$0xff]   ;;  %v14197_v19 = vld [vmem:[#allocation10 + $0xb4c] ss:$40 sps:$4 sm:$0xff]   ;;  %v14192_v20 = vld [vmem:[#allocation10 + $0x5f8] ss:$40 sps:$4 sm:$0xff]  }
 0x3b8   :  { %v5198_v10 = vadd.f32 %v12991_v24, %v5158_v28  ;;  %8267 = vmatprep.subr.bf16.mxu0 %v14176_v40  ;;  %v14195_v23 = vld [vmem:[#allocation10 + $0xb48] ss:$40 sps:$4 sm:$0xff]   ;;  %v14200_v24 = vld [vmem:[#allocation10 + $0x64c] ss:$40 sps:$4 sm:$0xff]   ;;  %v14203_v25 = vld [vmem:[#allocation10 + $0xb9c] ss:$40 sps:$4 sm:$0xff]  }
 0x3b9   :  { %v14198_v26 = vld [vmem:[#allocation10 + $0x648] ss:$40 sps:$4 sm:$0xff]   ;;  %v14201_v40 = vld [vmem:[#allocation10 + $0xb98] ss:$40 sps:$4 sm:$0xff]   ;;  %v14206_v45 = vld [vmem:[#allocation10 + $0x69c] ss:$40 sps:$4 sm:$0xff]  }
 0x3ba   :  { %8243 = vmatpush1.bf16.msra.mxu1 %v14123_v36  ;;  %v14204_v28 = vld [vmem:[#allocation10 + $0x698] ss:$40 sps:$4 sm:$0xff]   ;;  %v14207_v36 = vld [vmem:[#allocation10 + $0xbe8] ss:$40 sps:$4 sm:$0xff]  }
 0x3bb   :  { %8244 = vmatprep.subr.bf16.mxu1 %v14131_v21  ;;  %v14212_v21 = vld [vmem:[#allocation10 + $0x6ec] ss:$40 sps:$4 sm:$0xff]  }
 0x3be   :  { %8245 = vmatpush1.bf16.msra.mxu1 %v14129_v29  ;;  %v14210_v29 = vld [vmem:[#allocation10 + $0x6e8] ss:$40 sps:$4 sm:$0xff]  }
 0x3bf   :  { %8246 = vmatprep.subr.bf16.mxu1 %v14137_v30  ;;  %v14213_v30 = vld [vmem:[#allocation10 + $0xc38] ss:$40 sps:$4 sm:$0xff]  }
 0x3c2   :  { %8247 = vmatpush1.bf16.msra.mxu1 %v14135_v33  ;;  %v14218_v33 = vld [vmem:[#allocation10 + $0x73c] ss:$40 sps:$4 sm:$0xff]  }
 0x3c3   :  { %8248 = vmatprep.subr.bf16.mxu1 %v14143_v34  ;;  %v14221_v34 = vld [vmem:[#allocation10 + $0x514] ss:$40 sps:$4 sm:$0xff]  }
 0x3c6   :  { %8249 = vmatpush1.bf16.msra.mxu1 %v14141_v35  ;;  %v14216_v35 = vld [vmem:[#allocation10 + $0x738] ss:$40 sps:$4 sm:$0xff]  }
 0x3c7   :  { %8250 = vmatprep.subr.bf16.mxu1 %v14149_v37  ;;  %v14219_v37 = vld [vmem:[#allocation10 + $0x510] ss:$40 sps:$4 sm:$0xff]  }
 0x3ca   :  { %8251 = vmatpush1.bf16.msra.mxu1 %v14147_v43  ;;  %v14224_v43 = vld [vmem:[#allocation10 + $0x78c] ss:$40 sps:$4 sm:$0xff]  }
 0x3cb   :  { %8252 = vmatprep.subr.bf16.mxu1 %v14155_v44  ;;  %v14227_v44 = vld [vmem:[#allocation10 + $0x564] ss:$40 sps:$4 sm:$0xff]  }
 0x3ce   :  { %8253 = vmatpush1.bf16.msra.mxu1 %v14153_v31  ;;  %v14222_v31 = vld [vmem:[#allocation10 + $0x788] ss:$40 sps:$4 sm:$0xff]  }
 0x3cf   :  { %8254 = vmatprep.subr.bf16.mxu1 %v14161_v49  ;;  %v14225_v49 = vld [vmem:[#allocation10 + $0x560] ss:$40 sps:$4 sm:$0xff]  }
 0x3d2   :  { %8255 = vmatpush1.bf16.msra.mxu1 %v14159_v50  ;;  %v13011_v51 = vpop.f32.mrb[20].mxu0  ;;  %v13033_v52 = vpop.f32.mrb[20].mxu1  ;;  %v14230_v50 = vld [vmem:[#allocation10 + $0x7dc] ss:$40 sps:$4 sm:$0xff]  }
 0x3d3   :  { %v13012_v55 = vpop.f32.mrb[21].mxu0  ;;  %v13034_v39 = vpop.f32.mrb[21].mxu1  ;;  %8256 = vmatprep.subr.bf16.mxu1 %v14167_v48  ;;  %v14233_v48 = vld [vmem:[#allocation10 + $0x5b4] ss:$40 sps:$4 sm:$0xff]  }
 0x3d4   :  { %v13013_v56 = vadd.f32 %v13012_v55, %v13011_v51  ;;  %v13035_v57 = vadd.f32 %v13034_v39, %v13033_v52  ;;  %v13014_v58 = vpop.f32.mrb[22].mxu0  ;;  %v13036_v59 = vpop.f32.mrb[22].mxu1  ;;  %v14228_v51 = vld [vmem:[#allocation10 + $0x7d8] ss:$40 sps:$4 sm:$0xff]   ;;  %v14239_v55 = vld [vmem:[#allocation10 + $0x604] ss:$40 sps:$4 sm:$0xff]  }
 0x3d5   :  { %v13015_v61 = vpop.f32.mrb[23].mxu0  ;;  %v13037_v32 = vpop.f32.mrb[23].mxu1  ;;  %v14231_v52 = vld [vmem:[#allocation10 + $0x5b0] ss:$40 sps:$4 sm:$0xff]  }
 0x3d6   :  { %v5238_v41 = vadd.f32 %v13013_v56, %v5198_v10  ;;  %8257 = vmatpush1.bf16.msra.mxu1 %v14165_v54  ;;  %v14215_v10 = vld [vmem:[#allocation10 + $0xc3c] ss:$40 sps:$4 sm:$0xff]   ;;  %v14236_v54 = vld [vmem:[#allocation10 + $0x82c] ss:$40 sps:$4 sm:$0xff]   ;;  %v14234_v39 = vld [vmem:[#allocation10 + $0x828] ss:$40 sps:$4 sm:$0xff]  }
 0x3d7   :  { %8308 = vmatprep.subr.bf16.mxu1 %v14173_v47  ;;  %v14237_v47 = vld [vmem:[#allocation10 + $0x600] ss:$40 sps:$4 sm:$0xff]   ;;  %v14242_v56 = vld [vmem:[#allocation10 + $0x87c] ss:$40 sps:$4 sm:$0xff]   ;;  %v14243_v59 = vld [vmem:[#allocation10 + $0x650] ss:$40 sps:$4 sm:$0xff]  }
 0x3d8   :  { %v5278_v1 = vadd.f32 %v13035_v57, %v5238_v41  ;;  %v14245_v57 = vld [vmem:[#allocation10 + $0x654] ss:$40 sps:$4 sm:$0xff]   ;;  %v14240_v58 = vld [vmem:[#allocation10 + $0x878] ss:$40 sps:$4 sm:$0xff]   ;;  %v14251_v32 = vld [vmem:[#allocation10 + $0x6a4] ss:$40 sps:$4 sm:$0xff]  }
 0x3d9   :  { %8259 = vmatmul.mubr.bf16.vlgmr.msra.gmra.mrb[28].mxu1 %v15747_v46  ;;  %v14248_v61 = vld [vmem:[#allocation10 + $0x8cc] ss:$40 sps:$4 sm:$0xff]   ;;  %v14246_v41 = vld [vmem:[#allocation10 + $0x8c8] ss:$40 sps:$4 sm:$0xff]  }
 0x3da   :  { %5292 = vst [vmem:[%s16005_s10 + $0x20] sm:$0xff] %v5278_v1  ;;  %v15763_v9 = vpack.c.bf16 %v5278_v1, %v5278_v1  ;;  %8309 = vmatpush1.bf16.msra.mxu1 %v14171_v62  ;;  %8340 = vmatprep.mubr.bf16.mxu1 %v15381_v53  ;;  %v14249_v62 = vld [vmem:[#allocation10 + $0x6a0] ss:$40 sps:$4 sm:$0xff]   ;;  %v14257_v1 = vld [vmem:[#allocation10 + $0x6f4] ss:$40 sps:$4 sm:$0xff]  }
 0x3db   :  { %8310 = vmatprep.subr.bf16.mxu1 %v14179_v0  ;;  %v14254_v0 = vld [vmem:[#allocation10 + $0x91c] ss:$40 sps:$4 sm:$0xff]  }
 0x3dc   :  { %8218 = vmatmul.mubr.bf16.vlgmr.msra.gmra.mrb[28].mxu0 %v15763_v9 }
 0x3dd   :  { %8268 = vmatpush1.bf16.msra.mxu0 %v14174_v8  ;;  %8299 = vmatprep.mubr.bf16.mxu0 %v15745_v42  ;;  %v14252_v8 = vld [vmem:[#allocation10 + $0x918] ss:$40 sps:$4 sm:$0xff]  }
 0x3de   :  { %8311 = vmatpush1.bf16.msra.mxu1 %v14177_v5  ;;  %8269 = vmatprep.subr.bf16.mxu0 %v14182_v13  ;;  %v14255_v5 = vld [vmem:[#allocation10 + $0x6f0] ss:$40 sps:$4 sm:$0xff]   ;;  %v14260_v13 = vld [vmem:[#allocation10 + $0x96c] ss:$40 sps:$4 sm:$0xff]  }
 0x3df   :  { %8312 = vmatprep.subr.bf16.mxu1 %v14185_v11  ;;  %v14263_v11 = vld [vmem:[#allocation10 + $0x744] ss:$40 sps:$4 sm:$0xff]  }
 0x3e1   :  { %8270 = vmatpush1.bf16.msra.mxu0 %v14180_v12  ;;  %v14258_v12 = vld [vmem:[#allocation10 + $0x968] ss:$40 sps:$4 sm:$0xff]  }
 0x3e2   :  { %8313 = vmatpush1.bf16.msra.mxu1 %v14183_v14  ;;  %8271 = vmatprep.subr.bf16.mxu0 %v14188_v15  ;;  %v14261_v14 = vld [vmem:[#allocation10 + $0x740] ss:$40 sps:$4 sm:$0xff]   ;;  %v14266_v15 = vld [vmem:[#allocation10 + $0x9bc] ss:$40 sps:$4 sm:$0xff]  }
 0x3e3   :  { %8314 = vmatprep.subr.bf16.mxu1 %v14191_v17  ;;  %v14269_v17 = vld [vmem:[#allocation10 + $0x794] ss:$40 sps:$4 sm:$0xff]  }
 0x3e5   :  { %8272 = vmatpush1.bf16.msra.mxu0 %v14186_v27  ;;  %v14264_v27 = vld [vmem:[#allocation10 + $0x9b8] ss:$40 sps:$4 sm:$0xff]  }
 0x3e6   :  { %8315 = vmatpush1.bf16.msra.mxu1 %v14189_v16  ;;  %8273 = vmatprep.subr.bf16.mxu0 %v14194_v18  ;;  %v14267_v16 = vld [vmem:[#allocation10 + $0x790] ss:$40 sps:$4 sm:$0xff]   ;;  %v14272_v18 = vld [vmem:[#allocation10 + $0x14] ss:$40 sps:$4 sm:$0xff]  }
 0x3e7   :  { %8316 = vmatprep.subr.bf16.mxu1 %v14197_v19  ;;  %v14275_v19 = vld [vmem:[#allocation10 + $0x7e4] ss:$40 sps:$4 sm:$0xff]  }
 0x3e9   :  { %8274 = vmatpush1.bf16.msra.mxu0 %v14192_v20  ;;  %v14270_v20 = vld [vmem:[#allocation10 + $0x10] ss:$40 sps:$4 sm:$0xff]  }
 0x3ea   :  { %8317 = vmatpush1.bf16.msra.mxu1 %v14195_v23  ;;  %8275 = vmatprep.subr.bf16.mxu0 %v14200_v24  ;;  %v14273_v23 = vld [vmem:[#allocation10 + $0x7e0] ss:$40 sps:$4 sm:$0xff]   ;;  %v14278_v24 = vld [vmem:[#allocation10 + $0x64] ss:$40 sps:$4 sm:$0xff]  }
 0x3eb   :  { %8318 = vmatprep.subr.bf16.mxu1 %v14203_v25  ;;  %v14281_v25 = vld [vmem:[#allocation10 + $0x834] ss:$40 sps:$4 sm:$0xff]  }
 0x3ed   :  { %8276 = vmatpush1.bf16.msra.mxu0 %v14198_v26  ;;  %v14276_v26 = vld [vmem:[#allocation10 + $0x60] ss:$40 sps:$4 sm:$0xff]  }
 0x3ee   :  { %8319 = vmatpush1.bf16.msra.mxu1 %v14201_v40  ;;  %8277 = vmatprep.subr.bf16.mxu0 %v14206_v45  ;;  %v14279_v40 = vld [vmem:[#allocation10 + $0x830] ss:$40 sps:$4 sm:$0xff]   ;;  %v14284_v45 = vld [vmem:[#allocation10 + $0xb4] ss:$40 sps:$4 sm:$0xff]  }
 0x3ef   :  { %8320 = vmatprep.subr.bf16.mxu1 %v14209_v4  ;;  %v14287_v4 = vld [vmem:[#allocation10 + $0x884] ss:$40 sps:$4 sm:$0xff]  }
 0x3f1   :  { %8278 = vmatpush1.bf16.msra.mxu0 %v14204_v28  ;;  %v14282_v28 = vld [vmem:[#allocation10 + $0xb0] ss:$40 sps:$4 sm:$0xff]  }
 0x3f2   :  { %8321 = vmatpush1.bf16.msra.mxu1 %v14207_v36  ;;  %8279 = vmatprep.subr.bf16.mxu0 %v14212_v21  ;;  %v14285_v36 = vld [vmem:[#allocation10 + $0x880] ss:$40 sps:$4 sm:$0xff]   ;;  %v14290_v21 = vld [vmem:[#allocation10 + $0x104] ss:$40 sps:$4 sm:$0xff]  }
 0x3f3   :  { %8322 = vmatprep.subr.bf16.mxu1 %v14215_v10  ;;  %v14293_v10 = vld [vmem:[#allocation10 + $0x8d4] ss:$40 sps:$4 sm:$0xff]  }
 0x3f5   :  { %8280 = vmatpush1.bf16.msra.mxu0 %v14210_v29  ;;  %v14288_v29 = vld [vmem:[#allocation10 + $0x100] ss:$40 sps:$4 sm:$0xff]  }
 0x3f6   :  { %8323 = vmatpush1.bf16.msra.mxu1 %v14213_v30  ;;  %8281 = vmatprep.subr.bf16.mxu0 %v14218_v33  ;;  %v14291_v30 = vld [vmem:[#allocation10 + $0x8d0] ss:$40 sps:$4 sm:$0xff]   ;;  %v14296_v33 = vld [vmem:[#allocation10 + $0x154] ss:$40 sps:$4 sm:$0xff]  }
 0x3f7   :  { %8390 = vmatprep.subr.bf16.mxu1 %v14221_v34  ;;  %v14299_v34 = vld [vmem:[#allocation10 + $0x924] ss:$40 sps:$4 sm:$0xff]  }
 0x3f9   :  { %8282 = vmatpush1.bf16.msra.mxu0 %v14216_v35  ;;  %8341 = vmatmul.mubr.bf16.vlgmr.msra.gmra.mrb[32].mxu1 %v15763_v9  ;;  %v14294_v35 = vld [vmem:[#allocation10 + $0x150] ss:$40 sps:$4 sm:$0xff]  }
 0x3fa   :  { %8391 = vmatpush1.bf16.msra.mxu1 %v14219_v37  ;;  %8422 = vmatprep.mubr.bf16.mxu1 %v15745_v42  ;;  %v14297_v37 = vld [vmem:[#allocation10 + $0x920] ss:$40 sps:$4 sm:$0xff]  }
 0x3fb   :  { %8283 = vmatprep.subr.bf16.mxu0 %v14224_v43  ;;  %8392 = vmatprep.subr.bf16.mxu1 %v14227_v44  ;;  %v14302_v43 = vld [vmem:[#allocation10 + $0x1a4] ss:$40 sps:$4 sm:$0xff]   ;;  %v14305_v44 = vld [vmem:[#allocation10 + $0x974] ss:$40 sps:$4 sm:$0xff]  }
 0x3fd   :  { %8284 = vmatpush1.bf16.msra.mxu0 %v14222_v31  ;;  %v14300_v31 = vld [vmem:[#allocation10 + $0x1a0] ss:$40 sps:$4 sm:$0xff]  }
 0x3fe   :  { %8393 = vmatpush1.bf16.msra.mxu1 %v14225_v49  ;;  %8285 = vmatprep.subr.bf16.mxu0 %v14230_v50  ;;  %v14303_v49 = vld [vmem:[#allocation10 + $0x970] ss:$40 sps:$4 sm:$0xff]   ;;  %v14308_v50 = vld [vmem:[#allocation10 + $0x1f4] ss:$40 sps:$4 sm:$0xff]  }
 0x3ff   :  { %8394 = vmatprep.subr.bf16.mxu1 %v14233_v48  ;;  %v14311_v48 = vld [vmem:[#allocation10 + $0x9c4] ss:$40 sps:$4 sm:$0xff]  }
 0x401   :  { %8286 = vmatpush1.bf16.msra.mxu0 %v14228_v51  ;;  %v14306_v51 = vld [vmem:[#allocation10 + $0x1f0] ss:$40 sps:$4 sm:$0xff]  }
 0x402   :  { %8395 = vmatpush1.bf16.msra.mxu1 %v14231_v52  ;;  %8287 = vmatprep.subr.bf16.mxu0 %v14236_v54  ;;  %v14309_v52 = vld [vmem:[#allocation10 + $0x9c0] ss:$40 sps:$4 sm:$0xff]   ;;  %v14314_v54 = vld [vmem:[#allocation10 + $0x244] ss:$40 sps:$4 sm:$0xff]  }
 0x403   :  { %8396 = vmatprep.subr.bf16.mxu1 %v14239_v55  ;;  %v14317_v55 = vld [vmem:[#allocation10 + $0x1c] ss:$40 sps:$4 sm:$0xff]  }
 0x405   :  { %8288 = vmatpush1.bf16.msra.mxu0 %v14234_v39  ;;  %v14312_v39 = vld [vmem:[#allocation10 + $0x240] ss:$40 sps:$4 sm:$0xff]  }
 0x406   :  { %8397 = vmatpush1.bf16.msra.mxu1 %v14237_v47  ;;  %8289 = vmatprep.subr.bf16.mxu0 %v14242_v56  ;;  %v14315_v47 = vld [vmem:[#allocation10 + $0x18] ss:$40 sps:$4 sm:$0xff]   ;;  %v14320_v56 = vld [vmem:[#allocation10 + $0x294] ss:$40 sps:$4 sm:$0xff]  }
 0x407   :  { %8398 = vmatprep.subr.bf16.mxu1 %v14245_v57  ;;  %v14323_v57 = vld [vmem:[#allocation10 + $0x6c] ss:$40 sps:$4 sm:$0xff]  }
 0x409   :  { %8290 = vmatpush1.bf16.msra.mxu0 %v14240_v58  ;;  %v14318_v58 = vld [vmem:[#allocation10 + $0x290] ss:$40 sps:$4 sm:$0xff]  }
 0x40a   :  { %8399 = vmatpush1.bf16.msra.mxu1 %v14243_v59  ;;  %8291 = vmatprep.subr.bf16.mxu0 %v14248_v61  ;;  %v14321_v59 = vld [vmem:[#allocation10 + $0x68] ss:$40 sps:$4 sm:$0xff]   ;;  %v14326_v61 = vld [vmem:[#allocation10 + $0x2e4] ss:$40 sps:$4 sm:$0xff]  }
 0x40b   :  { %8400 = vmatprep.subr.bf16.mxu1 %v14251_v32  ;;  %v14329_v32 = vld [vmem:[#allocation10 + $0xbc] ss:$40 sps:$4 sm:$0xff]  }
 0x40d   :  { %8292 = vmatpush1.bf16.msra.mxu0 %v14246_v41  ;;  %v14324_v41 = vld [vmem:[#allocation10 + $0x2e0] ss:$40 sps:$4 sm:$0xff]  }
 0x40e   :  { %8401 = vmatpush1.bf16.msra.mxu1 %v14249_v62  ;;  %8293 = vmatprep.subr.bf16.mxu0 %v14254_v0  ;;  %v14327_v62 = vld [vmem:[#allocation10 + $0xb8] ss:$40 sps:$4 sm:$0xff]   ;;  %v14332_v0 = vld [vmem:[#allocation10 + $0x334] ss:$40 sps:$4 sm:$0xff]  }
 0x40f   :  { %8402 = vmatprep.subr.bf16.mxu1 %v14257_v1  ;;  %v14335_v1 = vld [vmem:[#allocation10 + $0x10c] ss:$40 sps:$4 sm:$0xff]  }
 0x411   :  { %8294 = vmatpush1.bf16.msra.mxu0 %v14252_v8  ;;  %v14330_v8 = vld [vmem:[#allocation10 + $0x330] ss:$40 sps:$4 sm:$0xff]  }
 0x412   :  { %8403 = vmatpush1.bf16.msra.mxu1 %v14255_v5  ;;  %8295 = vmatprep.subr.bf16.mxu0 %v14260_v13  ;;  %v14333_v5 = vld [vmem:[#allocation10 + $0x108] ss:$40 sps:$4 sm:$0xff]   ;;  %v14338_v13 = vld [vmem:[#allocation10 + $0x384] ss:$40 sps:$4 sm:$0xff]  }
 0x413   :  { %8404 = vmatprep.subr.bf16.mxu1 %v14263_v11  ;;  %v14341_v11 = vld [vmem:[#allocation10 + $0x15c] ss:$40 sps:$4 sm:$0xff]  }
 0x415   :  { %8296 = vmatpush1.bf16.msra.mxu0 %v14258_v12  ;;  %v14336_v12 = vld [vmem:[#allocation10 + $0x380] ss:$40 sps:$4 sm:$0xff]  }
 0x416   :  { %8405 = vmatpush1.bf16.msra.mxu1 %v14261_v14  ;;  %8297 = vmatprep.subr.bf16.mxu0 %v14266_v15  ;;  %v14339_v14 = vld [vmem:[#allocation10 + $0x158] ss:$40 sps:$4 sm:$0xff]   ;;  %v14344_v15 = vld [vmem:[#allocation10 + $0x3d4] ss:$40 sps:$4 sm:$0xff]  }
 0x417   :  { %8406 = vmatprep.subr.bf16.mxu1 %v14269_v17  ;;  %v14347_v17 = vld [vmem:[#allocation10 + $0x1ac] ss:$40 sps:$4 sm:$0xff]  }
 0x419   :  { %8298 = vmatpush1.bf16.msra.mxu0 %v14264_v27  ;;  %v14342_v27 = vld [vmem:[#allocation10 + $0x3d0] ss:$40 sps:$4 sm:$0xff]  }
 0x41a   :  { %8407 = vmatpush1.bf16.msra.mxu1 %v14267_v16  ;;  %8349 = vmatprep.subr.bf16.mxu0 %v14272_v18  ;;  %v14345_v16 = vld [vmem:[#allocation10 + $0x1a8] ss:$40 sps:$4 sm:$0xff]   ;;  %v14350_v18 = vld [vmem:[#allocation10 + $0x424] ss:$40 sps:$4 sm:$0xff]  }
 0x41b   :  { %8408 = vmatprep.subr.bf16.mxu1 %v14275_v19  ;;  %v14353_v19 = vld [vmem:[#allocation10 + $0x1fc] ss:$40 sps:$4 sm:$0xff]  }
 0x41c   :  { %8300 = vmatmul.mubr.bf16.vlgmr.msra.gmra.mrb[32].mxu0 %v15749_v22 }
 0x41d   :  { %8350 = vmatpush1.bf16.msra.mxu0 %v14270_v20  ;;  %8381 = vmatprep.mubr.bf16.mxu0 %v15740_v38  ;;  %v14348_v20 = vld [vmem:[#allocation10 + $0x420] ss:$40 sps:$4 sm:$0xff]  }
 0x41e   :  { %8409 = vmatpush1.bf16.msra.mxu1 %v14273_v23  ;;  %8351 = vmatprep.subr.bf16.mxu0 %v14278_v24  ;;  %v14351_v23 = vld [vmem:[#allocation10 + $0x1f8] ss:$40 sps:$4 sm:$0xff]   ;;  %v14356_v24 = vld [vmem:[#allocation10 + $0x474] ss:$40 sps:$4 sm:$0xff]  }
 0x41f   :  { %8410 = vmatprep.subr.bf16.mxu1 %v14281_v25  ;;  %v14359_v25 = vld [vmem:[#allocation10 + $0x24c] ss:$40 sps:$4 sm:$0xff]  }
 0x421   :  { %8352 = vmatpush1.bf16.msra.mxu0 %v14276_v26  ;;  %v14354_v26 = vld [vmem:[#allocation10 + $0x470] ss:$40 sps:$4 sm:$0xff]  }
 0x422   :  { %8411 = vmatpush1.bf16.msra.mxu1 %v14279_v40  ;;  %8353 = vmatprep.subr.bf16.mxu0 %v14284_v45  ;;  %v14357_v40 = vld [vmem:[#allocation10 + $0x248] ss:$40 sps:$4 sm:$0xff]   ;;  %v14362_v45 = vld [vmem:[#allocation10 + $0x4c4] ss:$40 sps:$4 sm:$0xff]  }
 0x423   :  { %8412 = vmatprep.subr.bf16.mxu1 %v14287_v4  ;;  %v14365_v4 = vld [vmem:[#allocation10 + $0x29c] ss:$40 sps:$4 sm:$0xff]  }
 0x425   :  { %8354 = vmatpush1.bf16.msra.mxu0 %v14282_v28  ;;  %v14360_v28 = vld [vmem:[#allocation10 + $0x4c0] ss:$40 sps:$4 sm:$0xff]  }
 0x426   :  { %8413 = vmatpush1.bf16.msra.mxu1 %v14285_v36  ;;  %8355 = vmatprep.subr.bf16.mxu0 %v14290_v21  ;;  %v14363_v36 = vld [vmem:[#allocation10 + $0x298] ss:$40 sps:$4 sm:$0xff]   ;;  %v14368_v21 = vld [vmem:[#allocation10 + $0xa14] ss:$40 sps:$4 sm:$0xff]  }
 0x427   :  { %8414 = vmatprep.subr.bf16.mxu1 %v14293_v10  ;;  %v14371_v10 = vld [vmem:[#allocation10 + $0x2ec] ss:$40 sps:$4 sm:$0xff]  }
 0x429   :  { %8356 = vmatpush1.bf16.msra.mxu0 %v14288_v29  ;;  %v14366_v29 = vld [vmem:[#allocation10 + $0xa10] ss:$40 sps:$4 sm:$0xff]  }
 0x42a   :  { %8415 = vmatpush1.bf16.msra.mxu1 %v14291_v30  ;;  %8357 = vmatprep.subr.bf16.mxu0 %v14296_v33  ;;  %v14369_v30 = vld [vmem:[#allocation10 + $0x2e8] ss:$40 sps:$4 sm:$0xff]   ;;  %v14374_v33 = vld [vmem:[#allocation10 + $0xa64] ss:$40 sps:$4 sm:$0xff]  }
 0x42b   :  { %8416 = vmatprep.subr.bf16.mxu1 %v14299_v34  ;;  %v14377_v34 = vld [vmem:[#allocation10 + $0x33c] ss:$40 sps:$4 sm:$0xff]  }
 0x42d   :  { %8358 = vmatpush1.bf16.msra.mxu0 %v14294_v35  ;;  %v14372_v35 = vld [vmem:[#allocation10 + $0xa60] ss:$40 sps:$4 sm:$0xff]  }
 0x42e   :  { %8417 = vmatpush1.bf16.msra.mxu1 %v14297_v37  ;;  %8359 = vmatprep.subr.bf16.mxu0 %v14302_v43  ;;  %v14375_v37 = vld [vmem:[#allocation10 + $0x338] ss:$40 sps:$4 sm:$0xff]   ;;  %v14380_v43 = vld [vmem:[#allocation10 + $0xab4] ss:$40 sps:$4 sm:$0xff]  }
 0x42f   :  { %8418 = vmatprep.subr.bf16.mxu1 %v14305_v44  ;;  %v14383_v44 = vld [vmem:[#allocation10 + $0x38c] ss:$40 sps:$4 sm:$0xff]  }
 0x431   :  { %8360 = vmatpush1.bf16.msra.mxu0 %v14300_v31  ;;  %v14378_v31 = vld [vmem:[#allocation10 + $0xab0] ss:$40 sps:$4 sm:$0xff]  }
 0x432   :  { %8419 = vmatpush1.bf16.msra.mxu1 %v14303_v49  ;;  %8361 = vmatprep.subr.bf16.mxu0 %v14308_v50  ;;  %v14381_v49 = vld [vmem:[#allocation10 + $0x388] ss:$40 sps:$4 sm:$0xff]   ;;  %v14386_v50 = vld [vmem:[#allocation10 + $0xb04] ss:$40 sps:$4 sm:$0xff]  }
 0x433   :  { %8420 = vmatprep.subr.bf16.mxu1 %v14311_v48  ;;  %v14389_v48 = vld [vmem:[#allocation10 + $0x3dc] ss:$40 sps:$4 sm:$0xff]  }
 0x435   :  { %8362 = vmatpush1.bf16.msra.mxu0 %v14306_v51  ;;  %v14384_v51 = vld [vmem:[#allocation10 + $0xb00] ss:$40 sps:$4 sm:$0xff]  }
 0x436   :  { %8421 = vmatpush1.bf16.msra.mxu1 %v14309_v52  ;;  %8363 = vmatprep.subr.bf16.mxu0 %v14314_v54  ;;  %v14387_v52 = vld [vmem:[#allocation10 + $0x3d8] ss:$40 sps:$4 sm:$0xff]   ;;  %v14392_v54 = vld [vmem:[#allocation10 + $0xb54] ss:$40 sps:$4 sm:$0xff]  }
 0x437   :  { %8472 = vmatprep.subr.bf16.mxu1 %v14317_v55  ;;  %v14395_v55 = vld [vmem:[#allocation10 + $0x42c] ss:$40 sps:$4 sm:$0xff]  }
 0x439   :  { %8364 = vmatpush1.bf16.msra.mxu0 %v14312_v39  ;;  %8423 = vmatmul.mubr.bf16.vlgmr.msra.gmra.mrb[36].mxu1 %v15749_v22  ;;  %v14390_v39 = vld [vmem:[#allocation10 + $0xb50] ss:$40 sps:$4 sm:$0xff]  }
 0x43a   :  { %8473 = vmatpush1.bf16.msra.mxu1 %v14315_v47  ;;  %8504 = vmatprep.mubr.bf16.mxu1 %v15740_v38  ;;  %v14393_v47 = vld [vmem:[#allocation10 + $0x428] ss:$40 sps:$4 sm:$0xff]  }
 0x43b   :  { %8365 = vmatprep.subr.bf16.mxu0 %v14320_v56  ;;  %8474 = vmatprep.subr.bf16.mxu1 %v14323_v57  ;;  %v14398_v56 = vld [vmem:[#allocation10 + $0xba4] ss:$40 sps:$4 sm:$0xff]  }
 0x43c   :  { %v14401_v57 = vld [vmem:[#allocation10 + $0x47c] ss:$40 sps:$4 sm:$0xff]  }
 0x43d   :  { %8366 = vmatpush1.bf16.msra.mxu0 %v14318_v58 }
 0x43e   :  { %8475 = vmatpush1.bf16.msra.mxu1 %v14321_v59  ;;  %8367 = vmatprep.subr.bf16.mxu0 %v14326_v61 }
 0x43f   :  { %8476 = vmatprep.subr.bf16.mxu1 %v14329_v32 }
 0x441   :  { %8368 = vmatpush1.bf16.msra.mxu0 %v14324_v41 }
 0x442   :  { %8477 = vmatpush1.bf16.msra.mxu1 %v14327_v62  ;;  %8369 = vmatprep.subr.bf16.mxu0 %v14332_v0  ;;  %v14396_v62 = vld [vmem:[#allocation10 + $0xba0] ss:$40 sps:$4 sm:$0xff]  }
 0x443   :  { %8478 = vmatprep.subr.bf16.mxu1 %v14335_v1 }
 0x445   :  { %8370 = vmatpush1.bf16.msra.mxu0 %v14330_v8 }
 0x446   :  { %8479 = vmatpush1.bf16.msra.mxu1 %v14333_v5  ;;  %8371 = vmatprep.subr.bf16.mxu0 %v14338_v13  ;;  %v14399_v5 = vld [vmem:[#allocation10 + $0x478] ss:$40 sps:$4 sm:$0xff]   ;;  %v14404_v13 = vld [vmem:[#allocation10 + $0xbf4] ss:$40 sps:$4 sm:$0xff]  }
 0x447   :  { %8480 = vmatprep.subr.bf16.mxu1 %v14341_v11 }
 0x449   :  { %8372 = vmatpush1.bf16.msra.mxu0 %v14336_v12 }
 0x44a   :  { %8481 = vmatpush1.bf16.msra.mxu1 %v14339_v14  ;;  %8373 = vmatprep.subr.bf16.mxu0 %v14344_v15  ;;  %v14407_v14 = vld [vmem:[#allocation10 + $0x4cc] ss:$40 sps:$4 sm:$0xff]   ;;  %v14402_v15 = vld [vmem:[#allocation10 + $0xbf0] ss:$40 sps:$4 sm:$0xff]  }
 0x44b   :  { %8482 = vmatprep.subr.bf16.mxu1 %v14347_v17  ;;  %v14405_v17 = vld [vmem:[#allocation10 + $0x4c8] ss:$40 sps:$4 sm:$0xff]  }
 0x44d   :  { %8374 = vmatpush1.bf16.msra.mxu0 %v14342_v27  ;;  %v14410_v27 = vld [vmem:[#allocation10 + $0xc44] ss:$40 sps:$4 sm:$0xff]  }
 0x44e   :  { %8483 = vmatpush1.bf16.msra.mxu1 %v14345_v16  ;;  %8375 = vmatprep.subr.bf16.mxu0 %v14350_v18  ;;  %v14413_v16 = vld [vmem:[#allocation10 + $0xa1c] ss:$40 sps:$4 sm:$0xff]   ;;  %v14408_v18 = vld [vmem:[#allocation10 + $0xc40] ss:$40 sps:$4 sm:$0xff]  }
 0x44f   :  { %8484 = vmatprep.subr.bf16.mxu1 %v14353_v19  ;;  %v14411_v19 = vld [vmem:[#allocation10 + $0xa18] ss:$40 sps:$4 sm:$0xff]  }
 0x451   :  { %8376 = vmatpush1.bf16.msra.mxu0 %v14348_v20  ;;  %v14416_v20 = vld [vmem:[#allocation10 + $0x51c] ss:$40 sps:$4 sm:$0xff]  }
 0x452   :  { %8485 = vmatpush1.bf16.msra.mxu1 %v14351_v23  ;;  %8377 = vmatprep.subr.bf16.mxu0 %v14356_v24  ;;  %v14419_v23 = vld [vmem:[#allocation10 + $0xa6c] ss:$40 sps:$4 sm:$0xff]   ;;  %v14414_v24 = vld [vmem:[#allocation10 + $0x518] ss:$40 sps:$4 sm:$0xff]  }
 0x453   :  { %8486 = vmatprep.subr.bf16.mxu1 %v14359_v25  ;;  %v14417_v25 = vld [vmem:[#allocation10 + $0xa68] ss:$40 sps:$4 sm:$0xff]  }
 0x455   :  { %8378 = vmatpush1.bf16.msra.mxu0 %v14354_v26  ;;  %v14422_v26 = vld [vmem:[#allocation10 + $0x56c] ss:$40 sps:$4 sm:$0xff]  }
 0x456   :  { %8487 = vmatpush1.bf16.msra.mxu1 %v14357_v40  ;;  %8379 = vmatprep.subr.bf16.mxu0 %v14362_v45  ;;  %v14425_v40 = vld [vmem:[#allocation10 + $0xabc] ss:$40 sps:$4 sm:$0xff]   ;;  %v14420_v45 = vld [vmem:[#allocation10 + $0x568] ss:$40 sps:$4 sm:$0xff]  }
 0x457   :  { %8488 = vmatprep.subr.bf16.mxu1 %v14365_v4  ;;  %v14423_v4 = vld [vmem:[#allocation10 + $0xab8] ss:$40 sps:$4 sm:$0xff]  }
 0x459   :  { %8380 = vmatpush1.bf16.msra.mxu0 %v14360_v28  ;;  %v14428_v28 = vld [vmem:[#allocation10 + $0x5bc] ss:$40 sps:$4 sm:$0xff]  }
 0x45a   :  { %8489 = vmatpush1.bf16.msra.mxu1 %v14363_v36  ;;  %8431 = vmatprep.subr.bf16.mxu0 %v14368_v21  ;;  %v14431_v36 = vld [vmem:[#allocation10 + $0xb0c] ss:$40 sps:$4 sm:$0xff]   ;;  %v14426_v21 = vld [vmem:[#allocation10 + $0x5b8] ss:$40 sps:$4 sm:$0xff]  }
 0x45b   :  { %8490 = vmatprep.subr.bf16.mxu1 %v14371_v10  ;;  %v14429_v10 = vld [vmem:[#allocation10 + $0xb08] ss:$40 sps:$4 sm:$0xff]  }
 0x45c   :  { %8382 = vmatmul.mubr.bf16.vlgmr.msra.gmra.mrb[36].mxu0 %v15747_v46 }
 0x45d   :  { %8432 = vmatpush1.bf16.msra.mxu0 %v14366_v29  ;;  %8463 = vmatprep.mubr.bf16.mxu0 %v15381_v53  ;;  %v14434_v29 = vld [vmem:[#allocation10 + $0x60c] ss:$40 sps:$4 sm:$0xff]  }
 0x45e   :  { %8491 = vmatpush1.bf16.msra.mxu1 %v14369_v30  ;;  %8433 = vmatprep.subr.bf16.mxu0 %v14374_v33  ;;  %v14437_v30 = vld [vmem:[#allocation10 + $0xb5c] ss:$40 sps:$4 sm:$0xff]   ;;  %v14432_v33 = vld [vmem:[#allocation10 + $0x608] ss:$40 sps:$4 sm:$0xff]  }
 0x45f   :  { %8492 = vmatprep.subr.bf16.mxu1 %v14377_v34  ;;  %v14435_v34 = vld [vmem:[#allocation10 + $0xb58] ss:$40 sps:$4 sm:$0xff]  }
 0x461   :  { %8434 = vmatpush1.bf16.msra.mxu0 %v14372_v35  ;;  %v14440_v35 = vld [vmem:[#allocation10 + $0x65c] ss:$40 sps:$4 sm:$0xff]  }
 0x462   :  { %8493 = vmatpush1.bf16.msra.mxu1 %v14375_v37  ;;  %8435 = vmatprep.subr.bf16.mxu0 %v14380_v43  ;;  %v14443_v37 = vld [vmem:[#allocation10 + $0xbac] ss:$40 sps:$4 sm:$0xff]   ;;  %v14438_v43 = vld [vmem:[#allocation10 + $0x658] ss:$40 sps:$4 sm:$0xff]  }
 0x463   :  { %8494 = vmatprep.subr.bf16.mxu1 %v14383_v44  ;;  %v14441_v44 = vld [vmem:[#allocation10 + $0xba8] ss:$40 sps:$4 sm:$0xff]  }
 0x465   :  { %8436 = vmatpush1.bf16.msra.mxu0 %v14378_v31  ;;  %v14446_v31 = vld [vmem:[#allocation10 + $0x6ac] ss:$40 sps:$4 sm:$0xff]  }
 0x466   :  { %8495 = vmatpush1.bf16.msra.mxu1 %v14381_v49  ;;  %8437 = vmatprep.subr.bf16.mxu0 %v14386_v50  ;;  %v14449_v49 = vld [vmem:[#allocation10 + $0xbfc] ss:$40 sps:$4 sm:$0xff]   ;;  %v14444_v50 = vld [vmem:[#allocation10 + $0x6a8] ss:$40 sps:$4 sm:$0xff]  }
 0x467   :  { %8496 = vmatprep.subr.bf16.mxu1 %v14389_v48  ;;  %v14447_v48 = vld [vmem:[#allocation10 + $0xbf8] ss:$40 sps:$4 sm:$0xff]  }
 0x469   :  { %8438 = vmatpush1.bf16.msra.mxu0 %v14384_v51  ;;  %v14452_v51 = vld [vmem:[#allocation10 + $0x6fc] ss:$40 sps:$4 sm:$0xff]  }
 0x46a   :  { %8497 = vmatpush1.bf16.msra.mxu1 %v14387_v52  ;;  %8439 = vmatprep.subr.bf16.mxu0 %v14392_v54  ;;  %v14455_v52 = vld [vmem:[#allocation10 + $0xc4c] ss:$40 sps:$4 sm:$0xff]   ;;  %v14450_v54 = vld [vmem:[#allocation10 + $0x6f8] ss:$40 sps:$4 sm:$0xff]  }
 0x46b   :  { %8498 = vmatprep.subr.bf16.mxu1 %v14395_v55  ;;  %v14453_v55 = vld [vmem:[#allocation10 + $0xc48] ss:$40 sps:$4 sm:$0xff]  }
 0x46c   :  { %v8137_v58 = vpop.f32.mrb[24].mxu0  ;;  %v8178_v59 = vpop.f32.mrb[24].mxu1 }
 0x46d   :  { %v15776_v61 = vadd.f32 %v8178_v59, %v8137_v58  ;;  %8440 = vmatpush1.bf16.msra.mxu0 %v14390_v39  ;;  %v8139_v32 = vpop.f32.mrb[25].mxu0  ;;  %v8180_v41 = vpop.f32.mrb[25].mxu1  ;;  %v14458_v39 = vld [vmem:[#allocation10 + $0x74c] ss:$40 sps:$4 sm:$0xff]   ;;  %v14464_v58 = vld [vmem:[#allocation10 + $0x79c] ss:$40 sps:$4 sm:$0xff]  }
 0x46e   :  { %v15778_v0 = vadd.f32 %v8180_v41, %v8139_v32  ;;  %8499 = vmatpush1.bf16.msra.mxu1 %v14393_v47  ;;  %v8141_v1 = vpop.f32.mrb[26].mxu0  ;;  %v8182_v8 = vpop.f32.mrb[26].mxu1  ;;  %8441 = vmatprep.subr.bf16.mxu0 %v14398_v56  ;;  %v14461_v47 = vld [vmem:[#allocation10 + $0x524] ss:$40 sps:$4 sm:$0xff]   ;;  %v14456_v56 = vld [vmem:[#allocation10 + $0x748] ss:$40 sps:$4 sm:$0xff]  }
 0x46f   :  { %v8142_v11 = vpop.f32.mrb[27].mxu0  ;;  %v8183_v12 = vpop.f32.mrb[27].mxu1  ;;  %8500 = vmatprep.subr.bf16.mxu1 %v14401_v57  ;;  %v14459_v57 = vld [vmem:[#allocation10 + $0x520] ss:$40 sps:$4 sm:$0xff]   ;;  %v14467_v59 = vld [vmem:[#allocation10 + $0x574] ss:$40 sps:$4 sm:$0xff]  }
 0x470   :  { %v14462_v32 = vld [vmem:[#allocation10 + $0x798] ss:$40 sps:$4 sm:$0xff]   ;;  %v14473_v1 = vld [vmem:[#allocation10 + $0x5c4] ss:$40 sps:$4 sm:$0xff]   ;;  %v14468_v8 = vld [vmem:[#allocation10 + $0x7e8] ss:$40 sps:$4 sm:$0xff]  }
 0x471   :  { %8442 = vmatpush1.bf16.msra.mxu0 %v14396_v62  ;;  %v14465_v41 = vld [vmem:[#allocation10 + $0x570] ss:$40 sps:$4 sm:$0xff]   ;;  %v14470_v62 = vld [vmem:[#allocation10 + $0x7ec] ss:$40 sps:$4 sm:$0xff]  }
 0x472   :  { %8501 = vmatpush1.bf16.msra.mxu1 %v14399_v5  ;;  %8443 = vmatprep.subr.bf16.mxu0 %v14404_v13  ;;  %v14471_v5 = vld [vmem:[#allocation10 + $0x5c0] ss:$40 sps:$4 sm:$0xff]   ;;  %v14476_v13 = vld [vmem:[#allocation10 + $0x83c] ss:$40 sps:$4 sm:$0xff]  }
 0x473   :  { %8502 = vmatprep.subr.bf16.mxu1 %v14407_v14  ;;  %v14479_v11 = vld [vmem:[#allocation10 + $0x614] ss:$40 sps:$4 sm:$0xff]   ;;  %v14474_v12 = vld [vmem:[#allocation10 + $0x838] ss:$40 sps:$4 sm:$0xff]  }
 0x474   :  { %v14477_v14 = vld [vmem:[#allocation10 + $0x610] ss:$40 sps:$4 sm:$0xff]  }
 0x475   :  { %8444 = vmatpush1.bf16.msra.mxu0 %v14402_v15  ;;  %v14482_v15 = vld [vmem:[#allocation10 + $0x88c] ss:$40 sps:$4 sm:$0xff]  }
 0x476   :  { %8503 = vmatpush1.bf16.msra.mxu1 %v14405_v17  ;;  %8445 = vmatprep.subr.bf16.mxu0 %v14410_v27  ;;  %v14480_v17 = vld [vmem:[#allocation10 + $0x888] ss:$40 sps:$4 sm:$0xff]  }
 0x477   :  { %8554 = vmatprep.subr.bf16.mxu1 %v14413_v16  ;;  %v14483_v27 = vld [vmem:[#allocation10 + $0x660] ss:$40 sps:$4 sm:$0xff]   ;;  %v14488_v16 = vld [vmem:[#allocation10 + $0x8dc] ss:$40 sps:$4 sm:$0xff]  }
 0x479   :  { %8446 = vmatpush1.bf16.msra.mxu0 %v14408_v18  ;;  %8505 = vmatmul.mubr.bf16.vlgmr.msra.gmra.mrb[40].mxu1 %v15747_v46  ;;  %v14491_v18 = vld [vmem:[#allocation10 + $0x6b4] ss:$40 sps:$4 sm:$0xff]  }
 0x47a   :  { %8555 = vmatpush1.bf16.msra.mxu1 %v14411_v19  ;;  %8513 = vmatprep.subr.bf16.mxu0 %v14416_v20  ;;  %v14486_v19 = vld [vmem:[#allocation10 + $0x8d8] ss:$40 sps:$4 sm:$0xff]  }
 0x47b   :  { %8556 = vmatprep.subr.bf16.mxu1 %v14419_v23  ;;  %8586 = vmatprep.mubr.bf16.mxu1 %v15381_v53  ;;  %v14489_v20 = vld [vmem:[#allocation10 + $0x6b0] ss:$40 sps:$4 sm:$0xff]   ;;  %v14494_v23 = vld [vmem:[#allocation10 + $0x92c] ss:$40 sps:$4 sm:$0xff]  }
 0x47c   :  { %8464 = vmatmul.mubr.bf16.vlgmr.msra.gmra.mrb[40].mxu0 %v15763_v9 }
 0x47d   :  { %8514 = vmatpush1.bf16.msra.mxu0 %v14414_v24  ;;  %8545 = vmatprep.mubr.bf16.mxu0 %v15745_v42  ;;  %v14497_v24 = vld [vmem:[#allocation10 + $0x704] ss:$40 sps:$4 sm:$0xff]  }
 0x47e   :  { %8557 = vmatpush1.bf16.msra.mxu1 %v14417_v25  ;;  %8515 = vmatprep.subr.bf16.mxu0 %v14422_v26 }
 0x47f   :  { %8558 = vmatprep.subr.bf16.mxu1 %v14425_v40  ;;  %v14492_v40 = vld [vmem:[#allocation10 + $0x928] ss:$40 sps:$4 sm:$0xff]  }
 0x481   :  { %8516 = vmatpush1.bf16.msra.mxu0 %v14420_v45 }
 0x482   :  { %8559 = vmatpush1.bf16.msra.mxu1 %v14423_v4  ;;  %8517 = vmatprep.subr.bf16.mxu0 %v14428_v28  ;;  %v14495_v4 = vld [vmem:[#allocation10 + $0x700] ss:$40 sps:$4 sm:$0xff]   ;;  %v14500_v28 = vld [vmem:[#allocation10 + $0x97c] ss:$40 sps:$4 sm:$0xff]  }
 0x483   :  { %8560 = vmatprep.subr.bf16.mxu1 %v14431_v36 }
 0x485   :  { %8518 = vmatpush1.bf16.msra.mxu0 %v14426_v21 }
 0x486   :  { %8561 = vmatpush1.bf16.msra.mxu1 %v14429_v10  ;;  %8519 = vmatprep.subr.bf16.mxu0 %v14434_v29  ;;  %v14503_v10 = vld [vmem:[#allocation10 + $0x754] ss:$40 sps:$4 sm:$0xff]  }
 0x487   :  { %8562 = vmatprep.subr.bf16.mxu1 %v14437_v30 }
 0x489   :  { %8520 = vmatpush1.bf16.msra.mxu0 %v14432_v33 }
 0x48a   :  { %8563 = vmatpush1.bf16.msra.mxu1 %v14435_v34  ;;  %8521 = vmatprep.subr.bf16.mxu0 %v14440_v35  ;;  %v14498_v35 = vld [vmem:[#allocation10 + $0x978] ss:$40 sps:$4 sm:$0xff]  }
 0x48b   :  { %8564 = vmatprep.subr.bf16.mxu1 %v14443_v37 }
 0x48d   :  { %8522 = vmatpush1.bf16.msra.mxu0 %v14438_v43  ;;  %v14501_v43 = vld [vmem:[#allocation10 + $0x750] ss:$40 sps:$4 sm:$0xff]  }
 0x48e   :  { %8565 = vmatpush1.bf16.msra.mxu1 %v14441_v44  ;;  %8523 = vmatprep.subr.bf16.mxu0 %v14446_v31  ;;  %v14506_v44 = vld [vmem:[#allocation10 + $0x9cc] ss:$40 sps:$4 sm:$0xff]  }
 0x48f   :  { %8566 = vmatprep.subr.bf16.mxu1 %v14449_v49  ;;  %v14509_v31 = vld [vmem:[#allocation10 + $0x7a4] ss:$40 sps:$4 sm:$0xff]   ;;  %v14504_v49 = vld [vmem:[#allocation10 + $0x9c8] ss:$40 sps:$4 sm:$0xff]  }
 0x491   :  { %8524 = vmatpush1.bf16.msra.mxu0 %v14444_v50  ;;  %v14512_v50 = vld [vmem:[#allocation10 + $0x24] ss:$40 sps:$4 sm:$0xff]  }
 0x492   :  { %8567 = vmatpush1.bf16.msra.mxu1 %v14447_v48  ;;  %8525 = vmatprep.subr.bf16.mxu0 %v14452_v51  ;;  %v14515_v48 = vld [vmem:[#allocation10 + $0x7f4] ss:$40 sps:$4 sm:$0xff]   ;;  %v14513_v51 = vld [vmem:[#allocation10 + $0x7f0] ss:$40 sps:$4 sm:$0xff]  }
 0x493   :  { %8568 = vmatprep.subr.bf16.mxu1 %v14455_v52  ;;  %v14518_v52 = vld [vmem:[#allocation10 + $0x74] ss:$40 sps:$4 sm:$0xff]  }
 0x495   :  { %8526 = vmatpush1.bf16.msra.mxu0 %v14450_v54  ;;  %v14521_v54 = vld [vmem:[#allocation10 + $0x844] ss:$40 sps:$4 sm:$0xff]  }
 0x496   :  { %8569 = vmatpush1.bf16.msra.mxu1 %v14453_v55  ;;  %8527 = vmatprep.subr.bf16.mxu0 %v14458_v39  ;;  %v14516_v55 = vld [vmem:[#allocation10 + $0x70] ss:$40 sps:$4 sm:$0xff]   ;;  %v14519_v39 = vld [vmem:[#allocation10 + $0x840] ss:$40 sps:$4 sm:$0xff]  }
 0x497   :  { %8636 = vmatprep.subr.bf16.mxu1 %v14461_v47  ;;  %v14524_v47 = vld [vmem:[#allocation10 + $0xc4] ss:$40 sps:$4 sm:$0xff]  }
 0x499   :  { %8528 = vmatpush1.bf16.msra.mxu0 %v14456_v56  ;;  %8587 = vmatmul.mubr.bf16.vlgmr.msra.gmra.mrb[44].mxu1 %v15763_v9  ;;  %v14527_v56 = vld [vmem:[#allocation10 + $0x894] ss:$40 sps:$4 sm:$0xff]  }
 0x49a   :  { %8637 = vmatpush1.bf16.msra.mxu1 %v14459_v57  ;;  %8668 = vmatprep.mubr.bf16.mxu1 %v15745_v42  ;;  %v14485_v42 = vld [vmem:[#allocation10 + $0x664] ss:$40 sps:$4 sm:$0xff]   ;;  %v14522_v57 = vld [vmem:[#allocation10 + $0xc0] ss:$40 sps:$4 sm:$0xff]  }
 0x49b   :  { %8529 = vmatprep.subr.bf16.mxu0 %v14464_v58  ;;  %8638 = vmatprep.subr.bf16.mxu1 %v14467_v59  ;;  %v14525_v58 = vld [vmem:[#allocation10 + $0x890] ss:$40 sps:$4 sm:$0xff]   ;;  %v14530_v59 = vld [vmem:[#allocation10 + $0x114] ss:$40 sps:$4 sm:$0xff]  }
 0x49d   :  { %8530 = vmatpush1.bf16.msra.mxu0 %v14462_v32  ;;  %v14533_v32 = vld [vmem:[#allocation10 + $0x8e4] ss:$40 sps:$4 sm:$0xff]  }
 0x49e   :  { %8639 = vmatpush1.bf16.msra.mxu1 %v14465_v41  ;;  %8531 = vmatprep.subr.bf16.mxu0 %v14470_v62  ;;  %v14528_v41 = vld [vmem:[#allocation10 + $0x110] ss:$40 sps:$4 sm:$0xff]   ;;  %v14536_v62 = vld [vmem:[#allocation10 + $0x164] ss:$40 sps:$4 sm:$0xff]  }
 0x49f   :  { %8640 = vmatprep.subr.bf16.mxu1 %v14473_v1  ;;  %v14539_v1 = vld [vmem:[#allocation10 + $0x934] ss:$40 sps:$4 sm:$0xff]  }
 0x4a1   :  { %8532 = vmatpush1.bf16.msra.mxu0 %v14468_v8  ;;  %v14534_v8 = vld [vmem:[#allocation10 + $0x160] ss:$40 sps:$4 sm:$0xff]  }
 0x4a2   :  { %8641 = vmatpush1.bf16.msra.mxu1 %v14471_v5  ;;  %8533 = vmatprep.subr.bf16.mxu0 %v14476_v13  ;;  %v14537_v5 = vld [vmem:[#allocation10 + $0x930] ss:$40 sps:$4 sm:$0xff]   ;;  %v14542_v13 = vld [vmem:[#allocation10 + $0x1b4] ss:$40 sps:$4 sm:$0xff]  }
 0x4a3   :  { %8642 = vmatprep.subr.bf16.mxu1 %v14479_v11  ;;  %v14545_v11 = vld [vmem:[#allocation10 + $0x984] ss:$40 sps:$4 sm:$0xff]  }
 0x4a5   :  { %8534 = vmatpush1.bf16.msra.mxu0 %v14474_v12 }
 0x4a6   :  { %8643 = vmatpush1.bf16.msra.mxu1 %v14477_v14  ;;  %8535 = vmatprep.subr.bf16.mxu0 %v14482_v15  ;;  %v14540_v15 = vld [vmem:[#allocation10 + $0x1b0] ss:$40 sps:$4 sm:$0xff]  }
 0x4a7   :  { %8644 = vmatprep.subr.bf16.mxu1 %v14485_v42 }
 0x4a9   :  { %8536 = vmatpush1.bf16.msra.mxu0 %v14480_v17  ;;  %v14543_v17 = vld [vmem:[#allocation10 + $0x980] ss:$40 sps:$4 sm:$0xff]  }
 0x4aa   :  { %8645 = vmatpush1.bf16.msra.mxu1 %v14483_v27  ;;  %8537 = vmatprep.subr.bf16.mxu0 %v14488_v16  ;;  %v14548_v27 = vld [vmem:[#allocation10 + $0x204] ss:$40 sps:$4 sm:$0xff]  }
 0x4ab   :  { %8646 = vmatprep.subr.bf16.mxu1 %v14491_v18  ;;  %v14551_v18 = vld [vmem:[#allocation10 + $0x9d4] ss:$40 sps:$4 sm:$0xff]  }
 0x4ac   :  { %v15786_v25 = vpop.f32.mrb[28].mxu1 }
 0x4ad   :  { %v15788_v26 = vpop.f32.mrb[29].mxu1  ;;  %8538 = vmatpush1.bf16.msra.mxu0 %v14486_v19  ;;  %v14546_v19 = vld [vmem:[#allocation10 + $0x200] ss:$40 sps:$4 sm:$0xff]  }
 0x4ae   :  { %v8264_v45 = vpop.f32.mrb[30].mxu1  ;;  %8647 = vmatpush1.bf16.msra.mxu1 %v14489_v20  ;;  %8539 = vmatprep.subr.bf16.mxu0 %v14494_v23  ;;  %v14549_v20 = vld [vmem:[#allocation10 + $0x9d0] ss:$40 sps:$4 sm:$0xff]   ;;  %v14554_v23 = vld [vmem:[#allocation10 + $0x254] ss:$40 sps:$4 sm:$0xff]  }
 0x4af   :  { %v8265_v36 = vpop.f32.mrb[31].mxu1  ;;  %v8219_v21 = vpop.f32.mrb[28].mxu0  ;;  %8648 = vmatprep.subr.bf16.mxu1 %v14497_v24  ;;  %v14557_v24 = vld [vmem:[#allocation9 + $0x4] ss:$40 sps:$4 sm:$0xff]   ;;  %v14555_v45 = vld [vmem:[#allocation9] ss:$40 sps:$4 sm:$0xff]  }
 0x4b0   :  { %v15791_v29 = vadd.f32 %v8219_v21, %v15776_v61  ;;  %v8221_v30 = vpop.f32.mrb[29].mxu0  ;;  %v14507_v61 = vld [vmem:[#allocation10 + $0x7a0] ss:$40 sps:$4 sm:$0xff]  }
 0x4b1   :  { %v15794_v33 = vadd.f32 %v8221_v30, %v15778_v0  ;;  %8540 = vmatpush1.bf16.msra.mxu0 %v14492_v40  ;;  %v8223_v34 = vpop.f32.mrb[30].mxu0  ;;  %v14510_v0 = vld [vmem:[#allocation10 + $0x20] ss:$40 sps:$4 sm:$0xff]   ;;  %v14552_v40 = vld [vmem:[#allocation10 + $0x250] ss:$40 sps:$4 sm:$0xff]  }
 0x4b2   :  { %8649 = vmatpush1.bf16.msra.mxu1 %v14495_v4  ;;  %v8224_v37 = vpop.f32.mrb[31].mxu0  ;;  %8541 = vmatprep.subr.bf16.mxu0 %v14500_v28  ;;  %v14560_v4 = vld [vmem:[#allocation10 + $0x2a4] ss:$40 sps:$4 sm:$0xff]   ;;  %v14563_v28 = vld [vmem:[#allocation9 + $0x54] ss:$40 sps:$4 sm:$0xff]  }
 0x4b3   :  { %8650 = vmatprep.subr.bf16.mxu1 %v14503_v10  ;;  %v15203_v36 = vld [vmem:[%s16004_s9 + $0x8] sm:$0xff]  ;;  %v14561_v30 = vld [vmem:[#allocation9 + $0x50] ss:$40 sps:$4 sm:$0xff]  }
 0x4b4   :  { %v15805_v21 = vpack.c.bf16 %v15203_v36, %v15203_v36  ;;  %v14558_v10 = vld [vmem:[#allocation10 + $0x2a0] ss:$40 sps:$4 sm:$0xff]   ;;  %v14566_v34 = vld [vmem:[#allocation10 + $0x2f4] ss:$40 sps:$4 sm:$0xff]   ;;  %v14564_v37 = vld [vmem:[#allocation10 + $0x2f0] ss:$40 sps:$4 sm:$0xff]  }
 0x4b5   :  { %8542 = vmatpush1.bf16.msra.mxu0 %v14498_v35  ;;  %v14569_v35 = vld [vmem:[#allocation9 + $0xa4] ss:$40 sps:$4 sm:$0xff]  }
 0x4b6   :  { %8651 = vmatpush1.bf16.msra.mxu1 %v14501_v43  ;;  %8543 = vmatprep.subr.bf16.mxu0 %v14506_v44  ;;  %v14567_v43 = vld [vmem:[#allocation9 + $0xa0] ss:$40 sps:$4 sm:$0xff]   ;;  %v14572_v44 = vld [vmem:[#allocation10 + $0x344] ss:$40 sps:$4 sm:$0xff]  }
 0x4b7   :  { %8652 = vmatprep.subr.bf16.mxu1 %v14509_v31  ;;  %v14575_v31 = vld [vmem:[#allocation9 + $0xf4] ss:$40 sps:$4 sm:$0xff]   ;;  %v14629_v36 = vld [vmem:[#allocation9 + $0x3c4] ss:$40 sps:$4 sm:$0xff]  }
 0x4b9   :  { %8544 = vmatpush1.bf16.msra.mxu0 %v14504_v49  ;;  %v14570_v49 = vld [vmem:[#allocation10 + $0x340] ss:$40 sps:$4 sm:$0xff]  }
 0x4ba   :  { %8653 = vmatpush1.bf16.msra.mxu1 %v14507_v61  ;;  %8595 = vmatprep.subr.bf16.mxu0 %v14512_v50  ;;  %v14578_v61 = vld [vmem:[#allocation10 + $0x394] ss:$40 sps:$4 sm:$0xff]   ;;  %v14581_v50 = vld [vmem:[#allocation9 + $0x144] ss:$40 sps:$4 sm:$0xff]  }
 0x4bb   :  { %8654 = vmatprep.subr.bf16.mxu1 %v14515_v48  ;;  %v14576_v48 = vld [vmem:[#allocation10 + $0x390] ss:$40 sps:$4 sm:$0xff]  }
 0x4bc   :  { %8546 = vmatmul.mubr.bf16.vlgmr.msra.gmra.mrb[44].mxu0 %v15749_v22 }
 0x4bd   :  { %8596 = vmatpush1.bf16.msra.mxu0 %v14510_v0  ;;  %8627 = vmatprep.mubr.bf16.mxu0 %v15740_v38  ;;  %v14531_v38 = vld [vmem:[#allocation10 + $0x8e0] ss:$40 sps:$4 sm:$0xff]  }
 0x4be   :  { %8655 = vmatpush1.bf16.msra.mxu1 %v14513_v51  ;;  %8597 = vmatprep.subr.bf16.mxu0 %v14518_v52  ;;  %v14579_v0 = vld [vmem:[#allocation9 + $0x140] ss:$40 sps:$4 sm:$0xff]   ;;  %v14584_v51 = vld [vmem:[#allocation10 + $0x3e4] ss:$40 sps:$4 sm:$0xff]   ;;  %v14587_v52 = vld [vmem:[#allocation9 + $0x194] ss:$40 sps:$4 sm:$0xff]  }
 0x4bf   :  { %8656 = vmatprep.subr.bf16.mxu1 %v14521_v54  ;;  %v14582_v54 = vld [vmem:[#allocation10 + $0x3e0] ss:$40 sps:$4 sm:$0xff]  }
 0x4c1   :  { %8598 = vmatpush1.bf16.msra.mxu0 %v14516_v55  ;;  %v14585_v55 = vld [vmem:[#allocation9 + $0x190] ss:$40 sps:$4 sm:$0xff]  }
 0x4c2   :  { %8657 = vmatpush1.bf16.msra.mxu1 %v14519_v39  ;;  %8599 = vmatprep.subr.bf16.mxu0 %v14524_v47  ;;  %v14590_v39 = vld [vmem:[#allocation10 + $0x434] ss:$40 sps:$4 sm:$0xff]   ;;  %v14593_v47 = vld [vmem:[#allocation9 + $0x1e4] ss:$40 sps:$4 sm:$0xff]  }
 0x4c3   :  { %8658 = vmatprep.subr.bf16.mxu1 %v14527_v56  ;;  %v14588_v56 = vld [vmem:[#allocation10 + $0x430] ss:$40 sps:$4 sm:$0xff]  }
 0x4c5   :  { %8600 = vmatpush1.bf16.msra.mxu0 %v14522_v57  ;;  %v14591_v57 = vld [vmem:[#allocation9 + $0x1e0] ss:$40 sps:$4 sm:$0xff]  }
 0x4c6   :  { %8659 = vmatpush1.bf16.msra.mxu1 %v14525_v58  ;;  %8601 = vmatprep.subr.bf16.mxu0 %v14530_v59  ;;  %v14596_v58 = vld [vmem:[#allocation10 + $0x484] ss:$40 sps:$4 sm:$0xff]  }
 0x4c7   :  { %8660 = vmatprep.subr.bf16.mxu1 %v14533_v32  ;;  %v14599_v32 = vld [vmem:[#allocation9 + $0x234] ss:$40 sps:$4 sm:$0xff]  }
 0x4c9   :  { %8602 = vmatpush1.bf16.msra.mxu0 %v14528_v41 }
 0x4ca   :  { %8661 = vmatpush1.bf16.msra.mxu1 %v14531_v38  ;;  %8603 = vmatprep.subr.bf16.mxu0 %v14536_v62 }
 0x4cb   :  { %8662 = vmatprep.subr.bf16.mxu1 %v14539_v1 }
 0x4cc   :  { %v15798_v12 = vpop.f32.mrb[32].mxu1 }
 0x4cd   :  { %v15800_v14 = vpop.f32.mrb[33].mxu1  ;;  %8604 = vmatpush1.bf16.msra.mxu0 %v14534_v8  ;;  %v14594_v8 = vld [vmem:[#allocation10 + $0x480] ss:$40 sps:$4 sm:$0xff]  }
 0x4ce   :  { %v8346_v42 = vpop.f32.mrb[34].mxu1  ;;  %8663 = vmatpush1.bf16.msra.mxu1 %v14537_v5  ;;  %8605 = vmatprep.subr.bf16.mxu0 %v14542_v13  ;;  %v14597_v13 = vld [vmem:[#allocation9 + $0x230] ss:$40 sps:$4 sm:$0xff]  }
 0x4cf   :  { %v8347_v16 = vpop.f32.mrb[35].mxu1  ;;  %8664 = vmatprep.subr.bf16.mxu1 %v14545_v11  ;;  %v14602_v11 = vld [vmem:[#allocation10 + $0x4d4] ss:$40 sps:$4 sm:$0xff]   ;;  %v14605_v42 = vld [vmem:[#allocation9 + $0x284] ss:$40 sps:$4 sm:$0xff]  }
 0x4d0   :  { %v14611_v16 = vld [vmem:[#allocation9 + $0x2d4] ss:$40 sps:$4 sm:$0xff]  }
 0x4d1   :  { %8606 = vmatpush1.bf16.msra.mxu0 %v14540_v15 }
 0x4d2   :  { %8665 = vmatpush1.bf16.msra.mxu1 %v14543_v17  ;;  %8607 = vmatprep.subr.bf16.mxu0 %v14548_v27  ;;  %v14608_v27 = vld [vmem:[#allocation10 + $0xa24] ss:$40 sps:$4 sm:$0xff]  }
 0x4d3   :  { %8666 = vmatprep.subr.bf16.mxu1 %v14551_v18  ;;  %v14606_v18 = vld [vmem:[#allocation10 + $0xa20] ss:$40 sps:$4 sm:$0xff]  }
 0x4d5   :  { %8608 = vmatpush1.bf16.msra.mxu0 %v14546_v19  ;;  %v14609_v19 = vld [vmem:[#allocation9 + $0x2d0] ss:$40 sps:$4 sm:$0xff]  }
 0x4d6   :  { %8667 = vmatpush1.bf16.msra.mxu1 %v14549_v20  ;;  %8609 = vmatprep.subr.bf16.mxu0 %v14554_v23  ;;  %v14617_v20 = vld [vmem:[#allocation9 + $0x324] ss:$40 sps:$4 sm:$0xff]   ;;  %v14615_v23 = vld [vmem:[#allocation9 + $0x320] ss:$40 sps:$4 sm:$0xff]  }
 0x4d7   :  { %10718 = vmatprep.subr.bf16.mxu1 %v14557_v24  ;;  %v14620_v24 = vld [vmem:[#allocation10 + $0xac4] ss:$40 sps:$4 sm:$0xff]  }
 0x4d9   :  { %8610 = vmatpush1.bf16.msra.mxu0 %v14552_v40  ;;  %8669 = vmatmul.mubr.bf16.vlgmr.msra.gmra.mrb[48].mxu1 %v15749_v22  ;;  %v14573_v22 = vld [vmem:[#allocation9 + $0xf0] ss:$40 sps:$4 sm:$0xff]   ;;  %v14623_v40 = vld [vmem:[#allocation9 + $0x374] ss:$40 sps:$4 sm:$0xff]  }
 0x4da   :  { %10719 = vmatpush1.bf16.msra.mxu1 %v14555_v45  ;;  %10750 = vmatprep.mubr.bf16.mxu1 %v15805_v21  ;;  %v14618_v45 = vld [vmem:[#allocation10 + $0xac0] ss:$40 sps:$4 sm:$0xff]  }
 0x4db   :  { %8611 = vmatprep.subr.bf16.mxu0 %v14560_v4  ;;  %10720 = vmatprep.subr.bf16.mxu1 %v14563_v28  ;;  %v14621_v4 = vld [vmem:[#allocation9 + $0x370] ss:$40 sps:$4 sm:$0xff]   ;;  %v14626_v28 = vld [vmem:[#allocation10 + $0xb14] ss:$40 sps:$4 sm:$0xff]  }
 0x4dd   :  { %8612 = vmatpush1.bf16.msra.mxu0 %v14558_v10  ;;  %v14627_v10 = vld [vmem:[#allocation9 + $0x3c0] ss:$40 sps:$4 sm:$0xff]  }
 0x4de   :  { %10721 = vmatpush1.bf16.msra.mxu1 %v14561_v30  ;;  %8613 = vmatprep.subr.bf16.mxu0 %v14566_v34  ;;  %v14632_v30 = vld [vmem:[#allocation10 + $0xb64] ss:$40 sps:$4 sm:$0xff]   ;;  %v14635_v34 = vld [vmem:[#allocation9 + $0x414] ss:$40 sps:$4 sm:$0xff]  }
 0x4df   :  { %10722 = vmatprep.subr.bf16.mxu1 %v14569_v35  ;;  %v14630_v35 = vld [vmem:[#allocation10 + $0xb60] ss:$40 sps:$4 sm:$0xff]  }
 0x4e1   :  { %8614 = vmatpush1.bf16.msra.mxu0 %v14564_v37  ;;  %v14633_v37 = vld [vmem:[#allocation9 + $0x410] ss:$40 sps:$4 sm:$0xff]  }
 0x4e2   :  { %10723 = vmatpush1.bf16.msra.mxu1 %v14567_v43  ;;  %8615 = vmatprep.subr.bf16.mxu0 %v14572_v44  ;;  %v14638_v43 = vld [vmem:[#allocation10 + $0xbb4] ss:$40 sps:$4 sm:$0xff]   ;;  %v14641_v44 = vld [vmem:[#allocation9 + $0x464] ss:$40 sps:$4 sm:$0xff]  }
 0x4e3   :  { %10724 = vmatprep.subr.bf16.mxu1 %v14575_v31 }
 0x4e5   :  { %8616 = vmatpush1.bf16.msra.mxu0 %v14570_v49 }
 0x4e6   :  { %10725 = vmatpush1.bf16.msra.mxu1 %v14573_v22  ;;  %8617 = vmatprep.subr.bf16.mxu0 %v14578_v61  ;;  %v14636_v22 = vld [vmem:[#allocation10 + $0xbb0] ss:$40 sps:$4 sm:$0xff]  }
 0x4e7   :  { %10726 = vmatprep.subr.bf16.mxu1 %v14581_v50  ;;  %v14639_v50 = vld [vmem:[#allocation9 + $0x460] ss:$40 sps:$4 sm:$0xff]  }
 0x4e9   :  { %8618 = vmatpush1.bf16.msra.mxu0 %v14576_v48  ;;  %v14644_v48 = vld [vmem:[#allocation10 + $0xc04] ss:$40 sps:$4 sm:$0xff]  }
 0x4ea   :  { %10727 = vmatpush1.bf16.msra.mxu1 %v14579_v0  ;;  %8619 = vmatprep.subr.bf16.mxu0 %v14584_v51  ;;  %v14647_v51 = vld [vmem:[#allocation9 + $0x4b4] ss:$40 sps:$4 sm:$0xff]  }
 0x4eb   :  { %10728 = vmatprep.subr.bf16.mxu1 %v14587_v52  ;;  %v14642_v52 = vld [vmem:[#allocation10 + $0xc00] ss:$40 sps:$4 sm:$0xff]  }
 0x4ed   :  { %8620 = vmatpush1.bf16.msra.mxu0 %v14582_v54  ;;  %v14645_v54 = vld [vmem:[#allocation9 + $0x4b0] ss:$40 sps:$4 sm:$0xff]  }
 0x4ee   :  { %10729 = vmatpush1.bf16.msra.mxu1 %v14585_v55  ;;  %8621 = vmatprep.subr.bf16.mxu0 %v14590_v39  ;;  %v14650_v55 = vld [vmem:[#allocation10 + $0xc54] ss:$40 sps:$4 sm:$0xff]   ;;  %v14653_v39 = vld [vmem:[#allocation9 + $0xa04] ss:$40 sps:$4 sm:$0xff]  }
 0x4ef   :  { %v8301_v59 = vpop.f32.mrb[32].mxu0  ;;  %10730 = vmatprep.subr.bf16.mxu1 %v14593_v47  ;;  %v14648_v47 = vld [vmem:[#allocation10 + $0xc50] ss:$40 sps:$4 sm:$0xff]  }
 0x4f0   :  { %v8302_v41 = vadd.f32 %v8301_v59, %v15786_v25  ;;  %v8303_v38 = vpop.f32.mrb[33].mxu0  ;;  %v14600_v25 = vld [vmem:[#allocation10 + $0x4d0] ss:$40 sps:$4 sm:$0xff]  }
 0x4f1   :  { %v8304_v62 = vadd.f32 %v8303_v38, %v15788_v26  ;;  %v8305_v1 = vpop.f32.mrb[34].mxu0  ;;  %8622 = vmatpush1.bf16.msra.mxu0 %v14588_v56  ;;  %v14603_v26 = vld [vmem:[#allocation9 + $0x280] ss:$40 sps:$4 sm:$0xff]   ;;  %v14657_v38 = vld [vmem:[#allocation9 + $0xa50] ss:$40 sps:$4 sm:$0xff]  }
 0x4f2   :  { %v8306_v5 = vpop.f32.mrb[35].mxu0  ;;  %10731 = vmatpush1.bf16.msra.mxu1 %v14591_v57  ;;  %8623 = vmatprep.subr.bf16.mxu0 %v14596_v58  ;;  %v15812_v15 = vadd.f32 %v15798_v12, %v8302_v41  ;;  %v14614_v12 = vld [vmem:[#allocation10 + $0xa74] ss:$40 sps:$4 sm:$0xff]   ;;  %v14651_v56 = vld [vmem:[#allocation9 + $0xa00] ss:$40 sps:$4 sm:$0xff]   ;;  %v15205_v1 = vld [vmem:[%s16004_s9 + $0x18] sm:$0xff] }
 0x4f3   :  { %10732 = vmatprep.subr.bf16.mxu1 %v14599_v32  ;;  %v15815_v17 = vadd.f32 %v15800_v14, %v8304_v62  ;;  %v14612_v14 = vld [vmem:[#allocation10 + $0xa70] ss:$40 sps:$4 sm:$0xff]   ;;  %v14656_v57 = vld [vmem:[#allocation9 + $0x504] ss:$40 sps:$4 sm:$0xff]   ;;  %v14659_v32 = vld [vmem:[#allocation9 + $0xa54] ss:$40 sps:$4 sm:$0xff]  }
 0x4f4   :  { %v15204_v58 = vld [vmem:[%s16004_s9] sm:$0xff]  ;;  %v14654_v41 = vld [vmem:[#allocation9 + $0x500] ss:$40 sps:$4 sm:$0xff]   ;;  %v14665_v5 = vld [vmem:[#allocation9 + $0xaa4] ss:$40 sps:$4 sm:$0xff]  }
 0x4f5   :  { %8624 = vmatpush1.bf16.msra.mxu0 %v14594_v8  ;;  %v15826_v59 = vpack.c.bf16 %v15204_v58, %v15204_v58  ;;  %v14662_v62 = vld [vmem:[#allocation9 + $0x554] ss:$40 sps:$4 sm:$0xff]   ;;  %v15832_v8 = vpack.c.bf16 %v15205_v1, %v15205_v1  ;;  %v14720_v1 = vld [vmem:[#allocation9 + $0x870] ss:$40 sps:$4 sm:$0xff]  }
 0x4f6   :  { %10733 = vmatpush1.bf16.msra.mxu1 %v14597_v13  ;;  %8625 = vmatprep.subr.bf16.mxu0 %v14602_v11  ;;  %v14660_v13 = vld [vmem:[#allocation9 + $0x550] ss:$40 sps:$4 sm:$0xff]   ;;  %v14663_v11 = vld [vmem:[#allocation9 + $0xaa0] ss:$40 sps:$4 sm:$0xff]   ;;  %v14719_v58 = vld [vmem:[#allocation9 + $0x5fc] ss:$40 sps:$4 sm:$0xff]  }
 0x4f7   :  { %10734 = vmatprep.subr.bf16.mxu1 %v14605_v42  ;;  %v14668_v42 = vld [vmem:[#allocation9 + $0x5a4] ss:$40 sps:$4 sm:$0xff]  }
 0x4f9   :  { %8626 = vmatpush1.bf16.msra.mxu0 %v14600_v25  ;;  %v14671_v25 = vld [vmem:[#allocation9 + $0xaf4] ss:$40 sps:$4 sm:$0xff]  }
 0x4fa   :  { %10735 = vmatpush1.bf16.msra.mxu1 %v14603_v26  ;;  %8677 = vmatprep.subr.bf16.mxu0 %v14608_v27  ;;  %v14666_v26 = vld [vmem:[#allocation9 + $0x5a0] ss:$40 sps:$4 sm:$0xff]   ;;  %v14669_v27 = vld [vmem:[#allocation9 + $0xaf0] ss:$40 sps:$4 sm:$0xff]  }
 0x4fb   :  { %10736 = vmatprep.subr.bf16.mxu1 %v14611_v16  ;;  %v14674_v16 = vld [vmem:[#allocation9 + $0x5f4] ss:$40 sps:$4 sm:$0xff]  }
 0x4fc   :  { %8628 = vmatmul.mubr.bf16.vlgmr.msra.gmra.mrb[48].mxu0 %v15747_v46  ;;  %v14624_v46 = vld [vmem:[#allocation10 + $0xb10] ss:$40 sps:$4 sm:$0xff]  }
 0x4fd   :  { %8678 = vmatpush1.bf16.msra.mxu0 %v14606_v18  ;;  %8709 = vmatprep.mubr.bf16.mxu0 %v15381_v53  ;;  %v14677_v18 = vld [vmem:[#allocation9 + $0xb44] ss:$40 sps:$4 sm:$0xff]  }
 0x4fe   :  { %10737 = vmatpush1.bf16.msra.mxu1 %v14609_v19  ;;  %8679 = vmatprep.subr.bf16.mxu0 %v14614_v12  ;;  %v14675_v19 = vld [vmem:[#allocation9 + $0xb40] ss:$40 sps:$4 sm:$0xff]   ;;  %v14680_v12 = vld [vmem:[#allocation9 + $0x644] ss:$40 sps:$4 sm:$0xff]  }
 0x4ff   :  { %10738 = vmatprep.subr.bf16.mxu1 %v14617_v20  ;;  %v14683_v20 = vld [vmem:[#allocation9 + $0xb94] ss:$40 sps:$4 sm:$0xff]  }
 0x501   :  { %8680 = vmatpush1.bf16.msra.mxu0 %v14612_v14  ;;  %v14678_v14 = vld [vmem:[#allocation9 + $0x640] ss:$40 sps:$4 sm:$0xff]  }
 0x502   :  { %10739 = vmatpush1.bf16.msra.mxu1 %v14615_v23  ;;  %8681 = vmatprep.subr.bf16.mxu0 %v14620_v24  ;;  %v14681_v23 = vld [vmem:[#allocation9 + $0xb90] ss:$40 sps:$4 sm:$0xff]   ;;  %v14686_v24 = vld [vmem:[#allocation9 + $0x694] ss:$40 sps:$4 sm:$0xff]  }
 0x503   :  { %10740 = vmatprep.subr.bf16.mxu1 %v14623_v40  ;;  %v14689_v40 = vld [vmem:[#allocation9 + $0xbe4] ss:$40 sps:$4 sm:$0xff]  }
 0x505   :  { %8682 = vmatpush1.bf16.msra.mxu0 %v14618_v45  ;;  %v14684_v45 = vld [vmem:[#allocation9 + $0x690] ss:$40 sps:$4 sm:$0xff]  }
 0x506   :  { %10741 = vmatpush1.bf16.msra.mxu1 %v14621_v4  ;;  %8683 = vmatprep.subr.bf16.mxu0 %v14626_v28  ;;  %v14687_v4 = vld [vmem:[#allocation9 + $0xbe0] ss:$40 sps:$4 sm:$0xff]   ;;  %v14692_v28 = vld [vmem:[#allocation9 + $0x6e4] ss:$40 sps:$4 sm:$0xff]  }
 0x507   :  { %10742 = vmatprep.subr.bf16.mxu1 %v14629_v36 }
 0x509   :  { %8684 = vmatpush1.bf16.msra.mxu0 %v14624_v46  ;;  %v14695_v46 = vld [vmem:[#allocation9 + $0xc34] ss:$40 sps:$4 sm:$0xff]  }
 0x50a   :  { %10743 = vmatpush1.bf16.msra.mxu1 %v14627_v10  ;;  %8685 = vmatprep.subr.bf16.mxu0 %v14632_v30 }
 0x50b   :  { %10744 = vmatprep.subr.bf16.mxu1 %v14635_v34 }
 0x50c   :  { %v15819_v31 = vpop.f32.mrb[36].mxu1 }
 0x50d   :  { %v15821_v49 = vpop.f32.mrb[37].mxu1  ;;  %8686 = vmatpush1.bf16.msra.mxu0 %v14630_v35 }
 0x50e   :  { %v8428_v61 = vpop.f32.mrb[38].mxu1  ;;  %10745 = vmatpush1.bf16.msra.mxu1 %v14633_v37  ;;  %8687 = vmatprep.subr.bf16.mxu0 %v14638_v43  ;;  %v14690_v37 = vld [vmem:[#allocation9 + $0x6e0] ss:$40 sps:$4 sm:$0xff]  }
 0x50f   :  { %v8429_v0 = vpop.f32.mrb[39].mxu1  ;;  %10746 = vmatprep.subr.bf16.mxu1 %v14641_v44  ;;  %v14693_v44 = vld [vmem:[#allocation9 + $0xc30] ss:$40 sps:$4 sm:$0xff]   ;;  %v14701_v61 = vld [vmem:[#allocation9 + $0x50c] ss:$40 sps:$4 sm:$0xff]  }
 0x510   :  { %v14704_v0 = vld [vmem:[#allocation9 + $0x784] ss:$40 sps:$4 sm:$0xff]  }
 0x511   :  { %8688 = vmatpush1.bf16.msra.mxu0 %v14636_v22  ;;  %v14698_v22 = vld [vmem:[#allocation9 + $0x734] ss:$40 sps:$4 sm:$0xff]  }
 0x512   :  { %10747 = vmatpush1.bf16.msra.mxu1 %v14639_v50  ;;  %8689 = vmatprep.subr.bf16.mxu0 %v14644_v48  ;;  %v14696_v50 = vld [vmem:[#allocation9 + $0x730] ss:$40 sps:$4 sm:$0xff]  }
 0x513   :  { %10748 = vmatprep.subr.bf16.mxu1 %v14647_v51  ;;  %v14707_v51 = vld [vmem:[#allocation9 + $0x55c] ss:$40 sps:$4 sm:$0xff]  }
 0x515   :  { %8690 = vmatpush1.bf16.msra.mxu0 %v14642_v52  ;;  %v14702_v52 = vld [vmem:[#allocation9 + $0x780] ss:$40 sps:$4 sm:$0xff]  }
 0x516   :  { %10749 = vmatpush1.bf16.msra.mxu1 %v14645_v54  ;;  %8691 = vmatprep.subr.bf16.mxu0 %v14650_v55  ;;  %v14705_v54 = vld [vmem:[#allocation9 + $0x558] ss:$40 sps:$4 sm:$0xff]   ;;  %v14710_v55 = vld [vmem:[#allocation9 + $0x7d4] ss:$40 sps:$4 sm:$0xff]  }
 0x517   :  { %10800 = vmatprep.subr.bf16.mxu1 %v14653_v39  ;;  %v14713_v39 = vld [vmem:[#allocation9 + $0x5ac] ss:$40 sps:$4 sm:$0xff]  }
 0x519   :  { %8692 = vmatpush1.bf16.msra.mxu0 %v14648_v47  ;;  %10751 = vmatmul.mubr.bf16.vlgmr.msra.gmra.mrb[52].mxu1 %v15826_v59  ;;  %v14708_v47 = vld [vmem:[#allocation9 + $0x7d0] ss:$40 sps:$4 sm:$0xff]  }
 0x51a   :  { %10801 = vmatpush1.bf16.msra.mxu1 %v14651_v56  ;;  %10759 = vmatprep.subr.bf16.mxu0 %v14656_v57  ;;  %v14711_v56 = vld [vmem:[#allocation9 + $0x5a8] ss:$40 sps:$4 sm:$0xff]   ;;  %v14716_v57 = vld [vmem:[#allocation9 + $0x824] ss:$40 sps:$4 sm:$0xff]  }
 0x51b   :  { %10802 = vmatprep.subr.bf16.mxu1 %v14659_v32  ;;  %10832 = vmatprep.mubr.bf16.mxu1 %v15381_v53  ;;  %v14714_v32 = vld [vmem:[#allocation9 + $0x820] ss:$40 sps:$4 sm:$0xff]  }
 0x51c   :  { %8710 = vmatmul.mubr.bf16.vlgmr.msra.gmra.mrb[52].mxu0 %v15763_v9  ;;  %v14672_v9 = vld [vmem:[#allocation9 + $0x5f0] ss:$40 sps:$4 sm:$0xff]  }
 0x51d   :  { %10760 = vmatpush1.bf16.msra.mxu0 %v14654_v41  ;;  %10791 = vmatprep.mubr.bf16.mxu0 %v15832_v8  ;;  %v14717_v41 = vld [vmem:[#allocation9 + $0x5f8] ss:$40 sps:$4 sm:$0xff]  }
 0x51e   :  { %10803 = vmatpush1.bf16.msra.mxu1 %v14657_v38  ;;  %10761 = vmatprep.subr.bf16.mxu0 %v14662_v62  ;;  %v14722_v38 = vld [vmem:[#allocation9 + $0x874] ss:$40 sps:$4 sm:$0xff]  }
 0x51f   :  { %10804 = vmatprep.subr.bf16.mxu1 %v14665_v5  ;;  %v14725_v62 = vld [vmem:[#allocation9 + $0x64c] ss:$40 sps:$4 sm:$0xff]   ;;  %v14723_v5 = vld [vmem:[#allocation9 + $0x648] ss:$40 sps:$4 sm:$0xff]  }
 0x521   :  { %10762 = vmatpush1.bf16.msra.mxu0 %v14660_v13  ;;  %v14728_v13 = vld [vmem:[#allocation9 + $0x8c4] ss:$40 sps:$4 sm:$0xff]  }
 0x522   :  { %10805 = vmatpush1.bf16.msra.mxu1 %v14663_v11  ;;  %10763 = vmatprep.subr.bf16.mxu0 %v14668_v42  ;;  %v14731_v11 = vld [vmem:[#allocation9 + $0x69c] ss:$40 sps:$4 sm:$0xff]   ;;  %v14726_v42 = vld [vmem:[#allocation9 + $0x8c0] ss:$40 sps:$4 sm:$0xff]  }
 0x523   :  { %10806 = vmatprep.subr.bf16.mxu1 %v14671_v25  ;;  %v14729_v25 = vld [vmem:[#allocation9 + $0x698] ss:$40 sps:$4 sm:$0xff]  }
 0x525   :  { %10764 = vmatpush1.bf16.msra.mxu0 %v14666_v26  ;;  %v14734_v26 = vld [vmem:[#allocation9 + $0x914] ss:$40 sps:$4 sm:$0xff]  }
 0x526   :  { %10807 = vmatpush1.bf16.msra.mxu1 %v14669_v27  ;;  %10765 = vmatprep.subr.bf16.mxu0 %v14674_v16  ;;  %v14737_v27 = vld [vmem:[#allocation9 + $0x6ec] ss:$40 sps:$4 sm:$0xff]  }
 0x527   :  { %10808 = vmatprep.subr.bf16.mxu1 %v14677_v18 }
 0x529   :  { %10766 = vmatpush1.bf16.msra.mxu0 %v14672_v9  ;;  %v14732_v9 = vld [vmem:[#allocation9 + $0x910] ss:$40 sps:$4 sm:$0xff]  }
 0x52a   :  { %10809 = vmatpush1.bf16.msra.mxu1 %v14675_v19  ;;  %10767 = vmatprep.subr.bf16.mxu0 %v14680_v12  ;;  %v14735_v12 = vld [vmem:[#allocation9 + $0x6e8] ss:$40 sps:$4 sm:$0xff]  }
 0x52b   :  { %10810 = vmatprep.subr.bf16.mxu1 %v14683_v20  ;;  %v14740_v20 = vld [vmem:[#allocation9 + $0x964] ss:$40 sps:$4 sm:$0xff]  }
 0x52d   :  { %10768 = vmatpush1.bf16.msra.mxu0 %v14678_v14 }
 0x52e   :  { %10811 = vmatpush1.bf16.msra.mxu1 %v14681_v23  ;;  %10769 = vmatprep.subr.bf16.mxu0 %v14686_v24  ;;  %v14743_v24 = vld [vmem:[#allocation9 + $0x73c] ss:$40 sps:$4 sm:$0xff]  }
 0x52f   :  { %v8383_v36 = vpop.f32.mrb[36].mxu0  ;;  %10812 = vmatprep.subr.bf16.mxu1 %v14689_v40 }
 0x530   :  { %v15838_v10 = vadd.f32 %v15819_v31, %v8383_v36  ;;  %v8385_v30 = vpop.f32.mrb[37].mxu0  ;;  %v14699_v31 = vld [vmem:[#allocation9 + $0x508] ss:$40 sps:$4 sm:$0xff]  }
 0x531   :  { %v15841_v34 = vadd.f32 %v15821_v49, %v8385_v30  ;;  %v8387_v35 = vpop.f32.mrb[38].mxu0  ;;  %10770 = vmatpush1.bf16.msra.mxu0 %v14684_v45  ;;  %v15206_v49 = vld [vmem:[%s16004_s9 + $0x20] sm:$0xff]  ;;  %v14738_v36 = vld [vmem:[#allocation9 + $0x960] ss:$40 sps:$4 sm:$0xff]  }
 0x532   :  { %v8388_v43 = vpop.f32.mrb[39].mxu0  ;;  %10813 = vmatpush1.bf16.msra.mxu1 %v14687_v4  ;;  %10771 = vmatprep.subr.bf16.mxu0 %v14692_v28  ;;  %v15846_v48 = vpack.c.bf16 %v15206_v49, %v15206_v49  ;;  %v14741_v30 = vld [vmem:[#allocation9 + $0x738] ss:$40 sps:$4 sm:$0xff]   ;;  %v14746_v35 = vld [vmem:[#allocation9 + $0x9b4] ss:$40 sps:$4 sm:$0xff]  }
 0x533   :  { %10814 = vmatprep.subr.bf16.mxu1 %v14695_v46  ;;  %v14744_v43 = vld [vmem:[#allocation9 + $0x9b0] ss:$40 sps:$4 sm:$0xff]   ;;  %v14758_v49 = vld [vmem:[#allocation9 + $0x5c] ss:$40 sps:$4 sm:$0xff]  }
 0x535   :  { %10772 = vmatpush1.bf16.msra.mxu0 %v14690_v37  ;;  %v14749_v37 = vld [vmem:[#allocation9 + $0x78c] ss:$40 sps:$4 sm:$0xff]  }
 0x536   :  { %10815 = vmatpush1.bf16.msra.mxu1 %v14693_v44  ;;  %10773 = vmatprep.subr.bf16.mxu0 %v14698_v22  ;;  %v14752_v44 = vld [vmem:[#allocation9 + $0xc] ss:$40 sps:$4 sm:$0xff]   ;;  %v14755_v22 = vld [vmem:[#allocation9 + $0x7dc] ss:$40 sps:$4 sm:$0xff]  }
 0x537   :  { %10882 = vmatprep.subr.bf16.mxu1 %v14701_v61  ;;  %v15207_v61 = vld [vmem:[%s16004_s9 + $0x10] sm:$0xff] }
 0x539   :  { %10774 = vmatpush1.bf16.msra.mxu0 %v14696_v50  ;;  %10833 = vmatmul.mubr.bf16.vlgmr.msra.gmra.mrb[56].mxu1 %v15846_v48  ;;  %v15863_v50 = vpack.c.bf16 %v15207_v61, %v15207_v61  ;;  %v14810_v61 = vld [vmem:[#allocation9 + $0x328] ss:$40 sps:$4 sm:$0xff]  }
 0x53a   :  { %10883 = vmatpush1.bf16.msra.mxu1 %v14699_v31  ;;  %10914 = vmatprep.mubr.bf16.mxu1 %v15832_v8  ;;  %v14753_v31 = vld [vmem:[#allocation9 + $0x7d8] ss:$40 sps:$4 sm:$0xff]  }
 0x53b   :  { %10775 = vmatprep.subr.bf16.mxu0 %v14704_v0  ;;  %10884 = vmatprep.subr.bf16.mxu1 %v14707_v51  ;;  %v14761_v0 = vld [vmem:[#allocation9 + $0x82c] ss:$40 sps:$4 sm:$0xff]   ;;  %v14756_v51 = vld [vmem:[#allocation9 + $0x58] ss:$40 sps:$4 sm:$0xff]  }
 0x53d   :  { %10776 = vmatpush1.bf16.msra.mxu0 %v14702_v52  ;;  %v14759_v52 = vld [vmem:[#allocation9 + $0x828] ss:$40 sps:$4 sm:$0xff]  }
 0x53e   :  { %10885 = vmatpush1.bf16.msra.mxu1 %v14705_v54  ;;  %10777 = vmatprep.subr.bf16.mxu0 %v14710_v55  ;;  %v14764_v54 = vld [vmem:[#allocation9 + $0xac] ss:$40 sps:$4 sm:$0xff]   ;;  %v14767_v55 = vld [vmem:[#allocation9 + $0x87c] ss:$40 sps:$4 sm:$0xff]  }
 0x53f   :  { %10886 = vmatprep.subr.bf16.mxu1 %v14713_v39  ;;  %v14762_v39 = vld [vmem:[#allocation9 + $0xa8] ss:$40 sps:$4 sm:$0xff]  }
 0x541   :  { %10778 = vmatpush1.bf16.msra.mxu0 %v14708_v47  ;;  %v14765_v47 = vld [vmem:[#allocation9 + $0x878] ss:$40 sps:$4 sm:$0xff]  }
 0x542   :  { %10887 = vmatpush1.bf16.msra.mxu1 %v14711_v56  ;;  %10779 = vmatprep.subr.bf16.mxu0 %v14716_v57  ;;  %v14770_v56 = vld [vmem:[#allocation9 + $0xfc] ss:$40 sps:$4 sm:$0xff]   ;;  %v14773_v57 = vld [vmem:[#allocation9 + $0x8cc] ss:$40 sps:$4 sm:$0xff]  }
 0x543   :  { %10888 = vmatprep.subr.bf16.mxu1 %v14719_v58  ;;  %v14768_v58 = vld [vmem:[#allocation9 + $0xf8] ss:$40 sps:$4 sm:$0xff]  }
 0x545   :  { %10780 = vmatpush1.bf16.msra.mxu0 %v14714_v32  ;;  %v14771_v32 = vld [vmem:[#allocation9 + $0x8c8] ss:$40 sps:$4 sm:$0xff]  }
 0x546   :  { %10889 = vmatpush1.bf16.msra.mxu1 %v14717_v41  ;;  %10781 = vmatprep.subr.bf16.mxu0 %v14722_v38  ;;  %v14776_v41 = vld [vmem:[#allocation9 + $0x14c] ss:$40 sps:$4 sm:$0xff]   ;;  %v14779_v38 = vld [vmem:[#allocation9 + $0x91c] ss:$40 sps:$4 sm:$0xff]  }
 0x547   :  { %10890 = vmatprep.subr.bf16.mxu1 %v14725_v62  ;;  %v14774_v62 = vld [vmem:[#allocation9 + $0x148] ss:$40 sps:$4 sm:$0xff]  }
 0x549   :  { %10782 = vmatpush1.bf16.msra.mxu0 %v14720_v1  ;;  %v14777_v1 = vld [vmem:[#allocation9 + $0x918] ss:$40 sps:$4 sm:$0xff]  }
 0x54a   :  { %10891 = vmatpush1.bf16.msra.mxu1 %v14723_v5  ;;  %10783 = vmatprep.subr.bf16.mxu0 %v14728_v13  ;;  %v14782_v5 = vld [vmem:[#allocation9 + $0x19c] ss:$40 sps:$4 sm:$0xff]   ;;  %v14785_v13 = vld [vmem:[#allocation9 + $0x96c] ss:$40 sps:$4 sm:$0xff]  }
 0x54b   :  { %10892 = vmatprep.subr.bf16.mxu1 %v14731_v11 }
 0x54c   :  { %v15850_v16 = vpop.f32.mrb[40].mxu1 }
 0x54d   :  { %v15852_v18 = vpop.f32.mrb[41].mxu1  ;;  %10784 = vmatpush1.bf16.msra.mxu0 %v14726_v42 }
 0x54e   :  { %v8510_v19 = vpop.f32.mrb[42].mxu1  ;;  %10893 = vmatpush1.bf16.msra.mxu1 %v14729_v25  ;;  %10785 = vmatprep.subr.bf16.mxu0 %v14734_v26  ;;  %v14780_v25 = vld [vmem:[#allocation9 + $0x198] ss:$40 sps:$4 sm:$0xff]  }
 0x54f   :  { %v8465_v14 = vpop.f32.mrb[40].mxu0  ;;  %v8511_v23 = vpop.f32.mrb[43].mxu1  ;;  %10894 = vmatprep.subr.bf16.mxu1 %v14737_v27  ;;  %v14783_v27 = vld [vmem:[#allocation9 + $0x968] ss:$40 sps:$4 sm:$0xff]  }
 0x550   :  { %v15855_v40 = vadd.f32 %v8465_v14, %v15838_v10  ;;  %v8467_v45 = vpop.f32.mrb[41].mxu0  ;;  %v14747_v10 = vld [vmem:[#allocation9 + $0x788] ss:$40 sps:$4 sm:$0xff]   ;;  %v14789_v14 = vld [vmem:[#allocation9 + $0x9b8] ss:$40 sps:$4 sm:$0xff]  }
 0x551   :  { %v15858_v4 = vadd.f32 %v8467_v45, %v15841_v34  ;;  %v8469_v28 = vpop.f32.mrb[42].mxu0  ;;  %10786 = vmatpush1.bf16.msra.mxu0 %v14732_v9  ;;  %v14750_v34 = vld [vmem:[#allocation9 + $0x8] ss:$40 sps:$4 sm:$0xff]   ;;  %v14788_v9 = vld [vmem:[#allocation9 + $0x1ec] ss:$40 sps:$4 sm:$0xff]  }
 0x552   :  { %v8470_v46 = vpop.f32.mrb[43].mxu0  ;;  %10895 = vmatpush1.bf16.msra.mxu1 %v14735_v12  ;;  %10787 = vmatprep.subr.bf16.mxu0 %v14740_v20  ;;  %v14791_v12 = vld [vmem:[#allocation9 + $0x9bc] ss:$40 sps:$4 sm:$0xff]   ;;  %v14786_v20 = vld [vmem:[#allocation9 + $0x1e8] ss:$40 sps:$4 sm:$0xff]  }
 0x553   :  { %10896 = vmatprep.subr.bf16.mxu1 %v14743_v24  ;;  %v14794_v23 = vld [vmem:[#allocation9 + $0x23c] ss:$40 sps:$4 sm:$0xff]   ;;  %v14792_v45 = vld [vmem:[#allocation9 + $0x238] ss:$40 sps:$4 sm:$0xff]  }
 0x554   :  { %v14797_v24 = vld [vmem:[#allocation9 + $0x14] ss:$40 sps:$4 sm:$0xff]   ;;  %v14795_v28 = vld [vmem:[#allocation9 + $0x10] ss:$40 sps:$4 sm:$0xff]   ;;  %v14803_v46 = vld [vmem:[#allocation9 + $0x64] ss:$40 sps:$4 sm:$0xff]  }
 0x555   :  { %10788 = vmatpush1.bf16.msra.mxu0 %v14738_v36  ;;  %v14800_v36 = vld [vmem:[#allocation9 + $0x28c] ss:$40 sps:$4 sm:$0xff]  }
 0x556   :  { %10897 = vmatpush1.bf16.msra.mxu1 %v14741_v30  ;;  %10789 = vmatprep.subr.bf16.mxu0 %v14746_v35  ;;  %v14798_v30 = vld [vmem:[#allocation9 + $0x288] ss:$40 sps:$4 sm:$0xff]  }
 0x557   :  { %10898 = vmatprep.subr.bf16.mxu1 %v14749_v37  ;;  %v14801_v35 = vld [vmem:[#allocation9 + $0x60] ss:$40 sps:$4 sm:$0xff]   ;;  %v14806_v37 = vld [vmem:[#allocation9 + $0x2dc] ss:$40 sps:$4 sm:$0xff]  }
 0x559   :  { %10790 = vmatpush1.bf16.msra.mxu0 %v14744_v43  ;;  %v14809_v43 = vld [vmem:[#allocation9 + $0xb4] ss:$40 sps:$4 sm:$0xff]  }
 0x55a   :  { %10899 = vmatpush1.bf16.msra.mxu1 %v14747_v10  ;;  %10841 = vmatprep.subr.bf16.mxu0 %v14752_v44  ;;  %v14804_v10 = vld [vmem:[#allocation9 + $0x2d8] ss:$40 sps:$4 sm:$0xff]  }
 0x55b   :  { %10900 = vmatprep.subr.bf16.mxu1 %v14755_v22  ;;  %v14807_v44 = vld [vmem:[#allocation9 + $0xb0] ss:$40 sps:$4 sm:$0xff]   ;;  %v14812_v22 = vld [vmem:[#allocation9 + $0x32c] ss:$40 sps:$4 sm:$0xff]  }
 0x55c   :  { %10792 = vmatmul.mubr.bf16.vlgmr.msra.gmra.mrb[56].mxu0 %v15863_v50 }
 0x55d   :  { %10842 = vmatpush1.bf16.msra.mxu0 %v14750_v34  ;;  %10873 = vmatprep.mubr.bf16.mxu0 %v15805_v21  ;;  %v14815_v34 = vld [vmem:[#allocation9 + $0x104] ss:$40 sps:$4 sm:$0xff]  }
 0x55e   :  { %10901 = vmatpush1.bf16.msra.mxu1 %v14753_v31  ;;  %10843 = vmatprep.subr.bf16.mxu0 %v14758_v49  ;;  %v14813_v31 = vld [vmem:[#allocation9 + $0x100] ss:$40 sps:$4 sm:$0xff]   ;;  %v14818_v49 = vld [vmem:[#allocation9 + $0x37c] ss:$40 sps:$4 sm:$0xff]  }
 0x55f   :  { %10902 = vmatprep.subr.bf16.mxu1 %v14761_v0  ;;  %v14821_v0 = vld [vmem:[#allocation9 + $0x154] ss:$40 sps:$4 sm:$0xff]  }
 0x561   :  { %10844 = vmatpush1.bf16.msra.mxu0 %v14756_v51  ;;  %v14816_v51 = vld [vmem:[#allocation9 + $0x378] ss:$40 sps:$4 sm:$0xff]  }
 0x562   :  { %10903 = vmatpush1.bf16.msra.mxu1 %v14759_v52  ;;  %10845 = vmatprep.subr.bf16.mxu0 %v14764_v54  ;;  %v14819_v52 = vld [vmem:[#allocation9 + $0x150] ss:$40 sps:$4 sm:$0xff]   ;;  %v14824_v54 = vld [vmem:[#allocation9 + $0x3cc] ss:$40 sps:$4 sm:$0xff]  }
 0x563   :  { %10904 = vmatprep.subr.bf16.mxu1 %v14767_v55  ;;  %v14827_v55 = vld [vmem:[#allocation9 + $0x1a4] ss:$40 sps:$4 sm:$0xff]  }
 0x565   :  { %10846 = vmatpush1.bf16.msra.mxu0 %v14762_v39  ;;  %v14822_v39 = vld [vmem:[#allocation9 + $0x3c8] ss:$40 sps:$4 sm:$0xff]  }
 0x566   :  { %10905 = vmatpush1.bf16.msra.mxu1 %v14765_v47  ;;  %10847 = vmatprep.subr.bf16.mxu0 %v14770_v56  ;;  %v14825_v47 = vld [vmem:[#allocation9 + $0x1a0] ss:$40 sps:$4 sm:$0xff]   ;;  %v14830_v56 = vld [vmem:[#allocation9 + $0x41c] ss:$40 sps:$4 sm:$0xff]  }
 0x567   :  { %10906 = vmatprep.subr.bf16.mxu1 %v14773_v57  ;;  %v14833_v57 = vld [vmem:[#allocation9 + $0x1f4] ss:$40 sps:$4 sm:$0xff]  }
 0x569   :  { %10848 = vmatpush1.bf16.msra.mxu0 %v14768_v58  ;;  %v14828_v58 = vld [vmem:[#allocation9 + $0x418] ss:$40 sps:$4 sm:$0xff]  }
 0x56a   :  { %10907 = vmatpush1.bf16.msra.mxu1 %v14771_v32  ;;  %10849 = vmatprep.subr.bf16.mxu0 %v14776_v41  ;;  %v14831_v32 = vld [vmem:[#allocation9 + $0x1f0] ss:$40 sps:$4 sm:$0xff]   ;;  %v14836_v41 = vld [vmem:[#allocation9 + $0x46c] ss:$40 sps:$4 sm:$0xff]  }
 0x56b   :  { %10908 = vmatprep.subr.bf16.mxu1 %v14779_v38 }
 0x56c   :  { %v15867_v11 = vpop.f32.mrb[44].mxu1 }
 0x56d   :  { %v15869_v42 = vpop.f32.mrb[45].mxu1  ;;  %10850 = vmatpush1.bf16.msra.mxu0 %v14774_v62  ;;  %v14839_v62 = vld [vmem:[#allocation9 + $0x244] ss:$40 sps:$4 sm:$0xff]  }
 0x56e   :  { %v8592_v26 = vpop.f32.mrb[46].mxu1  ;;  %10909 = vmatpush1.bf16.msra.mxu1 %v14777_v1  ;;  %10851 = vmatprep.subr.bf16.mxu0 %v14782_v5 }
 0x56f   :  { %v8593_v19 = vpop.f32.mrb[47].mxu1  ;;  %10910 = vmatprep.subr.bf16.mxu1 %v14785_v13  ;;  %v14834_v26 = vld [vmem:[#allocation9 + $0x468] ss:$40 sps:$4 sm:$0xff]  }
 0x570   :  { %v14842_v19 = vld [vmem:[#allocation9 + $0x4bc] ss:$40 sps:$4 sm:$0xff]  }
 0x571   :  { %10852 = vmatpush1.bf16.msra.mxu0 %v14780_v25 }
 0x572   :  { %10911 = vmatpush1.bf16.msra.mxu1 %v14783_v27  ;;  %10853 = vmatprep.subr.bf16.mxu0 %v14788_v9  ;;  %v14837_v9 = vld [vmem:[#allocation9 + $0x240] ss:$40 sps:$4 sm:$0xff]  }
 0x573   :  { %10912 = vmatprep.subr.bf16.mxu1 %v14791_v12 }
 0x575   :  { %10854 = vmatpush1.bf16.msra.mxu0 %v14786_v20  ;;  %v14845_v20 = vld [vmem:[#allocation9 + $0x294] ss:$40 sps:$4 sm:$0xff]  }
 0x576   :  { %10913 = vmatpush1.bf16.msra.mxu1 %v14789_v14  ;;  %10855 = vmatprep.subr.bf16.mxu0 %v14794_v23  ;;  %v14848_v23 = vld [vmem:[#allocation9 + $0xa0c] ss:$40 sps:$4 sm:$0xff]  }
 0x577   :  { %10964 = vmatprep.subr.bf16.mxu1 %v14797_v24  ;;  %v14851_v24 = vld [vmem:[#allocation9 + $0x2e4] ss:$40 sps:$4 sm:$0xff]  }
 0x579   :  { %10856 = vmatpush1.bf16.msra.mxu0 %v14792_v45  ;;  %10915 = vmatmul.mubr.bf16.vlgmr.msra.gmra.mrb[60].mxu1 %v15863_v50  ;;  %v14846_v45 = vld [vmem:[#allocation9 + $0xa08] ss:$40 sps:$4 sm:$0xff]  }
 0x57a   :  { %10965 = vmatpush1.bf16.msra.mxu1 %v14795_v28  ;;  %10996 = vmatprep.mubr.bf16.mxu1 %v15805_v21  ;;  %v14849_v28 = vld [vmem:[#allocation9 + $0x2e0] ss:$40 sps:$4 sm:$0xff]  }
 0x57b   :  { %10857 = vmatprep.subr.bf16.mxu0 %v14800_v36  ;;  %10966 = vmatprep.subr.bf16.mxu1 %v14803_v46  ;;  %v14857_v36 = vld [vmem:[#allocation9 + $0x334] ss:$40 sps:$4 sm:$0xff]   ;;  %v14855_v46 = vld [vmem:[#allocation9 + $0x330] ss:$40 sps:$4 sm:$0xff]  }
 0x57d   :  { %10858 = vmatpush1.bf16.msra.mxu0 %v14798_v30  ;;  %v14860_v30 = vld [vmem:[#allocation9 + $0xaac] ss:$40 sps:$4 sm:$0xff]  }
 0x57e   :  { %10967 = vmatpush1.bf16.msra.mxu1 %v14801_v35  ;;  %10859 = vmatprep.subr.bf16.mxu0 %v14806_v37  ;;  %v14863_v35 = vld [vmem:[#allocation9 + $0x384] ss:$40 sps:$4 sm:$0xff]   ;;  %v14858_v37 = vld [vmem:[#allocation9 + $0xaa8] ss:$40 sps:$4 sm:$0xff]  }
 0x57f   :  { %10968 = vmatprep.subr.bf16.mxu1 %v14809_v43  ;;  %v14861_v43 = vld [vmem:[#allocation9 + $0x380] ss:$40 sps:$4 sm:$0xff]  }
 0x581   :  { %10860 = vmatpush1.bf16.msra.mxu0 %v14804_v10  ;;  %v14866_v10 = vld [vmem:[#allocation9 + $0xafc] ss:$40 sps:$4 sm:$0xff]  }
 0x582   :  { %10969 = vmatpush1.bf16.msra.mxu1 %v14807_v44  ;;  %10861 = vmatprep.subr.bf16.mxu0 %v14812_v22  ;;  %v14869_v44 = vld [vmem:[#allocation9 + $0x3d4] ss:$40 sps:$4 sm:$0xff]   ;;  %v14864_v22 = vld [vmem:[#allocation9 + $0xaf8] ss:$40 sps:$4 sm:$0xff]  }
 0x583   :  { %10970 = vmatprep.subr.bf16.mxu1 %v14815_v34  ;;  %v14867_v34 = vld [vmem:[#allocation9 + $0x3d0] ss:$40 sps:$4 sm:$0xff]  }
 0x585   :  { %10862 = vmatpush1.bf16.msra.mxu0 %v14810_v61  ;;  %v14872_v61 = vld [vmem:[#allocation9 + $0xb4c] ss:$40 sps:$4 sm:$0xff]  }
 0x586   :  { %10971 = vmatpush1.bf16.msra.mxu1 %v14813_v31  ;;  %10863 = vmatprep.subr.bf16.mxu0 %v14818_v49  ;;  %v14875_v31 = vld [vmem:[#allocation9 + $0x424] ss:$40 sps:$4 sm:$0xff]   ;;  %v14870_v49 = vld [vmem:[#allocation9 + $0xb48] ss:$40 sps:$4 sm:$0xff]  }
 0x587   :  { %10972 = vmatprep.subr.bf16.mxu1 %v14821_v0  ;;  %v14873_v0 = vld [vmem:[#allocation9 + $0x420] ss:$40 sps:$4 sm:$0xff]  }
 0x589   :  { %10864 = vmatpush1.bf16.msra.mxu0 %v14816_v51  ;;  %v14878_v51 = vld [vmem:[#allocation9 + $0xb9c] ss:$40 sps:$4 sm:$0xff]  }
 0x58a   :  { %10973 = vmatpush1.bf16.msra.mxu1 %v14819_v52  ;;  %10865 = vmatprep.subr.bf16.mxu0 %v14824_v54  ;;  %v14881_v52 = vld [vmem:[#allocation9 + $0x474] ss:$40 sps:$4 sm:$0xff]  }
 0x58b   :  { %10974 = vmatprep.subr.bf16.mxu1 %v14827_v55 }
 0x58d   :  { %10866 = vmatpush1.bf16.msra.mxu0 %v14822_v39  ;;  %v14876_v39 = vld [vmem:[#allocation9 + $0xb98] ss:$40 sps:$4 sm:$0xff]  }
 0x58e   :  { %10975 = vmatpush1.bf16.msra.mxu1 %v14825_v47  ;;  %10867 = vmatprep.subr.bf16.mxu0 %v14830_v56  ;;  %v14879_v56 = vld [vmem:[#allocation9 + $0x470] ss:$40 sps:$4 sm:$0xff]  }
 0x58f   :  { %v8547_v38 = vpop.f32.mrb[44].mxu0  ;;  %10976 = vmatprep.subr.bf16.mxu1 %v14833_v57  ;;  %v14884_v57 = vld [vmem:[#allocation9 + $0xbec] ss:$40 sps:$4 sm:$0xff]  }
 0x590   :  { %v8548_v1 = vadd.f32 %v8547_v38, %v15850_v16  ;;  %v8549_v5 = vpop.f32.mrb[45].mxu0  ;;  %v14840_v16 = vld [vmem:[#allocation9 + $0x4b8] ss:$40 sps:$4 sm:$0xff]  }
 0x591   :  { %v8550_v13 = vadd.f32 %v8549_v5, %v15852_v18  ;;  %v8551_v25 = vpop.f32.mrb[46].mxu0  ;;  %10868 = vmatpush1.bf16.msra.mxu0 %v14828_v58  ;;  %v14843_v18 = vld [vmem:[#allocation9 + $0x290] ss:$40 sps:$4 sm:$0xff]   ;;  %v14885_v38 = vld [vmem:[#allocation9 + $0x4c0] ss:$40 sps:$4 sm:$0xff]  }
 0x592   :  { %v8552_v27 = vpop.f32.mrb[47].mxu0  ;;  %10977 = vmatpush1.bf16.msra.mxu1 %v14831_v32  ;;  %10869 = vmatprep.subr.bf16.mxu0 %v14836_v41  ;;  %v15876_v12 = vadd.f32 %v15867_v11, %v8548_v1  ;;  %v14854_v11 = vld [vmem:[#allocation9 + $0xa5c] ss:$40 sps:$4 sm:$0xff]   ;;  %v14882_v41 = vld [vmem:[#allocation9 + $0xbe8] ss:$40 sps:$4 sm:$0xff]  }
 0x593   :  { %10978 = vmatprep.subr.bf16.mxu1 %v14839_v62  ;;  %v15879_v14 = vadd.f32 %v15869_v42, %v8550_v13  ;;  %v14852_v42 = vld [vmem:[#allocation9 + $0xa58] ss:$40 sps:$4 sm:$0xff]   ;;  %v14887_v32 = vld [vmem:[#allocation9 + $0x4c4] ss:$40 sps:$4 sm:$0xff]   ;;  %v14893_v1 = vld [vmem:[#allocation9 + $0xa14] ss:$40 sps:$4 sm:$0xff]  }
 0x594   :  { %v14890_v62 = vld [vmem:[#allocation9 + $0xc3c] ss:$40 sps:$4 sm:$0xff]   ;;  %v14888_v5 = vld [vmem:[#allocation9 + $0xc38] ss:$40 sps:$4 sm:$0xff]  }
 0x595   :  { %10870 = vmatpush1.bf16.msra.mxu0 %v14834_v26  ;;  %v14891_v13 = vld [vmem:[#allocation9 + $0xa10] ss:$40 sps:$4 sm:$0xff]   ;;  %v14896_v25 = vld [vmem:[#allocation9 + $0x514] ss:$40 sps:$4 sm:$0xff]   ;;  %v14899_v26 = vld [vmem:[#allocation9 + $0xa64] ss:$40 sps:$4 sm:$0xff]  }
 0x596   :  { %10979 = vmatpush1.bf16.msra.mxu1 %v14837_v9  ;;  %10871 = vmatprep.subr.bf16.mxu0 %v14842_v19  ;;  %v14894_v27 = vld [vmem:[#allocation9 + $0x510] ss:$40 sps:$4 sm:$0xff]   ;;  %v14897_v9 = vld [vmem:[#allocation9 + $0xa60] ss:$40 sps:$4 sm:$0xff]   ;;  %v14902_v19 = vld [vmem:[#allocation9 + $0x564] ss:$40 sps:$4 sm:$0xff]  }
 0x597   :  { %10980 = vmatprep.subr.bf16.mxu1 %v14845_v20  ;;  %v14905_v20 = vld [vmem:[#allocation9 + $0xab4] ss:$40 sps:$4 sm:$0xff]  }
 0x599   :  { %10872 = vmatpush1.bf16.msra.mxu0 %v14840_v16  ;;  %v14900_v16 = vld [vmem:[#allocation9 + $0x560] ss:$40 sps:$4 sm:$0xff]  }
 0x59a   :  { %10981 = vmatpush1.bf16.msra.mxu1 %v14843_v18  ;;  %10923 = vmatprep.subr.bf16.mxu0 %v14848_v23  ;;  %v14903_v18 = vld [vmem:[#allocation9 + $0xab0] ss:$40 sps:$4 sm:$0xff]   ;;  %v14908_v23 = vld [vmem:[#allocation9 + $0x5b4] ss:$40 sps:$4 sm:$0xff]  }
 0x59b   :  { %10982 = vmatprep.subr.bf16.mxu1 %v14851_v24  ;;  %v14911_v24 = vld [vmem:[#allocation9 + $0xb04] ss:$40 sps:$4 sm:$0xff]  }
 0x59c   :  { %10874 = vmatmul.mubr.bf16.vlgmr.msra.gmra.mrb[60].mxu0 %v15826_v59 }
 0x59d   :  { %10924 = vmatpush1.bf16.msra.mxu0 %v14846_v45  ;;  %10955 = vmatprep.mubr.bf16.mxu0 %v15381_v53  ;;  %v14906_v45 = vld [vmem:[#allocation9 + $0x5b0] ss:$40 sps:$4 sm:$0xff]  }
 0x59e   :  { %10983 = vmatpush1.bf16.msra.mxu1 %v14849_v28  ;;  %10925 = vmatprep.subr.bf16.mxu0 %v14854_v11  ;;  %v14909_v28 = vld [vmem:[#allocation9 + $0xb00] ss:$40 sps:$4 sm:$0xff]   ;;  %v14914_v11 = vld [vmem:[#allocation9 + $0x604] ss:$40 sps:$4 sm:$0xff]  }
 0x59f   :  { %10984 = vmatprep.subr.bf16.mxu1 %v14857_v36  ;;  %v14917_v36 = vld [vmem:[#allocation9 + $0xb54] ss:$40 sps:$4 sm:$0xff]  }
 0x5a1   :  { %10926 = vmatpush1.bf16.msra.mxu0 %v14852_v42  ;;  %v14912_v42 = vld [vmem:[#allocation9 + $0x600] ss:$40 sps:$4 sm:$0xff]  }
 0x5a2   :  { %10985 = vmatpush1.bf16.msra.mxu1 %v14855_v46  ;;  %10927 = vmatprep.subr.bf16.mxu0 %v14860_v30  ;;  %v14915_v46 = vld [vmem:[#allocation9 + $0xb50] ss:$40 sps:$4 sm:$0xff]   ;;  %v14920_v30 = vld [vmem:[#allocation9 + $0x654] ss:$40 sps:$4 sm:$0xff]  }
 0x5a3   :  { %10986 = vmatprep.subr.bf16.mxu1 %v14863_v35  ;;  %v14923_v35 = vld [vmem:[#allocation9 + $0xba4] ss:$40 sps:$4 sm:$0xff]  }
 0x5a5   :  { %10928 = vmatpush1.bf16.msra.mxu0 %v14858_v37  ;;  %v14918_v37 = vld [vmem:[#allocation9 + $0x650] ss:$40 sps:$4 sm:$0xff]  }
 0x5a6   :  { %10987 = vmatpush1.bf16.msra.mxu1 %v14861_v43  ;;  %10929 = vmatprep.subr.bf16.mxu0 %v14866_v10  ;;  %v14921_v43 = vld [vmem:[#allocation9 + $0xba0] ss:$40 sps:$4 sm:$0xff]   ;;  %v14926_v10 = vld [vmem:[#allocation9 + $0x6a4] ss:$40 sps:$4 sm:$0xff]  }
 0x5a7   :  { %10988 = vmatprep.subr.bf16.mxu1 %v14869_v44  ;;  %v14929_v44 = vld [vmem:[#allocation9 + $0xbf4] ss:$40 sps:$4 sm:$0xff]  }
 0x5a9   :  { %10930 = vmatpush1.bf16.msra.mxu0 %v14864_v22  ;;  %v14924_v22 = vld [vmem:[#allocation9 + $0x6a0] ss:$40 sps:$4 sm:$0xff]  }
 0x5aa   :  { %10989 = vmatpush1.bf16.msra.mxu1 %v14867_v34  ;;  %10931 = vmatprep.subr.bf16.mxu0 %v14872_v61  ;;  %v14927_v34 = vld [vmem:[#allocation9 + $0xbf0] ss:$40 sps:$4 sm:$0xff]   ;;  %v14932_v61 = vld [vmem:[#allocation9 + $0x6f4] ss:$40 sps:$4 sm:$0xff]  }
 0x5ab   :  { %10990 = vmatprep.subr.bf16.mxu1 %v14875_v31 }
 0x5ac   :  { %v15883_v54 = vpop.f32.mrb[48].mxu1 }
 0x5ad   :  { %v15885_v55 = vpop.f32.mrb[49].mxu1  ;;  %10932 = vmatpush1.bf16.msra.mxu0 %v14870_v49  ;;  %v14935_v49 = vld [vmem:[#allocation9 + $0xc44] ss:$40 sps:$4 sm:$0xff]  }
 0x5ae   :  { %v8674_v47 = vpop.f32.mrb[50].mxu1  ;;  %10991 = vmatpush1.bf16.msra.mxu1 %v14873_v0  ;;  %10933 = vmatprep.subr.bf16.mxu0 %v14878_v51 }
 0x5af   :  { %v8675_v58 = vpop.f32.mrb[51].mxu1  ;;  %10992 = vmatprep.subr.bf16.mxu1 %v14881_v52  ;;  %v14930_v47 = vld [vmem:[#allocation9 + $0x6f0] ss:$40 sps:$4 sm:$0xff]  }
 0x5b0   :  { %v14938_v58 = vld [vmem:[#allocation9 + $0x744] ss:$40 sps:$4 sm:$0xff]  }
 0x5b1   :  { %10934 = vmatpush1.bf16.msra.mxu0 %v14876_v39 }
 0x5b2   :  { %10993 = vmatpush1.bf16.msra.mxu1 %v14879_v56  ;;  %10935 = vmatprep.subr.bf16.mxu0 %v14884_v57  ;;  %v14933_v57 = vld [vmem:[#allocation9 + $0xc40] ss:$40 sps:$4 sm:$0xff]  }
 0x5b3   :  { %10994 = vmatprep.subr.bf16.mxu1 %v14887_v32  ;;  %v14941_v32 = vld [vmem:[#allocation9 + $0x51c] ss:$40 sps:$4 sm:$0xff]  }
 0x5b5   :  { %10936 = vmatpush1.bf16.msra.mxu0 %v14882_v41  ;;  %v14936_v41 = vld [vmem:[#allocation9 + $0x740] ss:$40 sps:$4 sm:$0xff]  }
 0x5b6   :  { %10995 = vmatpush1.bf16.msra.mxu1 %v14885_v38  ;;  %10937 = vmatprep.subr.bf16.mxu0 %v14890_v62  ;;  %v14944_v38 = vld [vmem:[#allocation9 + $0x794] ss:$40 sps:$4 sm:$0xff]  }
 0x5b7   :  { %11046 = vmatprep.subr.bf16.mxu1 %v14893_v1  ;;  %v14947_v62 = vld [vmem:[#allocation9 + $0x56c] ss:$40 sps:$4 sm:$0xff]   ;;  %v14945_v1 = vld [vmem:[#allocation9 + $0x568] ss:$40 sps:$4 sm:$0xff]  }
 0x5b9   :  { %10938 = vmatpush1.bf16.msra.mxu0 %v14888_v5  ;;  %10997 = vmatmul.mubr.bf16.vlgmr.msra.gmra.mrb[64].mxu1 %v15826_v59  ;;  %v14950_v5 = vld [vmem:[#allocation9 + $0x7e4] ss:$40 sps:$4 sm:$0xff]  }
 0x5ba   :  { %11047 = vmatpush1.bf16.msra.mxu1 %v14891_v13  ;;  %11005 = vmatprep.subr.bf16.mxu0 %v14896_v25  ;;  %v14953_v13 = vld [vmem:[#allocation9 + $0x5bc] ss:$40 sps:$4 sm:$0xff]   ;;  %v14948_v25 = vld [vmem:[#allocation9 + $0x7e0] ss:$40 sps:$4 sm:$0xff]  }
 0x5bb   :  { %11048 = vmatprep.subr.bf16.mxu1 %v14899_v26  ;;  %11078 = vmatprep.mubr.bf16.mxu1 %v15381_v53  ;;  %v14951_v26 = vld [vmem:[#allocation9 + $0x5b8] ss:$40 sps:$4 sm:$0xff]  }
 0x5bc   :  { %10956 = vmatmul.mubr.bf16.vlgmr.msra.gmra.mrb[64].mxu0 %v15846_v48 }
 0x5bd   :  { %11006 = vmatpush1.bf16.msra.mxu0 %v14894_v27  ;;  %11037 = vmatprep.mubr.bf16.mxu0 %v15832_v8  ;;  %v14956_v27 = vld [vmem:[#allocation9 + $0x834] ss:$40 sps:$4 sm:$0xff]  }
 0x5be   :  { %11049 = vmatpush1.bf16.msra.mxu1 %v14897_v9  ;;  %11007 = vmatprep.subr.bf16.mxu0 %v14902_v19  ;;  %v14959_v9 = vld [vmem:[#allocation9 + $0x60c] ss:$40 sps:$4 sm:$0xff]   ;;  %v14954_v19 = vld [vmem:[#allocation9 + $0x830] ss:$40 sps:$4 sm:$0xff]  }
 0x5bf   :  { %11050 = vmatprep.subr.bf16.mxu1 %v14905_v20  ;;  %v14957_v20 = vld [vmem:[#allocation9 + $0x608] ss:$40 sps:$4 sm:$0xff]  }
 0x5c1   :  { %11008 = vmatpush1.bf16.msra.mxu0 %v14900_v16  ;;  %v14962_v16 = vld [vmem:[#allocation9 + $0x884] ss:$40 sps:$4 sm:$0xff]  }
 0x5c2   :  { %11051 = vmatpush1.bf16.msra.mxu1 %v14903_v18  ;;  %11009 = vmatprep.subr.bf16.mxu0 %v14908_v23  ;;  %v14965_v18 = vld [vmem:[#allocation9 + $0x65c] ss:$40 sps:$4 sm:$0xff]   ;;  %v14960_v23 = vld [vmem:[#allocation9 + $0x880] ss:$40 sps:$4 sm:$0xff]  }
 0x5c3   :  { %11052 = vmatprep.subr.bf16.mxu1 %v14911_v24  ;;  %v14963_v24 = vld [vmem:[#allocation9 + $0x658] ss:$40 sps:$4 sm:$0xff]  }
 0x5c5   :  { %11010 = vmatpush1.bf16.msra.mxu0 %v14906_v45  ;;  %v14968_v45 = vld [vmem:[#allocation9 + $0x8d4] ss:$40 sps:$4 sm:$0xff]  }
 0x5c6   :  { %11053 = vmatpush1.bf16.msra.mxu1 %v14909_v28  ;;  %11011 = vmatprep.subr.bf16.mxu0 %v14914_v11  ;;  %v14971_v28 = vld [vmem:[#allocation9 + $0x6ac] ss:$40 sps:$4 sm:$0xff]   ;;  %v14966_v11 = vld [vmem:[#allocation9 + $0x8d0] ss:$40 sps:$4 sm:$0xff]  }
 0x5c7   :  { %11054 = vmatprep.subr.bf16.mxu1 %v14917_v36  ;;  %v14969_v36 = vld [vmem:[#allocation9 + $0x6a8] ss:$40 sps:$4 sm:$0xff]  }
 0x5c9   :  { %11012 = vmatpush1.bf16.msra.mxu0 %v14912_v42  ;;  %v14974_v42 = vld [vmem:[#allocation9 + $0x924] ss:$40 sps:$4 sm:$0xff]  }
 0x5ca   :  { %11055 = vmatpush1.bf16.msra.mxu1 %v14915_v46  ;;  %11013 = vmatprep.subr.bf16.mxu0 %v14920_v30  ;;  %v14977_v46 = vld [vmem:[#allocation9 + $0x6fc] ss:$40 sps:$4 sm:$0xff]  }
 0x5cb   :  { %11056 = vmatprep.subr.bf16.mxu1 %v14923_v35 }
 0x5cd   :  { %11014 = vmatpush1.bf16.msra.mxu0 %v14918_v37 }
 0x5ce   :  { %11057 = vmatpush1.bf16.msra.mxu1 %v14921_v43  ;;  %11015 = vmatprep.subr.bf16.mxu0 %v14926_v10  ;;  %v14972_v43 = vld [vmem:[#allocation9 + $0x920] ss:$40 sps:$4 sm:$0xff]  }
 0x5cf   :  { %v8629_v31 = vpop.f32.mrb[48].mxu0  ;;  %11058 = vmatprep.subr.bf16.mxu1 %v14929_v44 }
 0x5d0   :  { %v15892_v0 = vadd.f32 %v15883_v54, %v8629_v31  ;;  %v8631_v51 = vpop.f32.mrb[49].mxu0  ;;  %v14939_v54 = vld [vmem:[#allocation9 + $0x518] ss:$40 sps:$4 sm:$0xff]  }
 0x5d1   :  { %v15895_v52 = vadd.f32 %v15885_v55, %v8631_v51  ;;  %v8633_v39 = vpop.f32.mrb[50].mxu0  ;;  %11016 = vmatpush1.bf16.msra.mxu0 %v14924_v22  ;;  %v14942_v55 = vld [vmem:[#allocation9 + $0x790] ss:$40 sps:$4 sm:$0xff]  }
 0x5d2   :  { %v8634_v56 = vpop.f32.mrb[51].mxu0  ;;  %11059 = vmatpush1.bf16.msra.mxu1 %v14927_v34  ;;  %11017 = vmatprep.subr.bf16.mxu0 %v14932_v61  ;;  %v14975_v22 = vld [vmem:[#allocation9 + $0x6f8] ss:$40 sps:$4 sm:$0xff]   ;;  %v14980_v34 = vld [vmem:[#allocation9 + $0x974] ss:$40 sps:$4 sm:$0xff]  }
 0x5d3   :  { %11060 = vmatprep.subr.bf16.mxu1 %v14935_v49  ;;  %v14983_v49 = vld [vmem:[#allocation9 + $0x74c] ss:$40 sps:$4 sm:$0xff]  }
 0x5d5   :  { %11018 = vmatpush1.bf16.msra.mxu0 %v14930_v47 }
 0x5d6   :  { %11061 = vmatpush1.bf16.msra.mxu1 %v14933_v57  ;;  %11019 = vmatprep.subr.bf16.mxu0 %v14938_v58  ;;  %v14981_v57 = vld [vmem:[#allocation9 + $0x748] ss:$40 sps:$4 sm:$0xff]   ;;  %v14986_v58 = vld [vmem:[#allocation9 + $0x9c4] ss:$40 sps:$4 sm:$0xff]  }
 0x5d7   :  { %11128 = vmatprep.subr.bf16.mxu1 %v14941_v32  ;;  %v14989_v32 = vld [vmem:[#allocation9 + $0x79c] ss:$40 sps:$4 sm:$0xff]  }
 0x5d9   :  { %11020 = vmatpush1.bf16.msra.mxu0 %v14936_v41  ;;  %11079 = vmatmul.mubr.bf16.vlgmr.msra.gmra.mrb[68].mxu1 %v15846_v48  ;;  %v14984_v41 = vld [vmem:[#allocation9 + $0x9c0] ss:$40 sps:$4 sm:$0xff]  }
 0x5da   :  { %11129 = vmatpush1.bf16.msra.mxu1 %v14939_v54  ;;  %11160 = vmatprep.mubr.bf16.mxu1 %v15832_v8  ;;  %v14992_v54 = vld [vmem:[#allocation9 + $0x1c] ss:$40 sps:$4 sm:$0xff]  }
 0x5db   :  { %11021 = vmatprep.subr.bf16.mxu0 %v14944_v38  ;;  %11130 = vmatprep.subr.bf16.mxu1 %v14947_v62  ;;  %v14995_v38 = vld [vmem:[#allocation9 + $0x7ec] ss:$40 sps:$4 sm:$0xff]   ;;  %v14993_v62 = vld [vmem:[#allocation9 + $0x7e8] ss:$40 sps:$4 sm:$0xff]  }
 0x5dd   :  { %11022 = vmatpush1.bf16.msra.mxu0 %v14942_v55  ;;  %v14998_v55 = vld [vmem:[#allocation9 + $0x6c] ss:$40 sps:$4 sm:$0xff]  }
 0x5de   :  { %11131 = vmatpush1.bf16.msra.mxu1 %v14945_v1  ;;  %11023 = vmatprep.subr.bf16.mxu0 %v14950_v5  ;;  %v15001_v1 = vld [vmem:[#allocation9 + $0x83c] ss:$40 sps:$4 sm:$0xff]   ;;  %v14996_v5 = vld [vmem:[#allocation9 + $0x68] ss:$40 sps:$4 sm:$0xff]  }
 0x5df   :  { %11132 = vmatprep.subr.bf16.mxu1 %v14953_v13  ;;  %v14999_v13 = vld [vmem:[#allocation9 + $0x838] ss:$40 sps:$4 sm:$0xff]  }
 0x5e1   :  { %11024 = vmatpush1.bf16.msra.mxu0 %v14948_v25  ;;  %v15004_v25 = vld [vmem:[#allocation9 + $0xbc] ss:$40 sps:$4 sm:$0xff]  }
 0x5e2   :  { %11133 = vmatpush1.bf16.msra.mxu1 %v14951_v26  ;;  %11025 = vmatprep.subr.bf16.mxu0 %v14956_v27  ;;  %v15007_v26 = vld [vmem:[#allocation9 + $0x88c] ss:$40 sps:$4 sm:$0xff]   ;;  %v15002_v27 = vld [vmem:[#allocation9 + $0xb8] ss:$40 sps:$4 sm:$0xff]  }
 0x5e3   :  { %11134 = vmatprep.subr.bf16.mxu1 %v14959_v9  ;;  %v15005_v9 = vld [vmem:[#allocation9 + $0x888] ss:$40 sps:$4 sm:$0xff]  }
 0x5e5   :  { %11026 = vmatpush1.bf16.msra.mxu0 %v14954_v19  ;;  %v15010_v19 = vld [vmem:[#allocation9 + $0x10c] ss:$40 sps:$4 sm:$0xff]  }
 0x5e6   :  { %11135 = vmatpush1.bf16.msra.mxu1 %v14957_v20  ;;  %11027 = vmatprep.subr.bf16.mxu0 %v14962_v16  ;;  %v15013_v20 = vld [vmem:[#allocation9 + $0x8dc] ss:$40 sps:$4 sm:$0xff]   ;;  %v15008_v16 = vld [vmem:[#allocation9 + $0x108] ss:$40 sps:$4 sm:$0xff]  }
 0x5e7   :  { %11136 = vmatprep.subr.bf16.mxu1 %v14965_v18  ;;  %v15011_v18 = vld [vmem:[#allocation9 + $0x8d8] ss:$40 sps:$4 sm:$0xff]  }
 0x5e9   :  { %11028 = vmatpush1.bf16.msra.mxu0 %v14960_v23  ;;  %v15016_v23 = vld [vmem:[#allocation9 + $0x15c] ss:$40 sps:$4 sm:$0xff]  }
 0x5ea   :  { %11137 = vmatpush1.bf16.msra.mxu1 %v14963_v24  ;;  %11029 = vmatprep.subr.bf16.mxu0 %v14968_v45  ;;  %v15019_v24 = vld [vmem:[#allocation9 + $0x92c] ss:$40 sps:$4 sm:$0xff]   ;;  %v15014_v45 = vld [vmem:[#allocation9 + $0x158] ss:$40 sps:$4 sm:$0xff]  }
 0x5eb   :  { %11138 = vmatprep.subr.bf16.mxu1 %v14971_v28  ;;  %v15017_v28 = vld [vmem:[#allocation9 + $0x928] ss:$40 sps:$4 sm:$0xff]  }
 0x5ec   :  { %v10752_v30 = vpop.f32.mrb[52].mxu1 }
 0x5ed   :  { %v15900_v35 = vadd.f32 %v10752_v30, %v15791_v29  ;;  %v10754_v37 = vpop.f32.mrb[53].mxu1  ;;  %11030 = vmatpush1.bf16.msra.mxu0 %v14966_v11  ;;  %v15022_v11 = vld [vmem:[#allocation9 + $0x1ac] ss:$40 sps:$4 sm:$0xff]   ;;  %v15020_v30 = vld [vmem:[#allocation9 + $0x1a8] ss:$40 sps:$4 sm:$0xff]  }
 0x5ee   :  { %v15903_v10 = vadd.f32 %v10754_v37, %v15794_v33  ;;  %v10756_v44 = vpop.f32.mrb[54].mxu1  ;;  %11139 = vmatpush1.bf16.msra.mxu1 %v14969_v36  ;;  %11031 = vmatprep.subr.bf16.mxu0 %v14974_v42  ;;  %v14978_v33 = vld [vmem:[#allocation9 + $0x970] ss:$40 sps:$4 sm:$0xff]   ;;  %v15025_v36 = vld [vmem:[#allocation9 + $0x97c] ss:$40 sps:$4 sm:$0xff]  }
 0x5ef   :  { %v8711_v61 = vpop.f32.mrb[52].mxu0  ;;  %v10757_v31 = vpop.f32.mrb[55].mxu1  ;;  %11140 = vmatprep.subr.bf16.mxu1 %v14977_v46  ;;  %v15028_v44 = vld [vmem:[#allocation9 + $0x1fc] ss:$40 sps:$4 sm:$0xff]  }
 0x5f0   :  { %v15906_v51 = vadd.f32 %v8711_v61, %v15892_v0  ;;  %v8713_v29 = vpop.f32.mrb[53].mxu0  ;;  %v14987_v0 = vld [vmem:[#allocation9 + $0x798] ss:$40 sps:$4 sm:$0xff]   ;;  %v15029_v31 = vld [vmem:[#allocation9 + $0x9c8] ss:$40 sps:$4 sm:$0xff]  }
 0x5f1   :  { %v15909_v39 = vadd.f32 %v8713_v29, %v15895_v52  ;;  %v8715_v47 = vpop.f32.mrb[54].mxu0  ;;  %11032 = vmatpush1.bf16.msra.mxu0 %v14972_v43  ;;  %v14990_v52 = vld [vmem:[#allocation9 + $0x18] ss:$40 sps:$4 sm:$0xff]   ;;  %v15037_v29 = vld [vmem:[#allocation9 + $0x24] ss:$40 sps:$4 sm:$0xff]  }
 0x5f2   :  { %v8716_v56 = vpop.f32.mrb[55].mxu0  ;;  %11141 = vmatpush1.bf16.msra.mxu1 %v14975_v22  ;;  %11033 = vmatprep.subr.bf16.mxu0 %v14980_v34  ;;  %v15023_v43 = vld [vmem:[#allocation9 + $0x978] ss:$40 sps:$4 sm:$0xff]   ;;  %v15031_v34 = vld [vmem:[#allocation9 + $0x9cc] ss:$40 sps:$4 sm:$0xff]  }
 0x5f3   :  { %11142 = vmatprep.subr.bf16.mxu1 %v14983_v49  ;;  %v15026_v61 = vld [vmem:[#allocation9 + $0x1f8] ss:$40 sps:$4 sm:$0xff]   ;;  %v15034_v49 = vld [vmem:[#allocation9 + $0x24c] ss:$40 sps:$4 sm:$0xff]   ;;  %v15032_v47 = vld [vmem:[#allocation9 + $0x248] ss:$40 sps:$4 sm:$0xff]  }
 0x5f4   :  { %v15040_v56 = vld [vmem:[#allocation9 + $0x29c] ss:$40 sps:$4 sm:$0xff]  }
 0x5f5   :  { %11034 = vmatpush1.bf16.msra.mxu0 %v14978_v33  ;;  %v15035_v33 = vld [vmem:[#allocation9 + $0x20] ss:$40 sps:$4 sm:$0xff]  }
 0x5f6   :  { %11143 = vmatpush1.bf16.msra.mxu1 %v14981_v57  ;;  %11035 = vmatprep.subr.bf16.mxu0 %v14986_v58  ;;  %v15043_v57 = vld [vmem:[#allocation9 + $0x74] ss:$40 sps:$4 sm:$0xff]   ;;  %v15038_v58 = vld [vmem:[#allocation9 + $0x298] ss:$40 sps:$4 sm:$0xff]  }
 0x5f7   :  { %11144 = vmatprep.subr.bf16.mxu1 %v14989_v32  ;;  %v15041_v32 = vld [vmem:[#allocation9 + $0x70] ss:$40 sps:$4 sm:$0xff]  }
 0x5f9   :  { %11036 = vmatpush1.bf16.msra.mxu0 %v14984_v41  ;;  %v15046_v41 = vld [vmem:[#allocation9 + $0x2ec] ss:$40 sps:$4 sm:$0xff]  }
 0x5fa   :  { %11145 = vmatpush1.bf16.msra.mxu1 %v14987_v0  ;;  %11087 = vmatprep.subr.bf16.mxu0 %v14992_v54  ;;  %v15049_v0 = vld [vmem:[#allocation9 + $0xc4] ss:$40 sps:$4 sm:$0xff]   ;;  %v15044_v54 = vld [vmem:[#allocation9 + $0x2e8] ss:$40 sps:$4 sm:$0xff]  }
 0x5fb   :  { %11146 = vmatprep.subr.bf16.mxu1 %v14995_v38  ;;  %v15047_v38 = vld [vmem:[#allocation9 + $0xc0] ss:$40 sps:$4 sm:$0xff]  }
 0x5fc   :  { %11038 = vmatmul.mubr.bf16.vlgmr.msra.gmra.mrb[68].mxu0 %v15863_v50 }
 0x5fd   :  { %11088 = vmatpush1.bf16.msra.mxu0 %v14990_v52  ;;  %11119 = vmatprep.mubr.bf16.mxu0 %v15805_v21  ;;  %v15052_v52 = vld [vmem:[#allocation9 + $0x33c] ss:$40 sps:$4 sm:$0xff]  }
 0x5fe   :  { %11147 = vmatpush1.bf16.msra.mxu1 %v14993_v62  ;;  %11089 = vmatprep.subr.bf16.mxu0 %v14998_v55  ;;  %v15055_v62 = vld [vmem:[#allocation9 + $0x114] ss:$40 sps:$4 sm:$0xff]   ;;  %v15050_v55 = vld [vmem:[#allocation9 + $0x338] ss:$40 sps:$4 sm:$0xff]  }
 0x5ff   :  { %11148 = vmatprep.subr.bf16.mxu1 %v15001_v1  ;;  %v15053_v1 = vld [vmem:[#allocation9 + $0x110] ss:$40 sps:$4 sm:$0xff]  }
 0x601   :  { %11090 = vmatpush1.bf16.msra.mxu0 %v14996_v5  ;;  %v15058_v5 = vld [vmem:[#allocation9 + $0x38c] ss:$40 sps:$4 sm:$0xff]  }
 0x602   :  { %11149 = vmatpush1.bf16.msra.mxu1 %v14999_v13  ;;  %11091 = vmatprep.subr.bf16.mxu0 %v15004_v25  ;;  %v15056_v13 = vld [vmem:[#allocation9 + $0x388] ss:$40 sps:$4 sm:$0xff]  }
 0x603   :  { %11150 = vmatprep.subr.bf16.mxu1 %v15007_v26  ;;  %v15059_v25 = vld [vmem:[#allocation9 + $0x160] ss:$40 sps:$4 sm:$0xff]   ;;  %v15064_v26 = vld [vmem:[#allocation9 + $0x3dc] ss:$40 sps:$4 sm:$0xff]  }
 0x605   :  { %11092 = vmatpush1.bf16.msra.mxu0 %v15002_v27  ;;  %v15067_v27 = vld [vmem:[#allocation9 + $0x1b4] ss:$40 sps:$4 sm:$0xff]  }
 0x606   :  { %11151 = vmatpush1.bf16.msra.mxu1 %v15005_v9  ;;  %11093 = vmatprep.subr.bf16.mxu0 %v15010_v19  ;;  %v15062_v9 = vld [vmem:[#allocation9 + $0x3d8] ss:$40 sps:$4 sm:$0xff]  }
 0x607   :  { %11152 = vmatprep.subr.bf16.mxu1 %v15013_v20  ;;  %v15065_v19 = vld [vmem:[#allocation9 + $0x1b0] ss:$40 sps:$4 sm:$0xff]   ;;  %v15070_v20 = vld [vmem:[#allocation9 + $0x42c] ss:$40 sps:$4 sm:$0xff]  }
 0x609   :  { %11094 = vmatpush1.bf16.msra.mxu0 %v15008_v16  ;;  %v15073_v16 = vld [vmem:[#allocation9 + $0x204] ss:$40 sps:$4 sm:$0xff]  }
 0x60a   :  { %11153 = vmatpush1.bf16.msra.mxu1 %v15011_v18  ;;  %11095 = vmatprep.subr.bf16.mxu0 %v15016_v23  ;;  %v15919_v18 = vld [vmem:[#allocation12] sm:$0xff]  ;;  %v15068_v23 = vld [vmem:[#allocation9 + $0x428] ss:$40 sps:$4 sm:$0xff]  }
 0x60b   :  { %11154 = vmatprep.subr.bf16.mxu1 %v15019_v24  ;;  %v15071_v24 = vld [vmem:[#allocation9 + $0x200] ss:$40 sps:$4 sm:$0xff]  }
 0x60c   :  { %v15913_v42 = vpop.f32.mrb[56].mxu1 }
 0x60d   :  { %v15915_v46 = vpop.f32.mrb[57].mxu1  ;;  %11096 = vmatpush1.bf16.msra.mxu0 %v15014_v45  ;;  %v15076_v45 = vld [vmem:[#allocation9 + $0x47c] ss:$40 sps:$4 sm:$0xff]  }
 0x60e   :  { %v10838_v37 = vpop.f32.mrb[58].mxu1  ;;  %11155 = vmatpush1.bf16.msra.mxu1 %v15017_v28  ;;  %11097 = vmatprep.subr.bf16.mxu0 %v15022_v11  ;;  %v15079_v11 = vld [vmem:[#allocation9 + $0x254] ss:$40 sps:$4 sm:$0xff]  }
 0x60f   :  { %v10839_v22 = vpop.f32.mrb[59].mxu1  ;;  %11156 = vmatprep.subr.bf16.mxu1 %v15025_v36 }
 0x611   :  { %11098 = vmatpush1.bf16.msra.mxu0 %v15020_v30  ;;  %v11340_v30 = vrot.slane %v15919_v18, %v15648_v2 }
 0x612   :  { %11157 = vmatpush1.bf16.msra.mxu1 %v15023_v43  ;;  %11099 = vmatprep.subr.bf16.mxu0 %v15028_v44  ;;  %v11344_v44 = vrot.slane %v15919_v18, %v15656_v6 }
 0x613   :  { %11158 = vmatprep.subr.bf16.mxu1 %v15031_v34  ;;  %v15074_v34 = vld [vmem:[#allocation9 + $0x478] ss:$40 sps:$4 sm:$0xff]  }
 0x615   :  { %11100 = vmatpush1.bf16.msra.mxu0 %v15026_v61 }
 0x616   :  { %11159 = vmatpush1.bf16.msra.mxu1 %v15029_v31  ;;  %11101 = vmatprep.subr.bf16.mxu0 %v15034_v49  ;;  %v15077_v49 = vld [vmem:[#allocation9 + $0x250] ss:$40 sps:$4 sm:$0xff]  }
 0x617   :  { %11210 = vmatprep.subr.bf16.mxu1 %v15037_v29  ;;  %v15082_v29 = vld [vmem:[#allocation9 + $0x4cc] ss:$40 sps:$4 sm:$0xff]  }
 0x619   :  { %11102 = vmatpush1.bf16.msra.mxu0 %v15032_v47  ;;  %11161 = vmatmul.mubr.bf16.vlgmr.msra.gmra.mrb[72].mxu1 %v15863_v50  ;;  %v15085_v47 = vld [vmem:[#allocation9 + $0x2a4] ss:$40 sps:$4 sm:$0xff]  }
 0x61a   :  { %11211 = vmatpush1.bf16.msra.mxu1 %v15035_v33  ;;  %11242 = vmatprep.mubr.bf16.mxu1 %v15805_v21  ;;  %v15061_v21 = vld [vmem:[#allocation9 + $0x164] ss:$40 sps:$4 sm:$0xff]  }
 0x61b   :  { %11103 = vmatprep.subr.bf16.mxu0 %v15040_v56  ;;  %11212 = vmatprep.subr.bf16.mxu1 %v15043_v57  ;;  %v15088_v57 = vld [vmem:[#allocation9 + $0xa1c] ss:$40 sps:$4 sm:$0xff]  }
 0x61d   :  { %11104 = vmatpush1.bf16.msra.mxu0 %v15038_v58  ;;  %v15086_v58 = vld [vmem:[#allocation9 + $0xa18] ss:$40 sps:$4 sm:$0xff]  }
 0x61e   :  { %11213 = vmatpush1.bf16.msra.mxu1 %v15041_v32  ;;  %11105 = vmatprep.subr.bf16.mxu0 %v15046_v41  ;;  %v15089_v32 = vld [vmem:[#allocation9 + $0x2f0] ss:$40 sps:$4 sm:$0xff]   ;;  %v15094_v41 = vld [vmem:[#allocation9 + $0xa6c] ss:$40 sps:$4 sm:$0xff]  }
 0x61f   :  { %11214 = vmatprep.subr.bf16.mxu1 %v15049_v0  ;;  %v15097_v0 = vld [vmem:[#allocation9 + $0x344] ss:$40 sps:$4 sm:$0xff]  }
 0x621   :  { %11106 = vmatpush1.bf16.msra.mxu0 %v15044_v54  ;;  %v15092_v54 = vld [vmem:[#allocation9 + $0xa68] ss:$40 sps:$4 sm:$0xff]  }
 0x622   :  { %11215 = vmatpush1.bf16.msra.mxu1 %v15047_v38  ;;  %11107 = vmatprep.subr.bf16.mxu0 %v15052_v52  ;;  %v15095_v38 = vld [vmem:[#allocation9 + $0x340] ss:$40 sps:$4 sm:$0xff]   ;;  %v15100_v52 = vld [vmem:[#allocation9 + $0xabc] ss:$40 sps:$4 sm:$0xff]  }
 0x623   :  { %11216 = vmatprep.subr.bf16.mxu1 %v15055_v62  ;;  %v15103_v62 = vld [vmem:[#allocation9 + $0x394] ss:$40 sps:$4 sm:$0xff]  }
 0x625   :  { %11108 = vmatpush1.bf16.msra.mxu0 %v15050_v55  ;;  %v15098_v55 = vld [vmem:[#allocation9 + $0xab8] ss:$40 sps:$4 sm:$0xff]  }
 0x626   :  { %11217 = vmatpush1.bf16.msra.mxu1 %v15053_v1  ;;  %11109 = vmatprep.subr.bf16.mxu0 %v15058_v5  ;;  %v15101_v1 = vld [vmem:[#allocation9 + $0x390] ss:$40 sps:$4 sm:$0xff]   ;;  %v15106_v5 = vld [vmem:[#allocation9 + $0xb0c] ss:$40 sps:$4 sm:$0xff]  }
 0x627   :  { %11218 = vmatprep.subr.bf16.mxu1 %v15061_v21  ;;  %v15109_v21 = vld [vmem:[#allocation9 + $0x3e4] ss:$40 sps:$4 sm:$0xff]  }
 0x629   :  { %11110 = vmatpush1.bf16.msra.mxu0 %v15056_v13  ;;  %v15104_v13 = vld [vmem:[#allocation9 + $0xb08] ss:$40 sps:$4 sm:$0xff]  }
 0x62a   :  { %11219 = vmatpush1.bf16.msra.mxu1 %v15059_v25  ;;  %11111 = vmatprep.subr.bf16.mxu0 %v15064_v26  ;;  %v15107_v25 = vld [vmem:[#allocation9 + $0x3e0] ss:$40 sps:$4 sm:$0xff]   ;;  %v15112_v26 = vld [vmem:[#allocation9 + $0xb5c] ss:$40 sps:$4 sm:$0xff]  }
 0x62b   :  { %11220 = vmatprep.subr.bf16.mxu1 %v15067_v27  ;;  %v15115_v27 = vld [vmem:[#allocation9 + $0x434] ss:$40 sps:$4 sm:$0xff]  }
 0x62d   :  { %11112 = vmatpush1.bf16.msra.mxu0 %v15062_v9  ;;  %v15110_v9 = vld [vmem:[#allocation9 + $0xb58] ss:$40 sps:$4 sm:$0xff]  }
 0x62e   :  { %11221 = vmatpush1.bf16.msra.mxu1 %v15065_v19  ;;  %11113 = vmatprep.subr.bf16.mxu0 %v15070_v20  ;;  %v15113_v19 = vld [vmem:[#allocation9 + $0x430] ss:$40 sps:$4 sm:$0xff]   ;;  %v15118_v20 = vld [vmem:[#allocation9 + $0xbac] ss:$40 sps:$4 sm:$0xff]  }
 0x62f   :  { %v10793_v28 = vpop.f32.mrb[56].mxu0  ;;  %11222 = vmatprep.subr.bf16.mxu1 %v15073_v16  ;;  %v15121_v16 = vld [vmem:[#allocation9 + $0x484] ss:$40 sps:$4 sm:$0xff]  }
 0x630   :  { %v10794_v36 = vadd.f32 %v10793_v28, %v15900_v35  ;;  %v10795_v37 = vpop.f32.mrb[57].mxu0 }
 0x631   :  { %v10796_v43 = vadd.f32 %v10795_v37, %v15903_v10  ;;  %v10797_v22 = vpop.f32.mrb[58].mxu0  ;;  %11114 = vmatpush1.bf16.msra.mxu0 %v15068_v23  ;;  %v15080_v10 = vld [vmem:[#allocation9 + $0x4c8] ss:$40 sps:$4 sm:$0xff]   ;;  %v15127_v37 = vld [vmem:[#allocation9 + $0x4d4] ss:$40 sps:$4 sm:$0xff]  }
 0x632   :  { %v10835_v61 = vadd.f32 %v15913_v42, %v10794_v36  ;;  %v10798_v31 = vpop.f32.mrb[59].mxu0  ;;  %11223 = vmatpush1.bf16.msra.mxu1 %v15071_v24  ;;  %11115 = vmatprep.subr.bf16.mxu0 %v15076_v45  ;;  %v15083_v42 = vld [vmem:[#allocation9 + $0x2a0] ss:$40 sps:$4 sm:$0xff]   ;;  %v15124_v36 = vld [vmem:[#allocation9 + $0xbfc] ss:$40 sps:$4 sm:$0xff]  }
 0x633   :  { %v10837_v35 = vadd.f32 %v15915_v46, %v10796_v43  ;;  %11224 = vmatprep.subr.bf16.mxu1 %v15079_v11  ;;  %v15091_v46 = vld [vmem:[#allocation9 + $0x2f4] ss:$40 sps:$4 sm:$0xff]   ;;  %v15116_v45 = vld [vmem:[#allocation9 + $0xba8] ss:$40 sps:$4 sm:$0xff]   ;;  %v15122_v43 = vld [vmem:[#allocation9 + $0xbf8] ss:$40 sps:$4 sm:$0xff]  }
 0x634   :  { %v11387_v33 = vadd.f32 %v11340_v30, %v10835_v61  ;;  %v15119_v11 = vld [vmem:[#allocation9 + $0x480] ss:$40 sps:$4 sm:$0xff]   ;;  %v15130_v22 = vld [vmem:[#allocation9 + $0xc4c] ss:$40 sps:$4 sm:$0xff]  }
 0x635   :  { %v11388_v56 = vadd.f32 %v11344_v44, %v10837_v35  ;;  %11116 = vmatpush1.bf16.msra.mxu0 %v15074_v34  ;;  %v15125_v44 = vld [vmem:[#allocation9 + $0x4d0] ss:$40 sps:$4 sm:$0xff]   ;;  %v15133_v34 = vld [vmem:[#allocation9 + $0xa24] ss:$40 sps:$4 sm:$0xff]   ;;  %v15131_v31 = vld [vmem:[#allocation9 + $0xa20] ss:$40 sps:$4 sm:$0xff]  }
 0x636   :  { %11397 = vst [vmem:[%s16006_s11] sm:$0xff] %v11387_v33  ;;  %11225 = vmatpush1.bf16.msra.mxu1 %v15077_v49  ;;  %11117 = vmatprep.subr.bf16.mxu0 %v15082_v29  ;;  %v15128_v61 = vld [vmem:[#allocation9 + $0xc48] ss:$40 sps:$4 sm:$0xff]   ;;  %v15136_v49 = vld [vmem:[#allocation9 + $0x524] ss:$40 sps:$4 sm:$0xff]   ;;  %v15139_v29 = vld [vmem:[#allocation9 + $0xa74] ss:$40 sps:$4 sm:$0xff]  }
 0x637   :  { %11398 = vst [vmem:[%s16006_s11 + $0x8] sm:$0xff] %v11388_v56  ;;  %11226 = vmatprep.subr.bf16.mxu1 %v15085_v47  ;;  %v15134_v35 = vld [vmem:[#allocation9 + $0x520] ss:$40 sps:$4 sm:$0xff]   ;;  %v15137_v47 = vld [vmem:[#allocation9 + $0xa70] ss:$40 sps:$4 sm:$0xff]  }
 0x638   :  { %v15142_v33 = vld [vmem:[#allocation9 + $0x574] ss:$40 sps:$4 sm:$0xff]   ;;  %v15145_v56 = vld [vmem:[#allocation9 + $0xac4] ss:$40 sps:$4 sm:$0xff]  }
 0x639   :  { %11118 = vmatpush1.bf16.msra.mxu0 %v15080_v10  ;;  %v15140_v10 = vld [vmem:[#allocation9 + $0x570] ss:$40 sps:$4 sm:$0xff]  }
 0x63a   :  { %11227 = vmatpush1.bf16.msra.mxu1 %v15083_v42  ;;  %11169 = vmatprep.subr.bf16.mxu0 %v15088_v57  ;;  %v15143_v42 = vld [vmem:[#allocation9 + $0xac0] ss:$40 sps:$4 sm:$0xff]   ;;  %v15148_v57 = vld [vmem:[#allocation9 + $0x5c4] ss:$40 sps:$4 sm:$0xff]  }
 0x63b   :  { %11228 = vmatprep.subr.bf16.mxu1 %v15091_v46  ;;  %v15146_v46 = vld [vmem:[#allocation9 + $0x5c0] ss:$40 sps:$4 sm:$0xff]  }
 0x63c   :  { %11120 = vmatmul.mubr.bf16.vlgmr.msra.gmra.mrb[72].mxu0 %v15826_v59 }
 0x63d   :  { %11170 = vmatpush1.bf16.msra.mxu0 %v15086_v58  ;;  %11201 = vmatprep.mubr.bf16.mxu0 %v15381_v53  ;;  %v15149_v58 = vld [vmem:[#allocation9 + $0xb10] ss:$40 sps:$4 sm:$0xff]  }
 0x63e   :  { %11229 = vmatpush1.bf16.msra.mxu1 %v15089_v32  ;;  %11171 = vmatprep.subr.bf16.mxu0 %v15094_v41  ;;  %v15154_v32 = vld [vmem:[#allocation9 + $0x614] ss:$40 sps:$4 sm:$0xff]   ;;  %v15152_v41 = vld [vmem:[#allocation9 + $0x610] ss:$40 sps:$4 sm:$0xff]  }
 0x63f   :  { %11230 = vmatprep.subr.bf16.mxu1 %v15097_v0  ;;  %v15160_v0 = vld [vmem:[#allocation9 + $0x664] ss:$40 sps:$4 sm:$0xff]  }
 0x641   :  { %11172 = vmatpush1.bf16.msra.mxu0 %v15092_v54  ;;  %v15163_v54 = vld [vmem:[#allocation9 + $0xbb4] ss:$40 sps:$4 sm:$0xff]  }
 0x642   :  { %11231 = vmatpush1.bf16.msra.mxu1 %v15095_v38  ;;  %11173 = vmatprep.subr.bf16.mxu0 %v15100_v52  ;;  %v15158_v38 = vld [vmem:[#allocation9 + $0x660] ss:$40 sps:$4 sm:$0xff]   ;;  %v15161_v52 = vld [vmem:[#allocation9 + $0xbb0] ss:$40 sps:$4 sm:$0xff]  }
 0x643   :  { %11232 = vmatprep.subr.bf16.mxu1 %v15103_v62  ;;  %v15166_v62 = vld [vmem:[#allocation9 + $0x6b4] ss:$40 sps:$4 sm:$0xff]  }
 0x645   :  { %11174 = vmatpush1.bf16.msra.mxu0 %v15098_v55  ;;  %v15169_v55 = vld [vmem:[#allocation9 + $0xc04] ss:$40 sps:$4 sm:$0xff]  }
 0x646   :  { %11233 = vmatpush1.bf16.msra.mxu1 %v15101_v1  ;;  %11175 = vmatprep.subr.bf16.mxu0 %v15106_v5  ;;  %v15164_v1 = vld [vmem:[#allocation9 + $0x6b0] ss:$40 sps:$4 sm:$0xff]   ;;  %v15167_v5 = vld [vmem:[#allocation9 + $0xc00] ss:$40 sps:$4 sm:$0xff]  }
 0x647   :  { %11234 = vmatprep.subr.bf16.mxu1 %v15109_v21  ;;  %v15172_v21 = vld [vmem:[#allocation9 + $0x704] ss:$40 sps:$4 sm:$0xff]  }
 0x649   :  { %11176 = vmatpush1.bf16.msra.mxu0 %v15104_v13 }
 0x64a   :  { %11235 = vmatpush1.bf16.msra.mxu1 %v15107_v25  ;;  %11177 = vmatprep.subr.bf16.mxu0 %v15112_v26  ;;  %v15175_v25 = vld [vmem:[#allocation9 + $0xc54] ss:$40 sps:$4 sm:$0xff]  }
 0x64b   :  { %11236 = vmatprep.subr.bf16.mxu1 %v15115_v27 }
 0x64c   :  { %v15937_v23 = vpop.f32.mrb[60].mxu1 }
 0x64d   :  { %v15939_v24 = vpop.f32.mrb[61].mxu1  ;;  %11178 = vmatpush1.bf16.msra.mxu0 %v15110_v9 }
 0x64e   :  { %v10920_v28 = vpop.f32.mrb[62].mxu1  ;;  %11237 = vmatpush1.bf16.msra.mxu1 %v15113_v19  ;;  %11179 = vmatprep.subr.bf16.mxu0 %v15118_v20  ;;  %v15170_v20 = vld [vmem:[#allocation9 + $0x700] ss:$40 sps:$4 sm:$0xff]  }
 0x64f   :  { %v10921_v30 = vpop.f32.mrb[63].mxu1  ;;  %11238 = vmatprep.subr.bf16.mxu1 %v15121_v16  ;;  %v15178_v28 = vld [vmem:[#allocation9 + $0x754] ss:$40 sps:$4 sm:$0xff]  }
 0x650   :  { %v15176_v30 = vld [vmem:[#allocation9 + $0x750] ss:$40 sps:$4 sm:$0xff]  }
 0x651   :  { %11180 = vmatpush1.bf16.msra.mxu0 %v15116_v45  ;;  %v15173_v45 = vld [vmem:[#allocation9 + $0xc50] ss:$40 sps:$4 sm:$0xff]  }
 0x652   :  { %11239 = vmatpush1.bf16.msra.mxu1 %v15119_v11  ;;  %11181 = vmatprep.subr.bf16.mxu0 %v15124_v36 }
 0x653   :  { %11240 = vmatprep.subr.bf16.mxu1 %v15127_v37  ;;  %v15184_v37 = vld [vmem:[#allocation9 + $0x7f4] ss:$40 sps:$4 sm:$0xff]  }
 0x655   :  { %11182 = vmatpush1.bf16.msra.mxu0 %v15122_v43  ;;  %v15182_v43 = vld [vmem:[#allocation9 + $0x7f0] ss:$40 sps:$4 sm:$0xff]  }
 0x656   :  { %11241 = vmatpush1.bf16.msra.mxu1 %v15125_v44  ;;  %11183 = vmatprep.subr.bf16.mxu0 %v15130_v22  ;;  %v15187_v44 = vld [vmem:[#allocation9 + $0x844] ss:$40 sps:$4 sm:$0xff]   ;;  %v15190_v22 = vld [vmem:[#allocation9 + $0x894] ss:$40 sps:$4 sm:$0xff]  }
 0x657   :  { %11292 = vmatprep.subr.bf16.mxu1 %v15133_v34  ;;  %v15193_v34 = vld [vmem:[#allocation9 + $0x8e4] ss:$40 sps:$4 sm:$0xff]  }
 0x659   :  { %11184 = vmatpush1.bf16.msra.mxu0 %v15128_v61  ;;  %11243 = vmatmul.mubr.bf16.vlgmr.msra.gmra.mrb[76].mxu1 %v15826_v59  ;;  %v15151_v59 = vld [vmem:[#allocation9 + $0xb14] ss:$40 sps:$4 sm:$0xff]   ;;  %v15191_v61 = vld [vmem:[#allocation9 + $0x8e0] ss:$40 sps:$4 sm:$0xff]  }
 0x65a   :  { %11293 = vmatpush1.bf16.msra.mxu1 %v15131_v31  ;;  %11251 = vmatprep.subr.bf16.mxu0 %v15136_v49  ;;  %v15196_v31 = vld [vmem:[#allocation9 + $0x934] ss:$40 sps:$4 sm:$0xff]  }
 0x65b   :  { %11294 = vmatprep.subr.bf16.mxu1 %v15139_v29  ;;  %11324 = vmatprep.mubr.bf16.mxu1 %v15381_v53  ;;  %v15157_v53 = vld [vmem:[#allocation9 + $0xb64] ss:$40 sps:$4 sm:$0xff]  }
 0x65c   :  { %11202 = vmatmul.mubr.bf16.vlgmr.msra.gmra.mrb[76].mxu0 %v15846_v48 }
 0x65d   :  { %11252 = vmatpush1.bf16.msra.mxu0 %v15134_v35  ;;  %11283 = vmatprep.mubr.bf16.mxu0 %v15832_v8  ;;  %v15155_v8 = vld [vmem:[#allocation9 + $0xb60] ss:$40 sps:$4 sm:$0xff]   ;;  %v15194_v35 = vld [vmem:[#allocation9 + $0x930] ss:$40 sps:$4 sm:$0xff]  }
 0x65e   :  { %11295 = vmatpush1.bf16.msra.mxu1 %v15137_v47  ;;  %11253 = vmatprep.subr.bf16.mxu0 %v15142_v33 }
 0x65f   :  { %11296 = vmatprep.subr.bf16.mxu1 %v15145_v56  ;;  %v11348_v56 = vrot.slane %v15919_v18, %v15651_v3  ;;  %v15200_v3 = vld [vmem:[#allocation9 + $0x9d0] ss:$40 sps:$4 sm:$0xff]  }
 0x661   :  { %11254 = vmatpush1.bf16.msra.mxu0 %v15140_v10  ;;  %v15199_v10 = vld [vmem:[#allocation9 + $0x984] ss:$40 sps:$4 sm:$0xff]  }
 0x662   :  { %11297 = vmatpush1.bf16.msra.mxu1 %v15143_v42  ;;  %11255 = vmatprep.subr.bf16.mxu0 %v15148_v57 }
 0x663   :  { %11298 = vmatprep.subr.bf16.mxu1 %v15151_v59  ;;  %v11352_v59 = vrot.slane %v15919_v18, %v15659_v7 }
 0x665   :  { %11256 = vmatpush1.bf16.msra.mxu0 %v15146_v46 }
 0x666   :  { %11299 = vmatpush1.bf16.msra.mxu1 %v15149_v58  ;;  %11257 = vmatprep.subr.bf16.mxu0 %v15154_v32 }
 0x667   :  { %11300 = vmatprep.subr.bf16.mxu1 %v15157_v53  ;;  %v15197_v53 = vld [vmem:[#allocation9 + $0x980] ss:$40 sps:$4 sm:$0xff]  }
 0x669   :  { %11258 = vmatpush1.bf16.msra.mxu0 %v15152_v41 }
 0x66a   :  { %11301 = vmatpush1.bf16.msra.mxu1 %v15155_v8  ;;  %11259 = vmatprep.subr.bf16.mxu0 %v15160_v0 }
 0x66b   :  { %11302 = vmatprep.subr.bf16.mxu1 %v15163_v54 }
 0x66d   :  { %11260 = vmatpush1.bf16.msra.mxu0 %v15158_v38 }
 0x66e   :  { %11303 = vmatpush1.bf16.msra.mxu1 %v15161_v52  ;;  %11261 = vmatprep.subr.bf16.mxu0 %v15166_v62  ;;  %v11359_v62 = vsub.s32 5, %v15645_v60 }
 0x66f   :  { %v10875_v13 = vpop.f32.mrb[60].mxu0  ;;  %11304 = vmatprep.subr.bf16.mxu1 %v15169_v55 }
 0x670   :  { %v10876_v26 = vadd.f32 %v10875_v13, %v15812_v15  ;;  %v10877_v27 = vpop.f32.mrb[61].mxu0  ;;  %v15181_v15 = vld [vmem:[#allocation9 + $0x7a4] ss:$40 sps:$4 sm:$0xff]  }
 0x671   :  { %v10878_v9 = vadd.f32 %v10877_v27, %v15815_v17  ;;  %v10879_v19 = vpop.f32.mrb[62].mxu0  ;;  %11262 = vmatpush1.bf16.msra.mxu0 %v15164_v1  ;;  %v15179_v17 = vld [vmem:[#allocation9 + $0x7a0] ss:$40 sps:$4 sm:$0xff]  }
 0x672   :  { %v10880_v16 = vpop.f32.mrb[63].mxu0  ;;  %11305 = vmatpush1.bf16.msra.mxu1 %v15167_v5  ;;  %11263 = vmatprep.subr.bf16.mxu0 %v15172_v21  ;;  %v10917_v11 = vadd.f32 %v15937_v23, %v10876_v26  ;;  %v15185_v23 = vld [vmem:[#allocation9 + $0x840] ss:$40 sps:$4 sm:$0xff]   ;;  %v11356_v5 = vrot.slane %v15919_v18, %v15682_v63 }
 0x673   :  { %11306 = vmatprep.subr.bf16.mxu1 %v15175_v25  ;;  %v10919_v36 = vadd.f32 %v15939_v24, %v10878_v9  ;;  %v15188_v24 = vld [vmem:[#allocation9 + $0x890] ss:$40 sps:$4 sm:$0xff]   ;;  %v11360_v25 = vrot.slane %v15919_v18, %v11359_v62 }
 0x675   :  { %11264 = vmatpush1.bf16.msra.mxu0 %v15170_v20 }
 0x676   :  { %11307 = vmatpush1.bf16.msra.mxu1 %v15173_v45  ;;  %11265 = vmatprep.subr.bf16.mxu0 %v15178_v28 }
 0x679   :  { %11266 = vmatpush1.bf16.msra.mxu0 %v15176_v30  ;;  %11325 = vmatmul.mubr.bf16.vlgmr.msra.gmra.mrb[80].mxu1 %v15846_v48 }
 0x67a   :  { %11267 = vmatprep.subr.bf16.mxu0 %v15181_v15 }
 0x67d   :  { %11268 = vmatpush1.bf16.msra.mxu0 %v15179_v17 }
 0x67e   :  { %11269 = vmatprep.subr.bf16.mxu0 %v15184_v37 }
 0x681   :  { %11270 = vmatpush1.bf16.msra.mxu0 %v15182_v43 }
 0x682   :  { %11271 = vmatprep.subr.bf16.mxu0 %v15187_v44 }
 0x685   :  { %11272 = vmatpush1.bf16.msra.mxu0 %v15185_v23  ;;  %v11363_v23 = vsub.s32 6, %v15645_v60 }
 0x686   :  { %11273 = vmatprep.subr.bf16.mxu0 %v15190_v22  ;;  %v11367_v22 = vsub.s32 7, %v15645_v60 }
 0x689   :  { %11274 = vmatpush1.bf16.msra.mxu0 %v15188_v24 }
 0x68a   :  { %11275 = vmatprep.subr.bf16.mxu0 %v15193_v34 }
 0x68c   :  { %v10998_v48 = vpop.f32.mrb[64].mxu1 }
 0x68d   :  { %v10999_v49 = vadd.f32 %v10998_v48, %v15855_v40  ;;  %v11000_v29 = vpop.f32.mrb[65].mxu1  ;;  %11276 = vmatpush1.bf16.msra.mxu0 %v15191_v61 }
 0x68e   :  { %v11001_v47 = vadd.f32 %v11000_v29, %v15858_v4  ;;  %v11002_v33 = vpop.f32.mrb[66].mxu1  ;;  %11277 = vmatprep.subr.bf16.mxu0 %v15196_v31  ;;  %v15202_v4 = vld [vmem:[#allocation9 + $0x9d4] ss:$40 sps:$4 sm:$0xff]  }
 0x68f   :  { %v10957_v42 = vpop.f32.mrb[64].mxu0  ;;  %v11003_v57 = vpop.f32.mrb[67].mxu1 }
 0x690   :  { %v10958_v46 = vadd.f32 %v10957_v42, %v10917_v11  ;;  %v10959_v58 = vpop.f32.mrb[65].mxu0 }
 0x691   :  { %v10960_v32 = vadd.f32 %v10959_v58, %v10919_v36  ;;  %v10961_v40 = vpop.f32.mrb[66].mxu0  ;;  %11278 = vmatpush1.bf16.msra.mxu0 %v15194_v35 }
 0x692   :  { %v11389_v41 = vadd.f32 %v11348_v56, %v10958_v46  ;;  %v10962_v8 = vpop.f32.mrb[67].mxu0  ;;  %11279 = vmatprep.subr.bf16.mxu0 %v15199_v10 }
 0x693   :  { %v11390_v0 = vadd.f32 %v11352_v59, %v10960_v32 }
 0x694   :  { %11399 = vst [vmem:[%s16006_s11 + $0x10] sm:$0xff] %v11389_v41 }
 0x695   :  { %11400 = vst [vmem:[%s16006_s11 + $0x18] sm:$0xff] %v11390_v0  ;;  %11280 = vmatpush1.bf16.msra.mxu0 %v15197_v53 }
 0x696   :  { %11281 = vmatprep.subr.bf16.mxu0 %v15202_v4 }
 0x699   :  { %11282 = vmatpush1.bf16.msra.mxu0 %v15200_v3 }
 0x69c   :  { %11284 = vmatmul.mubr.bf16.vlgmr.msra.gmra.mrb[80].mxu0 %v15863_v50 }
 0x6ac   :  { %v11080_v7 = vpop.f32.mrb[68].mxu1 }
 0x6ad   :  { %v11082_v54 = vpop.f32.mrb[69].mxu1 }
 0x6ae   :  { %v11084_v38 = vpop.f32.mrb[70].mxu1 }
 0x6af   :  { %v11085_v52 = vpop.f32.mrb[71].mxu1 }
 0x6cf   :  { %v11039_v55 = vpop.f32.mrb[68].mxu0 }
 0x6d0   :  { %v11040_v1 = vadd.f32 %v11039_v55, %v10999_v49  ;;  %v11041_v21 = vpop.f32.mrb[69].mxu0 }
 0x6d1   :  { %v11042_v13 = vadd.f32 %v11041_v21, %v11001_v47  ;;  %v11043_v26 = vpop.f32.mrb[70].mxu0 }
 0x6d2   :  { %v11081_v27 = vadd.f32 %v11080_v7, %v11040_v1  ;;  %v11044_v9 = vpop.f32.mrb[71].mxu0 }
 0x6d3   :  { %v11083_v19 = vadd.f32 %v11082_v54, %v11042_v13 }
 0x6d4   :  { %v11391_v50 = vadd.f32 %v11356_v5, %v11081_v27 }
 0x6d5   :  { %v11392_v20 = vadd.f32 %v11360_v25, %v11083_v19 }
 0x6d6   :  { %11401 = vst [vmem:[%s16006_s11 + $0x20] sm:$0xff] %v11391_v50 }
 0x6d7   :  { %11402 = vst [vmem:[%s16006_s11 + $0x28] sm:$0xff] %v11392_v20 }
 0x6ec   :  { %v11162_v16 = vpop.f32.mrb[72].mxu1 }
 0x6ed   :  { %v11164_v63 = vpop.f32.mrb[73].mxu1 }
 0x6ee   :  { %v11166_v45 = vpop.f32.mrb[74].mxu1 }
 0x6ef   :  { %v11167_v28 = vpop.f32.mrb[75].mxu1 }
 0x70f   :  { %v11121_v11 = vpop.f32.mrb[72].mxu0 }
 0x710   :  { %v11122_v36 = vadd.f32 %v11121_v11, %v15876_v12  ;;  %v11123_v30 = vpop.f32.mrb[73].mxu0  ;;  %v11364_v12 = vrot.slane %v15919_v18, %v11363_v23 }
 0x711   :  { %v11124_v15 = vadd.f32 %v11123_v30, %v15879_v14  ;;  %v11125_v17 = vpop.f32.mrb[74].mxu0  ;;  %v11368_v14 = vrot.slane %v15919_v18, %v11367_v22  ;;  %v11334_v18 = vld [vmem:[#allocation12 + $0x8] sm:$0x3] }
 0x712   :  { %v11126_v37 = vpop.f32.mrb[75].mxu0  ;;  %v11163_v43 = vadd.f32 %v11162_v16, %v11122_v36  ;;  %v11372_v32 = vrot.slane %v11334_v18, %v15648_v2  ;;  %v11376_v41 = vrot.slane %v11334_v18, %v15656_v6 }
 0x713   :  { %v11165_v44 = vadd.f32 %v11164_v63, %v11124_v15 }
 0x72c   :  { %v11244_v24 = vpop.f32.mrb[76].mxu1 }
 0x72d   :  { %v11245_v34 = vadd.f32 %v11244_v24, %v15906_v51  ;;  %v11246_v61 = vpop.f32.mrb[77].mxu1 }
 0x72e   :  { %v11247_v31 = vadd.f32 %v11246_v61, %v15909_v39  ;;  %v11248_v48 = vpop.f32.mrb[78].mxu1 }
 0x72f   :  { %v11203_v49 = vpop.f32.mrb[76].mxu0  ;;  %v11249_v29 = vpop.f32.mrb[79].mxu1 }
 0x730   :  { %v11204_v35 = vadd.f32 %v11203_v49, %v11163_v43  ;;  %v11205_v47 = vpop.f32.mrb[77].mxu0 }
 0x731   :  { %v11206_v33 = vadd.f32 %v11205_v47, %v11165_v44  ;;  %v11207_v56 = vpop.f32.mrb[78].mxu0 }
 0x732   :  { %v11393_v10 = vadd.f32 %v11364_v12, %v11204_v35  ;;  %v11208_v42 = vpop.f32.mrb[79].mxu0 }
 0x733   :  { %v11394_v60 = vadd.f32 %v11368_v14, %v11206_v33 }
 0x734   :  { %11403 = vst [vmem:[%s16006_s11 + $0x30] sm:$0xff] %v11393_v10 }
 0x735   :  { %11404 = vst [vmem:[%s16006_s11 + $0x38] sm:$0xff] %v11394_v60 }
 0x74c   :  { %v11326_v51 = vpop.f32.mrb[80].mxu1 }
 0x74d   :  { %v11328_v39 = vpop.f32.mrb[81].mxu1 }
 0x74e   :  { %v11330_v57 = vpop.f32.mrb[82].mxu1 }
 0x74f   :  { %v11331_v59 = vpop.f32.mrb[83].mxu1 }
 0x76f   :  { %v11285_v46 = vpop.f32.mrb[80].mxu0 }
 0x770   :  { %v11286_v58 = vadd.f32 %v11285_v46, %v11245_v34  ;;  %v11287_v40 = vpop.f32.mrb[81].mxu0 }
 0x771   :  { %v11288_v53 = vadd.f32 %v11287_v40, %v11247_v31  ;;  %v11289_v8 = vpop.f32.mrb[82].mxu0 }
 0x772   :  { %v11327_v4 = vadd.f32 %v11326_v51, %v11286_v58  ;;  %v11290_v0 = vpop.f32.mrb[83].mxu0 }
 0x773   :  { %v11329_v3 = vadd.f32 %v11328_v39, %v11288_v53 }
 0x774   :  { %v11395_v7 = vadd.f32 %v11372_v32, %v11327_v4 }
 0x775   :  { %v11396_v54 = vadd.f32 %v11376_v41, %v11329_v3 }
 0x776   :  { %11405 = vst [vmem:[%s16006_s11 + $0x40] sm:$0xff] %v11395_v7 }
 0x777   :  { %11406 = vst [vmem:[%s16006_s11 + $0x48] sm:$0xff] %v11396_v54 }
 0x778   :  { %11419 = vsyncpa [#allocation3], 1 }
 0x779   :  { %11420 = vsyncpa [#allocation5], 1 }
 0x77a   :  { %11421 = vsyncpa [#allocation8], 1 }
 0x77b   :  { %11422 = vsyncpa [#allocation11], 1 }

</bundles_post_ra>
